<compile_context>
chip_gen: v5e
topology: v5e:2x2
jax: 0.10.0
libtpu: 0.0.40
codegen_flags: <defaults>
</compile_context>

<pallas_src>
import jax
import jax.numpy as jnp
from jax.experimental import pallas as pl
from jax.experimental.pallas import tpu as pltpu

EPS = 1e-5
NEG_INF = -1e30


def _gelu_exact(x):
    # F.gelu default (erf-based), as used by diffusers GEGLU.
    return 0.5 * x * (1.0 + jax.lax.erf(x * 0.7071067811865476))


def _layernorm(x, gamma, beta):
    mu = jnp.mean(x, axis=-1, keepdims=True)
    var = jnp.mean(jnp.square(x - mu), axis=-1, keepdims=True)
    return (x - mu) * jax.lax.rsqrt(var + EPS) * gamma + beta


def _fusion_kernel(x_ref, p_ref, mbias_ref,
                   wq_ref, wk_ref, wv_ref, wo_ref,
                   wh_ref, wgate_ref, w2_ref,
                   affc_ref, afff_ref,
                   o_ref):
    # x_ref/p_ref: (T, C) f32 tokens, T = B*S (batch collapsed into the matmul M dim).
    # mbias_ref:   (T, T) f32 block-diagonal additive mask (0 in-frame, -1e30 cross-frame).
    # wq/wk/wv:    (heads, C, dh) bf16 (scale folded into wq).  wo: (heads, dh, C) bf16.
    # wh/wgate:    (C, dff) bf16.  w2: (dff, C) bf16.
    # affc:        (6, C) f32 rows = [bo, g1, be1, b2, g2, be2].  afff: (2, dff) f32 = [bh, bgate].
    x = x_ref[...]                       # f32, also the residual path
    p = p_ref[...]
    heads = wq_ref.shape[0]

    xb = x.astype(jnp.bfloat16)
    pb = p.astype(jnp.bfloat16)

    # Broadcast tokens across the head axis once -> every attention contraction is
    # a canonical batched matmul; no per-head lane slicing, no narrow concatenate.
    xh = jnp.broadcast_to(xb[None], (heads,) + xb.shape)    # (H, T, C)
    ph = jnp.broadcast_to(pb[None], (heads,) + pb.shape)

    # ---- cross attention: q from current frame, k/v from previous frame ----
    q3 = jnp.einsum('htc,hcd->htd', xh, wq_ref[...],
                    preferred_element_type=jnp.float32)      # (H, T, dh)
    k3 = jnp.einsum('htc,hcd->htd', ph, wk_ref[...],
                    preferred_element_type=jnp.float32)
    v3 = jnp.einsum('htc,hcd->htd', ph, wv_ref[...],
                    preferred_element_type=jnp.float32)

    # All-head scores in one batched contraction + block-diagonal frame mask.
    s = jnp.einsum('htd,hud->htu',
                   q3.astype(jnp.bfloat16), k3.astype(jnp.bfloat16),
                   preferred_element_type=jnp.float32)        # (H, T, T)
    s = s + mbias_ref[...][None]

    s = s - jnp.max(s, axis=-1, keepdims=True)
    e = jnp.exp(s)
    probs = e * pl.reciprocal(jnp.sum(e, axis=-1, keepdims=True), approx=True)

    ctx = jnp.einsum('htu,hud->htd',
                     probs.astype(jnp.bfloat16), v3.astype(jnp.bfloat16),
                     preferred_element_type=jnp.float32)      # (H, T, dh)

    # Output projection: sum_h ctx_h @ wo_h  ==  concat_h(ctx_h) @ Wo.
    attn = jnp.einsum('htd,hdc->htc',
                      ctx.astype(jnp.bfloat16), wo_ref[...],
                      preferred_element_type=jnp.float32)     # (H, T, C)
    attn = jnp.sum(attn, axis=0) + affc_ref[0:1, :]           # + to_out bias

    # ---- norm1 + residual ----
    h1 = _layernorm(attn, affc_ref[1:2, :], affc_ref[2:3, :]) + x

    # ---- GEGLU feed-forward (hidden / gate weights pre-split in the wrapper) ----
    h1b = h1.astype(jnp.bfloat16)
    hid = jnp.dot(h1b, wh_ref[...],
                  preferred_element_type=jnp.float32) + afff_ref[0:1, :]
    gate = jnp.dot(h1b, wgate_ref[...],
                   preferred_element_type=jnp.float32) + afff_ref[1:2, :]
    ffh = hid * _gelu_exact(gate)
    ff = jnp.dot(ffh.astype(jnp.bfloat16), w2_ref[...],
                 preferred_element_type=jnp.float32) + affc_ref[3:4, :]

    # ---- norm2 + residual ----
    out = _layernorm(ff, affc_ref[4:5, :], affc_ref[5:6, :]) + h1
    o_ref[...] = out.astype(o_ref.dtype)


def _prep_kernel_args(curr_nchw, prev_nchw, params, heads, dim_head):
    """Reshape tokens / weights into the kernel-friendly layout (JAX glue)."""
    B, C, H, W = curr_nchw.shape
    S = H * W
    T = B * S
    scale = float(dim_head) ** -0.5
    dff = params["w2"].shape[0]
    bf16 = jnp.bfloat16

    x2d = jnp.transpose(curr_nchw, (0, 2, 3, 1)).reshape(T, C).astype(jnp.float32)
    p2d = jnp.transpose(prev_nchw, (0, 2, 3, 1)).reshape(T, C).astype(jnp.float32)

    # Block-diagonal additive mask: tokens only attend within their own frame.
    fid = jnp.arange(T, dtype=jnp.int32) // S
    mbias = jnp.where(fid[:, None] == fid[None, :], 0.0, NEG_INF).astype(jnp.float32)

    wq_h = (params["wq"] * scale).reshape(C, heads, dim_head).transpose(1, 0, 2).astype(bf16)
    wk_h = params["wk"].reshape(C, heads, dim_head).transpose(1, 0, 2).astype(bf16)
    wv_h = params["wv"].reshape(C, heads, dim_head).transpose(1, 0, 2).astype(bf16)
    wo_h = params["wo"].reshape(heads, dim_head, C).astype(bf16)
    w_hidden = params["wg"][:, :dff].astype(bf16)
    w_gate = params["wg"][:, dff:].astype(bf16)
    w2 = params["w2"].astype(bf16)

    affc = jnp.concatenate([params["bo"], params["g1"], params["be1"],
                            params["b2"], params["g2"], params["be2"]], axis=0)   # (6, C)
    afff = jnp.concatenate([params["bg"][:, :dff], params["bg"][:, dff:]], axis=0)  # (2, dff)

    args = (x2d, p2d, mbias, wq_h, wk_h, wv_h, wo_h,
            w_hidden, w_gate, w2, affc, afff)
    return args, (B, S, C, H, W)


def cross_frame_fusion(curr_nchw, prev_nchw, params, *, heads, dim_head):
    """curr/prev: (B, C, H, W) float32. Returns (B, C, H, W) float32."""
    args, (B, S, C, H, W) = _prep_kernel_args(curr_nchw, prev_nchw, params,
                                              heads, dim_head)
    T = B * S

    vmem = pl.BlockSpec(memory_space=pltpu.MemorySpace.VMEM)
    out2d = pl.pallas_call(
        _fusion_kernel,
        out_shape=jax.ShapeDtypeStruct((T, C), jnp.float32),
        in_specs=[vmem] * len(args),
        out_specs=vmem,
    )(*args)

    return jnp.transpose(out2d.reshape(B, H, W, C), (0, 3, 1, 2))


def init_params(key, C, heads, dim_head):
    inner = heads * dim_head
    dff = 4 * C
    ks = jax.random.split(key, 8)
    rnd = lambda k, s: 0.05 * jax.random.normal(k, s, dtype=jnp.float32)
    return dict(
        wq=rnd(ks[0], (C, inner)),            # to_q (bias=False)
        wk=rnd(ks[1], (C, inner)),            # to_k (bias=False)
        wv=rnd(ks[2], (C, inner)),            # to_v (bias=False)
        wo=rnd(ks[3], (inner, C)),            # to_out[0] weight
        bo=rnd(ks[4], (1, C)),                # to_out[0] bias
        g1=jnp.ones((1, C), jnp.float32),     # norm1 gamma
        be1=jnp.zeros((1, C), jnp.float32),   # norm1 beta
        wg=rnd(ks[5], (C, 2 * dff)),          # GEGLU proj weight (hidden|gate)
        bg=rnd(ks[6], (1, 2 * dff)),          # GEGLU proj bias
        w2=rnd(ks[7], (dff, C)),              # ff output linear weight
        b2=jnp.zeros((1, C), jnp.float32),
        g2=jnp.ones((1, C), jnp.float32),     # norm2 gamma
        be2=jnp.zeros((1, C), jnp.float32),   # norm2 beta
    )


def reference(curr_nchw, prev_nchw, params, heads, dim_head):
    """Pure-JAX reference with the module's original structure. Matmul operands are
    cast to bf16 (f32 accumulation) to mirror the kernel's precision policy."""
    B, C, H, W = curr_nchw.shape
    S = H * W
    scale = float(dim_head) ** -0.5
    dff = params["w2"].shape[0]

    bf = lambda a: a.astype(jnp.bfloat16)
    mm = lambda a, b: jnp.matmul(bf(a), bf(b), preferred_element_type=jnp.float32)

    x = jnp.transpose(curr_nchw, (0, 2, 3, 1)).reshape(B, S, C).astype(jnp.float32)
    p = jnp.transpose(prev_nchw, (0, 2, 3, 1)).reshape(B, S, C).astype(jnp.float32)
    res = x

    q = mm(x, params["wq"] * scale)   # scale folded before the bf16 cast (as in kernel)
    k = mm(p, params["wk"])
    v = mm(p, params["wv"])
    qh = q.reshape(B, S, heads, dim_head).transpose(0, 2, 1, 3)
    kh = k.reshape(B, S, heads, dim_head).transpose(0, 2, 1, 3)
    vh = v.reshape(B, S, heads, dim_head).transpose(0, 2, 1, 3)
    s = jnp.einsum("bhqd,bhkd->bhqk", bf(qh), bf(kh),
                   preferred_element_type=jnp.float32)
    a = jax.nn.softmax(s, axis=-1)
    o = jnp.einsum("bhqk,bhkd->bhqd", bf(a), bf(vh),
                   preferred_element_type=jnp.float32)
    o = o.transpose(0, 2, 1, 3).reshape(B, S, heads * dim_head)
    attn = mm(o, params["wo"]) + params["bo"]

    def ln(z, g, b):
        mu = z.mean(-1, keepdims=True)
        var = jnp.square(z - mu).mean(-1, keepdims=True)
        return (z - mu) / jnp.sqrt(var + EPS) * g + b

    h1 = ln(attn, params["g1"], params["be1"]) + res
    proj = mm(h1, params["wg"]) + params["bg"]
    ffh = proj[..., :dff] * _gelu_exact(proj[..., dff:])
    ff = mm(ffh, params["w2"]) + params["b2"]
    out = ln(ff, params["g2"], params["be2"]) + h1
    return jnp.transpose(out.reshape(B, H, W, C), (0, 3, 1, 2))


if __name__ == "__main__":
    B, C, H, W = 2, 32, 8, 8          # dim = 32
    heads, dim_head = 4, 8            # inner_dim = 32

    key = jax.random.PRNGKey(0)
    k_curr, k_prev, k_params = jax.random.split(key, 3)
    curr = jax.random.normal(k_curr, (B, C, H, W), dtype=jnp.float32)
    prev = jax.random.normal(k_prev, (B, C, H, W), dtype=jnp.float32)
    params = init_params(k_params, C, heads, dim_head)

    out = cross_frame_fusion(curr, prev, params, heads=heads, dim_head=dim_head)
    out = jax.block_until_ready(out)

    ref = jax.block_until_ready(reference(curr, prev, params, heads, dim_head))
    assert out.shape == (B, C, H, W)
    max_err = float(jnp.max(jnp.abs(out - ref)))
    # Tolerance covers the approximate-reciprocal softmax and accumulation-order
    # differences; matmul precision (bf16 operands, f32 accumulate) is matched.
    assert jnp.allclose(out, ref, rtol=5e-3, atol=5e-3), max_err

    print("KERNEL_OK")
</pallas_src>

<mosaic_0001>
module attributes {stable_mosaic.version = 11 : i64} {
  func.func @_fusion_kernel(%arg0: memref<128x32xf32, #tpu.memory_space<vmem>>, %arg1: memref<128x32xf32, #tpu.memory_space<vmem>>, %arg2: memref<128x128xf32, #tpu.memory_space<vmem>>, %arg3: memref<4x32x8xbf16, #tpu.memory_space<vmem>>, %arg4: memref<4x32x8xbf16, #tpu.memory_space<vmem>>, %arg5: memref<4x32x8xbf16, #tpu.memory_space<vmem>>, %arg6: memref<4x8x32xbf16, #tpu.memory_space<vmem>>, %arg7: memref<32x128xbf16, #tpu.memory_space<vmem>>, %arg8: memref<32x128xbf16, #tpu.memory_space<vmem>>, %arg9: memref<128x32xbf16, #tpu.memory_space<vmem>>, %arg10: memref<6x32xf32, #tpu.memory_space<vmem>>, %arg11: memref<2x128xf32, #tpu.memory_space<vmem>>, %arg12: memref<128x32xf32, #tpu.memory_space<vmem>>) attributes {dimension_semantics = [], scalar_prefetch = 0 : i64, scratch_operands = 0 : i64, tpu.core_type = #tpu.core_type<tc>} {
    %c0 = arith.constant 0 : index
    %c0_0 = arith.constant 0 : index
    %0 = vector.load %arg0[%c0, %c0_0] : memref<128x32xf32, #tpu.memory_space<vmem>>, vector<128x32xf32>
    %c0_1 = arith.constant 0 : index
    %c0_2 = arith.constant 0 : index
    %1 = vector.load %arg1[%c0_1, %c0_2] : memref<128x32xf32, #tpu.memory_space<vmem>>, vector<128x32xf32>
    %2 = arith.truncf %0 : vector<128x32xf32> to vector<128x32xbf16>
    %3 = arith.truncf %1 : vector<128x32xf32> to vector<128x32xbf16>
    %4 = vector.shape_cast %2 : vector<128x32xbf16> to vector<1x128x32xbf16>
    %5 = vector.shape_cast %4 : vector<1x128x32xbf16> to vector<1x128x32xbf16>
    %6 = vector.broadcast %5 : vector<1x128x32xbf16> to vector<4x128x32xbf16>
    %7 = vector.shape_cast %3 : vector<128x32xbf16> to vector<1x128x32xbf16>
    %8 = vector.shape_cast %7 : vector<1x128x32xbf16> to vector<1x128x32xbf16>
    %9 = vector.broadcast %8 : vector<1x128x32xbf16> to vector<4x128x32xbf16>
    %c0_3 = arith.constant 0 : index
    %c0_4 = arith.constant 0 : index
    %c0_5 = arith.constant 0 : index
    %10 = vector.load %arg3[%c0_3, %c0_4, %c0_5] : memref<4x32x8xbf16, #tpu.memory_space<vmem>>, vector<4x32x8xbf16>
    "tpu.trace_start"() <{level = 10 : i32, message = "htc,hcd->htd"}> : () -> ()
    %cst = arith.constant dense<0.000000e+00> : vector<4x128x8xf32>
    %11 = tpu.matmul %6, %10, %cst {dimension_numbers = #tpu.dot_dimension_numbers<[2], [1], [1], [2], [0, 0, 0, 1, 1, 2], [0], [0]>} : vector<4x128x32xbf16>, vector<4x32x8xbf16>, vector<4x128x8xf32> -> vector<4x128x8xf32>
    "tpu.trace_stop"() : () -> ()
    %c0_6 = arith.constant 0 : index
    %c0_7 = arith.constant 0 : index
    %c0_8 = arith.constant 0 : index
    %12 = vector.load %arg4[%c0_6, %c0_7, %c0_8] : memref<4x32x8xbf16, #tpu.memory_space<vmem>>, vector<4x32x8xbf16>
    "tpu.trace_start"() <{level = 10 : i32, message = "htc,hcd->htd"}> : () -> ()
    %cst_9 = arith.constant dense<0.000000e+00> : vector<4x128x8xf32>
    %13 = tpu.matmul %9, %12, %cst_9 {dimension_numbers = #tpu.dot_dimension_numbers<[2], [1], [1], [2], [0, 0, 0, 1, 1, 2], [0], [0]>} : vector<4x128x32xbf16>, vector<4x32x8xbf16>, vector<4x128x8xf32> -> vector<4x128x8xf32>
    "tpu.trace_stop"() : () -> ()
    %c0_10 = arith.constant 0 : index
    %c0_11 = arith.constant 0 : index
    %c0_12 = arith.constant 0 : index
    %14 = vector.load %arg5[%c0_10, %c0_11, %c0_12] : memref<4x32x8xbf16, #tpu.memory_space<vmem>>, vector<4x32x8xbf16>
    "tpu.trace_start"() <{level = 10 : i32, message = "htc,hcd->htd"}> : () -> ()
    %cst_13 = arith.constant dense<0.000000e+00> : vector<4x128x8xf32>
    %15 = tpu.matmul %9, %14, %cst_13 {dimension_numbers = #tpu.dot_dimension_numbers<[2], [1], [1], [2], [0, 0, 0, 1, 1, 2], [0], [0]>} : vector<4x128x32xbf16>, vector<4x32x8xbf16>, vector<4x128x8xf32> -> vector<4x128x8xf32>
    "tpu.trace_stop"() : () -> ()
    %16 = arith.truncf %11 : vector<4x128x8xf32> to vector<4x128x8xbf16>
    %17 = arith.truncf %13 : vector<4x128x8xf32> to vector<4x128x8xbf16>
    "tpu.trace_start"() <{level = 10 : i32, message = "htd,hud->htu"}> : () -> ()
    %cst_14 = arith.constant dense<0.000000e+00> : vector<4x128x128xf32>
    %18 = tpu.matmul %16, %17, %cst_14 {dimension_numbers = #tpu.dot_dimension_numbers<[2], [2], [1], [1], [0, 0, 0, 1, 1, 1], [0], [0]>} : vector<4x128x8xbf16>, vector<4x128x8xbf16>, vector<4x128x128xf32> -> vector<4x128x128xf32>
    "tpu.trace_stop"() : () -> ()
    %c0_15 = arith.constant 0 : index
    %c0_16 = arith.constant 0 : index
    %19 = vector.load %arg2[%c0_15, %c0_16] : memref<128x128xf32, #tpu.memory_space<vmem>>, vector<128x128xf32>
    %20 = vector.shape_cast %19 : vector<128x128xf32> to vector<1x128x128xf32>
    %21 = vector.broadcast %20 : vector<1x128x128xf32> to vector<4x128x128xf32>
    %22 = arith.addf %18, %21 : vector<4x128x128xf32>
    %cst_17 = arith.constant dense<0xFF800000> : vector<4x128xf32>
    %23 = vector.multi_reduction <maximumf>, %22, %cst_17 [2] : vector<4x128x128xf32> to vector<4x128xf32>
    %24 = vector.shape_cast %23 : vector<4x128xf32> to vector<4x128x1xf32>
    %25 = vector.broadcast %24 : vector<4x128x1xf32> to vector<4x128x128xf32>
    %26 = arith.subf %22, %25 : vector<4x128x128xf32>
    %27 = math.exp %26 : vector<4x128x128xf32>
    %cst_18 = arith.constant dense<0.000000e+00> : vector<4x128xf32>
    %28 = vector.multi_reduction <add>, %27, %cst_18 [2] : vector<4x128x128xf32> to vector<4x128xf32>
    %29 = vector.shape_cast %28 : vector<4x128xf32> to vector<4x128x1xf32>
    %30 = tpu.reciprocal %29 {approx = true} : vector<4x128x1xf32> -> vector<4x128x1xf32>
    %31 = vector.broadcast %30 : vector<4x128x1xf32> to vector<4x128x128xf32>
    %32 = arith.mulf %27, %31 : vector<4x128x128xf32>
    %33 = arith.truncf %32 : vector<4x128x128xf32> to vector<4x128x128xbf16>
    %34 = arith.truncf %15 : vector<4x128x8xf32> to vector<4x128x8xbf16>
    "tpu.trace_start"() <{level = 10 : i32, message = "htu,hud->htd"}> : () -> ()
    %cst_19 = arith.constant dense<0.000000e+00> : vector<4x128x8xf32>
    %35 = tpu.matmul %33, %34, %cst_19 {dimension_numbers = #tpu.dot_dimension_numbers<[2], [1], [1], [2], [0, 0, 0, 1, 1, 2], [0], [0]>} : vector<4x128x128xbf16>, vector<4x128x8xbf16>, vector<4x128x8xf32> -> vector<4x128x8xf32>
    "tpu.trace_stop"() : () -> ()
    %36 = arith.truncf %35 : vector<4x128x8xf32> to vector<4x128x8xbf16>
    %c0_20 = arith.constant 0 : index
    %c0_21 = arith.constant 0 : index
    %c0_22 = arith.constant 0 : index
    %37 = vector.load %arg6[%c0_20, %c0_21, %c0_22] : memref<4x8x32xbf16, #tpu.memory_space<vmem>>, vector<4x8x32xbf16>
    "tpu.trace_start"() <{level = 10 : i32, message = "htd,hdc->htc"}> : () -> ()
    %cst_23 = arith.constant dense<0.000000e+00> : vector<4x128x32xf32>
    %38 = tpu.matmul %36, %37, %cst_23 {dimension_numbers = #tpu.dot_dimension_numbers<[2], [1], [1], [2], [0, 0, 0, 1, 1, 2], [0], [0]>} : vector<4x128x8xbf16>, vector<4x8x32xbf16>, vector<4x128x32xf32> -> vector<4x128x32xf32>
    "tpu.trace_stop"() : () -> ()
    %cst_24 = arith.constant dense<0.000000e+00> : vector<128x32xf32>
    %39 = vector.multi_reduction <add>, %38, %cst_24 [0] : vector<4x128x32xf32> to vector<128x32xf32>
    %c0_25 = arith.constant 0 : index
    %c0_26 = arith.constant 0 : index
    %40 = vector.load %arg10[%c0_25, %c0_26] : memref<6x32xf32, #tpu.memory_space<vmem>>, vector<1x32xf32>
    %41 = vector.broadcast %40 : vector<1x32xf32> to vector<128x32xf32>
    %42 = arith.addf %39, %41 : vector<128x32xf32>
    %c1 = arith.constant 1 : index
    %c0_27 = arith.constant 0 : index
    %43 = vector.load %arg10[%c1, %c0_27] : memref<6x32xf32, #tpu.memory_space<vmem>>, vector<1x32xf32>
    %c2 = arith.constant 2 : index
    %c0_28 = arith.constant 0 : index
    %44 = vector.load %arg10[%c2, %c0_28] : memref<6x32xf32, #tpu.memory_space<vmem>>, vector<1x32xf32>
    %cst_29 = arith.constant dense<0.000000e+00> : vector<128xf32>
    %45 = vector.multi_reduction <add>, %42, %cst_29 [1] : vector<128x32xf32> to vector<128xf32>
    %46 = vector.shape_cast %45 : vector<128xf32> to vector<128x1xf32>
    %cst_30 = arith.constant 3.200000e+01 : f32
    %47 = vector.broadcast %cst_30 : f32 to vector<128x1xf32>
    %48 = arith.divf %46, %47 : vector<128x1xf32>
    %49 = vector.broadcast %48 : vector<128x1xf32> to vector<128x32xf32>
    %50 = arith.subf %42, %49 : vector<128x32xf32>
    %51 = arith.mulf %50, %50 : vector<128x32xf32>
    %cst_31 = arith.constant dense<0.000000e+00> : vector<128xf32>
    %52 = vector.multi_reduction <add>, %51, %cst_31 [1] : vector<128x32xf32> to vector<128xf32>
    %53 = vector.shape_cast %52 : vector<128xf32> to vector<128x1xf32>
    %cst_32 = arith.constant 3.200000e+01 : f32
    %54 = vector.broadcast %cst_32 : f32 to vector<128x1xf32>
    %55 = arith.divf %53, %54 : vector<128x1xf32>
    %56 = vector.broadcast %48 : vector<128x1xf32> to vector<128x32xf32>
    %57 = arith.subf %42, %56 : vector<128x32xf32>
    %cst_33 = arith.constant 9.99999974E-6 : f32
    %58 = vector.broadcast %cst_33 : f32 to vector<128x1xf32>
    %59 = arith.addf %55, %58 : vector<128x1xf32>
    %60 = math.rsqrt %59 : vector<128x1xf32>
    %61 = vector.broadcast %60 : vector<128x1xf32> to vector<128x32xf32>
    %62 = arith.mulf %57, %61 : vector<128x32xf32>
    %63 = vector.broadcast %43 : vector<1x32xf32> to vector<128x32xf32>
    %64 = arith.mulf %62, %63 : vector<128x32xf32>
    %65 = vector.broadcast %44 : vector<1x32xf32> to vector<128x32xf32>
    %66 = arith.addf %64, %65 : vector<128x32xf32>
    %67 = arith.addf %66, %0 : vector<128x32xf32>
    %68 = arith.truncf %67 : vector<128x32xf32> to vector<128x32xbf16>
    %c0_34 = arith.constant 0 : index
    %c0_35 = arith.constant 0 : index
    %69 = vector.load %arg7[%c0_34, %c0_35] : memref<32x128xbf16, #tpu.memory_space<vmem>>, vector<32x128xbf16>
    %cst_36 = arith.constant dense<0.000000e+00> : vector<128x128xf32>
    %70 = tpu.matmul %68, %69, %cst_36 {dimension_numbers = #tpu.dot_dimension_numbers<[1], [0], [0], [1], [0, 0, 1, 1], [], []>} : vector<128x32xbf16>, vector<32x128xbf16>, vector<128x128xf32> -> vector<128x128xf32>
    %c0_37 = arith.constant 0 : index
    %c0_38 = arith.constant 0 : index
    %71 = vector.load %arg11[%c0_37, %c0_38] : memref<2x128xf32, #tpu.memory_space<vmem>>, vector<1x128xf32>
    %72 = vector.broadcast %71 : vector<1x128xf32> to vector<128x128xf32>
    %73 = arith.addf %70, %72 : vector<128x128xf32>
    %c0_39 = arith.constant 0 : index
    %c0_40 = arith.constant 0 : index
    %74 = vector.load %arg8[%c0_39, %c0_40] : memref<32x128xbf16, #tpu.memory_space<vmem>>, vector<32x128xbf16>
    %cst_41 = arith.constant dense<0.000000e+00> : vector<128x128xf32>
    %75 = tpu.matmul %68, %74, %cst_41 {dimension_numbers = #tpu.dot_dimension_numbers<[1], [0], [0], [1], [0, 0, 1, 1], [], []>} : vector<128x32xbf16>, vector<32x128xbf16>, vector<128x128xf32> -> vector<128x128xf32>
    %c1_42 = arith.constant 1 : index
    %c0_43 = arith.constant 0 : index
    %76 = vector.load %arg11[%c1_42, %c0_43] : memref<2x128xf32, #tpu.memory_space<vmem>>, vector<1x128xf32>
    %77 = vector.broadcast %76 : vector<1x128xf32> to vector<128x128xf32>
    %78 = arith.addf %75, %77 : vector<128x128xf32>
    %cst_44 = arith.constant 5.000000e-01 : f32
    %79 = vector.broadcast %cst_44 : f32 to vector<128x128xf32>
    %80 = arith.mulf %79, %78 : vector<128x128xf32>
    %cst_45 = arith.constant 0.707106769 : f32
    %81 = vector.broadcast %cst_45 : f32 to vector<128x128xf32>
    %82 = arith.mulf %78, %81 : vector<128x128xf32>
    %83 = math.erf %82 : vector<128x128xf32>
    %cst_46 = arith.constant 1.000000e+00 : f32
    %84 = vector.broadcast %cst_46 : f32 to vector<128x128xf32>
    %85 = arith.addf %84, %83 : vector<128x128xf32>
    %86 = arith.mulf %80, %85 : vector<128x128xf32>
    %87 = arith.mulf %73, %86 : vector<128x128xf32>
    %88 = arith.truncf %87 : vector<128x128xf32> to vector<128x128xbf16>
    %c0_47 = arith.constant 0 : index
    %c0_48 = arith.constant 0 : index
    %89 = vector.load %arg9[%c0_47, %c0_48] : memref<128x32xbf16, #tpu.memory_space<vmem>>, vector<128x32xbf16>
    %cst_49 = arith.constant dense<0.000000e+00> : vector<128x32xf32>
    %90 = tpu.matmul %88, %89, %cst_49 {dimension_numbers = #tpu.dot_dimension_numbers<[1], [0], [0], [1], [0, 0, 1, 1], [], []>} : vector<128x128xbf16>, vector<128x32xbf16>, vector<128x32xf32> -> vector<128x32xf32>
    %c3 = arith.constant 3 : index
    %c0_50 = arith.constant 0 : index
    %91 = vector.load %arg10[%c3, %c0_50] : memref<6x32xf32, #tpu.memory_space<vmem>>, vector<1x32xf32>
    %92 = vector.broadcast %91 : vector<1x32xf32> to vector<128x32xf32>
    %93 = arith.addf %90, %92 : vector<128x32xf32>
    %c4 = arith.constant 4 : index
    %c0_51 = arith.constant 0 : index
    %94 = vector.load %arg10[%c4, %c0_51] : memref<6x32xf32, #tpu.memory_space<vmem>>, vector<1x32xf32>
    %c5 = arith.constant 5 : index
    %c0_52 = arith.constant 0 : index
    %95 = vector.load %arg10[%c5, %c0_52] : memref<6x32xf32, #tpu.memory_space<vmem>>, vector<1x32xf32>
    %cst_53 = arith.constant dense<0.000000e+00> : vector<128xf32>
    %96 = vector.multi_reduction <add>, %93, %cst_53 [1] : vector<128x32xf32> to vector<128xf32>
    %97 = vector.shape_cast %96 : vector<128xf32> to vector<128x1xf32>
    %cst_54 = arith.constant 3.200000e+01 : f32
    %98 = vector.broadcast %cst_54 : f32 to vector<128x1xf32>
    %99 = arith.divf %97, %98 : vector<128x1xf32>
    %100 = vector.broadcast %99 : vector<128x1xf32> to vector<128x32xf32>
    %101 = arith.subf %93, %100 : vector<128x32xf32>
    %102 = arith.mulf %101, %101 : vector<128x32xf32>
    %cst_55 = arith.constant dense<0.000000e+00> : vector<128xf32>
    %103 = vector.multi_reduction <add>, %102, %cst_55 [1] : vector<128x32xf32> to vector<128xf32>
    %104 = vector.shape_cast %103 : vector<128xf32> to vector<128x1xf32>
    %cst_56 = arith.constant 3.200000e+01 : f32
    %105 = vector.broadcast %cst_56 : f32 to vector<128x1xf32>
    %106 = arith.divf %104, %105 : vector<128x1xf32>
    %107 = vector.broadcast %99 : vector<128x1xf32> to vector<128x32xf32>
    %108 = arith.subf %93, %107 : vector<128x32xf32>
    %cst_57 = arith.constant 9.99999974E-6 : f32
    %109 = vector.broadcast %cst_57 : f32 to vector<128x1xf32>
    %110 = arith.addf %106, %109 : vector<128x1xf32>
    %111 = math.rsqrt %110 : vector<128x1xf32>
    %112 = vector.broadcast %111 : vector<128x1xf32> to vector<128x32xf32>
    %113 = arith.mulf %108, %112 : vector<128x32xf32>
    %114 = vector.broadcast %94 : vector<1x32xf32> to vector<128x32xf32>
    %115 = arith.mulf %113, %114 : vector<128x32xf32>
    %116 = vector.broadcast %95 : vector<1x32xf32> to vector<128x32xf32>
    %117 = arith.addf %115, %116 : vector<128x32xf32>
    %118 = arith.addf %117, %67 : vector<128x32xf32>
    %c0_58 = arith.constant 0 : index
    %c0_59 = arith.constant 0 : index
    %119 = vector.load %arg12[%c0_58, %c0_59] : memref<128x32xf32, #tpu.memory_space<vmem>>, vector<128x32xf32>
    tpu.vector_store %arg12[%c0_58, %c0_59], %118 {strides = array<i32>} : memref<128x32xf32, #tpu.memory_space<vmem>>, vector<128x32xf32>,
    return
  }
}

</mosaic_0001>

<bundles_post_ra>
// kernel: tpu_custom_call.1
= control target key start
LH: loop header
LB: loop body
LE: loop exit
PB: predicated region body
PF: predicated region fallthrough
CT: control target
= control target key end

     0   :  { %vm174_vm0 = vcmask 261120   ;;  %vm1239_vm1 = vcmask 64512   ;;  %vm3284_vm2 = vcmask 1043456   ;;  %s9768_s3 = inlined_call_operand.vmem [shape: bf16[4,32,8], index: 3, kind: input, shape index: {}]   ;;  %s9769_s0 = inlined_call_operand.vmem [shape: f32[128,32], index: 0, kind: input, shape index: {}]   ;;  %s9770_s4 = inlined_call_operand.vmem [shape: bf16[4,32,8], index: 4, kind: input, shape index: {}]   ;;  %s9771_s1 = inlined_call_operand.vmem [shape: f32[128,32], index: 1, kind: input, shape index: {}]   ;;  %s9772_s5 = inlined_call_operand.vmem [shape: bf16[4,32,8], index: 5, kind: input, shape index: {}]   ;;  %s9773_s2 = inlined_call_operand.vmem [shape: f32[128,128], index: 2, kind: input, shape index: {}]   ;;  %s9774_s6 = inlined_call_operand.vmem [shape: bf16[4,8,32], index: 6, kind: input, shape index: {}]   ;;  %s9775_s10 = inlined_call_operand.vmem [shape: f32[6,32], index: 10, kind: input, shape index: {}]   ;;  %s9776_s7 = inlined_call_operand.vmem [shape: bf16[32,128], index: 7, kind: input, shape index: {}]   ;;  %s9777_s8 = inlined_call_operand.vmem [shape: bf16[32,128], index: 8, kind: input, shape index: {}]   ;;  %s9778_s11 = inlined_call_operand.vmem [shape: f32[2,128], index: 11, kind: input, shape index: {}]   ;;  %s9779_s9 = inlined_call_operand.vmem [shape: bf16[128,32], index: 9, kind: input, shape index: {}]   ;;  %s9780_s12 = inlined_call_operand.vmem [shape: f32[128,32], index: 12, kind: output, shape index: {}]  }
   0x1   :  { %v5996_v0 = vld [vmem:[%s9768_s3 + $0x8] sm:$0xff]  ;;  %v5998_v1 = vld [vmem:[%s9768_s3 + $0x18] sm:$0xff]  ;;  %v5995_v3 = vld [vmem:[%s9768_s3] sm:$0xff] }
   0x2   :  { %v6000_v2 = vld [vmem:[%s9768_s3 + $0x28] sm:$0xff]  ;;  %v5997_v4 = vld [vmem:[%s9768_s3 + $0x10] sm:$0xff]  ;;  %v5999_v5 = vld [vmem:[%s9768_s3 + $0x20] sm:$0xff]  ;;  %205 = vmatpush.bf16.msra.mxu0 %v5996_v0  ;;  %6031 = vmatpush.bf16.msra.mxu1 %v5998_v1 }
   0x3   :  { %v42_v6 = vld [vmem:[%s9769_s0] sm:$0xff]  ;;  %v43_v7 = vld [vmem:[%s9769_s0 + $0x8] sm:$0xff]  ;;  %327 = vmatpush.bf16.msra.mxu2 %v6000_v2  ;;  %6033 = vmatpush.bf16.msra.mxu3 %v6000_v2  ;;  %v6002_v24 = vld [vmem:[%s9768_s3 + $0x38] sm:$0xff] }
   0x4   :  { %v46_v8 = vld [vmem:[%s9769_s0 + $0x20] sm:$0xff]  ;;  %v74_v9 = vpack.c.bf16 %v42_v6, %v42_v6  ;;  %v75_v10 = vpack.c.bf16 %v43_v7, %v43_v7  ;;  %v47_v11 = vld [vmem:[%s9769_s0 + $0x28] sm:$0xff]  ;;  %v6001_v28 = vld [vmem:[%s9768_s3 + $0x30] sm:$0xff] }
   0x5   :  { %v78_v12 = vpack.c.bf16 %v46_v8, %v46_v8  ;;  %v54_v13 = vld [vmem:[%s9769_s0 + $0x60] sm:$0xff]  ;;  %v55_v14 = vld [vmem:[%s9769_s0 + $0x68] sm:$0xff]  ;;  %v79_v15 = vpack.c.bf16 %v47_v11, %v47_v11  ;;  %v44_v29 = vld [vmem:[%s9769_s0 + $0x10] sm:$0xff] }
   0x6   :  { %v86_v16 = vpack.c.bf16 %v54_v13, %v54_v13  ;;  %v87_v17 = vpack.c.bf16 %v55_v14, %v55_v14  ;;  %v138_v18 = vunpack.c.l.b16 %v74_v9  ;;  %v139_v19 = vunpack.c.l.b16 %v75_v10  ;;  %206 = vmatpush.bf16.msra.mxu0 %v5995_v3  ;;  %6032 = vmatpush.bf16.msra.mxu1 %v5997_v4  ;;  %v45_v30 = vld [vmem:[%s9769_s0 + $0x18] sm:$0xff]  ;;  %v48_v31 = vld [vmem:[%s9769_s0 + $0x30] sm:$0xff]  ;;  %v50_v50 = vld [vmem:[%s9769_s0 + $0x40] sm:$0xff] }
   0x7   :  { %v142_v20 = vunpack.c.l.b16 %v78_v12  ;;  %v143_v21 = vunpack.c.l.b16 %v79_v15  ;;  %328 = vmatpush.bf16.msra.mxu2 %v5999_v5  ;;  %6034 = vmatpush.bf16.msra.mxu3 %v5999_v5  ;;  %v49_v32 = vld [vmem:[%s9769_s0 + $0x38] sm:$0xff]  ;;  %v56_v33 = vld [vmem:[%s9769_s0 + $0x70] sm:$0xff]  ;;  %v76_v35 = vpack.c.bf16 %v44_v29, %v44_v29  ;;  %v77_v36 = vpack.c.bf16 %v45_v30, %v45_v30  ;;  %v51_v51 = vld [vmem:[%s9769_s0 + $0x48] sm:$0xff] }
   0x8   :  { %v150_v22 = vunpack.c.l.b16 %v86_v16  ;;  %v151_v23 = vunpack.c.l.b16 %v87_v17  ;;  %v6525_v25 = vpack.c.b16 %v139_v19, %v138_v18  ;;  %v57_v34 = vld [vmem:[%s9769_s0 + $0x78] sm:$0xff]  ;;  %v80_v37 = vpack.c.bf16 %v48_v31, %v48_v31  ;;  %v52_v57 = vld [vmem:[%s9769_s0 + $0x50] sm:$0xff]  ;;  %v6008_v59 = vld [vmem:[%s9770_s4 + $0x28] sm:$0xff] }
   0x9   :  { %v6527_v26 = vpack.c.b16 %v143_v21, %v142_v20  ;;  %v81_v38 = vpack.c.bf16 %v49_v32, %v49_v32  ;;  %v88_v39 = vpack.c.bf16 %v56_v33, %v56_v33  ;;  %v89_v40 = vpack.c.bf16 %v57_v34, %v57_v34  ;;  %v53_v58 = vld [vmem:[%s9769_s0 + $0x58] sm:$0xff]  ;;  %v6005_v2 = vld [vmem:[%s9770_s4 + $0x10] sm:$0xff]  ;;  %v6007_v3 = vld [vmem:[%s9770_s4 + $0x20] sm:$0xff] }
   0xa   :  { %v6529_v27 = vpack.c.b16 %v151_v23, %v150_v22  ;;  %266 = vmatpush.bf16.msrb.mxu0 %v5998_v1  ;;  %5699 = vmatmul.msk.bf16.vlgmr.msra.gmra.mxu2 %vm174_vm0, %v6525_v25  ;;  %v140_v41 = vunpack.c.l.b16 %v76_v35  ;;  %v141_v42 = vunpack.c.l.b16 %v77_v36  ;;  %v144_v43 = vunpack.c.l.b16 %v80_v37  ;;  %v6006_v60 = vld [vmem:[%s9770_s4 + $0x18] sm:$0xff]  ;;  %v58_v5 = vld [vmem:[%s9771_s1] sm:$0xff]  ;;  %v59_v6 = vld [vmem:[%s9771_s1 + $0x8] sm:$0xff] }
   0xb   :  { %388 = vmatpush.bf16.msrb.mxu3 %v6002_v24  ;;  %5667 = vmatmul.msk.bf16.vlgmr.msra.gmra.mxu0 %vm174_vm0, %v6525_v25  ;;  %v145_v44 = vunpack.c.l.b16 %v81_v38  ;;  %v152_v45 = vunpack.c.l.b16 %v88_v39  ;;  %v153_v46 = vunpack.c.l.b16 %v89_v40  ;;  %v82_v52 = vpack.c.bf16 %v50_v50, %v50_v50  ;;  %v60_v12 = vld [vmem:[%s9771_s1 + $0x10] sm:$0xff]  ;;  %v61_v13 = vld [vmem:[%s9771_s1 + $0x18] sm:$0xff]  ;;  %v62_v19 = vld [vmem:[%s9771_s1 + $0x20] sm:$0xff] }
   0xc   :  { %5685 = vmatmul.msk.bf16.vlgmr.msra.gmra.mxu1 %vm174_vm0, %v6527_v26  ;;  %5705 = vmatmul.msk.bf16.vlgmr.msra.gmra.mxu3 %vm174_vm0, %v6529_v27  ;;  %v6560_v47 = vpack.c.b16 %v141_v42, %v140_v41  ;;  %v83_v53 = vpack.c.bf16 %v51_v51, %v51_v51  ;;  %v84_v61 = vpack.c.bf16 %v52_v57, %v52_v57  ;;  %v63_v20 = vld [vmem:[%s9771_s1 + $0x28] sm:$0xff]  ;;  %v6003_v30 = vld [vmem:[%s9770_s4] sm:$0xff]  ;;  %v6009_v31 = vld [vmem:[%s9770_s4 + $0x30] sm:$0xff] }
   0xd   :  { %v157_v48 = vpack.c.b16 %v145_v44, %v144_v43  ;;  %v6562_v49 = vpack.c.b16 %v153_v46, %v152_v45  ;;  %v146_v54 = vunpack.c.l.b16 %v82_v52  ;;  %651 = vmatpush.bf16.msrb.mxu2 %v6008_v59  ;;  %590 = vmatpush.bf16.msrb.mxu1 %v6006_v60  ;;  %v85_v62 = vpack.c.bf16 %v53_v58, %v53_v58  ;;  %v64_v33 = vld [vmem:[%s9771_s1 + $0x30] sm:$0xff]  ;;  %v65_v34 = vld [vmem:[%s9771_s1 + $0x38] sm:$0xff] }
   0xe   :  { %267 = vmatpush.bf16.msrb.mxu0 %v5997_v4  ;;  %v147_v55 = vunpack.c.l.b16 %v83_v53  ;;  %v148_v63 = vunpack.c.l.b16 %v84_v61  ;;  %v6010_v4 = vld [vmem:[%s9770_s4 + $0x38] sm:$0xff]  ;;  %v90_v7 = vpack.c.bf16 %v58_v5, %v58_v5  ;;  %v91_v8 = vpack.c.bf16 %v59_v6, %v59_v6 }
   0xf   :  { %389 = vmatpush.bf16.msrb.mxu3 %v6001_v28  ;;  %v149_v0 = vunpack.c.l.b16 %v85_v62  ;;  %v92_v14 = vpack.c.bf16 %v60_v12, %v60_v12  ;;  %v93_v15 = vpack.c.bf16 %v61_v13, %v61_v13  ;;  %v94_v21 = vpack.c.bf16 %v62_v19, %v62_v19 }
  0x10   :  { %v158_v56 = vpack.c.b16 %v147_v55, %v146_v54  ;;  %v463_v9 = vunpack.c.l.b16 %v90_v7  ;;  %v464_v10 = vunpack.c.l.b16 %v91_v8  ;;  %v95_v22 = vpack.c.bf16 %v63_v20, %v63_v20 }
  0x11   :  { %v159_v1 = vpack.c.b16 %v149_v0, %v148_v63  ;;  %591 = vmatpush.bf16.msrb.mxu1 %v6005_v2  ;;  %652 = vmatpush.bf16.msrb.mxu2 %v6007_v3  ;;  %v465_v16 = vunpack.c.l.b16 %v92_v14  ;;  %v466_v17 = vunpack.c.l.b16 %v93_v15  ;;  %v467_v23 = vunpack.c.l.b16 %v94_v21 }
  0x12   :  { %v6627_v11 = vpack.c.b16 %v464_v10, %v463_v9  ;;  %v468_v24 = vunpack.c.l.b16 %v95_v22  ;;  %v96_v39 = vpack.c.bf16 %v64_v33, %v64_v33  ;;  %v97_v40 = vpack.c.bf16 %v65_v34, %v65_v34 }
  0x13   :  { %712 = vmatpush.bf16.msra.mxu3 %v6010_v4  ;;  %v6642_v18 = vpack.c.b16 %v466_v17, %v465_v16  ;;  %v66_v4 = vld [vmem:[%s9771_s1 + $0x40] sm:$0xff] }
  0x14   :  { %v6660_v29 = vpack.c.b16 %v468_v24, %v467_v23  ;;  %v470_v50 = vunpack.c.l.b16 %v97_v40  ;;  %v98_v10 = vpack.c.bf16 %v66_v4, %v66_v4 }
  0x16   :  { %v471_v20 = vunpack.c.l.b16 %v98_v10 }
  0x17   :  { %713 = vmatpush.bf16.msra.mxu3 %v6009_v31 }
  0x1a   :  { %5700 = vmatmul.msk.bf16.gmra.mxu2 %vm174_vm0, %v6560_v47 }
  0x1b   :  { %5668 = vmatmul.msk.bf16.gmra.mxu0 %vm174_vm0, %v6560_v47 }
  0x1c   :  { %5686 = vmatmul.msk.bf16.gmra.mxu1 %vm174_vm0, %v157_v48  ;;  %5706 = vmatmul.msk.bf16.gmra.mxu3 %vm174_vm0, %v6562_v49 }
  0x2a   :  { %5701 = vmatmul.msk.bf16.gmra.mxu2 %vm174_vm0, %v6527_v26 }
  0x2b   :  { %5669 = vmatmul.msk.bf16.gmra.mxu0 %vm174_vm0, %v6527_v26 }
  0x2c   :  { %5687 = vmatmul.msk.bf16.gmra.mxu1 %vm174_vm0, %v158_v56  ;;  %5715 = vmatmul.msk.bf16.vlgmr.msrb.gmra.mxu3 %vm174_vm0, %v6525_v25 }
  0x3a   :  { %5702 = vmatmul.msk.bf16.gmra.mxu2 %vm174_vm0, %v157_v48 }
  0x3b   :  { %5670 = vmatmul.msk.bf16.gmra.mxu0 %vm174_vm0, %v157_v48 }
  0x3c   :  { %5688 = vmatmul.msk.bf16.gmra.mxu1 %vm174_vm0, %v159_v1  ;;  %5716 = vmatmul.msk.bf16.gmra.mxu3 %vm174_vm0, %v6560_v47 }
  0x4a   :  { %5703 = vmatmul.msk.bf16.gmra.mxu2 %vm174_vm0, %v158_v56 }
  0x4b   :  { %5671 = vmatmul.msk.bf16.gmra.mxu0 %vm174_vm0, %v158_v56 }
  0x4c   :  { %5689 = vmatmul.msk.bf16.gmra.mxu1 %vm174_vm0, %v6529_v27  ;;  %5717 = vmatmul.msk.bf16.gmra.mxu3 %vm174_vm0, %v6527_v26  ;;  %v6004_v26 = vld [vmem:[%s9770_s4 + $0x8] sm:$0xff] }
  0x4d   :  { %529 = vmatpush.bf16.msra.mxu0 %v6004_v26 }
  0x51   :  { %530 = vmatpush.bf16.msra.mxu0 %v6003_v30 }
  0x5a   :  { %5704 = vmatmul.msk.bf16.gmra.mxu2 %vm174_vm0, %v159_v1 }
  0x5b   :  { %5672 = vmatmul.msk.bf16.gmra.mxu0 %vm174_vm0, %v159_v1 }
  0x5c   :  { %5690 = vmatmul.msk.bf16.gmra.mxu1 %vm174_vm0, %v6562_v49  ;;  %5718 = vmatmul.msk.bf16.gmra.mxu3 %vm174_vm0, %v157_v48  ;;  %v469_v48 = vunpack.c.l.b16 %v96_v39 }
  0x5e   :  { %v6694_v59 = vpack.c.b16 %v470_v50, %v469_v48 }
  0x6a   :  { %5763 = vmatmul.msk.bf16.vlgmr.msrb.gmra.mxu2 %vm174_vm0, %v6627_v11 }
  0x6b   :  { %5673 = vmatmul.msk.bf16.gmra.mxu0 %vm174_vm0, %v6529_v27 }
  0x6c   :  { %5747 = vmatmul.msk.bf16.vlgmr.msrb.gmra.mxu1 %vm174_vm0, %v6627_v11  ;;  %5719 = vmatmul.msk.bf16.gmra.mxu3 %vm174_vm0, %v158_v56 }
  0x7a   :  { %5764 = vmatmul.msk.bf16.gmra.mxu2 %vm174_vm0, %v6642_v18 }
  0x7b   :  { %5674 = vmatmul.msk.bf16.gmra.mxu0 %vm174_vm0, %v6562_v49 }
  0x7c   :  { %5748 = vmatmul.msk.bf16.gmra.mxu1 %vm174_vm0, %v6642_v18  ;;  %5720 = vmatmul.msk.bf16.gmra.mxu3 %vm174_vm0, %v159_v1 }
  0x88   :  { %v208_v28 = vpop.f32.mrf.mxu0 }
  0x89   :  { %v279_v32 = vpop.f32.mrf.mxu1  ;;  %v1015_v35 = vpack.c.bf16 %v208_v28, %v208_v28 }
  0x8a   :  { %5765 = vmatmul.msk.bf16.gmra.mxu2 %vm174_vm0, %v6660_v29 }
  0x8b   :  { %5683 = vmatmul.msk.bf16.vlgmr.msrb.gmra.mxu0 %vm174_vm0, %v6525_v25  ;;  %v1035_v25 = vpack.c.bf16 %v279_v32, %v279_v32  ;;  %v6682_v44 = vunpack.c.l.b16 %v1015_v35 }
  0x8c   :  { %5749 = vmatmul.msk.bf16.gmra.mxu1 %vm174_vm0, %v6660_v29  ;;  %5721 = vmatmul.msk.bf16.gmra.mxu3 %vm174_vm0, %v6529_v27 }
  0x8d   :  { %v330_v36 = vpop.f32.mrf.mxu2  ;;  %9871 = vst [vmem:[#allocation2_spill] sm:$0xff] %v6682_v44  ;;  %v6686_v45 = vunpack.c.l.b16 %v1035_v25 }
  0x8e   :  { %v1047_v53 = vpack.c.bf16 %v330_v36, %v330_v36 }
  0x8f   :  { %v360_v37 = vpop.f32.mrf.mxu3  ;;  %9873 = vst [vmem:[#allocation4_spill] sm:$0xff] %v6686_v45 }
  0x90   :  { %v210_v38 = vpop.f32.mrf.mxu0  ;;  %v1059_v51 = vpack.c.bf16 %v360_v37, %v360_v37  ;;  %v6698_v63 = vunpack.c.l.b16 %v1047_v53 }
  0x91   :  { %v1016_v41 = vpack.c.bf16 %v210_v38, %v210_v38  ;;  %v281_v42 = vpop.f32.mrf.mxu1 }
  0x92   :  { %v1036_v43 = vpack.c.bf16 %v281_v42, %v281_v42  ;;  %v6696_v60 = vunpack.c.l.b16 %v1059_v51  ;;  %v69_v42 = vld [vmem:[%s9771_s1 + $0x58] sm:$0xff] }
  0x93   :  { %v6684_v27 = vunpack.c.l.b16 %v1016_v41  ;;  %v68_v41 = vld [vmem:[%s9771_s1 + $0x50] sm:$0xff] }
  0x94   :  { %v6688_v46 = vunpack.c.l.b16 %v1036_v43  ;;  %9875 = vst [vmem:[#allocation6_spill] sm:$0xff] %v6696_v60 }
  0x95   :  { %9872 = vst [vmem:[#allocation3_spill] sm:$0xff] %v6684_v27  ;;  %v332_v55 = vpop.f32.mrf.mxu2 }
  0x96   :  { %9874 = vst [vmem:[#allocation5_spill] sm:$0xff] %v6688_v46  ;;  %v1048_v56 = vpack.c.bf16 %v332_v55, %v332_v55  ;;  %v100_v55 = vpack.c.bf16 %v68_v41, %v68_v41  ;;  %v70_v41 = vld [vmem:[%s9771_s1 + $0x60] sm:$0xff] }
  0x97   :  { %v362_v57 = vpop.f32.mrf.mxu3 }
  0x98   :  { %v213_v58 = vpop.f32.mrf.mxu0  ;;  %v1060_v61 = vpack.c.bf16 %v362_v57, %v362_v57  ;;  %v6700_v0 = vunpack.c.l.b16 %v1048_v56  ;;  %v101_v56 = vpack.c.bf16 %v69_v42, %v69_v42  ;;  %v71_v42 = vld [vmem:[%s9771_s1 + $0x68] sm:$0xff] }
  0x99   :  { %v284_v62 = vpop.f32.mrf.mxu1  ;;  %v1017_v5 = vpack.c.bf16 %v213_v58, %v213_v58 }
  0x9a   :  { %v6702_v1 = vunpack.c.l.b16 %v1060_v61  ;;  %5766 = vmatmul.msk.bf16.gmra.mxu2 %vm174_vm0, %v6694_v59  ;;  %v1037_v7 = vpack.c.bf16 %v284_v62, %v284_v62 }
  0x9b   :  { %5684 = vmatmul.msk.bf16.gmra.mxu0 %vm174_vm0, %v6560_v47  ;;  %v67_v47 = vld [vmem:[%s9771_s1 + $0x48] sm:$0xff]  ;;  %v6722_v16 = vunpack.c.l.b16 %v1017_v5 }
  0x9c   :  { %9876 = vst [vmem:[#allocation7_spill] sm:$0xff] %v6702_v1  ;;  %5750 = vmatmul.msk.bf16.gmra.mxu1 %vm174_vm0, %v6694_v59  ;;  %5722 = vmatmul.msk.bf16.gmra.mxu3 %vm174_vm0, %v6562_v49  ;;  %v99_v12 = vpack.c.bf16 %v67_v47, %v67_v47  ;;  %v6726_v17 = vunpack.c.l.b16 %v1037_v7  ;;  %v474_v7 = vunpack.c.l.b16 %v101_v56  ;;  %v103_v56 = vpack.c.bf16 %v71_v42, %v71_v42 }
  0x9d   :  { %v335_v6 = vpop.f32.mrf.mxu2  ;;  %9877 = vst [vmem:[#allocation8_spill] sm:$0xff] %v6722_v16 }
  0x9e   :  { %9879 = vst [vmem:[#allocation10_spill] sm:$0xff] %v6726_v17  ;;  %v472_v21 = vunpack.c.l.b16 %v99_v12  ;;  %v1049_v24 = vpack.c.bf16 %v335_v6, %v335_v6  ;;  %v473_v6 = vunpack.c.l.b16 %v100_v55  ;;  %v102_v55 = vpack.c.bf16 %v70_v41, %v70_v41 }
  0x9f   :  { %v365_v8 = vpop.f32.mrf.mxu3 }
  0xa0   :  { %v215_v9 = vpop.f32.mrf.mxu0  ;;  %v1061_v22 = vpack.c.bf16 %v365_v8, %v365_v8  ;;  %v6734_v33 = vpack.c.b16 %v472_v21, %v471_v20  ;;  %v6738_v25 = vunpack.c.l.b16 %v1049_v24  ;;  %v6774_v21 = vpack.c.b16 %v474_v7, %v473_v6 }
  0xa1   :  { %v1018_v13 = vpack.c.bf16 %v215_v9, %v215_v9  ;;  %v286_v14 = vpop.f32.mrf.mxu1 }
  0xa2   :  { %v1038_v15 = vpack.c.bf16 %v286_v14, %v286_v14  ;;  %v6736_v34 = vunpack.c.l.b16 %v1061_v22 }
  0xa3   :  { %v6724_v49 = vunpack.c.l.b16 %v1018_v13 }
  0xa4   :  { %v6728_v19 = vunpack.c.l.b16 %v1038_v15  ;;  %9881 = vst [vmem:[#allocation12_spill] sm:$0xff] %v6736_v34 }
  0xa5   :  { %9878 = vst [vmem:[#allocation9_spill] sm:$0xff] %v6724_v49  ;;  %v337_v28 = vpop.f32.mrf.mxu2  ;;  %v6018_v49 = vld [vmem:[%s9772_s5 + $0x38] sm:$0xff] }
  0xa6   :  { %9880 = vst [vmem:[#allocation11_spill] sm:$0xff] %v6728_v19  ;;  %v1050_v30 = vpack.c.bf16 %v337_v28, %v337_v28 }
  0xa7   :  { %v367_v31 = vpop.f32.mrf.mxu3 }
  0xa8   :  { %v218_v32 = vpop.f32.mrf.mxu0  ;;  %v1062_v35 = vpack.c.bf16 %v367_v31, %v367_v31  ;;  %v6740_v37 = vunpack.c.l.b16 %v1050_v30 }
  0xa9   :  { %v289_v36 = vpop.f32.mrf.mxu1  ;;  %v1019_v43 = vpack.c.bf16 %v218_v32, %v218_v32 }
  0xaa   :  { %v6742_v38 = vunpack.c.l.b16 %v1062_v35  ;;  %5767 = vmatmul.msk.bf16.gmra.mxu2 %vm174_vm0, %v6734_v33  ;;  %v1039_v50 = vpack.c.bf16 %v289_v36, %v289_v36 }
  0xab   :  { %5731 = vmatmul.msk.bf16.vlgmr.msra.gmra.mxu0 %vm174_vm0, %v6627_v11  ;;  %v6762_v62 = vunpack.c.l.b16 %v1019_v43 }
  0xac   :  { %9882 = vst [vmem:[#allocation13_spill] sm:$0xff] %v6742_v38  ;;  %5751 = vmatmul.msk.bf16.gmra.mxu1 %vm174_vm0, %v6734_v33  ;;  %5779 = vmatmul.msk.bf16.vlgmr.msra.gmra.mxu3 %vm174_vm0, %v6627_v11  ;;  %v6766_v47 = vunpack.c.l.b16 %v1039_v50 }
  0xad   :  { %v340_v48 = vpop.f32.mrf.mxu2  ;;  %9883 = vst [vmem:[#allocation14_spill] sm:$0xff] %v6762_v62 }
  0xae   :  { %9885 = vst [vmem:[#allocation16_spill] sm:$0xff] %v6766_v47  ;;  %v1051_v10 = vpack.c.bf16 %v340_v48, %v340_v48 }
  0xaf   :  { %v391_v51 = vpop.f32.mrf.mxu3 }
  0xb0   :  { %v220_v53 = vpop.f32.mrf.mxu0  ;;  %v1063_v8 = vpack.c.bf16 %v391_v51, %v391_v51  ;;  %v6778_v30 = vunpack.c.l.b16 %v1051_v10 }
  0xb1   :  { %v1020_v57 = vpack.c.bf16 %v220_v53, %v220_v53  ;;  %v291_v58 = vpop.f32.mrf.mxu1 }
  0xb2   :  { %v1040_v61 = vpack.c.bf16 %v291_v58, %v291_v58  ;;  %v6776_v22 = vunpack.c.l.b16 %v1063_v8  ;;  %9888 = vst [vmem:[#allocation19_spill] sm:$0xff] %v6778_v30 }
  0xb3   :  { %v6764_v4 = vunpack.c.l.b16 %v1020_v57 }
  0xb4   :  { %v6768_v5 = vunpack.c.l.b16 %v1040_v61  ;;  %9887 = vst [vmem:[#allocation18_spill] sm:$0xff] %v6776_v22 }
  0xb5   :  { %9884 = vst [vmem:[#allocation15_spill] sm:$0xff] %v6764_v4  ;;  %v342_v13 = vpop.f32.mrf.mxu2 }
  0xb6   :  { %9886 = vst [vmem:[#allocation17_spill] sm:$0xff] %v6768_v5  ;;  %v1052_v14 = vpack.c.bf16 %v342_v13, %v342_v13  ;;  %v475_v13 = vunpack.c.l.b16 %v102_v55 }
  0xb7   :  { %v393_v15 = vpop.f32.mrf.mxu3 }
  0xb8   :  { %v223_v20 = vpop.f32.mrf.mxu0  ;;  %v1064_v24 = vpack.c.bf16 %v393_v15, %v393_v15  ;;  %v6780_v31 = vunpack.c.l.b16 %v1052_v14  ;;  %v476_v14 = vunpack.c.l.b16 %v103_v56  ;;  %v6014_v15 = vld [vmem:[%s9772_s5 + $0x18] sm:$0xff] }
  0xb9   :  { %v294_v28 = vpop.f32.mrf.mxu1  ;;  %v1021_v43 = vpack.c.bf16 %v223_v20, %v223_v20  ;;  %v6016_v20 = vld [vmem:[%s9772_s5 + $0x28] sm:$0xff]  ;;  %850 = vmatpush.bf16.msra.mxu1 %v6014_v15 }
  0xba   :  { %9889 = vst [vmem:[#allocation20_spill] sm:$0xff] %v6780_v31  ;;  %v6782_v32 = vunpack.c.l.b16 %v1064_v24  ;;  %5768 = vmatmul.msk.bf16.gmra.mxu2 %vm174_vm0, %v6774_v21  ;;  %v1041_v50 = vpack.c.bf16 %v294_v28, %v294_v28  ;;  %v6820_v56 = vpack.c.b16 %v476_v14, %v475_v13 }
  0xbb   :  { %5732 = vmatmul.msk.bf16.gmra.mxu0 %vm174_vm0, %v6642_v18  ;;  %v6802_v6 = vunpack.c.l.b16 %v1021_v43  ;;  %911 = vmatpush.bf16.msra.mxu2 %v6016_v20 }
  0xbc   :  { %9890 = vst [vmem:[#allocation21_spill] sm:$0xff] %v6782_v32  ;;  %5752 = vmatmul.msk.bf16.gmra.mxu1 %vm174_vm0, %v6774_v21  ;;  %5780 = vmatmul.msk.bf16.gmra.mxu3 %vm174_vm0, %v6642_v18  ;;  %v6806_v8 = vunpack.c.l.b16 %v1041_v50 }
  0xbd   :  { %v345_v48 = vpop.f32.mrf.mxu2  ;;  %9891 = vst [vmem:[#allocation22_spill] sm:$0xff] %v6802_v6 }
  0xbe   :  { %9893 = vst [vmem:[#allocation24_spill] sm:$0xff] %v6806_v8  ;;  %v1053_v41 = vpack.c.bf16 %v345_v48, %v345_v48 }
  0xbf   :  { %v396_v51 = vpop.f32.mrf.mxu3  ;;  %9895 = vst [vmem:[#allocation26_spill] sm:$0xff] %v6820_v56 }
  0xc0   :  { %v225_v53 = vpop.f32.mrf.mxu0  ;;  %v1065_v24 = vpack.c.bf16 %v396_v51, %v396_v51  ;;  %v6015_v51 = vld [vmem:[%s9772_s5 + $0x20] sm:$0xff]  ;;  %v6830_v15 = vunpack.c.l.b16 %v1053_v41  ;;  %v72_v41 = vld [vmem:[%s9771_s1 + $0x70] sm:$0xff] }
  0xc1   :  { %v1022_v57 = vpack.c.bf16 %v225_v53, %v225_v53  ;;  %v296_v58 = vpop.f32.mrf.mxu1  ;;  %912 = vmatpush.bf16.msra.mxu2 %v6015_v51  ;;  %v104_v40 = vpack.c.bf16 %v72_v41, %v72_v41 }
  0xc2   :  { %v1042_v61 = vpack.c.bf16 %v296_v58, %v296_v58  ;;  %v6828_v48 = vunpack.c.l.b16 %v1065_v24  ;;  %9897 = vst [vmem:[#allocation28_spill] sm:$0xff] %v6830_v15 }
  0xc3   :  { %v6804_v7 = vunpack.c.l.b16 %v1022_v57  ;;  %v6013_v57 = vld [vmem:[%s9772_s5 + $0x10] sm:$0xff]  ;;  %v477_v52 = vunpack.c.l.b16 %v104_v40 }
  0xc4   :  { %v6808_v10 = vunpack.c.l.b16 %v1042_v61  ;;  %9896 = vst [vmem:[#allocation27_spill] sm:$0xff] %v6828_v48  ;;  %851 = vmatpush.bf16.msra.mxu1 %v6013_v57 }
  0xc5   :  { %9892 = vst [vmem:[#allocation23_spill] sm:$0xff] %v6804_v7  ;;  %v347_v43 = vpop.f32.mrf.mxu2 }
  0xc6   :  { %9894 = vst [vmem:[#allocation25_spill] sm:$0xff] %v6808_v10  ;;  %v1054_v50 = vpack.c.bf16 %v347_v43, %v347_v43  ;;  %v73_v43 = vld [vmem:[%s9771_s1 + $0x78] sm:$0xff] }
  0xc7   :  { %v398_v53 = vpop.f32.mrf.mxu3  ;;  %v105_v28 = vpack.c.bf16 %v73_v43, %v73_v43 }
  0xc8   :  { %v228_v55 = vpop.f32.mrf.mxu0  ;;  %v1066_v58 = vpack.c.bf16 %v398_v53, %v398_v53  ;;  %v6832_v20 = vunpack.c.l.b16 %v1054_v50 }
  0xc9   :  { %v299_v61 = vpop.f32.mrf.mxu1  ;;  %v1023_v50 = vpack.c.bf16 %v228_v55, %v228_v55  ;;  %v478_v14 = vunpack.c.l.b16 %v105_v28 }
  0xca   :  { %9898 = vst [vmem:[#allocation29_spill] sm:$0xff] %v6832_v20  ;;  %v6834_v13 = vunpack.c.l.b16 %v1066_v58  ;;  %5769 = vmatmul.msk.bf16.gmra.mxu2 %vm174_vm0, %v6820_v56  ;;  %v1043_v57 = vpack.c.bf16 %v299_v61, %v299_v61 }
  0xcb   :  { %5733 = vmatmul.msk.bf16.gmra.mxu0 %vm174_vm0, %v6660_v29  ;;  %v6854_v42 = vunpack.c.l.b16 %v1023_v50 }
  0xcc   :  { %9899 = vst [vmem:[#allocation30_spill] sm:$0xff] %v6834_v13  ;;  %5753 = vmatmul.msk.bf16.gmra.mxu1 %vm174_vm0, %v6820_v56  ;;  %5781 = vmatmul.msk.bf16.gmra.mxu3 %vm174_vm0, %v6660_v29  ;;  %v6858_v36 = vunpack.c.l.b16 %v1043_v57 }
  0xcd   :  { %v350_v53 = vpop.f32.mrf.mxu2  ;;  %9900 = vst [vmem:[#allocation31_spill] sm:$0xff] %v6854_v42 }
  0xce   :  { %9902 = vst [vmem:[#allocation33_spill] sm:$0xff] %v6858_v36  ;;  %v1055_v26 = vpack.c.bf16 %v350_v53, %v350_v53 }
  0xcf   :  { %v401_v51 = vpop.f32.mrf.mxu3 }
  0xd0   :  { %v230_v58 = vpop.f32.mrf.mxu0  ;;  %v1067_v55 = vpack.c.bf16 %v401_v51, %v401_v51  ;;  %v6870_v40 = vunpack.c.l.b16 %v1055_v26  ;;  %v6012_v26 = vld [vmem:[%s9772_s5 + $0x8] sm:$0xff] }
  0xd1   :  { %v1024_v3 = vpack.c.bf16 %v230_v58, %v230_v58  ;;  %v301_v9 = vpop.f32.mrf.mxu1  ;;  %6035 = vmatpush.bf16.msrb.mxu3 %v6012_v26  ;;  %789 = vmatpush.bf16.msrb.mxu0 %v6012_v26 }
  0xd2   :  { %v1044_v24 = vpack.c.bf16 %v301_v9, %v301_v9  ;;  %v6868_v57 = vunpack.c.l.b16 %v1067_v55  ;;  %9906 = vst [vmem:[#allocation37_spill] sm:$0xff] %v6870_v40 }
  0xd3   :  { %v6856_v23 = vunpack.c.l.b16 %v1024_v3  ;;  %v6866_v3 = vpack.c.b16 %v478_v14, %v477_v52 }
  0xd4   :  { %v6860_v12 = vunpack.c.l.b16 %v1044_v24  ;;  %9905 = vst [vmem:[#allocation36_spill] sm:$0xff] %v6868_v57 }
  0xd5   :  { %9901 = vst [vmem:[#allocation32_spill] sm:$0xff] %v6856_v23  ;;  %v352_v43 = vpop.f32.mrf.mxu2 }
  0xd6   :  { %9903 = vst [vmem:[#allocation34_spill] sm:$0xff] %v6860_v12  ;;  %v1056_v9 = vpack.c.bf16 %v352_v43, %v352_v43 }
  0xd7   :  { %v403_v50 = vpop.f32.mrf.mxu3  ;;  %9904 = vst [vmem:[#allocation35_spill] sm:$0xff] %v6866_v3 }
  0xd8   :  { %v233_v58 = vpop.f32.mrf.mxu0  ;;  %v1068_v24 = vpack.c.bf16 %v403_v50, %v403_v50  ;;  %v6872_v28 = vunpack.c.l.b16 %v1056_v9 }
  0xd9   :  { %v304_v35 = vpop.f32.mrf.mxu1  ;;  %v1025_v14 = vpack.c.bf16 %v233_v58, %v233_v58 }
  0xda   :  { %9907 = vst [vmem:[#allocation38_spill] sm:$0xff] %v6872_v28  ;;  %v6874_v51 = vunpack.c.l.b16 %v1068_v24  ;;  %5770 = vmatmul.msk.bf16.gmra.mxu2 %vm174_vm0, %v6866_v3  ;;  %v1045_v43 = vpack.c.bf16 %v304_v35, %v304_v35 }
  0xdb   :  { %5734 = vmatmul.msk.bf16.gmra.mxu0 %vm174_vm0, %v6694_v59  ;;  %v6891_v53 = vunpack.c.l.b16 %v1025_v14 }
  0xdc   :  { %9908 = vst [vmem:[#allocation39_spill] sm:$0xff] %v6874_v51  ;;  %5754 = vmatmul.msk.bf16.gmra.mxu1 %vm174_vm0, %v6866_v3  ;;  %5782 = vmatmul.msk.bf16.gmra.mxu3 %vm174_vm0, %v6694_v59  ;;  %v6895_v54 = vunpack.c.l.b16 %v1045_v43 }
  0xdd   :  { %v355_v55 = vpop.f32.mrf.mxu2  ;;  %9909 = vst [vmem:[#allocation40_spill] sm:$0xff] %v6891_v53 }
  0xde   :  { %9911 = vst [vmem:[#allocation42_spill] sm:$0xff] %v6895_v54  ;;  %v1057_v42 = vpack.c.bf16 %v355_v55, %v355_v55 }
  0xdf   :  { %v406_v9 = vpop.f32.mrf.mxu3 }
  0xe0   :  { %v235_v50 = vpop.f32.mrf.mxu0  ;;  %v1069_v2 = vpack.c.bf16 %v406_v9, %v406_v9  ;;  %v6905_v43 = vunpack.c.l.b16 %v1057_v42 }
  0xe1   :  { %v1026_v24 = vpack.c.bf16 %v235_v50, %v235_v50  ;;  %v306_v61 = vpop.f32.mrf.mxu1 }
  0xe2   :  { %v1046_v41 = vpack.c.bf16 %v306_v61, %v306_v61  ;;  %v6903_v14 = vunpack.c.l.b16 %v1069_v2  ;;  %9914 = vst [vmem:[#allocation45_spill] sm:$0xff] %v6905_v43 }
  0xe3   :  { %v6893_v52 = vunpack.c.l.b16 %v1026_v24 }
  0xe4   :  { %v6897_v39 = vunpack.c.l.b16 %v1046_v41  ;;  %9913 = vst [vmem:[#allocation44_spill] sm:$0xff] %v6903_v14 }
  0xe5   :  { %9910 = vst [vmem:[#allocation41_spill] sm:$0xff] %v6893_v52  ;;  %v357_v26 = vpop.f32.mrf.mxu2 }
  0xe6   :  { %9912 = vst [vmem:[#allocation43_spill] sm:$0xff] %v6897_v39  ;;  %v1058_v50 = vpack.c.bf16 %v357_v26, %v357_v26 }
  0xe7   :  { %v408_v23 = vpop.f32.mrf.mxu3 }
  0xe8   :  { %v238_v61 = vpop.f32.mrf.mxu0  ;;  %v1070_v24 = vpack.c.bf16 %v408_v23, %v408_v23  ;;  %v6907_v41 = vunpack.c.l.b16 %v1058_v50 }
  0xe9   :  { %v593_v34 = vpop.f32.mrf.mxu1  ;;  %v1027_v23 = vpack.c.bf16 %v238_v61, %v238_v61 }
  0xea   :  { %9915 = vst [vmem:[#allocation46_spill] sm:$0xff] %v6907_v41  ;;  %v6909_v9 = vunpack.c.l.b16 %v1070_v24  ;;  %5827 = vmatmul.msk.bf16.vlgmr.msra.gmra.mxu2 %vm174_vm0, %v6627_v11  ;;  %v1095_v26 = vpack.c.bf16 %v593_v34, %v593_v34 }
  0xeb   :  { %5735 = vmatmul.msk.bf16.gmra.mxu0 %vm174_vm0, %v6734_v33  ;;  %v6923_v53 = vunpack.c.l.b16 %v1027_v23 }
  0xec   :  { %9916 = vst [vmem:[#allocation47_spill] sm:$0xff] %v6909_v9  ;;  %5811 = vmatmul.msk.bf16.vlgmr.msra.gmra.mxu1 %vm174_vm0, %v6627_v11  ;;  %5783 = vmatmul.msk.bf16.gmra.mxu3 %vm174_vm0, %v6734_v33  ;;  %v6927_v38 = vunpack.c.l.b16 %v1095_v26 }
  0xed   :  { %v654_v42 = vpop.f32.mrf.mxu2  ;;  %9917 = vst [vmem:[#allocation48_spill] sm:$0xff] %v6923_v53 }
  0xee   :  { %v1111_v61 = vpack.c.bf16 %v654_v42, %v654_v42 }
  0xef   :  { %v411_v50 = vpop.f32.mrf.mxu3 }
  0xf0   :  { %v240_v24 = vpop.f32.mrf.mxu0  ;;  %v1071_v2 = vpack.c.bf16 %v411_v50, %v411_v50  ;;  %v6937_v26 = vunpack.c.l.b16 %v1111_v61 }
  0xf1   :  { %v1028_v58 = vpack.c.bf16 %v240_v24, %v240_v24  ;;  %v595_v35 = vpop.f32.mrf.mxu1 }
  0xf2   :  { %v1096_v55 = vpack.c.bf16 %v595_v35, %v595_v35  ;;  %v6935_v23 = vunpack.c.l.b16 %v1071_v2 }
  0xf3   :  { %v6925_v52 = vunpack.c.l.b16 %v1028_v58 }
  0xf4   :  { %v6929_v54 = vunpack.c.l.b16 %v1096_v55  ;;  %9919 = vst [vmem:[#allocation50_spill] sm:$0xff] %v6935_v23 }
  0xf5   :  { %9918 = vst [vmem:[#allocation49_spill] sm:$0xff] %v6925_v52  ;;  %v656_v9 = vpop.f32.mrf.mxu2 }
  0xf6   :  { %v1112_v39 = vpack.c.bf16 %v656_v9, %v656_v9 }
  0xf7   :  { %v413_v24 = vpop.f32.mrf.mxu3 }
  0xf8   :  { %v243_v35 = vpop.f32.mrf.mxu0  ;;  %v1072_v58 = vpack.c.bf16 %v413_v24, %v413_v24  ;;  %v6939_v55 = vunpack.c.l.b16 %v1112_v39 }
  0xf9   :  { %v598_v6 = vpop.f32.mrf.mxu1  ;;  %v1029_v39 = vpack.c.bf16 %v243_v35, %v243_v35 }
  0xfa   :  { %v6941_v50 = vunpack.c.l.b16 %v1072_v58  ;;  %5828 = vmatmul.msk.bf16.gmra.mxu2 %vm174_vm0, %v6642_v18  ;;  %v1097_v61 = vpack.c.bf16 %v598_v6, %v598_v6 }
  0xfb   :  { %5736 = vmatmul.msk.bf16.gmra.mxu0 %vm174_vm0, %v6774_v21  ;;  %v6955_v52 = vunpack.c.l.b16 %v1029_v39 }
  0xfc   :  { %9920 = vst [vmem:[#allocation51_spill] sm:$0xff] %v6941_v50  ;;  %5812 = vmatmul.msk.bf16.gmra.mxu1 %vm174_vm0, %v6642_v18  ;;  %5784 = vmatmul.msk.bf16.gmra.mxu3 %vm174_vm0, %v6774_v21  ;;  %v6959_v57 = vunpack.c.l.b16 %v1097_v61 }
  0xfd   :  { %v659_v42 = vpop.f32.mrf.mxu2  ;;  %9921 = vst [vmem:[#allocation52_spill] sm:$0xff] %v6955_v52 }
  0xfe   :  { %v1113_v35 = vpack.c.bf16 %v659_v42, %v659_v42 }
  0xff   :  { %v416_v24 = vpop.f32.mrf.mxu3 }
 0x100   :  { %v245_v58 = vpop.f32.mrf.mxu0  ;;  %v1073_v2 = vpack.c.bf16 %v416_v24, %v416_v24  ;;  %v6972_v24 = vunpack.c.l.b16 %v1113_v35 }
 0x101   :  { %v1030_v14 = vpack.c.bf16 %v245_v58, %v245_v58  ;;  %v600_v34 = vpop.f32.mrf.mxu1 }
 0x102   :  { %v1098_v53 = vpack.c.bf16 %v600_v34, %v600_v34  ;;  %v6970_v39 = vunpack.c.l.b16 %v1073_v2 }
 0x103   :  { %v6957_v7 = vunpack.c.l.b16 %v1030_v14  ;;  %v6011_v14 = vld [vmem:[%s9772_s5] sm:$0xff] }
 0x104   :  { %v6961_v9 = vunpack.c.l.b16 %v1098_v53  ;;  %9923 = vst [vmem:[#allocation54_spill] sm:$0xff] %v6970_v39  ;;  %6036 = vmatpush.bf16.msrb.mxu3 %v6011_v14  ;;  %790 = vmatpush.bf16.msrb.mxu0 %v6011_v14 }
 0x105   :  { %9922 = vst [vmem:[#allocation53_spill] sm:$0xff] %v6957_v7  ;;  %v661_v50 = vpop.f32.mrf.mxu2 }
 0x106   :  { %v1114_v51 = vpack.c.bf16 %v661_v50, %v661_v50 }
 0x107   :  { %v418_v58 = vpop.f32.mrf.mxu3 }
 0x108   :  { %v269_v34 = vpop.f32.mrf.mxu0  ;;  %v1074_v53 = vpack.c.bf16 %v418_v58, %v418_v58  ;;  %v6974_v60 = vunpack.c.l.b16 %v1114_v51  ;;  %972 = vmatpush.bf16.msra.mxu3 %v6018_v49 }
 0x109   :  { %v603_v61 = vpop.f32.mrf.mxu1  ;;  %v1031_v2 = vpack.c.bf16 %v269_v34, %v269_v34 }
 0x10a   :  { %v6976_v42 = vunpack.c.l.b16 %v1074_v53  ;;  %5829 = vmatmul.msk.bf16.gmra.mxu2 %vm174_vm0, %v6660_v29  ;;  %v1099_v58 = vpack.c.bf16 %v603_v61, %v603_v61 }
 0x10b   :  { %5737 = vmatmul.msk.bf16.gmra.mxu0 %vm174_vm0, %v6820_v56  ;;  %v6990_v7 = vunpack.c.l.b16 %v1031_v2 }
 0x10c   :  { %9924 = vst [vmem:[#allocation55_spill] sm:$0xff] %v6976_v42  ;;  %5813 = vmatmul.msk.bf16.gmra.mxu1 %vm174_vm0, %v6660_v29  ;;  %5785 = vmatmul.msk.bf16.gmra.mxu3 %vm174_vm0, %v6820_v56  ;;  %v6994_v36 = vunpack.c.l.b16 %v1099_v58 }
 0x10d   :  { %v664_v35 = vpop.f32.mrf.mxu2 }
 0x10e   :  { %v1115_v34 = vpack.c.bf16 %v664_v35, %v664_v35 }
 0x10f   :  { %v421_v14 = vpop.f32.mrf.mxu3 }
 0x110   :  { %v271_v53 = vpop.f32.mrf.mxu0  ;;  %v1075_v51 = vpack.c.bf16 %v421_v14, %v421_v14  ;;  %v7004_v58 = vunpack.c.l.b16 %v1115_v34 }
 0x111   :  { %v1032_v23 = vpack.c.bf16 %v271_v53, %v271_v53  ;;  %v605_v6 = vpop.f32.mrf.mxu1 }
 0x112   :  { %v1100_v52 = vpack.c.bf16 %v605_v6, %v605_v6  ;;  %v7002_v2 = vunpack.c.l.b16 %v1075_v51 }
 0x113   :  { %v6992_v1 = vunpack.c.l.b16 %v1032_v23 }
 0x114   :  { %v6996_v50 = vunpack.c.l.b16 %v1100_v52  ;;  %9925 = vst [vmem:[#allocation56_spill] sm:$0xff] %v7002_v2 }
 0x115   :  { %v666_v42 = vpop.f32.mrf.mxu2 }
 0x116   :  { %v1116_v12 = vpack.c.bf16 %v666_v42, %v666_v42 }
 0x117   :  { %v423_v53 = vpop.f32.mrf.mxu3 }
 0x118   :  { %v274_v6 = vpop.f32.mrf.mxu0  ;;  %v1076_v23 = vpack.c.bf16 %v423_v53, %v423_v53  ;;  %v7006_v52 = vunpack.c.l.b16 %v1116_v12 }
 0x119   :  { %v608_v62 = vpop.f32.mrf.mxu1  ;;  %v1033_v12 = vpack.c.bf16 %v274_v6, %v274_v6 }
 0x11a   :  { %v7008_v14 = vunpack.c.l.b16 %v1076_v23  ;;  %5830 = vmatmul.msk.bf16.gmra.mxu2 %vm174_vm0, %v6694_v59  ;;  %v1101_v34 = vpack.c.bf16 %v608_v62, %v608_v62 }
 0x11b   :  { %5738 = vmatmul.msk.bf16.gmra.mxu0 %vm174_vm0, %v6866_v3  ;;  %v7022_v48 = vunpack.c.l.b16 %v1033_v12 }
 0x11c   :  { %9926 = vst [vmem:[#allocation57_spill] sm:$0xff] %v7008_v14  ;;  %5814 = vmatmul.msk.bf16.gmra.mxu1 %vm174_vm0, %v6694_v59  ;;  %5786 = vmatmul.msk.bf16.gmra.mxu3 %vm174_vm0, %v6866_v3  ;;  %v7026_v43 = vunpack.c.l.b16 %v1101_v34 }
 0x11d   :  { %v669_v35 = vpop.f32.mrf.mxu2 }
 0x11e   :  { %v1117_v6 = vpack.c.bf16 %v669_v35, %v669_v35 }
 0x11f   :  { %v426_v53 = vpop.f32.mrf.mxu3 }
 0x120   :  { %v276_v23 = vpop.f32.mrf.mxu0  ;;  %v1077_v51 = vpack.c.bf16 %v426_v53, %v426_v53 }
 0x121   :  { %v1034_v39 = vpack.c.bf16 %v276_v23, %v276_v23  ;;  %v610_v61 = vpop.f32.mrf.mxu1 }
 0x122   :  { %v1102_v4 = vpack.c.bf16 %v610_v61, %v610_v61  ;;  %v7036_v12 = vunpack.c.l.b16 %v1077_v51 }
 0x123   :  { %v7024_v13 = vunpack.c.l.b16 %v1034_v39 }
 0x124   :  { %v7028_v42 = vunpack.c.l.b16 %v1102_v4  ;;  %9928 = vst [vmem:[#allocation59_spill] sm:$0xff] %v7036_v12  ;;  %v7040_v4 = vunpack.c.l.b16 %v1117_v6 }
 0x125   :  { %v671_v14 = vpop.f32.mrf.mxu2 }
 0x126   :  { %v1118_v41 = vpack.c.bf16 %v671_v14, %v671_v14 }
 0x127   :  { %v428_v23 = vpop.f32.mrf.mxu3 }
 0x128   :  { %v7034_v61 = vpop.f32.mrf.mxu0  ;;  %v1078_v39 = vpack.c.bf16 %v428_v23, %v428_v23  ;;  %v7042_v53 = vunpack.c.l.b16 %v1118_v41 }
 0x129   :  { %9927 = vst [vmem:[#allocation58_spill] sm:$0xff] %v7034_v61  ;;  %v7038_v34 = vpop.f32.mrf.mxu1 }
 0x12a   :  { %v7044_v8 = vunpack.c.l.b16 %v1078_v39  ;;  %5831 = vmatmul.msk.bf16.gmra.mxu2 %vm174_vm0, %v6734_v33 }
 0x12b   :  { %5795 = vmatmul.msk.bf16.vlgmr.msrb.gmra.mxu0 %vm174_vm0, %v6627_v11 }
 0x12c   :  { %9929 = vst [vmem:[#allocation60_spill] sm:$0xff] %v7044_v8  ;;  %5815 = vmatmul.msk.bf16.gmra.mxu1 %vm174_vm0, %v6734_v33  ;;  %5799 = vmatmul.msk.bf16.vlgmr.msrb.gmra.mxu3 %vm174_vm0, %v6734_v33 }
 0x12d   :  { %v7058_v41 = vpop.f32.mrf.mxu2 }
 0x12f   :  { %v715_v35 = vpop.f32.mrf.mxu3 }
 0x130   :  { %v7060_v6 = vpop.f32.mrf.mxu0  ;;  %v1127_v39 = vpack.c.bf16 %v715_v35, %v715_v35  ;;  %v6017_v35 = vld [vmem:[%s9772_s5 + $0x30] sm:$0xff] }
 0x131   :  { %9930 = vst [vmem:[#allocation61_spill] sm:$0xff] %v7060_v6  ;;  %v7062_v23 = vpop.f32.mrf.mxu1  ;;  %973 = vmatpush.bf16.msra.mxu3 %v6017_v35 }
 0x132   :  { %v7068_v14 = vunpack.c.l.b16 %v1127_v39 }
 0x134   :  { %9932 = vst [vmem:[#allocation63_spill] sm:$0xff] %v7068_v14 }
 0x135   :  { %v7064_v2 = vpop.f32.mrf.mxu2 }
 0x137   :  { %v717_v62 = vpop.f32.mrf.mxu3 }
 0x138   :  { %v7066_v10 = vpop.f32.mrf.mxu0  ;;  %v1128_v16 = vpack.c.bf16 %v717_v62, %v717_v62 }
 0x139   :  { %9931 = vst [vmem:[#allocation62_spill] sm:$0xff] %v7066_v10  ;;  %v7070_v51 = vpop.f32.mrf.mxu1 }
 0x13a   :  { %v7072_v12 = vunpack.c.l.b16 %v1128_v16  ;;  %5832 = vmatmul.msk.bf16.gmra.mxu2 %vm174_vm0, %v6774_v21 }
 0x13b   :  { %5796 = vmatmul.msk.bf16.gmra.mxu0 %vm174_vm0, %v6642_v18 }
 0x13c   :  { %9933 = vst [vmem:[#allocation64_spill] sm:$0xff] %v7072_v12  ;;  %5816 = vmatmul.msk.bf16.gmra.mxu1 %vm174_vm0, %v6774_v21  ;;  %5800 = vmatmul.msk.bf16.gmra.mxu3 %vm174_vm0, %v6774_v21 }
 0x13d   :  { %v7084_v62 = vpop.f32.mrf.mxu2 }
 0x13f   :  { %v720_v39 = vpop.f32.mrf.mxu3 }
 0x140   :  { %v7086_v16 = vpop.f32.mrf.mxu0  ;;  %v1129_v22 = vpack.c.bf16 %v720_v39, %v720_v39 }
 0x141   :  { %9934 = vst [vmem:[#allocation65_spill] sm:$0xff] %v7086_v16  ;;  %v7088_v8 = vpop.f32.mrf.mxu1 }
 0x142   :  { %v7100_v47 = vunpack.c.l.b16 %v1129_v22 }
 0x144   :  { %9936 = vst [vmem:[#allocation67_spill] sm:$0xff] %v7100_v47 }
 0x145   :  { %v7093_v32 = vpop.f32.mrf.mxu2 }
 0x147   :  { %v722_v40 = vpop.f32.mrf.mxu3 }
 0x148   :  { %v7095_v28 = vpop.f32.mrf.mxu0  ;;  %v1130_v5 = vpack.c.bf16 %v722_v40, %v722_v40 }
 0x149   :  { %9935 = vst [vmem:[#allocation66_spill] sm:$0xff] %v7095_v28  ;;  %v623_v44 = vpop.f32.mrf.mxu1 }
 0x14a   :  { %v7102_v27 = vunpack.c.l.b16 %v1130_v5  ;;  %5833 = vmatmul.msk.bf16.gmra.mxu2 %vm174_vm0, %v6820_v56 }
 0x14b   :  { %5797 = vmatmul.msk.bf16.gmra.mxu0 %vm174_vm0, %v6660_v29 }
 0x14c   :  { %9937 = vst [vmem:[#allocation68_spill] sm:$0xff] %v7102_v27  ;;  %5817 = vmatmul.msk.bf16.gmra.mxu1 %vm174_vm0, %v6820_v56  ;;  %5801 = vmatmul.msk.bf16.gmra.mxu3 %vm174_vm0, %v6820_v56  ;;  %v1107_v56 = vpack.c.bf16 %v623_v44, %v623_v44 }
 0x14d   :  { %v684_v22 = vpop.f32.mrf.mxu2 }
 0x14f   :  { %v725_v40 = vpop.f32.mrf.mxu3 }
 0x150   :  { %v7114_v35 = vpop.f32.mrf.mxu0  ;;  %v1131_v39 = vpack.c.bf16 %v725_v40, %v725_v40 }
 0x151   :  { %9938 = vst [vmem:[#allocation69_spill] sm:$0xff] %v7114_v35  ;;  %v625_v5 = vpop.f32.mrf.mxu1 }
 0x152   :  { %v7118_v20 = vunpack.c.l.b16 %v1131_v39  ;;  %v1108_v6 = vpack.c.bf16 %v625_v5, %v625_v5 }
 0x154   :  { %9939 = vst [vmem:[#allocation70_spill] sm:$0xff] %v7118_v20 }
 0x155   :  { %v686_v14 = vpop.f32.mrf.mxu2 }
 0x157   :  { %v727_v12 = vpop.f32.mrf.mxu3 }
 0x158   :  { %v7116_v15 = vpop.f32.mrf.mxu0  ;;  %v1132_v17 = vpack.c.bf16 %v727_v12, %v727_v12 }
 0x159   :  { %v628_v19 = vpop.f32.mrf.mxu1 }
 0x15a   :  { %v7120_v61 = vunpack.c.l.b16 %v1132_v17  ;;  %5834 = vmatmul.msk.bf16.gmra.mxu2 %vm174_vm0, %v6866_v3  ;;  %v1109_v12 = vpack.c.bf16 %v628_v19, %v628_v19 }
 0x15b   :  { %5798 = vmatmul.msk.bf16.gmra.mxu0 %vm174_vm0, %v6694_v59 }
 0x15c   :  { %9940 = vst [vmem:[#allocation71_spill] sm:$0xff] %v7120_v61  ;;  %5818 = vmatmul.msk.bf16.gmra.mxu1 %vm174_vm0, %v6866_v3  ;;  %5802 = vmatmul.msk.bf16.gmra.mxu3 %vm174_vm0, %v6866_v3  ;;  %v1407_v30 = vunpack.c.l.b16 %v1109_v12  ;;  %v1406_v3 = vunpack.c.l.b16 %v1108_v6 }
 0x15d   :  { %v689_v39 = vpop.f32.mrf.mxu2 }
 0x15e   :  { %v1125_v16 = vpack.c.bf16 %v689_v39, %v689_v39 }
 0x15f   :  { %v730_v49 = vpop.f32.mrf.mxu3 }
 0x160   :  { %v7132_v17 = vpop.f32.mrf.mxu0  ;;  %v1133_v10 = vpack.c.bf16 %v730_v49, %v730_v49  ;;  %v1124_v49 = vpack.c.bf16 %v686_v14, %v686_v14  ;;  %v1584_v44 = vunpack.c.l.b16 %v1125_v16 }
 0x161   :  { %v630_v47 = vpop.f32.mrf.mxu1 }
 0x162   :  { %v1110_v27 = vpack.c.bf16 %v630_v47, %v630_v47  ;;  %v7137_v20 = vunpack.c.l.b16 %v1133_v10  ;;  %v1105_v10 = vpack.c.bf16 %v7070_v51, %v7070_v51  ;;  %v1122_v51 = vpack.c.bf16 %v7093_v32, %v7093_v32 }
 0x164   :  { %v1408_v31 = vunpack.c.l.b16 %v1110_v27  ;;  %v1405_v27 = vunpack.c.l.b16 %v1107_v56  ;;  %v1583_v56 = vunpack.c.l.b16 %v1124_v49 }
 0x165   :  { %v691_v46 = vpop.f32.mrf.mxu2 }
 0x166   :  { %v1416_v45 = vpack.c.b16 %v1408_v31, %v1407_v30  ;;  %v1126_v28 = vpack.c.bf16 %v691_v46, %v691_v46  ;;  %v1106_v46 = vpack.c.bf16 %v7088_v8, %v7088_v8  ;;  %v1123_v31 = vpack.c.bf16 %v684_v22, %v684_v22 }
 0x167   :  { %v732_v35 = vpop.f32.mrf.mxu3  ;;  %v1415_v39 = vpack.c.b16 %v1406_v3, %v1405_v27  ;;  %v1121_v27 = vpack.c.bf16 %v7084_v62, %v7084_v62 }
 0x168   :  { %v7134_v40 = vpop.f32.mrf.mxu0  ;;  %v1463_v19 = vsel %vm1239_vm1, %v1416_v45, 0  ;;  %v1134_v61 = vpack.c.bf16 %v732_v35, %v732_v35  ;;  %v1585_v5 = vunpack.c.l.b16 %v1126_v28  ;;  %v1404_v14 = vunpack.c.l.b16 %v1106_v46 }
 0x169   :  { %v7139_v47 = vpop.f32.mrf.mxu1  ;;  %1465 = vmatpush.bf16.xpose.msrb.mxu1 %v1463_v19  ;;  %v1582_v8 = vunpack.c.l.b16 %v1123_v31  ;;  %v1460_v3 = vsel %vm1239_vm1, %v1415_v39, 0  ;;  %v1403_v35 = vunpack.c.l.b16 %v1105_v10  ;;  %v1104_v19 = vpack.c.bf16 %v7062_v23, %v7062_v23 }
 0x16a   :  { %v7141_v30 = vunpack.c.l.b16 %v1134_v61  ;;  %v1593_v6 = vpack.c.b16 %v1585_v5, %v1584_v44  ;;  %v1103_v5 = vpack.c.bf16 %v7038_v34, %v7038_v34  ;;  %v1581_v46 = vunpack.c.l.b16 %v1122_v51 }
 0x16b   :  { %v1592_v12 = vpack.c.b16 %v1583_v56, %v1582_v8  ;;  %v1414_v49 = vpack.c.b16 %v1404_v14, %v1403_v35  ;;  %v1402_v39 = vunpack.c.l.b16 %v1104_v19  ;;  %v1580_v32 = vunpack.c.l.b16 %v1121_v27 }
 0x16c   :  { %5843 = vmatmul.msk.bf16.vlgmr.msra.gmra.mxu3 %vm174_vm0, %v6627_v11  ;;  %v1766_v45 = vpack.c.b16 %v7141_v30, %v7137_v20  ;;  %v1640_v28 = vsel %vm1239_vm1, %v1593_v6, 0  ;;  %v1401_v34 = vunpack.c.l.b16 %v1103_v5  ;;  %v1120_v8 = vpack.c.bf16 %v7064_v2, %v7064_v2 }
 0x16d   :  { %v7152_v61 = vpop.f32.mrf.mxu2  ;;  %1642 = vmatpush.bf16.xpose.msrb.mxu2 %v1640_v28  ;;  %v1637_v31 = vsel %vm1239_vm1, %v1592_v12, 0  ;;  %v1457_v23 = vsel %vm1239_vm1, %v1414_v49, 0  ;;  %v1119_v35 = vpack.c.bf16 %v7058_v41, %v7058_v41 }
 0x16e   :  { %v1413_v51 = vpack.c.b16 %v1402_v39, %v1401_v34  ;;  %v1579_v19 = vunpack.c.l.b16 %v1120_v8  ;;  %v9942_v8 = vpack.c.b16 %v7042_v53, %v7040_v4 }
 0x16f   :  { %v735_v16 = vpop.f32.mrf.mxu3  ;;  %v1578_v2 = vunpack.c.l.b16 %v1119_v35 }
 0x170   :  { %v7154_v22 = vpop.f32.mrf.mxu0  ;;  %v1135_v44 = vpack.c.bf16 %v735_v16, %v735_v16  ;;  %v1591_v16 = vpack.c.b16 %v1581_v46, %v1580_v32  ;;  %v1454_v41 = vsel %vm1239_vm1, %v1413_v51, 0 }
 0x171   :  { %v7157_v11 = vpop.f32.mrf.mxu1  ;;  %1466 = vmatpush.bf16.xpose.msrb.mxu1 %v1460_v3 }
 0x172   :  { %v7173_v28 = vunpack.c.l.b16 %v1135_v44  ;;  %v1634_v27 = vsel %vm1239_vm1, %v1591_v16, 0  ;;  %v1628_v16 = vsel %vm1239_vm1, %v9942_v8, 0 }
 0x175   :  { %v7168_v6 = vpop.f32.mrf.mxu2  ;;  %1643 = vmatpush.bf16.xpose.msrb.mxu2 %v1637_v31 }
 0x177   :  { %v737_v10 = vpop.f32.mrf.mxu3 }
 0x178   :  { %v7170_v56 = vpop.f32.mrf.mxu0  ;;  %v1136_v62 = vpack.c.bf16 %v737_v10, %v737_v10 }
 0x179   :  { %v7175_v14 = vpop.f32.mrf.mxu1  ;;  %1467 = vmatpush.bf16.xpose.msrb.mxu1 %v1457_v23  ;;  %v9941_v23 = vpack.c.b16 %v7028_v42, %v7026_v43  ;;  %v9943_v43 = vpack.c.b16 %v6996_v50, %v6994_v36 }
 0x17a   :  { %v7179_v3 = vunpack.c.l.b16 %v1136_v62 }
 0x17b   :  { %v1451_v62 = vsel %vm1239_vm1, %v9941_v23, 0  ;;  %v1448_v42 = vsel %vm1239_vm1, %v9943_v43, 0 }
 0x17c   :  { %5844 = vmatmul.msk.bf16.gmra.mxu3 %vm174_vm0, %v6642_v18  ;;  %v1767_v12 = vpack.c.b16 %v7179_v3, %v7173_v28  ;;  %v1590_v18 = vpack.c.b16 %v1579_v19, %v1578_v2 }
 0x17d   :  { %v7188_v49 = vpop.f32.mrf.mxu2  ;;  %1644 = vmatpush.bf16.xpose.msrb.mxu2 %v1634_v27 }
 0x17e   :  { %v1631_v31 = vsel %vm1239_vm1, %v1590_v18, 0  ;;  %v9945_v18 = vpack.c.b16 %v6961_v9, %v6959_v57  ;;  %v9947_v57 = vpack.c.b16 %v6929_v54, %v6927_v38 }
 0x17f   :  { %v7190_v44 = vpop.f32.mrf.mxu3 }
 0x180   :  { %v7192_v5 = vpop.f32.mrf.mxu0  ;;  %v1445_v36 = vsel %vm1239_vm1, %v9945_v18, 0  ;;  %v1442_v9 = vsel %vm1239_vm1, %v9947_v57, 0 }
 0x181   :  { %v7195_v46 = vpop.f32.mrf.mxu1  ;;  %1468 = vmatpush.bf16.xpose.msrb.mxu1 %v1454_v41 }
 0x185   :  { %v7198_v39 = vpop.f32.mrf.mxu2  ;;  %1645 = vmatpush.bf16.xpose.msrb.mxu2 %v1631_v31 }
 0x187   :  { %v7200_v32 = vpop.f32.mrf.mxu3 }
 0x188   :  { %v562_v10 = vpop.f32.mrf.mxu0 }
 0x189   :  { %v7206_v34 = vpop.f32.mrf.mxu1  ;;  %1469 = vmatpush.bf16.xpose.msrb.mxu1 %v1451_v62 }
 0x18c   :  { %5845 = vmatmul.msk.bf16.gmra.mxu3 %vm174_vm0, %v6660_v29  ;;  %v9944_v29 = vpack.c.b16 %v7006_v52, %v7004_v58  ;;  %v9946_v58 = vpack.c.b16 %v6974_v60, %v6972_v24  ;;  %v1091_v24 = vpack.c.bf16 %v562_v10, %v562_v10 }
 0x18d   :  { %v7214_v35 = vpop.f32.mrf.mxu2  ;;  %1646 = vmatpush.bf16.xpose.msrb.mxu2 %v1628_v16 }
 0x18e   :  { %v1625_v4 = vsel %vm1239_vm1, %v9944_v29, 0  ;;  %v1622_v52 = vsel %vm1239_vm1, %v9946_v58, 0  ;;  %v1227_v10 = vunpack.c.l.b16 %v1091_v24 }
 0x18f   :  { %v745_v51 = vpop.f32.mrf.mxu3 }
 0x190   :  { %v564_v19 = vpop.f32.mrf.mxu0 }
 0x191   :  { %v7220_v27 = vpop.f32.mrf.mxu1  ;;  %1470 = vmatpush.bf16.xpose.msrb.mxu1 %v1448_v42 }
 0x195   :  { %v7226_v53 = vpop.f32.mrf.mxu2  ;;  %1647 = vmatpush.bf16.xpose.msrb.mxu2 %v1625_v4 }
 0x197   :  { %v747_v2 = vpop.f32.mrf.mxu3 }
 0x198   :  { %v567_v41 = vpop.f32.mrf.mxu0 }
 0x199   :  { %v7232_v50 = vpop.f32.mrf.mxu1  ;;  %1471 = vmatpush.bf16.xpose.msrb.mxu1 %v1445_v36  ;;  %v1093_v31 = vpack.c.bf16 %v567_v41, %v567_v41  ;;  %v9948_v41 = vpack.c.b16 %v6939_v55, %v6937_v26  ;;  %v1139_v26 = vpack.c.bf16 %v745_v51, %v745_v51  ;;  %v1140_v55 = vpack.c.bf16 %v747_v2, %v747_v2 }
 0x19b   :  { %v1229_v42 = vunpack.c.l.b16 %v1093_v31  ;;  %v1619_v18 = vsel %vm1239_vm1, %v9948_v41, 0  ;;  %v1760_v51 = vunpack.c.l.b16 %v1140_v55 }
 0x19c   :  { %5846 = vmatmul.msk.bf16.gmra.mxu3 %vm174_vm0, %v6694_v59  ;;  %v1092_v59 = vpack.c.bf16 %v564_v19, %v564_v19  ;;  %v9949_v19 = vpack.c.b16 %v6992_v1, %v6990_v7  ;;  %v1089_v1 = vpack.c.bf16 %v7170_v56, %v7170_v56  ;;  %v9950_v7 = vpack.c.b16 %v6700_v0, %v6698_v63 }
 0x19d   :  { %v7240_v23 = vpop.f32.mrf.mxu2  ;;  %1648 = vmatpush.bf16.xpose.msrb.mxu2 %v1622_v52  ;;  %v1137_v63 = vpack.c.bf16 %v7190_v44, %v7190_v44  ;;  %v1138_v0 = vpack.c.bf16 %v7200_v32, %v7200_v32  ;;  %v9951_v44 = vpack.c.b16 %v7024_v13, %v7022_v48  ;;  %v9952_v48 = vpack.c.b16 %v6740_v37, %v6738_v25  ;;  %v9954_v37 = vld [vmem:[#allocation66_spill] sm:$0xff] }
 0x19e   :  { %v1228_v36 = vunpack.c.l.b16 %v1092_v59  ;;  %v1759_v59 = vunpack.c.l.b16 %v1139_v26  ;;  %v1225_v56 = vunpack.c.l.b16 %v1089_v1  ;;  %v1086_v26 = vpack.c.bf16 %v7132_v17, %v7132_v17 }
 0x19f   :  { %v750_v62 = vpop.f32.mrf.mxu3 }
 0x1a0   :  { %v569_v8 = vpop.f32.mrf.mxu0  ;;  %v1141_v29 = vpack.c.bf16 %v750_v62, %v750_v62  ;;  %v1237_v57 = vpack.c.b16 %v1228_v36, %v1227_v10  ;;  %v1757_v36 = vunpack.c.l.b16 %v1137_v63  ;;  %v9956_v63 = vld [vmem:[#allocation4_spill] sm:$0xff] }
 0x1a1   :  { %v1094_v16 = vpack.c.bf16 %v569_v8, %v569_v8  ;;  %v7246_v43 = vpop.f32.mrf.mxu1  ;;  %1472 = vmatpush.bf16.xpose.msrb.mxu1 %v1442_v9  ;;  %v1090_v9 = vpack.c.bf16 %v7192_v5, %v7192_v5 }
 0x1a2   :  { %v1761_v52 = vunpack.c.l.b16 %v1141_v29  ;;  %v1283_v5 = vsel %vm1239_vm1, %v1237_v57, 0  ;;  %v1769_v29 = vpack.c.b16 %v1760_v51, %v1759_v59  ;;  %v1083_v59 = vpack.c.bf16 %v9954_v37, %v9954_v37 }
 0x1a3   :  { %v1230_v60 = vunpack.c.l.b16 %v1094_v16 }
 0x1a5   :  { %v1238_v4 = vpack.c.b16 %v1230_v60, %v1229_v42  ;;  %v7252_v58 = vpop.f32.mrf.mxu2  ;;  %1649 = vmatpush.bf16.xpose.msrb.mxu2 %v1619_v18  ;;  %v1226_v60 = vunpack.c.l.b16 %v1090_v9  ;;  %v1087_v18 = vpack.c.bf16 %v7134_v40, %v7134_v40  ;;  %v1222_v9 = vunpack.c.l.b16 %v1086_v26 }
 0x1a7   :  { %v1286_v54 = vsel %vm1239_vm1, %v1238_v4, 0  ;;  %v752_v38 = vpop.f32.mrf.mxu3  ;;  %v1088_v4 = vpack.c.bf16 %v7154_v22, %v7154_v22  ;;  %v1236_v41 = vpack.c.b16 %v1226_v60, %v1225_v56  ;;  %v1223_v40 = vunpack.c.l.b16 %v1087_v18  ;;  %v9955_v56 = vld [vmem:[#allocation5_spill] sm:$0xff] }
 0x1a8   :  { %5859 = vmatmul.msk.bf16.vlgmr.msrb.gmra.mxu1 %vm1239_vm1, %v9949_v19  ;;  %1288 = vmatpush.bf16.xpose.msra.mxu0 %v1286_v54  ;;  %v1142_v31 = vpack.c.bf16 %v752_v38, %v752_v38  ;;  %v1758_v54 = vunpack.c.l.b16 %v1138_v0  ;;  %v1814_v19 = vsel %vm1239_vm1, %v1769_v29, 0  ;;  %v9957_v0 = vpack.c.b16 %v9955_v56, %v9956_v63  ;;  %v9969_v56 = vld [vmem:[#allocation11_spill] sm:$0xff]  ;;  %v9970_v63 = vld [vmem:[#allocation10_spill] sm:$0xff] }
 0x1a9   :  { %v7259_v62 = vpop.f32.mrf.mxu1  ;;  %v1224_v10 = vunpack.c.l.b16 %v1088_v4  ;;  %v1280_v22 = vsel %vm1239_vm1, %v1236_v41, 0  ;;  %v7334_v4 = vpop.f32.mrf.mxu0  ;;  %v1219_v18 = vunpack.c.l.b16 %v1083_v59 }
 0x1aa   :  { %v1762_v8 = vunpack.c.l.b16 %v1142_v31  ;;  %v1768_v31 = vpack.c.b16 %v1758_v54, %v1757_v36  ;;  %v9958_v36 = vld [vmem:[#allocation65_spill] sm:$0xff]  ;;  %v9960_v54 = vld [vmem:[#allocation62_spill] sm:$0xff] }
 0x1ab   :  { %v1235_v55 = vpack.c.b16 %v1224_v10, %v1223_v40  ;;  %v1082_v28 = vpack.c.bf16 %v9958_v36, %v9958_v36  ;;  %v9961_v10 = vld [vmem:[#allocation20_spill] sm:$0xff] }
 0x1ac   :  { %v1770_v16 = vpack.c.b16 %v1762_v8, %v1761_v52  ;;  %5847 = vmatmul.msk.bf16.gmra.mxu3 %vm174_vm0, %v6734_v33  ;;  %5867 = vmatmul.msk.bf16.vlgmr.msrb.gmra.mxu2 %vm1239_vm1, %v9950_v7  ;;  %v1085_v8 = vpack.c.bf16 %v7116_v15, %v7116_v15  ;;  %v1811_v57 = vsel %vm1239_vm1, %v1768_v31, 0  ;;  %v9953_v15 = vld [vmem:[#allocation69_spill] sm:$0xff]  ;;  %v1805_v31 = vsel %vm1239_vm1, %v1766_v45, 0  ;;  %v9966_v45 = vld [vmem:[#allocation71_spill] sm:$0xff] }
 0x1ad   :  { %v7271_v2 = vpop.f32.mrf.mxu2  ;;  %v1277_v17 = vsel %vm1239_vm1, %v1235_v55, 0  ;;  %v1084_v7 = vpack.c.bf16 %v9953_v15, %v9953_v15  ;;  %v1218_v26 = vunpack.c.l.b16 %v1082_v28 }
 0x1ae   :  { %v1817_v42 = vsel %vm1239_vm1, %v1770_v16, 0 }
 0x1af   :  { %v7275_v24 = vpop.f32.mrf.mxu3  ;;  %1819 = vmatpush.bf16.xpose.msrb.mxu3 %v1817_v42  ;;  %v1808_v42 = vsel %vm1239_vm1, %v1767_v12, 0  ;;  %v9959_v12 = vld [vmem:[#allocation26_spill] sm:$0xff] }
 0x1b0   :  { %1289 = vmatpush.bf16.xpose.msra.mxu0 %v1283_v5  ;;  %v1220_v5 = vunpack.c.l.b16 %v1084_v7  ;;  %v9965_v7 = vld [vmem:[#allocation58_spill] sm:$0xff] }
 0x1b1   :  { %v7277_v33 = vpop.f32.mrf.mxu1  ;;  %v1079_v20 = vpack.c.bf16 %v9965_v7, %v9965_v7 }
 0x1b2   :  { %v1233_v3 = vpack.c.b16 %v1220_v5, %v1219_v18 }
 0x1b3   :  { %v1215_v28 = vunpack.c.l.b16 %v1079_v20 }
 0x1b5   :  { %v7287_v38 = vpop.f32.mrf.mxu2 }
 0x1b7   :  { %v7290_v52 = vpop.f32.mrf.mxu3  ;;  %1820 = vmatpush.bf16.xpose.msrb.mxu3 %v1814_v19  ;;  %v1081_v19 = vpack.c.bf16 %v9960_v54, %v9960_v54 }
 0x1b8   :  { %5860 = vmatmul.msk.bf16.gmra.mxu1 %vm1239_vm1, %v9951_v44  ;;  %1290 = vmatpush.bf16.xpose.msra.mxu0 %v1280_v22  ;;  %v9962_v44 = vld [vmem:[#allocation19_spill] sm:$0xff] }
 0x1b9   :  { %v7297_v32 = vpop.f32.mrf.mxu1  ;;  %v9963_v22 = vpack.c.b16 %v9961_v10, %v9962_v44  ;;  %v9974_v10 = vld [vmem:[#allocation28_spill] sm:$0xff] }
 0x1bc   :  { %5848 = vmatmul.msk.bf16.gmra.mxu3 %vm174_vm0, %v6774_v21  ;;  %5868 = vmatmul.msk.bf16.gmra.mxu2 %vm1239_vm1, %v9952_v48  ;;  %v1221_v21 = vunpack.c.l.b16 %v1085_v8  ;;  %v1271_v8 = vsel %vm1239_vm1, %v1233_v3, 0  ;;  %v7355_v48 = vpop.f32.mrf.mxu0 }
 0x1bd   :  { %v7309_v13 = vpop.f32.mrf.mxu2 }
 0x1be   :  { %v1234_v25 = vpack.c.b16 %v1222_v9, %v1221_v21  ;;  %v1217_v9 = vunpack.c.l.b16 %v1081_v19  ;;  %v9973_v19 = vld [vmem:[#allocation29_spill] sm:$0xff] }
 0x1bf   :  { %v7312_v16 = vpop.f32.mrf.mxu3  ;;  %1821 = vmatpush.bf16.xpose.msrb.mxu3 %v1811_v57  ;;  %v9975_v44 = vpack.c.b16 %v9973_v19, %v9974_v10 }
 0x1c0   :  { %1291 = vmatpush.bf16.xpose.msra.mxu0 %v1277_v17  ;;  %v1274_v29 = vsel %vm1239_vm1, %v1234_v25, 0  ;;  %v9964_v17 = vld [vmem:[#allocation61_spill] sm:$0xff]  ;;  %v1232_v15 = vpack.c.b16 %v1218_v26, %v1217_v9  ;;  %v9967_v25 = vld [vmem:[#allocation70_spill] sm:$0xff]  ;;  %v9977_v26 = vld [vmem:[#allocation67_spill] sm:$0xff] }
 0x1c1   :  { %v7315_v1 = vpop.f32.mrf.mxu1  ;;  %v1080_v21 = vpack.c.bf16 %v9964_v17, %v9964_v17  ;;  %v9968_v37 = vpack.c.b16 %v9966_v45, %v9967_v25 }
 0x1c3   :  { %v1802_v59 = vsel %vm1239_vm1, %v9968_v37, 0 }
 0x1c4   :  { %v7372_v18 = vpop.f32.mrf.mxu0 }
 0x1c5   :  { %v7321_v51 = vpop.f32.mrf.mxu2 }
 0x1c7   :  { %v7327_v60 = vpop.f32.mrf.mxu3  ;;  %1822 = vmatpush.bf16.xpose.msrb.mxu3 %v1808_v42  ;;  %v1216_v42 = vunpack.c.l.b16 %v1080_v21 }
 0x1c8   :  { %5861 = vmatmul.msk.bf16.gmra.mxu1 %vm1239_vm1, %v9957_v0  ;;  %1292 = vmatpush.bf16.xpose.msra.mxu0 %v1274_v29  ;;  %v9971_v0 = vpack.c.b16 %v9969_v56, %v9970_v63  ;;  %v1268_v29 = vsel %vm1239_vm1, %v1232_v15, 0  ;;  %v2535_v63 = vpack.c.bf16 %v7315_v1, %v7315_v1  ;;  %v9982_v1 = vld [vmem:[#allocation3_spill] sm:$0xff] }
 0x1c9   :  { %v883_v41 = vpop.f32.mrf.mxu1  ;;  %v1231_v3 = vpack.c.b16 %v1216_v42, %v1215_v28 }
 0x1ca   :  { %v2536_v20 = vpack.c.bf16 %v883_v41, %v883_v41 }
 0x1cb   :  { %v1265_v21 = vsel %vm1239_vm1, %v1231_v3, 0 }
 0x1cc   :  { %5849 = vmatmul.msk.bf16.gmra.mxu3 %vm174_vm0, %v9959_v12  ;;  %5869 = vmatmul.msk.bf16.gmra.mxu2 %vm1239_vm1, %v9963_v22  ;;  %v9972_v12 = vld [vmem:[#allocation35_spill] sm:$0xff]  ;;  %v7385_v15 = vpop.f32.mrf.mxu0 }
 0x1cd   :  { %v7346_v40 = vpop.f32.mrf.mxu2 }
 0x1ce   :  { %v2552_v3 = vpack.c.bf16 %v7346_v40, %v7346_v40  ;;  %v2550_v40 = vpack.c.bf16 %v7309_v13, %v7309_v13  ;;  %v2551_v13 = vpack.c.bf16 %v7321_v51, %v7321_v51 }
 0x1cf   :  { %v7352_v55 = vpop.f32.mrf.mxu3  ;;  %1823 = vmatpush.bf16.xpose.msrb.mxu3 %v1805_v31  ;;  %v9976_v31 = vld [vmem:[#allocation68_spill] sm:$0xff] }
 0x1d0   :  { %1293 = vmatpush.bf16.xpose.msra.mxu0 %v1271_v8  ;;  %v9978_v8 = vpack.c.b16 %v9976_v31, %v9977_v26  ;;  %v9983_v26 = vld [vmem:[#allocation2_spill] sm:$0xff] }
 0x1d1   :  { %v885_v57 = vpop.f32.mrf.mxu1 }
 0x1d2   :  { %v1799_v9 = vsel %vm1239_vm1, %v9978_v8, 0  ;;  %v2537_v45 = vpack.c.bf16 %v885_v57, %v885_v57  ;;  %v9979_v57 = vld [vmem:[#allocation64_spill] sm:$0xff]  ;;  %v9984_v8 = vpack.c.b16 %v9982_v1, %v9983_v26  ;;  %v2531_v1 = vpack.c.bf16 %v7246_v43, %v7246_v43 }
 0x1d3   :  { %v2516_v43 = vpack.c.bf16 %v7275_v24, %v7275_v24 }
 0x1d5   :  { %v946_v30 = vpop.f32.mrf.mxu2 }
 0x1d7   :  { %v7365_v5 = vpop.f32.mrf.mxu3  ;;  %1824 = vmatpush.bf16.xpose.msrb.mxu3 %v1802_v59  ;;  %v2534_v59 = vpack.c.bf16 %v7297_v32, %v7297_v32 }
 0x1d8   :  { %5862 = vmatmul.msk.bf16.gmra.mxu1 %vm1239_vm1, %v9971_v0  ;;  %1294 = vmatpush.bf16.xpose.msra.mxu0 %v1268_v29  ;;  %v2793_v29 = vunpack.c.l.b16 %v2536_v20  ;;  %v9986_v20 = vld [vmem:[#allocation16_spill] sm:$0xff] }
 0x1d9   :  { %v888_v36 = vpop.f32.mrf.mxu1  ;;  %v2791_v32 = vunpack.c.l.b16 %v2534_v59 }
 0x1da   :  { %v2538_v54 = vpack.c.bf16 %v888_v36, %v888_v36  ;;  %v2794_v36 = vunpack.c.l.b16 %v2537_v45 }
 0x1dc   :  { %5850 = vmatmul.msk.bf16.gmra.mxu3 %vm174_vm0, %v9972_v12  ;;  %5870 = vmatmul.msk.bf16.gmra.mxu2 %vm1239_vm1, %v9975_v44  ;;  %v2795_v25 = vunpack.c.l.b16 %v2538_v54  ;;  %v2553_v12 = vpack.c.bf16 %v946_v30, %v946_v30  ;;  %v9980_v54 = vld [vmem:[#allocation63_spill] sm:$0xff]  ;;  %v2792_v30 = vunpack.c.l.b16 %v2535_v63 }
 0x1dd   :  { %v949_v22 = vpop.f32.mrf.mxu2  ;;  %v9981_v19 = vpack.c.b16 %v9979_v57, %v9980_v54  ;;  %v2533_v57 = vpack.c.bf16 %v7277_v33, %v7277_v33  ;;  %v9991_v33 = vld [vmem:[#allocation21_spill] sm:$0xff] }
 0x1de   :  { %v2554_v42 = vpack.c.bf16 %v949_v22, %v949_v22  ;;  %v2939_v63 = vunpack.c.l.b16 %v2553_v12  ;;  %v2936_v12 = vunpack.c.l.b16 %v2550_v40 }
 0x1df   :  { %v827_v17 = vpop.f32.mrf.mxu3  ;;  %1825 = vmatpush.bf16.xpose.msrb.mxu3 %v1799_v9  ;;  %v1796_v10 = vsel %vm1239_vm1, %v9981_v19, 0  ;;  %v7401_v9 = vpop.f32.mrf.mxu0 }
 0x1e0   :  { %1295 = vmatpush.bf16.xpose.msra.mxu0 %v1265_v21  ;;  %v2522_v0 = vpack.c.bf16 %v827_v17, %v827_v17  ;;  %v2940_v44 = vunpack.c.l.b16 %v2554_v42  ;;  %v2803_v42 = vpack.c.b16 %v2794_v36, %v2793_v29  ;;  %v9988_v29 = vld [vmem:[#allocation38_spill] sm:$0xff]  ;;  %v9989_v36 = vld [vmem:[#allocation37_spill] sm:$0xff] }
 0x1e1   :  { %v890_v7 = vpop.f32.mrf.mxu1  ;;  %v9990_v51 = vpack.c.b16 %v9988_v29, %v9989_v36 }
 0x1e2   :  { %v2539_v37 = vpack.c.bf16 %v890_v7, %v890_v7  ;;  %v2650_v17 = vunpack.c.l.b16 %v2522_v0  ;;  %v9985_v7 = vld [vmem:[#allocation17_spill] sm:$0xff] }
 0x1e3   :  { %v9987_v45 = vpack.c.b16 %v9985_v7, %v9986_v20  ;;  %v2517_v7 = vpack.c.bf16 %v7290_v52, %v7290_v52  ;;  %v2526_v52 = vpack.c.bf16 %v7175_v14, %v7175_v14  ;;  %v9995_v14 = vld [vmem:[#allocation8_spill] sm:$0xff] }
 0x1e4   :  { %v2796_v56 = vunpack.c.l.b16 %v2539_v37  ;;  %v2521_v37 = vpack.c.bf16 %v7365_v5, %v7365_v5  ;;  %v2518_v5 = vpack.c.bf16 %v7312_v16, %v7312_v16 }
 0x1e5   :  { %v951_v41 = vpop.f32.mrf.mxu2 }
 0x1e6   :  { %v2804_v28 = vpack.c.b16 %v2796_v56, %v2795_v25  ;;  %v2555_v31 = vpack.c.bf16 %v951_v41, %v951_v41  ;;  %v2520_v25 = vpack.c.bf16 %v7352_v55, %v7352_v55  ;;  %v2938_v56 = vunpack.c.l.b16 %v2552_v3 }
 0x1e7   :  { %v829_v22 = vpop.f32.mrf.mxu3  ;;  %1826 = vmatpush.bf16.xpose.msrb.mxu3 %v1796_v10  ;;  %5851 = vmatmul.msk.bf16.vlgmr.msra.gmra.mxu0 %vm1239_vm1, %v9984_v8  ;;  %v2532_v41 = vpack.c.bf16 %v7259_v62, %v7259_v62  ;;  %v2802_v3 = vpack.c.b16 %v2792_v30, %v2791_v32  ;;  %v2519_v62 = vpack.c.bf16 %v7327_v60, %v7327_v60  ;;  %v2937_v10 = vunpack.c.l.b16 %v2551_v13  ;;  %v7435_v40 = vpop.f32.mrf.mxu0 }
 0x1e8   :  { %v2523_v21 = vpack.c.bf16 %v829_v22, %v829_v22  ;;  %5863 = vmatmul.msk.bf16.gmra.mxu1 %vm1239_vm1, %v9987_v45  ;;  %v2941_v59 = vunpack.c.l.b16 %v2555_v31  ;;  %v2648_v19 = vunpack.c.l.b16 %v2520_v25  ;;  %v2948_v16 = vpack.c.b16 %v2939_v63, %v2938_v56 }
 0x1e9   :  { %2813 = vmatpush.bf16.msra.mxu1 %v2804_v28  ;;  %v2649_v28 = vunpack.c.l.b16 %v2521_v37  ;;  %v2530_v31 = vpack.c.bf16 %v7232_v50, %v7232_v50  ;;  %v2789_v26 = vunpack.c.l.b16 %v2532_v41  ;;  %v2790_v32 = vunpack.c.l.b16 %v2533_v57 }
 0x1ea   :  { %v2651_v0 = vunpack.c.l.b16 %v2523_v21  ;;  %v2949_v54 = vpack.c.b16 %v2941_v59, %v2940_v44  ;;  %v9992_v44 = vld [vmem:[#allocation18_spill] sm:$0xff]  ;;  %v2548_v60 = vpack.c.bf16 %v7271_v2, %v7271_v2  ;;  %v2549_v30 = vpack.c.bf16 %v7287_v38, %v7287_v38 }
 0x1eb   :  { %v9993_v22 = vpack.c.b16 %v9991_v33, %v9992_v44  ;;  %v2529_v50 = vpack.c.bf16 %v7220_v27, %v7220_v27  ;;  %v2658_v21 = vpack.c.b16 %v2649_v28, %v2648_v19  ;;  %v2646_v20 = vunpack.c.l.b16 %v2518_v5  ;;  %v9994_v5 = vld [vmem:[#allocation9_spill] sm:$0xff] }
 0x1ec   :  { %v2659_v55 = vpack.c.b16 %v2651_v0, %v2650_v17  ;;  %5871 = vmatmul.msk.bf16.gmra.mxu2 %vm1239_vm1, %v9990_v51  ;;  %v2528_v17 = vpack.c.bf16 %v7206_v34, %v7206_v34  ;;  %v2647_v45 = vunpack.c.l.b16 %v2519_v62  ;;  %v2947_v2 = vpack.c.b16 %v2937_v10, %v2936_v12  ;;  %v9997_v51 = vld [vmem:[#allocation25_spill] sm:$0xff] }
 0x1ed   :  { %2814 = vmatpush.bf16.msra.mxu1 %v2803_v42  ;;  %2958 = vmatpush.bf16.msra.mxu2 %v2949_v54  ;;  %v2787_v25 = vunpack.c.l.b16 %v2530_v31  ;;  %v2546_v38 = vpack.c.bf16 %v7240_v23, %v7240_v23  ;;  %v2788_v34 = vunpack.c.l.b16 %v2531_v1  ;;  %v2801_v37 = vpack.c.b16 %v2790_v32, %v2789_v26 }
 0x1ee   :  { %5875 = vmatmul.msk.bf16.vlgmr.msrb.gmra.mxu3 %vm1239_vm1, %v9993_v22  ;;  %2668 = vmatpush.bf16.msrb.mxu0 %v2659_v55  ;;  %v2547_v27 = vpack.c.bf16 %v7252_v58, %v7252_v58  ;;  %v2934_v24 = vunpack.c.l.b16 %v2548_v60  ;;  %v2935_v59 = vunpack.c.l.b16 %v2549_v30  ;;  %v2527_v13 = vpack.c.bf16 %v7195_v46, %v7195_v46  ;;  %v10000_v60 = vld [vmem:[#allocation46_spill] sm:$0xff]  ;;  %v10001_v30 = vld [vmem:[#allocation45_spill] sm:$0xff] }
 0x1ef   :  { %v975_v8 = vpop.f32.mrf.mxu3  ;;  %v2785_v56 = vunpack.c.l.b16 %v2528_v17  ;;  %v2544_v23 = vpack.c.bf16 %v7214_v35, %v7214_v35  ;;  %v2644_v63 = vunpack.c.l.b16 %v2516_v43  ;;  %v2645_v0 = vunpack.c.l.b16 %v2517_v7  ;;  %v807_v28 = vpop.f32.mrf.mxu0  ;;  %v10003_v43 = vld [vmem:[#allocation30_spill] sm:$0xff] }
 0x1f0   :  { %v2556_v42 = vpack.c.bf16 %v975_v8, %v975_v8  ;;  %v2657_v41 = vpack.c.b16 %v2647_v45, %v2646_v20  ;;  %v2786_v57 = vunpack.c.l.b16 %v2529_v50  ;;  %v2545_v58 = vpack.c.bf16 %v7226_v53, %v7226_v53 }
 0x1f1   :  { %2815 = vmatpush.bf16.msra.mxu1 %v2802_v3  ;;  %2959 = vmatpush.bf16.msra.mxu2 %v2948_v16  ;;  %v2932_v54 = vunpack.c.l.b16 %v2546_v38  ;;  %v9996_v19 = vpack.c.b16 %v9994_v5, %v9995_v14  ;;  %v2800_v46 = vpack.c.b16 %v2788_v34, %v2787_v25  ;;  %v2933_v29 = vunpack.c.l.b16 %v2547_v27  ;;  %v9998_v3 = vld [vmem:[#allocation24_spill] sm:$0xff]  ;;  %v10007_v5 = vld [vmem:[#allocation14_spill] sm:$0xff] }
 0x1f2   :  { %2669 = vmatpush.bf16.msrb.mxu0 %v2658_v21  ;;  %v7465_v36 = vunpack.c.l.b16 %v2556_v42  ;;  %v9999_v12 = vpack.c.b16 %v9997_v51, %v9998_v3  ;;  %v2946_v62 = vpack.c.b16 %v2935_v59, %v2934_v24  ;;  %v2524_v53 = vpack.c.bf16 %v7139_v47, %v7139_v47 }
 0x1f3   :  { %v2525_v10 = vpack.c.bf16 %v7157_v11, %v7157_v11  ;;  %v2783_v33 = vunpack.c.l.b16 %v2526_v52  ;;  %v2656_v22 = vpack.c.b16 %v2645_v0, %v2644_v63  ;;  %v2542_v16 = vpack.c.bf16 %v7188_v49, %v7188_v49 }
 0x1f4   :  { %v2784_v31 = vunpack.c.l.b16 %v2527_v13  ;;  %v2543_v1 = vpack.c.bf16 %v7198_v39, %v7198_v39  ;;  %v2799_v26 = vpack.c.b16 %v2786_v57, %v2785_v56  ;;  %v2930_v32 = vunpack.c.l.b16 %v2544_v23  ;;  %v10004_v39 = vld [vmem:[#allocation27_spill] sm:$0xff] }
 0x1f5   :  { %2816 = vmatpush.bf16.msra.mxu1 %v2801_v37  ;;  %2960 = vmatpush.bf16.msra.mxu2 %v2947_v2  ;;  %v2931_v8 = vunpack.c.l.b16 %v2545_v58  ;;  %v2945_v47 = vpack.c.b16 %v2933_v29, %v2932_v54  ;;  %v10002_v17 = vpack.c.b16 %v10000_v60, %v10001_v30  ;;  %v2781_v50 = vunpack.c.l.b16 %v2524_v53  ;;  %v10018_v30 = vld [vmem:[#allocation23_spill] sm:$0xff] }
 0x1f6   :  { %2670 = vmatpush.bf16.msrb.mxu0 %v2657_v41  ;;  %v2540_v49 = vpack.c.bf16 %v7152_v61, %v7152_v61  ;;  %v10005_v21 = vpack.c.b16 %v10003_v43, %v10004_v39  ;;  %v2782_v7 = vunpack.c.l.b16 %v2525_v10  ;;  %v2541_v20 = vpack.c.bf16 %v7168_v6, %v7168_v6  ;;  %v10021_v39 = vld [vmem:[#allocation43_spill] sm:$0xff] }
 0x1f7   :  { %v977_v55 = vpop.f32.mrf.mxu3  ;;  %5852 = vmatmul.msk.bf16.gmra.mxu0 %vm1239_vm1, %v9996_v19  ;;  %v2928_v45 = vunpack.c.l.b16 %v2542_v16  ;;  %v2798_v25 = vpack.c.b16 %v2784_v31, %v2783_v33  ;;  %v809_v38 = vpop.f32.mrf.mxu0  ;;  %v2929_v34 = vunpack.c.l.b16 %v2543_v1  ;;  %v2944_v37 = vpack.c.b16 %v2931_v8, %v2930_v32  ;;  %v10013_v31 = vld [vmem:[#allocation6_spill] sm:$0xff] }
 0x1f8   :  { %v2557_v35 = vpack.c.bf16 %v977_v55, %v977_v55  ;;  %5864 = vmatmul.msk.bf16.gmra.mxu1 %vm1239_vm1, %v9999_v12  ;;  %v2514_v27 = vpack.c.bf16 %v807_v28, %v807_v28  ;;  %v2515_v24 = vpack.c.bf16 %v809_v38, %v809_v38  ;;  %v2926_v42 = vunpack.c.l.b16 %v2540_v49  ;;  %v10006_v55 = vld [vmem:[#allocation15_spill] sm:$0xff]  ;;  %v10010_v28 = vld [vmem:[#allocation33_spill] sm:$0xff] }
 0x1f9   :  { %2817 = vmatpush.bf16.msra.mxu1 %v2800_v46  ;;  %2961 = vmatpush.bf16.msra.mxu2 %v2946_v62  ;;  %v2927_v52 = vunpack.c.l.b16 %v2541_v20  ;;  %v2797_v56 = vpack.c.b16 %v2782_v7, %v2781_v50  ;;  %v2943_v23 = vpack.c.b16 %v2929_v34, %v2928_v45  ;;  %v2512_v6 = vpack.c.bf16 %v7401_v9, %v7401_v9  ;;  %v10027_v34 = vld [vmem:[#allocation47_spill] sm:$0xff] }
 0x1fa   :  { %v7475_v44 = vunpack.c.l.b16 %v2557_v35  ;;  %2671 = vmatpush.bf16.msrb.mxu0 %v2656_v22  ;;  %v2642_v61 = vunpack.c.l.b16 %v2514_v27  ;;  %v2643_v59 = vunpack.c.l.b16 %v2515_v24  ;;  %v2513_v63 = vpack.c.bf16 %v7435_v40, %v7435_v40  ;;  %v10009_v40 = vld [vmem:[#allocation34_spill] sm:$0xff] }
 0x1fb   :  { %v2640_v41 = vunpack.c.l.b16 %v2512_v6  ;;  %v10008_v14 = vpack.c.b16 %v10006_v55, %v10007_v5  ;;  %v2942_v19 = vpack.c.b16 %v2927_v52, %v2926_v42  ;;  %v2508_v9 = vpack.c.bf16 %v7334_v4, %v7334_v4 }
 0x1fc   :  { %v3087_v11 = vpack.c.b16 %v7475_v44, %v7465_v36  ;;  %5872 = vmatmul.msk.bf16.gmra.mxu2 %vm1239_vm1, %v10002_v17  ;;  %v2655_v0 = vpack.c.b16 %v2643_v59, %v2642_v61  ;;  %v2641_v57 = vunpack.c.l.b16 %v2513_v63  ;;  %v10011_v29 = vpack.c.b16 %v10009_v40, %v10010_v28  ;;  %v10019_v17 = vld [vmem:[#allocation22_spill] sm:$0xff] }
 0x1fd   :  { %2818 = vmatpush.bf16.msra.mxu1 %v2799_v26  ;;  %2962 = vmatpush.bf16.msra.mxu2 %v2945_v47  ;;  %v2510_v35 = vpack.c.bf16 %v7372_v18, %v7372_v18  ;;  %v2511_v51 = vpack.c.bf16 %v7385_v15, %v7385_v15  ;;  %v2509_v62 = vpack.c.bf16 %v7355_v48, %v7355_v48  ;;  %v2636_v10 = vunpack.c.l.b16 %v2508_v9  ;;  %v10012_v18 = vld [vmem:[#allocation7_spill] sm:$0xff]  ;;  %v10016_v26 = vld [vmem:[#allocation36_spill] sm:$0xff]  ;;  %v7554_v61 = vld [vmem:[%s9773_s2] sm:$0xff] }
 0x1fe   :  { %5876 = vmatmul.msk.bf16.gmra.mxu3 %vm1239_vm1, %v10005_v21  ;;  %2672 = vmatpush.bf16.msrb.mxu0 %v2655_v0  ;;  %v2654_v3 = vpack.c.b16 %v2641_v57, %v2640_v41  ;;  %v10014_v1 = vpack.c.b16 %v10012_v18, %v10013_v31  ;;  %v10015_v15 = vld [vmem:[#allocation39_spill] sm:$0xff]  ;;  %v10020_v50 = vpack.c.b16 %v10018_v30, %v10019_v17  ;;  %v10022_v21 = vld [vmem:[#allocation42_spill] sm:$0xff] }
 0x1ff   :  { %v980_v2 = vpop.f32.mrf.mxu3  ;;  %v2638_v4 = vunpack.c.l.b16 %v2510_v35  ;;  %v2639_v53 = vunpack.c.l.b16 %v2511_v51  ;;  %v2637_v33 = vunpack.c.l.b16 %v2509_v62  ;;  %v10017_v32 = vpack.c.b16 %v10015_v15, %v10016_v26  ;;  %v7571_v57 = vld [vmem:[%s9773_s2 + $0x8] sm:$0xff]  ;;  %v10036_v62 = vld [vmem:[#allocation41_spill] sm:$0xff]  ;;  %v10040_v31 = vld [vmem:[#allocation54_spill] sm:$0xff] }
 0x200   :  { %v2558_v13 = vpack.c.bf16 %v980_v2, %v980_v2  ;;  %v10023_v7 = vpack.c.b16 %v10021_v39, %v10022_v21  ;;  %v10024_v2 = vld [vmem:[#allocation13_spill] sm:$0xff]  ;;  %v10039_v18 = vld [vmem:[#allocation55_spill] sm:$0xff] }
 0x201   :  { %2819 = vmatpush.bf16.msra.mxu1 %v2798_v25  ;;  %2963 = vmatpush.bf16.msra.mxu2 %v2944_v37  ;;  %v2653_v22 = vpack.c.b16 %v2639_v53, %v2638_v4  ;;  %v2652_v8 = vpack.c.b16 %v2637_v33, %v2636_v10  ;;  %v10025_v25 = vld [vmem:[#allocation12_spill] sm:$0xff]  ;;  %v7615_v15 = vld [vmem:[%s9773_s2 + $0x18] sm:$0xff] }
 0x202   :  { %v7499_v58 = vunpack.c.l.b16 %v2558_v13  ;;  %2673 = vmatpush.bf16.msrb.mxu0 %v2654_v3  ;;  %v10026_v38 = vpack.c.b16 %v10024_v2, %v10025_v25  ;;  %v10028_v37 = vld [vmem:[#allocation44_spill] sm:$0xff]  ;;  %v7646_v2 = vld [vmem:[%s9773_s2 + $0x28] sm:$0xff] }
 0x203   :  { %v10029_v27 = vpack.c.b16 %v10027_v34, %v10028_v37  ;;  %v10037_v4 = vld [vmem:[#allocation40_spill] sm:$0xff]  ;;  %v10045_v34 = vld [vmem:[#allocation57_spill] sm:$0xff] }
 0x204   :  { %v10038_v53 = vpack.c.b16 %v10036_v62, %v10037_v4  ;;  %v10046_v37 = vld [vmem:[#allocation56_spill] sm:$0xff]  ;;  %v10052_v62 = vld [vmem:[#allocation59_spill] sm:$0xff] }
 0x205   :  { %2820 = vmatpush.bf16.msra.mxu1 %v2797_v56  ;;  %2964 = vmatpush.bf16.msra.mxu2 %v2943_v23  ;;  %v10030_v56 = vld [vmem:[#allocation32_spill] sm:$0xff]  ;;  %v10031_v23 = vld [vmem:[#allocation31_spill] sm:$0xff] }
 0x206   :  { %2674 = vmatpush.bf16.msrb.mxu0 %v2653_v22  ;;  %v10032_v6 = vpack.c.b16 %v10030_v56, %v10031_v23  ;;  %v7664_v56 = vld [vmem:[%s9773_s2 + $0x30] sm:$0xff] }
 0x207   :  { %v982_v54 = vpop.f32.mrf.mxu3  ;;  %5853 = vmatmul.msk.bf16.gmra.mxu0 %vm1239_vm1, %v10008_v14  ;;  %v10033_v14 = vld [vmem:[#allocation51_spill] sm:$0xff] }
 0x208   :  { %v2559_v46 = vpack.c.bf16 %v982_v54, %v982_v54  ;;  %5865 = vmatmul.msk.bf16.gmra.mxu1 %vm1239_vm1, %v10011_v29  ;;  %v7591_v29 = vld [vmem:[%s9773_s2 + $0x10] sm:$0xff] }
 0x209   :  { %2965 = vmatpush.bf16.msra.mxu2 %v2942_v19  ;;  %v10034_v19 = vld [vmem:[#allocation50_spill] sm:$0xff] }
 0x20a   :  { %v7515_v12 = vunpack.c.l.b16 %v2559_v46  ;;  %2675 = vmatpush.bf16.msrb.mxu0 %v2652_v8  ;;  %v10035_v9 = vpack.c.b16 %v10033_v14, %v10034_v19 }
 0x20c   :  { %v3088_v16 = vpack.c.b16 %v7515_v12, %v7499_v58  ;;  %5873 = vmatmul.msk.bf16.gmra.mxu2 %vm1239_vm1, %v10014_v1  ;;  %v10041_v1 = vpack.c.b16 %v10039_v18, %v10040_v31 }
 0x20e   :  { %5877 = vmatmul.msk.bf16.gmra.mxu3 %vm1239_vm1, %v10017_v32 }
 0x20f   :  { %v985_v48 = vpop.f32.mrf.mxu3 }
 0x210   :  { %v2560_v47 = vpack.c.bf16 %v985_v48, %v985_v48 }
 0x212   :  { %v7533_v49 = vunpack.c.l.b16 %v2560_v47  ;;  %v7628_v47 = vld [vmem:[%s9773_s2 + $0x20] sm:$0xff] }
 0x217   :  { %v987_v60 = vpop.f32.mrf.mxu3  ;;  %5854 = vmatmul.msk.bf16.gmra.mxu0 %vm1239_vm1, %v10020_v50  ;;  %v10042_v50 = vld [vmem:[#allocation49_spill] sm:$0xff] }
 0x218   :  { %v2561_v43 = vpack.c.bf16 %v987_v60, %v987_v60  ;;  %5866 = vmatmul.msk.bf16.gmra.mxu1 %vm1239_vm1, %v10023_v7 }
 0x21a   :  { %v7539_v20 = vunpack.c.l.b16 %v2561_v43  ;;  %v10043_v43 = vld [vmem:[#allocation48_spill] sm:$0xff] }
 0x21b   :  { %v10044_v39 = vpack.c.b16 %v10042_v50, %v10043_v43 }
 0x21c   :  { %v3089_v45 = vpack.c.b16 %v7539_v20, %v7533_v49  ;;  %5874 = vmatmul.msk.bf16.gmra.mxu2 %vm1239_vm1, %v10026_v38 }
 0x21e   :  { %5878 = vmatmul.msk.bf16.gmra.mxu3 %vm1239_vm1, %v10029_v27  ;;  %v10047_v27 = vpack.c.b16 %v10045_v34, %v10046_v37 }
 0x21f   :  { %v990_v24 = vpop.f32.mrf.mxu3 }
 0x220   :  { %v2562_v59 = vpack.c.bf16 %v990_v24, %v990_v24 }
 0x222   :  { %v7564_v63 = vunpack.c.l.b16 %v2562_v59 }
 0x225   :  { %v1474_v42 = vpop.f32.mrf.mxu1 }
 0x226   :  { %v7557_v52 = vadd.f32 %v1474_v42, %v7554_v61 }
 0x227   :  { %v992_v13 = vpop.f32.mrf.mxu3  ;;  %5855 = vmatmul.msk.bf16.gmra.mxu0 %vm1239_vm1, %v10032_v6  ;;  %v10048_v6 = vld [vmem:[#allocation53_spill] sm:$0xff] }
 0x228   :  { %1900 = vmax.xlane.f32.xlu0 %v7557_v52  ;;  %v2563_v0 = vpack.c.bf16 %v992_v13, %v992_v13 }
 0x22a   :  { %v7566_v41 = vunpack.c.l.b16 %v2563_v0  ;;  %v10049_v0 = vld [vmem:[#allocation52_spill] sm:$0xff] }
 0x22c   :  { %v3090_v55 = vpack.c.b16 %v7566_v41, %v7564_v63 }
 0x22d   :  { %v1476_v54 = vpop.f32.mrf.mxu1 }
 0x22e   :  { %v7576_v5 = vadd.f32 %v1476_v54, %v7571_v57  ;;  %5879 = vmatmul.msk.bf16.gmra.mxu3 %vm1239_vm1, %v10035_v9  ;;  %v10050_v54 = vpack.c.b16 %v10048_v6, %v10049_v0 }
 0x22f   :  { %v7582_v46 = vpop.f32.mrf.mxu3  ;;  %v1651_v40 = vpop.f32.mrf.mxu2 }
 0x230   :  { %1902 = vmax.xlane.f32.xlu1 %v7576_v5  ;;  %v7586_v28 = vadd.f32 %v1651_v40, %v7554_v61 }
 0x232   :  { %1932 = vmax.xlane.f32.xlu0 %v7586_v28 }
 0x235   :  { %v1479_v35 = vpop.f32.mrf.mxu1 }
 0x236   :  { %v7595_v51 = vadd.f32 %v1479_v35, %v7591_v29  ;;  %v10051_v35 = vld [vmem:[#allocation60_spill] sm:$0xff] }
 0x237   :  { %v7597_v3 = vpop.f32.mrf.mxu3  ;;  %5856 = vmatmul.msk.bf16.gmra.mxu0 %vm1239_vm1, %v10038_v53  ;;  %v1653_v10 = vpop.f32.mrf.mxu2  ;;  %v10053_v4 = vpack.c.b16 %v10051_v35, %v10052_v62  ;;  %v7685_v53 = vld [vmem:[%s9773_s2 + $0x38] sm:$0xff]  ;;  %v7713_v35 = vld [vmem:[%s9773_s2 + $0x40] sm:$0xff]  ;;  %v2564_v62 = vpack.c.bf16 %v7582_v46, %v7582_v46 }
 0x238   :  { %1904 = vmax.xlane.f32.xlu2 %v7595_v51  ;;  %v7605_v33 = vadd.f32 %v1653_v10, %v7571_v57 }
 0x239   :  { %v3079_v46 = vunpack.c.l.b16 %v2564_v62 }
 0x23a   :  { %1934 = vmax.xlane.f32.xlu0 %v7605_v33 }
 0x23d   :  { %v1481_v22 = vpop.f32.mrf.mxu1 }
 0x23e   :  { %5880 = vmatmul.msk.bf16.gmra.mxu3 %vm1239_vm1, %v10041_v1  ;;  %v7623_v8 = vadd.f32 %v1481_v22, %v7615_v15 }
 0x23f   :  { %v7617_v26 = vpop.f32.mrf.mxu3  ;;  %v1656_v32 = vpop.f32.mrf.mxu2 }
 0x240   :  { %v7620_v48 = vadd.f32 %v1656_v32, %v7591_v29 }
 0x242   :  { %1906 = vmax.xlane.f32.xlu0 %v7623_v8  ;;  %1936 = vmax.xlane.f32.xlu2 %v7620_v48 }
 0x245   :  { %v1484_v60 = vpop.f32.mrf.mxu1 }
 0x246   :  { %v7633_v30 = vadd.f32 %v1484_v60, %v7628_v47 }
 0x247   :  { %v1002_v17 = vpop.f32.mrf.mxu3  ;;  %5857 = vmatmul.msk.bf16.gmra.mxu0 %vm1239_vm1, %v10044_v39  ;;  %v1658_v21 = vpop.f32.mrf.mxu2 }
 0x248   :  { %1908 = vmax.xlane.f32.xlu1 %v7633_v30  ;;  %v7641_v7 = vadd.f32 %v1658_v21, %v7615_v15 }
 0x24a   :  { %1938 = vmax.xlane.f32.xlu0 %v7641_v7 }
 0x24d   :  { %v1486_v25 = vpop.f32.mrf.mxu1 }
 0x24e   :  { %v7650_v38 = vadd.f32 %v1486_v25, %v7646_v2  ;;  %5881 = vmatmul.msk.bf16.gmra.mxu3 %vm1239_vm1, %v10047_v27 }
 0x24f   :  { %v1005_v24 = vpop.f32.mrf.mxu3  ;;  %v1661_v59 = vpop.f32.mrf.mxu2 }
 0x250   :  { %1910 = vmax.xlane.f32.xlu2 %v7650_v38  ;;  %v7658_v42 = vadd.f32 %v1661_v59, %v7628_v47  ;;  %v2568_v43 = vpack.c.bf16 %v1005_v24, %v1005_v24  ;;  %v7708_v24 = vld [vmem:[%s9773_s2 + $0x48] sm:$0xff] }
 0x252   :  { %1940 = vmax.xlane.f32.xlu1 %v7658_v42  ;;  %v3083_v6 = vunpack.c.l.b16 %v2568_v43 }
 0x255   :  { %v1489_v13 = vpop.f32.mrf.mxu1 }
 0x256   :  { %v7671_v19 = vadd.f32 %v1489_v13, %v7664_v56  ;;  %v2566_v13 = vpack.c.bf16 %v7617_v26, %v7617_v26 }
 0x257   :  { %v1007_v23 = vpop.f32.mrf.mxu3  ;;  %5858 = vmatmul.msk.bf16.gmra.mxu0 %vm1239_vm1, %v10050_v54  ;;  %v1663_v14 = vpop.f32.mrf.mxu2 }
 0x258   :  { %v7674_v9 = vadd.f32 %v1663_v14, %v7646_v2  ;;  %v2569_v39 = vpack.c.bf16 %v1007_v23, %v1007_v23  ;;  %v2567_v23 = vpack.c.bf16 %v1002_v17, %v1002_v17  ;;  %v2565_v17 = vpack.c.bf16 %v7597_v3, %v7597_v3 }
 0x25a   :  { %1912 = vmax.xlane.f32.xlu1 %v7671_v19  ;;  %1942 = vmax.xlane.f32.xlu2 %v7674_v9  ;;  %v3084_v0 = vunpack.c.l.b16 %v2569_v39  ;;  %v3080_v39 = vunpack.c.l.b16 %v2565_v17 }
 0x25d   :  { %v1491_v40 = vpop.f32.mrf.mxu1 }
 0x25e   :  { %5882 = vmatmul.msk.bf16.gmra.mxu3 %vm1239_vm1, %v10053_v4  ;;  %v7691_v31 = vadd.f32 %v1491_v40, %v7685_v53  ;;  %v3081_v4 = vunpack.c.l.b16 %v2566_v13 }
 0x25f   :  { %v1010_v10 = vpop.f32.mrf.mxu3  ;;  %v1666_v22 = vpop.f32.mrf.mxu2 }
 0x260   :  { %v7688_v18 = vadd.f32 %v1666_v22, %v7664_v56  ;;  %v2570_v1 = vpack.c.bf16 %v1010_v10, %v1010_v10  ;;  %v3082_v10 = vunpack.c.l.b16 %v2567_v23  ;;  %v7744_v23 = vld [vmem:[%s9773_s2 + $0x50] sm:$0xff] }
 0x262   :  { %1944 = vmax.xlane.f32.xlu0 %v7688_v18  ;;  %1914 = vmax.xlane.f32.xlu2 %v7691_v31  ;;  %v3085_v21 = vunpack.c.l.b16 %v2570_v1  ;;  %v3093_v1 = vpack.c.b16 %v3084_v0, %v3083_v6 }
 0x264   :  { %v1297_v32 = vpop.f32.mrf.mxu0 }
 0x265   :  { %v1494_v60 = vpop.f32.mrf.mxu1  ;;  %v7696_v37 = vadd.f32 %v1297_v32, %v7554_v61 }
 0x266   :  { %v7724_v32 = vadd.f32 %v1494_v60, %v7713_v35 }
 0x267   :  { %v1012_v50 = vpop.f32.mrf.mxu3  ;;  %v1668_v34 = vpop.f32.mrf.mxu2 }
 0x268   :  { %v2571_v25 = vpack.c.bf16 %v1012_v50, %v1012_v50  ;;  %v7699_v27 = vadd.f32 %v1668_v34, %v7685_v53  ;;  %v3091_v34 = vpack.c.b16 %v3080_v39, %v3079_v46 }
 0x26a   :  { %v3086_v59 = vunpack.c.l.b16 %v2571_v25  ;;  %1946 = vmax.xlane.f32.xlu1 %v7699_v27  ;;  %1868 = vmax.xlane.f32.xlu2 %v7696_v37 }
 0x26c   :  { %v3094_v54 = vpack.c.b16 %v3086_v59, %v3085_v21  ;;  %v1299_v14 = vpop.f32.mrf.mxu0  ;;  %v3092_v21 = vpack.c.b16 %v3082_v10, %v3081_v4 }
 0x26d   :  { %v1496_v40 = vpop.f32.mrf.mxu1 }
 0x26e   :  { %3103 = vmatpush.bf16.msra.mxu3 %v3094_v54  ;;  %v7716_v26 = vadd.f32 %v1496_v40, %v7708_v24 }
 0x26f   :  { %v1671_v22 = vpop.f32.mrf.mxu2 }
 0x270   :  { %1918 = vmax.xlane.f32.xlu0 %v7716_v26  ;;  %v7739_v13 = vadd.f32 %v1671_v22, %v7713_v35 }
 0x271   :  { %v1828_v50 = vpop.f32.mrf.mxu3 }
 0x272   :  { %v7727_v43 = vadd.f32 %v1828_v50, %v7554_v61  ;;  %3104 = vmatpush.bf16.msra.mxu3 %v3093_v1  ;;  %1916 = vmax.xlane.f32.xlu2 %v7724_v32  ;;  %v7736_v61 = vadd.f32 %v1299_v14, %v7571_v57 }
 0x274   :  { %1964 = vmax.xlane.f32.xlu1 %v7727_v43  ;;  %v1302_v3 = vpop.f32.mrf.mxu0 }
 0x275   :  { %v7732_v25 = vadd.f32 %v1302_v3, %v7591_v29  ;;  %v1499_v6 = vpop.f32.mrf.mxu1 }
 0x276   :  { %3105 = vmatpush.bf16.msra.mxu3 %v3092_v21  ;;  %v7749_v54 = vadd.f32 %v1499_v6, %v7744_v23 }
 0x277   :  { %v1673_v60 = vpop.f32.mrf.mxu2 }
 0x278   :  { %1872 = vmax.xlane.f32.xlu0 %v7732_v25  ;;  %10054 = vst [vmem:[#allocation69_spill] sm:$0xff] %v7749_v54  ;;  %v7756_v62 = vadd.f32 %v1673_v60, %v7708_v24 }
 0x279   :  { %v1830_v59 = vpop.f32.mrf.mxu3 }
 0x27a   :  { %3106 = vmatpush.bf16.msra.mxu3 %v3091_v34  ;;  %1870 = vmax.xlane.f32.xlu2 %v7736_v61  ;;  %v7762_v17 = vadd.f32 %v1830_v59, %v7571_v57 }
 0x27c   :  { %1948 = vmax.xlane.f32.xlu1 %v7739_v13  ;;  %v1304_v0 = vpop.f32.mrf.mxu0 }
 0x27d   :  { %v1501_v49 = vpop.f32.mrf.mxu1  ;;  %v7784_v58 = vadd.f32 %v1304_v0, %v7615_v15 }
 0x27e   :  { %3107 = vmatpush.bf16.msra.mxu3 %v3090_v55  ;;  %v7772_v55 = vld [vmem:[%s9773_s2 + $0x58] sm:$0xff] }
 0x27f   :  { %v1676_v14 = vpop.f32.mrf.mxu2  ;;  %v7796_v10 = vadd.f32 %v1501_v49, %v7772_v55 }
 0x280   :  { %1920 = vmax.xlane.f32.xlu0 %v7749_v54  ;;  %v7775_v20 = vadd.f32 %v1676_v14, %v7744_v23 }
 0x281   :  { %v1833_v40 = vpop.f32.mrf.mxu3  ;;  %10056 = vst [vmem:[#allocation5_spill] sm:$0xff] %v7796_v10 }
 0x282   :  { %3108 = vmatpush.bf16.msra.mxu3 %v3089_v45  ;;  %1950 = vmax.xlane.f32.xlu2 %v7756_v62  ;;  %v7808_v50 = vadd.f32 %v1833_v40, %v7591_v29 }
 0x284   :  { %1966 = vmax.xlane.f32.xlu1 %v7762_v17  ;;  %v1307_v63 = vpop.f32.mrf.mxu0 }
 0x285   :  { %v1504_v36 = vpop.f32.mrf.mxu1 }
 0x286   :  { %3109 = vmatpush.bf16.msra.mxu3 %v3088_v16  ;;  %v7790_v16 = vadd.f32 %v1307_v63, %v7628_v47 }
 0x287   :  { %v1678_v41 = vpop.f32.mrf.mxu2 }
 0x288   :  { %v7778_v45 = vadd.f32 %v1678_v41, %v7772_v55 }
 0x289   :  { %v1835_v57 = vpop.f32.mrf.mxu3 }
 0x28a   :  { %10055 = vst [vmem:[#allocation66_spill] sm:$0xff] %v7778_v45  ;;  %3110 = vmatpush.bf16.msra.mxu3 %v3087_v11  ;;  %1954 = vmax.xlane.f32.xlu0 %v7778_v45  ;;  %v7805_v1 = vadd.f32 %v1835_v57, %v7615_v15  ;;  %v7821_v15 = vld [vmem:[%s9773_s2 + $0x60] sm:$0xff] }
 0x28b   :  { %1952 = vmax.xlane.f32.xlu2 %v7775_v20  ;;  %v7830_v34 = vadd.f32 %v1504_v36, %v7821_v15 }
 0x28c   :  { %1874 = vmax.xlane.f32.xlu1 %v7784_v58  ;;  %v1309_v12 = vpop.f32.mrf.mxu0 }
 0x28d   :  { %v7793_v4 = vadd.f32 %v1309_v12, %v7646_v2  ;;  %v1506_v46 = vpop.f32.mrf.mxu1  ;;  %10059 = vst [vmem:[#allocation26_spill] sm:$0xff] %v7830_v34 }
 0x28f   :  { %v1681_v39 = vpop.f32.mrf.mxu2 }
 0x290   :  { %v7824_v29 = vadd.f32 %v1681_v39, %v7821_v15 }
 0x291   :  { %v1838_v44 = vpop.f32.mrf.mxu3 }
 0x292   :  { %1878 = vmax.xlane.f32.xlu0 %v7793_v4  ;;  %v7802_v22 = vadd.f32 %v1838_v44, %v7628_v47  ;;  %v7816_v47 = vld [vmem:[%s9773_s2 + $0x68] sm:$0xff]  ;;  %10057 = vst [vmem:[#allocation4_spill] sm:$0xff] %v7824_v29 }
 0x293   :  { %1876 = vmax.xlane.f32.xlu2 %v7790_v16  ;;  %v7827_v60 = vadd.f32 %v1506_v46, %v7816_v47 }
 0x294   :  { %1922 = vmax.xlane.f32.xlu1 %v7796_v10  ;;  %v1312_v11 = vpop.f32.mrf.mxu0 }
 0x295   :  { %10058 = vst [vmem:[#allocation65_spill] sm:$0xff] %v7827_v60  ;;  %v7836_v0 = vadd.f32 %v1312_v11, %v7664_v56 }
 0x297   :  { %v1683_v40 = vpop.f32.mrf.mxu2 }
 0x298   :  { %v7855_v46 = vadd.f32 %v1683_v40, %v7816_v47 }
 0x299   :  { %v1840_v3 = vpop.f32.mrf.mxu3 }
 0x29a   :  { %1972 = vmax.xlane.f32.xlu0 %v7802_v22  ;;  %v7842_v63 = vadd.f32 %v1840_v3, %v7646_v2  ;;  %10060 = vst [vmem:[#allocation62_spill] sm:$0xff] %v7855_v46 }
 0x29b   :  { %1970 = vmax.xlane.f32.xlu2 %v7805_v1  ;;  %v1901_v59 = vpop.xlane.xlu0 %1900 }
 0x29c   :  { %1968 = vmax.xlane.f32.xlu1 %v7808_v50  ;;  %v1314_v21 = vpop.f32.mrf.mxu0  ;;  %v2012_v57 = vsub.f32 %v7557_v52, %v1901_v59 }
 0x29d   :  { %v7839_v14 = vadd.f32 %v1314_v21, %v7685_v53 }
 0x29e   :  { %v2092_v12 = vmul.f32 1.442695, %v2012_v57 }
 0x29f   :  { %v1686_v52 = vpop.f32.mrf.mxu2 }
 0x2a0   :  { %6046 = vpow2.f32 %v2092_v12 }
 0x2a1   :  { %v1843_v6 = vpop.f32.mrf.mxu3 }
 0x2a2   :  { %1956 = vmax.xlane.f32.xlu0 %v7824_v29  ;;  %v7849_v36 = vadd.f32 %v1843_v6, %v7664_v56  ;;  %v7864_v6 = vld [vmem:[%s9773_s2 + $0x70] sm:$0xff] }
 0x2a3   :  { %1926 = vmax.xlane.f32.xlu2 %v7827_v60  ;;  %v1903_v44 = vpop.xlane.xlu1 %1902  ;;  %v7872_v57 = vadd.f32 %v1686_v52, %v7864_v6  ;;  %v7882_v52 = vld [vmem:[%s9773_s2 + $0x78] sm:$0xff] }
 0x2a4   :  { %1924 = vmax.xlane.f32.xlu1 %v7830_v34  ;;  %v1317_v41 = vpop.f32.mrf.mxu0  ;;  %v2013_v39 = vsub.f32 %v7576_v5, %v1903_v44 }
 0x2a5   :  { %v1933_v49 = vpop.xlane.xlu0 %1932  ;;  %v7852_v11 = vadd.f32 %v1317_v41, %v7713_v35  ;;  %10061 = vst [vmem:[#allocation20_spill] sm:$0xff] %v7872_v57 }
 0x2a6   :  { %v2094_v59 = vmul.f32 1.442695, %v2013_v39  ;;  %v7869_v41 = vpop.eup %6046  ;;  %v2028_v44 = vsub.f32 %v7586_v28, %v1933_v49 }
 0x2a7   :  { %v1688_v39 = vpop.f32.mrf.mxu2 }
 0x2a8   :  { %6048 = vpow2.f32 %v2094_v59  ;;  %v7885_v59 = vadd.f32 %v1688_v39, %v7882_v52 }
 0x2a9   :  { %v1845_v2 = vpop.f32.mrf.mxu3 }
 0x2aa   :  { %1882 = vmax.xlane.f32.xlu0 %v7839_v14  ;;  %v7867_v40 = vadd.f32 %v1845_v2, %v7685_v53  ;;  %10062 = vst [vmem:[#allocation19_spill] sm:$0xff] %v7885_v59 }
 0x2ab   :  { %1880 = vmax.xlane.f32.xlu2 %v7836_v0  ;;  %v1905_v21 = vpop.xlane.xlu2 %1904 }
 0x2ac   :  { %1974 = vmax.xlane.f32.xlu1 %v7842_v63  ;;  %v1319_v56 = vpop.f32.mrf.mxu0  ;;  %v2014_v28 = vsub.f32 %v7595_v51, %v1905_v21 }
 0x2ad   :  { %v1935_v3 = vpop.xlane.xlu0 %1934 }
 0x2ae   :  { %v2029_v5 = vsub.f32 %v7605_v33, %v1935_v3  ;;  %v7887_v33 = vpop.eup %6048  ;;  %v7890_v3 = vadd.f32 %v1319_v56, %v7708_v24  ;;  %v2096_v39 = vmul.f32 1.442695, %v2014_v28 }
 0x2b0   :  { %v2126_v34 = vmul.f32 1.442695, %v2029_v5 }
 0x2b1   :  { %v1848_v12 = vpop.f32.mrf.mxu3 }
 0x2b2   :  { %1884 = vmax.xlane.f32.xlu0 %v7852_v11  ;;  %6050 = vpow2.f32 %v2126_v34 }
 0x2b3   :  { %1976 = vmax.xlane.f32.xlu2 %v7849_v36 }
 0x2b4   :  { %1958 = vmax.xlane.f32.xlu1 %v7855_v46  ;;  %v1322_v2 = vpop.f32.mrf.mxu0  ;;  %v2124_v46 = vmul.f32 1.442695, %v2028_v44 }
 0x2b5   :  { %v1937_v53 = vpop.xlane.xlu2 %1936  ;;  %v1907_v60 = vpop.xlane.xlu0 %1906 }
 0x2b6   :  { %6052 = vpow2.f32 %v2124_v46  ;;  %v2030_v51 = vsub.f32 %v7620_v48, %v1937_v53  ;;  %v7916_v48 = vadd.f32 %v1322_v2, %v7744_v23 }
 0x2b7   :  { %6054 = vpow2.f32 %v2096_v39 }
 0x2b8   :  { %v7901_v29 = vpop.eup %6050  ;;  %v2128_v21 = vmul.f32 1.442695, %v2030_v51  ;;  %10066 = vst [vmem:[#allocation70_spill] sm:$0xff] %v7916_v48 }
 0x2b9   :  { %v1850_v5 = vpop.f32.mrf.mxu3 }
 0x2ba   :  { %1978 = vmax.xlane.f32.xlu0 %v7867_v40  ;;  %6056 = vpow2.f32 %v2128_v21  ;;  %v7927_v21 = vadd.f32 %v1850_v5, %v7708_v24 }
 0x2bb   :  { %2220 = vadd.xlane.f32.xlu2 %v7869_v41  ;;  %v7895_v49 = vpop.xlane.xlu1 %1908 }
 0x2bc   :  { %1960 = vmax.xlane.f32.xlu1 %v7872_v57  ;;  %v7899_v57 = vadd.f32 %v1848_v12, %v7713_v35  ;;  %v1324_v56 = vpop.f32.mrf.mxu0  ;;  %v7903_v54 = vpop.eup %6052 }
 0x2bd   :  { %v1939_v10 = vpop.xlane.xlu0 %1938  ;;  %v7913_v45 = vpop.eup %6054 }
 0x2be   :  { %10063 = vst [vmem:[#allocation61_spill] sm:$0xff] %v7899_v57  ;;  %v2031_v34 = vsub.f32 %v7641_v7, %v1939_v10  ;;  %v2015_v7 = vsub.f32 %v7623_v8, %v1907_v60 }
 0x2bf   :  { %10065 = vst [vmem:[#allocation71_spill] sm:$0xff] %v7913_v45 }
 0x2c0   :  { %v2130_v12 = vmul.f32 1.442695, %v2031_v34  ;;  %v2098_v51 = vmul.f32 1.442695, %v2015_v7 }
 0x2c1   :  { %v1853_v28 = vpop.f32.mrf.mxu3 }
 0x2c2   :  { %2222 = vadd.xlane.f32.xlu0 %v7887_v33  ;;  %6058 = vpow2.f32 %v2130_v12 }
 0x2c3   :  { %1962 = vmax.xlane.f32.xlu2 %v7885_v59  ;;  %v1911_v44 = vpop.xlane.xlu2 %1910  ;;  %v7911_v59 = vadd.f32 %v1324_v56, %v7772_v55  ;;  %v7922_v56 = vpop.eup %6056  ;;  %6060 = vpow2.f32 %v2098_v51 }
 0x2c4   :  { %1886 = vmax.xlane.f32.xlu1 %v7890_v3  ;;  %v1327_v53 = vpop.f32.mrf.mxu0  ;;  %10067 = vst [vmem:[#allocation11_spill] sm:$0xff] %v7922_v56 }
 0x2c5   :  { %v1941_v46 = vpop.xlane.xlu1 %1940  ;;  %10064 = vst [vmem:[#allocation58_spill] sm:$0xff] %v7911_v59 }
 0x2c6   :  { %v2032_v12 = vsub.f32 %v7658_v42, %v1941_v46  ;;  %v2017_v42 = vsub.f32 %v7650_v38, %v1911_v44  ;;  %v7961_v38 = vadd.f32 %v1853_v28, %v7744_v23 }
 0x2c8   :  { %v7924_v34 = vpop.eup %6058  ;;  %v2132_v7 = vmul.f32 1.442695, %v2032_v12 }
 0x2c9   :  { %10068 = vst [vmem:[#allocation10_spill] sm:$0xff] %v7924_v34  ;;  %v1855_v2 = vpop.f32.mrf.mxu3  ;;  %v7941_v5 = vpop.eup %6060 }
 0x2ca   :  { %1980 = vmax.xlane.f32.xlu0 %v7899_v57  ;;  %6062 = vpow2.f32 %v2132_v7 }
 0x2cb   :  { %2254 = vadd.xlane.f32.xlu2 %v7901_v29 }
 0x2cc   :  { %2252 = vadd.xlane.f32.xlu1 %v7903_v54  ;;  %v1329_v8 = vpop.f32.mrf.mxu0 }
 0x2cd   :  { %v1943_v35 = vpop.xlane.xlu2 %1942  ;;  %v1913_v10 = vpop.xlane.xlu1 %1912  ;;  %v7939_v24 = vadd.f32 %v1329_v8, %v7816_v47  ;;  %v2102_v8 = vmul.f32 1.442695, %v2017_v42 }
 0x2cf   :  { %10069 = vst [vmem:[#allocation35_spill] sm:$0xff] %v7939_v24  ;;  %6064 = vpow2.f32 %v2102_v8 }
 0x2d1   :  { %v1858_v46 = vpop.f32.mrf.mxu3 }
 0x2d2   :  { %2224 = vadd.xlane.f32.xlu0 %v7913_v45  ;;  %v7936_v45 = vadd.f32 %v1327_v53, %v7821_v15  ;;  %v2016_v53 = vsub.f32 %v7633_v30, %v7895_v49 }
 0x2d3   :  { %1890 = vmax.xlane.f32.xlu2 %v7911_v59 }
 0x2d4   :  { %1888 = vmax.xlane.f32.xlu1 %v7916_v48  ;;  %v7956_v48 = vadd.f32 %v1855_v2, %v7772_v55  ;;  %v2033_v55 = vsub.f32 %v7674_v9, %v1943_v35 }
 0x2d5   :  { %v1915_v39 = vpop.xlane.xlu2 %1914  ;;  %v1945_v57 = vpop.xlane.xlu0 %1944 }
 0x2d6   :  { %v2019_v30 = vsub.f32 %v7691_v31, %v1915_v39  ;;  %v2134_v28 = vmul.f32 1.442695, %v2033_v55  ;;  %v2018_v31 = vsub.f32 %v7671_v19, %v1913_v10  ;;  %v2034_v9 = vsub.f32 %v7688_v18, %v1945_v57 }
 0x2d8   :  { %v2106_v23 = vmul.f32 1.442695, %v2019_v30  ;;  %v7989_v30 = vadd.f32 %v1858_v46, %v7821_v15  ;;  %v2136_v55 = vmul.f32 1.442695, %v2034_v9 }
 0x2d9   :  { %v1860_v44 = vpop.f32.mrf.mxu3 }
 0x2da   :  { %2258 = vadd.xlane.f32.xlu0 %v7924_v34  ;;  %v7973_v42 = vadd.f32 %v1860_v44, %v7816_v47 }
 0x2db   :  { %2256 = vadd.xlane.f32.xlu2 %v7922_v56  ;;  %v2100_v56 = vmul.f32 1.442695, %v2016_v53 }
 0x2dc   :  { %1982 = vmax.xlane.f32.xlu1 %v7927_v21  ;;  %10070 = vst [vmem:[#allocation29_spill] sm:$0xff] %v7973_v42 }
 0x2dd   :  { %v1947_v60 = vpop.xlane.xlu1 %1946  ;;  %v7933_v59 = vpop.xlane.xlu2 %1868  ;;  %6066 = vpow2.f32 %v2100_v56  ;;  %v2104_v56 = vmul.f32 1.442695, %v2018_v31 }
 0x2de   :  { %6068 = vpow2.f32 %v2106_v23  ;;  %v2035_v19 = vsub.f32 %v7699_v27, %v1947_v60  ;;  %v1996_v18 = vsub.f32 %v7696_v37, %v7933_v59 }
 0x2df   :  { %6070 = vpow2.f32 %v2134_v28 }
 0x2e0   :  { %6072 = vpow2.f32 %v2104_v56  ;;  %v2138_v46 = vmul.f32 1.442695, %v2035_v19  ;;  %v2060_v28 = vmul.f32 1.442695, %v1996_v18 }
 0x2e1   :  { %6074 = vpow2.f32 %v2136_v55  ;;  %v1863_v15 = vpop.f32.mrf.mxu3 }
 0x2e2   :  { %1894 = vmax.xlane.f32.xlu0 %v7939_v24  ;;  %v7958_v24 = vpop.eup %6062  ;;  %v8006_v27 = vadd.f32 %v1863_v15, %v7864_v6  ;;  %6076 = vpow2.f32 %v2138_v46 }
 0x2e3   :  { %v7943_v34 = vpop.xlane.xlu0 %1918  ;;  %1892 = vmax.xlane.f32.xlu2 %v7936_v45  ;;  %v7975_v53 = vpop.eup %6064  ;;  %6078 = vpow2.f32 %v2060_v28 }
 0x2e4   :  { %2226 = vadd.xlane.f32.xlu1 %v7941_v5  ;;  %v7977_v8 = vpop.eup %6066 }
 0x2e5   :  { %v7951_v51 = vpop.xlane.xlu2 %1916  ;;  %v7991_v44 = vpop.eup %6068 }
 0x2e6   :  { %10071 = vst [vmem:[#allocation28_spill] sm:$0xff] %v7991_v44 }
 0x2e7   :  { %v7953_v12 = vpop.xlane.xlu1 %1964 }
 0x2e8   :  { %v2044_v37 = vsub.f32 %v7727_v43, %v7953_v12 }
 0x2e9   :  { %v1865_v18 = vpop.f32.mrf.mxu3 }
 0x2ea   :  { %2260 = vadd.xlane.f32.xlu0 %v7958_v24  ;;  %v2156_v19 = vmul.f32 1.442695, %v2044_v37  ;;  %v8026_v28 = vadd.f32 %v1865_v18, %v7882_v52 }
 0x2eb   :  { %1986 = vmax.xlane.f32.xlu2 %v7956_v48  ;;  %v7966_v49 = vpop.xlane.xlu0 %1872 }
 0x2ec   :  { %1984 = vmax.xlane.f32.xlu1 %v7961_v38  ;;  %6080 = vpow2.f32 %v2156_v19 }
 0x2ed   :  { %v1871_v2 = vpop.xlane.xlu2 %1870 }
 0x2ee   :  { %v1997_v9 = vsub.f32 %v7736_v61, %v1871_v2  ;;  %v1998_v2 = vsub.f32 %v7732_v25, %v7966_v49 }
 0x2ef   :  { %v7970_v7 = vpop.xlane.xlu1 %1948 }
 0x2f0   :  { %v2062_v43 = vmul.f32 1.442695, %v1997_v9 }
 0x2f2   :  { %1990 = vmax.xlane.f32.xlu0 %v7973_v42  ;;  %v7993_v42 = vpop.eup %6070 }
 0x2f3   :  { %2230 = vadd.xlane.f32.xlu2 %v7975_v53  ;;  %v7984_v35 = vpop.xlane.xlu0 %1920  ;;  %v8008_v60 = vpop.eup %6072 }
 0x2f4   :  { %2228 = vadd.xlane.f32.xlu1 %v7977_v8  ;;  %v8010_v31 = vpop.eup %6074 }
 0x2f5   :  { %v1951_v47 = vpop.xlane.xlu2 %1950 }
 0x2f7   :  { %v7986_v39 = vpop.xlane.xlu1 %1966 }
 0x2fa   :  { %2234 = vadd.xlane.f32.xlu0 %v7991_v44  ;;  %v8021_v44 = vpop.eup %6076 }
 0x2fb   :  { %1988 = vmax.xlane.f32.xlu2 %v7989_v30  ;;  %v8023_v12 = vpop.eup %6078 }
 0x2fc   :  { %2262 = vadd.xlane.f32.xlu1 %v7993_v42  ;;  %10072 = vst [vmem:[#allocation68_spill] sm:$0xff] %v8023_v12  ;;  %v8035_v18 = vpop.eup %6080 }
 0x2fd   :  { %v8001_v57 = vpop.xlane.xlu0 %1954 }
 0x2fe   :  { %v8003_v10 = vpop.xlane.xlu2 %1952 }
 0x2ff   :  { %v1875_v23 = vpop.xlane.xlu1 %1874 }
 0x300   :  { %v1999_v59 = vsub.f32 %v7784_v58, %v1875_v23  ;;  %v2037_v58 = vsub.f32 %v7756_v62, %v1951_v47  ;;  %v2064_v62 = vmul.f32 1.442695, %v1998_v2 }
 0x302   :  { %1992 = vmax.xlane.f32.xlu0 %v8006_v27  ;;  %v2066_v46 = vmul.f32 1.442695, %v1999_v59  ;;  %v2142_v59 = vmul.f32 1.442695, %v2037_v58 }
 0x303   :  { %2232 = vadd.xlane.f32.xlu2 %v8008_v60 }
 0x304   :  { %2264 = vadd.xlane.f32.xlu1 %v8010_v31  ;;  %6082 = vpow2.f32 %v2066_v46 }
 0x305   :  { %v1879_v56 = vpop.xlane.xlu0 %1878  ;;  %6084 = vpow2.f32 %v2062_v43 }
 0x306   :  { %v1877_v55 = vpop.xlane.xlu2 %1876  ;;  %6086 = vpow2.f32 %v2142_v59 }
 0x307   :  { %v8019_v15 = vpop.xlane.xlu1 %1922  ;;  %v2000_v61 = vsub.f32 %v7790_v16, %v1877_v55  ;;  %v2045_v16 = vsub.f32 %v7762_v17, %v7986_v39  ;;  %v2001_v17 = vsub.f32 %v7793_v4, %v1879_v56  ;;  %v1332_v39 = vpop.f32.mrf.mxu0 }
 0x309   :  { %v2068_v19 = vmul.f32 1.442695, %v2000_v61  ;;  %v2158_v61 = vmul.f32 1.442695, %v2045_v16 }
 0x30a   :  { %2188 = vadd.xlane.f32.xlu0 %v8023_v12  ;;  %v8037_v47 = vpop.eup %6082 }
 0x30b   :  { %2266 = vadd.xlane.f32.xlu2 %v8021_v44  ;;  %10073 = vst [vmem:[#allocation67_spill] sm:$0xff] %v8037_v47  ;;  %v8039_v12 = vpop.eup %6084  ;;  %6088 = vpow2.f32 %v2068_v19 }
 0x30c   :  { %1994 = vmax.xlane.f32.xlu1 %v8026_v28  ;;  %6090 = vpow2.f32 %v2064_v62  ;;  %v8053_v58 = vpop.eup %6086 }
 0x30d   :  { %v1973_v23 = vpop.xlane.xlu0 %1972  ;;  %10074 = vst [vmem:[#allocation64_spill] sm:$0xff] %v8053_v58 }
 0x30e   :  { %v1971_v37 = vpop.xlane.xlu2 %1970  ;;  %v2048_v4 = vsub.f32 %v7802_v22, %v1973_v23 }
 0x30f   :  { %v1969_v9 = vpop.xlane.xlu1 %1968  ;;  %v2047_v25 = vsub.f32 %v7805_v1, %v1971_v37  ;;  %v2036_v1 = vsub.f32 %v7739_v13, %v7970_v7  ;;  %v8067_v13 = vadd.f32 %v1332_v39, %v7864_v6 }
 0x310   :  { %v2046_v37 = vsub.f32 %v7808_v50, %v1969_v9 }
 0x311   :  { %v2162_v43 = vmul.f32 1.442695, %v2047_v25  ;;  %v8055_v2 = vpop.eup %6088  ;;  %v2140_v25 = vmul.f32 1.442695, %v2036_v1 }
 0x312   :  { %2284 = vadd.xlane.f32.xlu0 %v8035_v18  ;;  %10075 = vst [vmem:[#allocation63_spill] sm:$0xff] %v8055_v2  ;;  %v8057_v59 = vpop.eup %6090  ;;  %v2160_v7 = vmul.f32 1.442695, %v2046_v37 }
 0x313   :  { %2194 = vadd.xlane.f32.xlu2 %v8037_v47  ;;  %6092 = vpow2.f32 %v2162_v43  ;;  %v2070_v47 = vmul.f32 1.442695, %v2001_v17  ;;  %v2164_v43 = vmul.f32 1.442695, %v2048_v4 }
 0x314   :  { %2190 = vadd.xlane.f32.xlu1 %v8039_v12  ;;  %6094 = vpow2.f32 %v2158_v61 }
 0x315   :  { %v8047_v49 = vpop.xlane.xlu0 %1956  ;;  %6096 = vpow2.f32 %v2140_v25 }
 0x316   :  { %v8049_v55 = vpop.xlane.xlu2 %1926  ;;  %6098 = vpow2.f32 %v2070_v47 }
 0x317   :  { %v8051_v46 = vpop.xlane.xlu1 %1924  ;;  %6100 = vpow2.f32 %v2160_v7 }
 0x318   :  { %6102 = vpow2.f32 %v2164_v43 }
 0x31a   :  { %2270 = vadd.xlane.f32.xlu0 %v8053_v58  ;;  %v8069_v58 = vpop.eup %6092 }
 0x31b   :  { %2196 = vadd.xlane.f32.xlu2 %v8055_v2  ;;  %10076 = vst [vmem:[#allocation3_spill] sm:$0xff] %v8069_v58  ;;  %v8071_v2 = vpop.eup %6094 }
 0x31c   :  { %2192 = vadd.xlane.f32.xlu1 %v8057_v59  ;;  %v8082_v17 = vpop.eup %6096 }
 0x31d   :  { %v1883_v19 = vpop.xlane.xlu0 %1882  ;;  %v8084_v22 = vpop.eup %6098 }
 0x31e   :  { %v1881_v62 = vpop.xlane.xlu2 %1880  ;;  %v8086_v23 = vpop.eup %6100  ;;  %v2003_v47 = vsub.f32 %v7839_v14, %v1883_v19  ;;  %v2038_v14 = vsub.f32 %v7775_v20, %v8003_v10  ;;  %v2021_v19 = vsub.f32 %v7716_v26, %v7943_v34 }
 0x31f   :  { %v1975_v16 = vpop.xlane.xlu1 %1974  ;;  %v2002_v50 = vsub.f32 %v7836_v0, %v1881_v62  ;;  %v1334_v62 = vpop.f32.mrf.mxu0 }
 0x320   :  { %v2049_v0 = vsub.f32 %v7842_v63, %v1975_v16  ;;  %v8097_v4 = vpop.eup %6102  ;;  %v8102_v63 = vadd.f32 %v1334_v62, %v7882_v52  ;;  %v1509_v16 = vpop.f32.mrf.mxu1  ;;  %v2144_v62 = vmul.f32 1.442695, %v2038_v14 }
 0x321   :  { %v2072_v1 = vmul.f32 1.442695, %v2002_v50  ;;  %10077 = vst [vmem:[#allocation2_spill] sm:$0xff] %v8097_v4  ;;  %v2074_v50 = vmul.f32 1.442695, %v2003_v47 }
 0x322   :  { %1896 = vmax.xlane.f32.xlu0 %v8067_v13  ;;  %v2166_v7 = vmul.f32 1.442695, %v2049_v0 }
 0x323   :  { %2290 = vadd.xlane.f32.xlu2 %v8069_v58  ;;  %6104 = vpow2.f32 %v2072_v1 }
 0x324   :  { %2286 = vadd.xlane.f32.xlu1 %v8071_v2 }
 0x325   :  { %v8078_v56 = vpop.xlane.xlu0 %1884 }
 0x326   :  { %v1977_v9 = vpop.xlane.xlu2 %1976 }
 0x327   :  { %v8080_v61 = vpop.xlane.xlu1 %1958  ;;  %v2050_v26 = vsub.f32 %v7849_v36, %v1977_v9 }
 0x329   :  { %v8099_v43 = vpop.eup %6104  ;;  %v2168_v9 = vmul.f32 1.442695, %v2050_v26 }
 0x32a   :  { %2198 = vadd.xlane.f32.xlu0 %v8084_v22  ;;  %10078 = vst [vmem:[#allocation17_spill] sm:$0xff] %v8099_v43 }
 0x32b   :  { %2268 = vadd.xlane.f32.xlu2 %v8082_v17 }
 0x32c   :  { %2288 = vadd.xlane.f32.xlu1 %v8086_v23 }
 0x32d   :  { %v8093_v39 = vpop.xlane.xlu0 %1978 }
 0x32e   :  { %v2221_v37 = vpop.xlane.xlu2 %2220 }
 0x32f   :  { %v8095_v25 = vpop.xlane.xlu1 %1960  ;;  %6106 = vrcp.f32 %v2221_v37 }
 0x330   :  { %6108 = vpow2.f32 %v2166_v7  ;;  %v1511_v7 = vpop.f32.mrf.mxu1 }
 0x331   :  { %6110 = vpow2.f32 %v2074_v50  ;;  %v2004_v50 = vsub.f32 %v7852_v11, %v8078_v56 }
 0x332   :  { %2200 = vadd.xlane.f32.xlu0 %v8099_v43  ;;  %v2110_v43 = vmul.f32 1.442695, %v2021_v19 }
 0x333   :  { %2292 = vadd.xlane.f32.xlu2 %v8097_v4  ;;  %v8114_v4 = vadd.f32 %v1509_v16, %v7864_v6 }
 0x334   :  { %1898 = vmax.xlane.f32.xlu1 %v8102_v63 }
 0x335   :  { %v2223_v1 = vpop.xlane.xlu0 %2222  ;;  %v6107_v47 = vpop.eup %6106 }
 0x336   :  { %v8111_v0 = vpop.xlane.xlu2 %1962  ;;  %6112 = vrcp.f32 %v2223_v1  ;;  %v8116_v58 = vpop.eup %6108  ;;  %v2396_v20 = vmul.f32 %v6107_v47, %v7869_v41 }
 0x337   :  { %v1887_v37 = vpop.xlane.xlu1 %1886  ;;  %10079 = vst [vmem:[#allocation16_spill] sm:$0xff] %v8116_v58  ;;  %v8119_v10 = vpop.eup %6110  ;;  %6114 = vpow2.f32 %v2144_v62 }
 0x338   :  { %v2005_v34 = vsub.f32 %v7890_v3, %v1887_v37  ;;  %6116 = vpow2.f32 %v2110_v43  ;;  %v2460_v41 = vpack.c.bf16 %v2396_v20, %v2396_v20  ;;  %v2076_v3 = vmul.f32 1.442695, %v2004_v50 }
 0x339   :  { %v8130_v37 = vadd.f32 %v1511_v7, %v7882_v52  ;;  %v2051_v20 = vsub.f32 %v7867_v40, %v8093_v39 }
 0x33a   :  { %2294 = vadd.xlane.f32.xlu0 %v8116_v58  ;;  %v2078_v1 = vmul.f32 1.442695, %v2005_v34  ;;  %v2733_v43 = vunpack.c.l.b16 %v2460_v41 }
 0x33b   :  { %1928 = vmax.xlane.f32.xlu2 %v8114_v4 }
 0x33c   :  { %2202 = vadd.xlane.f32.xlu1 %v8119_v10  ;;  %v6113_v6 = vpop.eup %6112 }
 0x33d   :  { %v2397_v16 = vmul.f32 %v6113_v6, %v7887_v33  ;;  %v1981_v14 = vpop.xlane.xlu0 %1980  ;;  %v8132_v62 = vpop.eup %6114  ;;  %v2020_v33 = vsub.f32 %v7724_v32, %v7951_v51 }
 0x33e   :  { %v2255_v36 = vpop.xlane.xlu2 %2254  ;;  %v8134_v11 = vpop.eup %6116 }
 0x33f   :  { %v2253_v19 = vpop.xlane.xlu1 %2252  ;;  %6118 = vrcp.f32 %v2255_v36  ;;  %v2461_v47 = vpack.c.bf16 %v2397_v16, %v2397_v16  ;;  %v2108_v32 = vmul.f32 1.442695, %v2020_v33  ;;  %v2170_v16 = vmul.f32 1.442695, %v2051_v20 }
 0x340   :  { %6120 = vrcp.f32 %v2253_v19 }
 0x341   :  { %v2734_v58 = vunpack.c.l.b16 %v2461_v47  ;;  %6122 = vpow2.f32 %v2168_v9 }
 0x342   :  { %1930 = vmax.xlane.f32.xlu0 %v8130_v37  ;;  %6124 = vpow2.f32 %v2078_v1 }
 0x343   :  { %2272 = vadd.xlane.f32.xlu2 %v8132_v62  ;;  %v2749_v56 = vpack.c.b16 %v2734_v58, %v2733_v43  ;;  %6126 = vpow2.f32 %v2076_v3 }
 0x344   :  { %2238 = vadd.xlane.f32.xlu1 %v8134_v11  ;;  %6128 = vpow2.f32 %v2108_v32  ;;  %v10082_v32 = vld [vmem:[#allocation69_spill] sm:$0xff] }
 0x345   :  { %v6119_v52 = vpop.eup %6118  ;;  %v2225_v6 = vpop.xlane.xlu0 %2224  ;;  %2821 = vmatmul.bf16.vlgmr.msra.gmra.mxu1 %v2749_v56  ;;  %6130 = vpow2.f32 %v2170_v16 }
 0x346   :  { %v6121_v26 = vpop.eup %6120  ;;  %v2413_v34 = vmul.f32 %v6119_v52, %v7901_v29  ;;  %v8144_v7 = vpop.xlane.xlu2 %1890  ;;  %v10080_v29 = vld [vmem:[#allocation66_spill] sm:$0xff] }
 0x347   :  { %v2412_v50 = vmul.f32 %v6121_v26, %v7903_v54  ;;  %v1889_v41 = vpop.xlane.xlu1 %1888  ;;  %v8147_v58 = vpop.eup %6122  ;;  %v2039_v39 = vsub.f32 %v10080_v29, %v8001_v57  ;;  %v10081_v54 = vld [vmem:[#allocation61_spill] sm:$0xff] }
 0x348   :  { %v2477_v51 = vpack.c.bf16 %v2413_v34, %v2413_v34  ;;  %v8149_v9 = vpop.eup %6124  ;;  %v2052_v47 = vsub.f32 %v10081_v54, %v1981_v14  ;;  %v2022_v14 = vsub.f32 %v10082_v32, %v7984_v35 }
 0x349   :  { %v2476_v36 = vpack.c.bf16 %v2412_v50, %v2412_v50  ;;  %v8151_v40 = vpop.eup %6126  ;;  %v2146_v56 = vmul.f32 1.442695, %v2039_v39 }
 0x34a   :  { %v2879_v19 = vunpack.c.l.b16 %v2477_v51  ;;  %2296 = vadd.xlane.f32.xlu0 %v8147_v58  ;;  %v2172_v20 = vmul.f32 1.442695, %v2052_v47  ;;  %v8160_v26 = vpop.eup %6128  ;;  %v10083_v51 = vld [vmem:[#allocation70_spill] sm:$0xff]  ;;  %v2112_v35 = vmul.f32 1.442695, %v2022_v14 }
 0x34b   :  { %v2878_v1 = vunpack.c.l.b16 %v2476_v36  ;;  %2206 = vadd.xlane.f32.xlu2 %v8149_v9  ;;  %v8162_v50 = vpop.eup %6130  ;;  %v2006_v16 = vsub.f32 %v10083_v51, %v1889_v41  ;;  %v10084_v36 = vld [vmem:[#allocation4_spill] sm:$0xff]  ;;  %v10087_v51 = vld [vmem:[#allocation71_spill] sm:$0xff] }
 0x34c   :  { %2204 = vadd.xlane.f32.xlu1 %v8151_v40 }
 0x34d   :  { %v2894_v3 = vpack.c.b16 %v2879_v19, %v2878_v1  ;;  %v2259_v43 = vpop.xlane.xlu0 %2258  ;;  %v2040_v19 = vsub.f32 %v10084_v36, %v8047_v49  ;;  %v10085_v1 = vld [vmem:[#allocation10_spill] sm:$0xff]  ;;  %v2080_v41 = vmul.f32 1.442695, %v2006_v16  ;;  %v10088_v16 = vld [vmem:[#allocation5_spill] sm:$0xff] }
 0x34e   :  { %v2257_v33 = vpop.xlane.xlu2 %2256  ;;  %6132 = vrcp.f32 %v2259_v43  ;;  %v2023_v36 = vsub.f32 %v10088_v16, %v8019_v15 }
 0x34f   :  { %v1983_v52 = vpop.xlane.xlu1 %1982  ;;  %2966 = vmatmul.bf16.vlgmr.msra.gmra.mxu2 %v2894_v3  ;;  %6134 = vrcp.f32 %v2257_v33  ;;  %v10086_v3 = vld [vmem:[#allocation11_spill] sm:$0xff] }
 0x350   :  { %v2053_v57 = vsub.f32 %v7927_v21, %v1983_v52  ;;  %6136 = vrcp.f32 %v2225_v6 }
 0x351   :  { %6138 = vpow2.f32 %v2146_v56 }
 0x352   :  { %v2174_v34 = vmul.f32 1.442695, %v2053_v57  ;;  %2236 = vadd.xlane.f32.xlu0 %v8160_v26  ;;  %v2148_v57 = vmul.f32 1.442695, %v2040_v19  ;;  %v10089_v19 = vld [vmem:[#allocation58_spill] sm:$0xff] }
 0x354   :  { %6140 = vpow2.f32 %v2174_v34  ;;  %2298 = vadd.xlane.f32.xlu1 %v8162_v50  ;;  %v6133_v21 = vpop.eup %6132 }
 0x355   :  { %6142 = vpow2.f32 %v2172_v20  ;;  %v6135_v6 = vpop.eup %6134  ;;  %v1895_v29 = vpop.xlane.xlu0 %1894  ;;  %v2415_v54 = vmul.f32 %v6133_v21, %v10085_v1 }
 0x356   :  { %v8171_v39 = vpop.xlane.xlu2 %1892  ;;  %v2414_v43 = vmul.f32 %v6135_v6, %v10086_v3  ;;  %v6137_v33 = vpop.eup %6136  ;;  %v2007_v6 = vsub.f32 %v10089_v19, %v8144_v7 }
 0x357   :  { %v2227_v47 = vpop.xlane.xlu1 %2226  ;;  %v2479_v56 = vpack.c.bf16 %v2415_v54, %v2415_v54  ;;  %v8175_v52 = vpop.eup %6138  ;;  %v2398_v21 = vmul.f32 %v6137_v33, %v10087_v51 }
 0x358   :  { %6144 = vrcp.f32 %v2227_v47  ;;  %v2478_v34 = vpack.c.bf16 %v2414_v43, %v2414_v43 }
 0x359   :  { %v2881_v20 = vunpack.c.l.b16 %v2479_v56  ;;  %6146 = vpow2.f32 %v2112_v35  ;;  %v2462_v56 = vpack.c.bf16 %v2398_v21, %v2398_v21  ;;  %v10091_v21 = vld [vmem:[#allocation35_spill] sm:$0xff] }
 0x35a   :  { %v8177_v49 = vpop.eup %6140  ;;  %2274 = vadd.xlane.f32.xlu0 %v8175_v52  ;;  %v2880_v14 = vunpack.c.l.b16 %v2478_v34  ;;  %6148 = vpow2.f32 %v2080_v41  ;;  %v2114_v34 = vmul.f32 1.442695, %v2023_v36  ;;  %v2082_v41 = vmul.f32 1.442695, %v2007_v6 }
 0x35b   :  { %v8179_v32 = vpop.eup %6142  ;;  %2302 = vadd.xlane.f32.xlu2 %v8177_v49  ;;  %6150 = vpow2.f32 %v2148_v57  ;;  %v2009_v36 = vsub.f32 %v10091_v21, %v1895_v29 }
 0x35c   :  { %2300 = vadd.xlane.f32.xlu1 %v8179_v32  ;;  %v2895_v1 = vpack.c.b16 %v2881_v20, %v2880_v14  ;;  %v10090_v20 = vld [vmem:[#allocation62_spill] sm:$0xff] }
 0x35d   :  { %v2261_v35 = vpop.xlane.xlu0 %2260  ;;  %v2041_v14 = vsub.f32 %v10090_v20, %v8080_v61 }
 0x35e   :  { %v6145_v54 = vpop.eup %6144  ;;  %v1987_v47 = vpop.xlane.xlu2 %1986 }
 0x35f   :  { %v1985_v3 = vpop.xlane.xlu1 %1984  ;;  %2971 = vmatmul.bf16.gmra.mxu2 %v2895_v1  ;;  %v2055_v43 = vsub.f32 %v7956_v48, %v1987_v47  ;;  %v2399_v33 = vmul.f32 %v6145_v54, %v7941_v5  ;;  %v8191_v15 = vpop.eup %6146  ;;  %v2735_v48 = vunpack.c.l.b16 %v2462_v56  ;;  %v2150_v61 = vmul.f32 1.442695, %v2041_v14 }
 0x360   :  { %v8193_v16 = vpop.eup %6148  ;;  %v2054_v19 = vsub.f32 %v7961_v38, %v1985_v3  ;;  %v2008_v38 = vsub.f32 %v7936_v45, %v8171_v39 }
 0x361   :  { %v2178_v51 = vmul.f32 1.442695, %v2055_v43  ;;  %v2463_v57 = vpack.c.bf16 %v2399_v33, %v2399_v33  ;;  %v8195_v7 = vpop.eup %6150  ;;  %v2086_v43 = vmul.f32 1.442695, %v2009_v36 }
 0x362   :  { %2208 = vadd.xlane.f32.xlu0 %v8193_v16  ;;  %v2176_v56 = vmul.f32 1.442695, %v2054_v19  ;;  %v2084_v19 = vmul.f32 1.442695, %v2008_v38  ;;  %v10094_v38 = vld [vmem:[#allocation20_spill] sm:$0xff] }
 0x363   :  { %6152 = vpow2.f32 %v2178_v51  ;;  %2240 = vadd.xlane.f32.xlu2 %v8191_v15  ;;  %v2736_v5 = vunpack.c.l.b16 %v2463_v57 }
 0x364   :  { %6154 = vpow2.f32 %v2114_v34  ;;  %2276 = vadd.xlane.f32.xlu1 %v8195_v7 }
 0x365   :  { %6156 = vpow2.f32 %v2082_v41  ;;  %v2750_v6 = vpack.c.b16 %v2736_v5, %v2735_v48  ;;  %v8204_v1 = vpop.xlane.xlu0 %1990  ;;  %v10092_v41 = vld [vmem:[#allocation26_spill] sm:$0xff] }
 0x366   :  { %v2231_v54 = vpop.xlane.xlu2 %2230  ;;  %v2024_v51 = vsub.f32 %v10092_v41, %v8051_v46  ;;  %v10095_v41 = vld [vmem:[#allocation29_spill] sm:$0xff] }
 0x367   :  { %v2229_v47 = vpop.xlane.xlu1 %2228  ;;  %2826 = vmatmul.bf16.gmra.mxu1 %v2750_v6  ;;  %6158 = vrcp.f32 %v2231_v54 }
 0x368   :  { %6160 = vrcp.f32 %v2229_v47  ;;  %v2116_v6 = vmul.f32 1.442695, %v2024_v51  ;;  %v2057_v51 = vsub.f32 %v10095_v41, %v8204_v1  ;;  %v10096_v1 = vld [vmem:[#allocation28_spill] sm:$0xff] }
 0x369   :  { %v8206_v33 = vpop.eup %6152  ;;  %6162 = vrcp.f32 %v2261_v35 }
 0x36a   :  { %v8208_v34 = vpop.eup %6154  ;;  %6164 = vpow2.f32 %v2150_v61 }
 0x36b   :  { %v8210_v29 = vpop.eup %6156  ;;  %2306 = vadd.xlane.f32.xlu2 %v8206_v33  ;;  %2242 = vadd.xlane.f32.xlu0 %v8208_v34  ;;  %6166 = vpow2.f32 %v2086_v43 }
 0x36c   :  { %2210 = vadd.xlane.f32.xlu1 %v8210_v29  ;;  %6168 = vpow2.f32 %v2176_v56 }
 0x36d   :  { %v6159_v3 = vpop.eup %6158  ;;  %v2235_v35 = vpop.xlane.xlu0 %2234 }
 0x36e   :  { %v6161_v57 = vpop.eup %6160  ;;  %v1989_v20 = vpop.xlane.xlu2 %1988  ;;  %v2401_v14 = vmul.f32 %v6159_v3, %v7975_v53  ;;  %v10093_v53 = vld [vmem:[#allocation65_spill] sm:$0xff]  ;;  %v2042_v3 = vsub.f32 %v10094_v38, %v8095_v25 }
 0x36f   :  { %v2263_v48 = vpop.xlane.xlu1 %2262  ;;  %v2056_v5 = vsub.f32 %v7989_v30, %v1989_v20  ;;  %v2400_v21 = vmul.f32 %v6161_v57, %v7977_v8  ;;  %v6163_v36 = vpop.eup %6162  ;;  %v2025_v30 = vsub.f32 %v10093_v53, %v8049_v55 }
 0x370   :  { %6170 = vrcp.f32 %v2263_v48  ;;  %v2465_v45 = vpack.c.bf16 %v2401_v14, %v2401_v14  ;;  %v8222_v39 = vpop.eup %6164  ;;  %v2416_v56 = vmul.f32 %v6163_v36, %v7958_v24  ;;  %v2152_v25 = vmul.f32 1.442695, %v2042_v3 }
 0x371   :  { %6172 = vrcp.f32 %v2235_v35  ;;  %v2180_v46 = vmul.f32 1.442695, %v2056_v5  ;;  %v2464_v54 = vpack.c.bf16 %v2400_v21, %v2400_v21  ;;  %v8224_v61 = vpop.eup %6166  ;;  %v2118_v48 = vmul.f32 1.442695, %v2025_v30 }
 0x372   :  { %v2738_v47 = vunpack.c.l.b16 %v2465_v45  ;;  %v8226_v43 = vpop.eup %6168  ;;  %v2480_v21 = vpack.c.bf16 %v2416_v56, %v2416_v56 }
 0x373   :  { %6174 = vpow2.f32 %v2180_v46  ;;  %2278 = vadd.xlane.f32.xlu2 %v8222_v39  ;;  %2214 = vadd.xlane.f32.xlu0 %v8224_v61  ;;  %v2737_v8 = vunpack.c.l.b16 %v2464_v54 }
 0x374   :  { %6176 = vpow2.f32 %v2084_v19  ;;  %2304 = vadd.xlane.f32.xlu1 %v8226_v43  ;;  %v2182_v19 = vmul.f32 1.442695, %v2057_v51 }
 0x375   :  { %6178 = vpow2.f32 %v2116_v6  ;;  %v2751_v57 = vpack.c.b16 %v2738_v47, %v2737_v8  ;;  %v1993_v35 = vpop.xlane.xlu0 %1992  ;;  %v10097_v8 = vld [vmem:[#allocation19_spill] sm:$0xff] }
 0x376   :  { %v6171_v55 = vpop.eup %6170  ;;  %v2233_v20 = vpop.xlane.xlu2 %2232  ;;  %v2058_v47 = vsub.f32 %v8006_v27, %v1993_v35  ;;  %v2043_v56 = vsub.f32 %v10097_v8, %v8111_v0 }
 0x377   :  { %v6173_v14 = vpop.eup %6172  ;;  %v2265_v5 = vpop.xlane.xlu1 %2264  ;;  %2831 = vmatmul.bf16.gmra.mxu1 %v2751_v57  ;;  %6180 = vrcp.f32 %v2233_v20  ;;  %v2417_v24 = vmul.f32 %v6171_v55, %v7993_v42  ;;  %v2882_v42 = vunpack.c.l.b16 %v2480_v21 }
 0x378   :  { %6182 = vrcp.f32 %v2265_v5  ;;  %v2403_v46 = vmul.f32 %v6173_v14, %v10096_v1  ;;  %v2184_v57 = vmul.f32 1.442695, %v2058_v47  ;;  %v2154_v5 = vmul.f32 1.442695, %v2043_v56 }
 0x379   :  { %v8239_v36 = vpop.eup %6174  ;;  %v2481_v45 = vpack.c.bf16 %v2417_v24, %v2417_v24  ;;  %6184 = vpow2.f32 %v2118_v48 }
 0x37a   :  { %v8241_v6 = vpop.eup %6176  ;;  %6186 = vpow2.f32 %v2152_v25  ;;  %v2467_v27 = vpack.c.bf16 %v2403_v46, %v2403_v46 }
 0x37b   :  { %v8244_v54 = vpop.eup %6178  ;;  %2212 = vadd.xlane.f32.xlu2 %v8241_v6  ;;  %2308 = vadd.xlane.f32.xlu0 %v8239_v36  ;;  %v2883_v53 = vunpack.c.l.b16 %v2481_v45  ;;  %6188 = vpow2.f32 %v2182_v19 }
 0x37c   :  { %2244 = vadd.xlane.f32.xlu1 %v8244_v54  ;;  %v2740_v25 = vunpack.c.l.b16 %v2467_v27 }
 0x37d   :  { %v6181_v30 = vpop.eup %6180  ;;  %v2896_v38 = vpack.c.b16 %v2883_v53, %v2882_v42  ;;  %v2189_v3 = vpop.xlane.xlu0 %2188 }
 0x37e   :  { %v2267_v41 = vpop.xlane.xlu2 %2266  ;;  %v2402_v51 = vmul.f32 %v6181_v30, %v8008_v60  ;;  %v6183_v35 = vpop.eup %6182 }
 0x37f   :  { %v1995_v55 = vpop.xlane.xlu1 %1994  ;;  %2976 = vmatmul.bf16.gmra.mxu2 %v2896_v38  ;;  %6190 = vrcp.f32 %v2267_v41  ;;  %v8254_v48 = vpop.eup %6184  ;;  %v2418_v60 = vmul.f32 %v6183_v35, %v8010_v31 }
 0x380   :  { %v2059_v20 = vsub.f32 %v8026_v28, %v1995_v55  ;;  %v2466_v14 = vpack.c.bf16 %v2402_v51, %v2402_v51  ;;  %v8256_v24 = vpop.eup %6186  ;;  %6192 = vrcp.f32 %v2189_v3  ;;  %v10098_v3 = vld [vmem:[#allocation68_spill] sm:$0xff] }
 0x381   :  { %v8258_v19 = vpop.eup %6188  ;;  %6194 = vpow2.f32 %v2184_v57  ;;  %v2482_v53 = vpack.c.bf16 %v2418_v60, %v2418_v60 }
 0x382   :  { %v2186_v0 = vmul.f32 1.442695, %v2059_v20  ;;  %v2739_v21 = vunpack.c.l.b16 %v2466_v14 }
 0x383   :  { %2246 = vadd.xlane.f32.xlu2 %v8254_v48  ;;  %2280 = vadd.xlane.f32.xlu0 %v8256_v24  ;;  %v2884_v51 = vunpack.c.l.b16 %v2482_v53 }
 0x384   :  { %6196 = vpow2.f32 %v2186_v0  ;;  %2310 = vadd.xlane.f32.xlu1 %v8258_v19  ;;  %v2752_v28 = vpack.c.b16 %v2740_v25, %v2739_v21 }
 0x385   :  { %6198 = vpow2.f32 %v2154_v5  ;;  %v6191_v45 = vpop.eup %6190  ;;  %v2285_v1 = vpop.xlane.xlu0 %2284 }
 0x386   :  { %v2195_v46 = vpop.xlane.xlu2 %2194  ;;  %v2419_v42 = vmul.f32 %v6191_v45, %v8021_v44  ;;  %v6193_v30 = vpop.eup %6192 }
 0x387   :  { %v2191_v47 = vpop.xlane.xlu1 %2190  ;;  %2836 = vmatmul.bf16.gmra.mxu1 %v2752_v28  ;;  %v8265_v8 = vpop.eup %6194  ;;  %v2380_v41 = vmul.f32 %v6193_v30, %v10098_v3 }
 0x388   :  { %6200 = vrcp.f32 %v2191_v47  ;;  %v2483_v56 = vpack.c.bf16 %v2419_v42, %v2419_v42 }
 0x389   :  { %v2444_v20 = vpack.c.bf16 %v2380_v41, %v2380_v41 }
 0x38a   :  { %v8267_v38 = vpop.eup %6196  ;;  %v2885_v27 = vunpack.c.l.b16 %v2483_v56 }
 0x38b   :  { %v8269_v31 = vpop.eup %6198  ;;  %2312 = vadd.xlane.f32.xlu2 %v8265_v8  ;;  %2314 = vadd.xlane.f32.xlu0 %v8267_v38  ;;  %v2588_v21 = vunpack.c.l.b16 %v2444_v20 }
 0x38c   :  { %2282 = vadd.xlane.f32.xlu1 %v8269_v31  ;;  %v2897_v44 = vpack.c.b16 %v2885_v27, %v2884_v51 }
 0x38d   :  { %v2271_v55 = vpop.xlane.xlu0 %2270 }
 0x38e   :  { %v6201_v57 = vpop.eup %6200  ;;  %v2197_v35 = vpop.xlane.xlu2 %2196 }
 0x38f   :  { %v2381_v14 = vmul.f32 %v6201_v57, %v8039_v12  ;;  %v2193_v5 = vpop.xlane.xlu1 %2192  ;;  %2981 = vmatmul.bf16.gmra.mxu2 %v2897_v44 }
 0x390   :  { %6202 = vrcp.f32 %v2193_v5 }
 0x391   :  { %6204 = vrcp.f32 %v2285_v1  ;;  %v2445_v0 = vpack.c.bf16 %v2381_v14, %v2381_v14 }
 0x392   :  { %6206 = vrcp.f32 %v2195_v46  ;;  %v10099_v46 = vld [vmem:[#allocation67_spill] sm:$0xff] }
 0x393   :  { %v2589_v25 = vunpack.c.l.b16 %v2445_v0 }
 0x395   :  { %v2604_v60 = vpack.c.b16 %v2589_v25, %v2588_v21  ;;  %v1897_v45 = vpop.xlane.xlu0 %1896 }
 0x396   :  { %v6203_v28 = vpop.eup %6202  ;;  %v2291_v47 = vpop.xlane.xlu2 %2290  ;;  %v2010_v30 = vsub.f32 %v8067_v13, %v1897_v45 }
 0x397   :  { %v6205_v42 = vpop.eup %6204  ;;  %2676 = vmatmul.bf16.vlgmr.msrb.gmra.mxu0 %v2604_v60  ;;  %v2287_v53 = vpop.xlane.xlu1 %2286  ;;  %v2382_v3 = vmul.f32 %v6203_v28, %v8057_v59  ;;  %v10100_v28 = vld [vmem:[#allocation64_spill] sm:$0xff] }
 0x398   :  { %v6207_v56 = vpop.eup %6206  ;;  %6208 = vrcp.f32 %v2287_v53  ;;  %v2088_v12 = vmul.f32 1.442695, %v2010_v30  ;;  %v2428_v1 = vmul.f32 %v6205_v42, %v8035_v18 }
 0x399   :  { %6210 = vrcp.f32 %v2271_v55  ;;  %v2383_v41 = vmul.f32 %v6207_v56, %v10099_v46  ;;  %v2446_v51 = vpack.c.bf16 %v2382_v3, %v2382_v3 }
 0x39a   :  { %6212 = vpow2.f32 %v2088_v12  ;;  %v2492_v20 = vpack.c.bf16 %v2428_v1, %v2428_v1 }
 0x39b   :  { %6214 = vrcp.f32 %v2197_v35  ;;  %v2447_v5 = vpack.c.bf16 %v2383_v41, %v2383_v41  ;;  %v2590_v18 = vunpack.c.l.b16 %v2446_v51 }
 0x39c   :  { %v3023_v21 = vunpack.c.l.b16 %v2492_v20 }
 0x39d   :  { %v2199_v44 = vpop.xlane.xlu0 %2198  ;;  %v2591_v25 = vunpack.c.l.b16 %v2447_v5  ;;  %v10102_v5 = vld [vmem:[#allocation3_spill] sm:$0xff] }
 0x39e   :  { %v6209_v27 = vpop.eup %6208  ;;  %v2269_v57 = vpop.xlane.xlu2 %2268  ;;  %6216 = vrcp.f32 %v2199_v44 }
 0x39f   :  { %v2429_v14 = vmul.f32 %v6209_v27, %v8071_v2  ;;  %v2289_v13 = vpop.xlane.xlu1 %2288  ;;  %v6211_v0 = vpop.eup %6210  ;;  %v2605_v53 = vpack.c.b16 %v2591_v25, %v2590_v18 }
 0x3a0   :  { %6218 = vrcp.f32 %v2289_v13  ;;  %v8281_v59 = vpop.eup %6212  ;;  %v2421_v45 = vmul.f32 %v6211_v0, %v10100_v28 }
 0x3a1   :  { %v2493_v55 = vpack.c.bf16 %v2429_v14, %v2429_v14  ;;  %6220 = vrcp.f32 %v2269_v57  ;;  %2216 = vadd.xlane.f32.xlu1 %v8281_v59  ;;  %v6215_v60 = vpop.eup %6214  ;;  %v10101_v14 = vld [vmem:[#allocation63_spill] sm:$0xff] }
 0x3a2   :  { %6222 = vrcp.f32 %v2291_v47  ;;  %v2485_v51 = vpack.c.bf16 %v2421_v45, %v2421_v45  ;;  %v2384_v13 = vmul.f32 %v6215_v60, %v10101_v14 }
 0x3a3   :  { %v3024_v35 = vunpack.c.l.b16 %v2493_v55 }
 0x3a4   :  { %v6217_v2 = vpop.eup %6216  ;;  %v2887_v18 = vunpack.c.l.b16 %v2485_v51  ;;  %v2448_v45 = vpack.c.bf16 %v2384_v13, %v2384_v13  ;;  %v10103_v13 = vld [vmem:[#allocation16_spill] sm:$0xff] }
 0x3a5   :  { %v3039_v42 = vpack.c.b16 %v3024_v35, %v3023_v21  ;;  %v2201_v56 = vpop.xlane.xlu0 %2200  ;;  %v2385_v27 = vmul.f32 %v6217_v2, %v8084_v22 }
 0x3a6   :  { %v6219_v30 = vpop.eup %6218  ;;  %v2293_v12 = vpop.xlane.xlu2 %2292 }
 0x3a7   :  { %v6221_v3 = vpop.eup %6220  ;;  %3111 = vmatmul.bf16.vlgmr.msra.gmra.mxu3 %v3039_v42  ;;  %v1899_v1 = vpop.xlane.xlu1 %1898  ;;  %2681 = vmatmul.bf16.gmra.mxu0 %v2605_v53  ;;  %v2430_v44 = vmul.f32 %v6219_v30, %v8086_v23  ;;  %v2449_v21 = vpack.c.bf16 %v2385_v27, %v2385_v27  ;;  %v2592_v30 = vunpack.c.l.b16 %v2448_v45 }
 0x3a8   :  { %v6223_v46 = vpop.eup %6222  ;;  %v2011_v47 = vsub.f32 %v8102_v63, %v1899_v1  ;;  %v2420_v41 = vmul.f32 %v6221_v3, %v8082_v17 }
 0x3a9   :  { %v2431_v0 = vmul.f32 %v6223_v46, %v10102_v5  ;;  %v2494_v35 = vpack.c.bf16 %v2430_v44, %v2430_v44  ;;  %v2593_v2 = vunpack.c.l.b16 %v2449_v21 }
 0x3aa   :  { %v2090_v57 = vmul.f32 1.442695, %v2011_v47  ;;  %v2484_v20 = vpack.c.bf16 %v2420_v41, %v2420_v41 }
 0x3ab   :  { %v2495_v23 = vpack.c.bf16 %v2431_v0, %v2431_v0  ;;  %v3025_v42 = vunpack.c.l.b16 %v2494_v35  ;;  %v2606_v46 = vpack.c.b16 %v2593_v2, %v2592_v30  ;;  %v10104_v0 = vld [vmem:[#allocation17_spill] sm:$0xff] }
 0x3ac   :  { %6224 = vpow2.f32 %v2090_v57  ;;  %v2886_v55 = vunpack.c.l.b16 %v2484_v20 }
 0x3ad   :  { %v2295_v25 = vpop.xlane.xlu0 %2294  ;;  %v3026_v3 = vunpack.c.l.b16 %v2495_v23 }
 0x3ae   :  { %v2898_v63 = vpack.c.b16 %v2887_v18, %v2886_v55  ;;  %v1929_v28 = vpop.xlane.xlu2 %1928  ;;  %6226 = vrcp.f32 %v2295_v25  ;;  %v10105_v18 = vld [vmem:[#allocation2_spill] sm:$0xff] }
 0x3af   :  { %v2203_v17 = vpop.xlane.xlu1 %2202  ;;  %v2026_v22 = vsub.f32 %v8114_v4, %v1929_v28  ;;  %v3040_v47 = vpack.c.b16 %v3026_v3, %v3025_v42 }
 0x3b0   :  { %6228 = vrcp.f32 %v2203_v17  ;;  %2986 = vmatmul.bf16.gmra.mxu2 %v2898_v63 }
 0x3b1   :  { %6230 = vrcp.f32 %v2201_v56  ;;  %v2120_v60 = vmul.f32 1.442695, %v2026_v22 }
 0x3b2   :  { %v8292_v53 = vpop.eup %6224  ;;  %6232 = vrcp.f32 %v2293_v12 }
 0x3b3   :  { %6234 = vpow2.f32 %v2120_v60  ;;  %2218 = vadd.xlane.f32.xlu2 %v8292_v53 }
 0x3b4   :  { %v6227_v1 = vpop.eup %6226 }
 0x3b5   :  { %v1931_v41 = vpop.xlane.xlu0 %1930  ;;  %v2433_v5 = vmul.f32 %v6227_v1, %v10103_v13 }
 0x3b6   :  { %v6229_v4 = vpop.eup %6228  ;;  %v2273_v51 = vpop.xlane.xlu2 %2272  ;;  %v2027_v56 = vsub.f32 %v8130_v37, %v1931_v41 }
 0x3b7   :  { %v6231_v27 = vpop.eup %6230  ;;  %v2239_v44 = vpop.xlane.xlu1 %2238  ;;  %2686 = vmatmul.bf16.gmra.mxu0 %v2606_v46  ;;  %3116 = vmatmul.bf16.gmra.mxu3 %v3040_v47  ;;  %v2387_v14 = vmul.f32 %v6229_v4, %v8119_v10  ;;  %v2497_v25 = vpack.c.bf16 %v2433_v5, %v2433_v5 }
 0x3b8   :  { %v6233_v57 = vpop.eup %6232  ;;  %v2122_v12 = vmul.f32 1.442695, %v2027_v56  ;;  %v2386_v55 = vmul.f32 %v6231_v27, %v10104_v0 }
 0x3b9   :  { %v8296_v20 = vpop.eup %6234  ;;  %v2432_v21 = vmul.f32 %v6233_v57, %v10105_v18  ;;  %v2451_v35 = vpack.c.bf16 %v2387_v14, %v2387_v14  ;;  %v3028_v23 = vunpack.c.l.b16 %v2497_v25 }
 0x3ba   :  { %2248 = vadd.xlane.f32.xlu0 %v8296_v20  ;;  %6236 = vpow2.f32 %v2122_v12  ;;  %v2450_v17 = vpack.c.bf16 %v2386_v55, %v2386_v55 }
 0x3bb   :  { %6238 = vrcp.f32 %v2239_v44  ;;  %v2496_v22 = vpack.c.bf16 %v2432_v21, %v2432_v21  ;;  %v2595_v10 = vunpack.c.l.b16 %v2451_v35 }
 0x3bc   :  { %v2594_v60 = vunpack.c.l.b16 %v2450_v17 }
 0x3bd   :  { %v2297_v37 = vpop.xlane.xlu0 %2296  ;;  %v3027_v2 = vunpack.c.l.b16 %v2496_v22 }
 0x3be   :  { %v2207_v63 = vpop.xlane.xlu2 %2206  ;;  %v2607_v30 = vpack.c.b16 %v2595_v10, %v2594_v60 }
 0x3bf   :  { %v2205_v28 = vpop.xlane.xlu1 %2204  ;;  %v3041_v3 = vpack.c.b16 %v3028_v23, %v3027_v2 }
 0x3c0   :  { %6240 = vrcp.f32 %v2205_v28  ;;  %v8303_v45 = vpop.eup %6236 }
 0x3c1   :  { %6242 = vrcp.f32 %v2207_v63  ;;  %2250 = vadd.xlane.f32.xlu1 %v8303_v45  ;;  %v6239_v42 = vpop.eup %6238 }
 0x3c2   :  { %6244 = vrcp.f32 %v2297_v37  ;;  %v2405_v56 = vmul.f32 %v6239_v42, %v8134_v11 }
 0x3c4   :  { %v2469_v21 = vpack.c.bf16 %v2405_v56, %v2405_v56 }
 0x3c5   :  { %v2237_v46 = vpop.xlane.xlu0 %2236 }
 0x3c6   :  { %v6241_v1 = vpop.eup %6240  ;;  %6246 = vrcp.f32 %v2237_v46  ;;  %v2742_v28 = vunpack.c.l.b16 %v2469_v21 }
 0x3c7   :  { %v6243_v47 = vpop.eup %6242  ;;  %v2299_v4 = vpop.xlane.xlu1 %2298  ;;  %2691 = vmatmul.bf16.gmra.mxu0 %v2607_v30  ;;  %3121 = vmatmul.bf16.gmra.mxu3 %v3041_v3  ;;  %v2388_v27 = vmul.f32 %v6241_v1, %v8151_v40 }
 0x3c8   :  { %v6245_v41 = vpop.eup %6244  ;;  %6248 = vrcp.f32 %v2299_v4  ;;  %v2389_v44 = vmul.f32 %v6243_v47, %v8149_v9 }
 0x3c9   :  { %6250 = vrcp.f32 %v2273_v51  ;;  %v2434_v57 = vmul.f32 %v6245_v41, %v8147_v58  ;;  %v2452_v14 = vpack.c.bf16 %v2388_v27, %v2388_v27 }
 0x3ca   :  { %v2453_v13 = vpack.c.bf16 %v2389_v44, %v2389_v44 }
 0x3cb   :  { %v2498_v25 = vpack.c.bf16 %v2434_v57, %v2434_v57  ;;  %v2596_v51 = vunpack.c.l.b16 %v2452_v14 }
 0x3cc   :  { %v6247_v12 = vpop.eup %6246  ;;  %v2597_v58 = vunpack.c.l.b16 %v2453_v13 }
 0x3cd   :  { %v2275_v55 = vpop.xlane.xlu0 %2274  ;;  %v2404_v18 = vmul.f32 %v6247_v12, %v8160_v26  ;;  %v3029_v17 = vunpack.c.l.b16 %v2498_v25 }
 0x3ce   :  { %v6249_v5 = vpop.eup %6248  ;;  %v2303_v0 = vpop.xlane.xlu2 %2302  ;;  %v2608_v60 = vpack.c.b16 %v2597_v58, %v2596_v51 }
 0x3cf   :  { %6252 = vrcp.f32 %v2303_v0  ;;  %v2301_v35 = vpop.xlane.xlu1 %2300  ;;  %v2435_v40 = vmul.f32 %v6249_v5, %v8162_v50  ;;  %v2468_v9 = vpack.c.bf16 %v2404_v18, %v2404_v18  ;;  %v6251_v11 = vpop.eup %6250 }
 0x3d0   :  { %6254 = vrcp.f32 %v2301_v35  ;;  %v2422_v26 = vmul.f32 %v6251_v11, %v8132_v62 }
 0x3d1   :  { %6256 = vrcp.f32 %v2275_v55  ;;  %v2499_v37 = vpack.c.bf16 %v2435_v40, %v2435_v40  ;;  %v2741_v63 = vunpack.c.l.b16 %v2468_v9 }
 0x3d2   :  { %v2486_v47 = vpack.c.bf16 %v2422_v26, %v2422_v26 }
 0x3d3   :  { %v3030_v22 = vunpack.c.l.b16 %v2499_v37  ;;  %v2753_v10 = vpack.c.b16 %v2742_v28, %v2741_v63 }
 0x3d4   :  { %v2888_v27 = vunpack.c.l.b16 %v2486_v47 }
 0x3d5   :  { %v6253_v23 = vpop.eup %6252  ;;  %v3042_v2 = vpack.c.b16 %v3030_v22, %v3029_v17  ;;  %v2209_v30 = vpop.xlane.xlu0 %2208  ;;  %2841 = vmatmul.bf16.gmra.mxu1 %v2753_v10 }
 0x3d6   :  { %v6255_v42 = vpop.eup %6254  ;;  %v2241_v50 = vpop.xlane.xlu2 %2240  ;;  %v2437_v41 = vmul.f32 %v6253_v23, %v8177_v49 }
 0x3d7   :  { %v6257_v3 = vpop.eup %6256  ;;  %v2277_v1 = vpop.xlane.xlu1 %2276  ;;  %2696 = vmatmul.bf16.gmra.mxu0 %v2608_v60  ;;  %3126 = vmatmul.bf16.gmra.mxu3 %v3042_v2  ;;  %v2436_v4 = vmul.f32 %v6255_v42, %v8179_v32  ;;  %6258 = vrcp.f32 %v2241_v50 }
 0x3d8   :  { %v2423_v46 = vmul.f32 %v6257_v3, %v8175_v52  ;;  %6260 = vrcp.f32 %v2209_v30  ;;  %v2501_v57 = vpack.c.bf16 %v2437_v41, %v2437_v41 }
 0x3d9   :  { %v2500_v56 = vpack.c.bf16 %v2436_v4, %v2436_v4  ;;  %6262 = vrcp.f32 %v2277_v1 }
 0x3da   :  { %v2487_v62 = vpack.c.bf16 %v2423_v46, %v2423_v46  ;;  %v3032_v55 = vunpack.c.l.b16 %v2501_v57 }
 0x3db   :  { %v3031_v32 = vunpack.c.l.b16 %v2500_v56 }
 0x3dc   :  { %v2889_v44 = vunpack.c.l.b16 %v2487_v62 }
 0x3dd   :  { %v6259_v0 = vpop.eup %6258  ;;  %v3043_v35 = vpack.c.b16 %v3032_v55, %v3031_v32 }
 0x3de   :  { %v2307_v12 = vpop.xlane.xlu2 %2306  ;;  %v2243_v14 = vpop.xlane.xlu0 %2242  ;;  %v2899_v13 = vpack.c.b16 %v2889_v44, %v2888_v27  ;;  %v2406_v49 = vmul.f32 %v6259_v0, %v8191_v15 }
 0x3df   :  { %v2211_v5 = vpop.xlane.xlu1 %2210  ;;  %6264 = vrcp.f32 %v2243_v14  ;;  %v6261_v52 = vpop.eup %6260 }
 0x3e0   :  { %2991 = vmatmul.bf16.gmra.mxu2 %v2899_v13  ;;  %6266 = vrcp.f32 %v2211_v5  ;;  %v2390_v18 = vmul.f32 %v6261_v52, %v8193_v16  ;;  %v6263_v21 = vpop.eup %6262  ;;  %v2470_v37 = vpack.c.bf16 %v2406_v49, %v2406_v49  ;;  %v3218_v13 = vld [vmem:[%s9774_s6 + $0x8] sm:$0xf] }
 0x3e1   :  { %6268 = vrcp.f32 %v2307_v12  ;;  %v2424_v16 = vmul.f32 %v6263_v21, %v8195_v7  ;;  %v3518_v55 = vsel %vm3284_vm2, %v3218_v13, 0 }
 0x3e2   :  { %v2454_v28 = vpack.c.bf16 %v2390_v18, %v2390_v18  ;;  %v2743_v10 = vunpack.c.l.b16 %v2470_v37  ;;  %3527 = vmatpush.bf16.msrb.mxu2 %v3518_v55  ;;  %v3219_v18 = vld [vmem:[%s9774_s6 + $0xc] sm:$0xf] }
 0x3e4   :  { %v2598_v23 = vunpack.c.l.b16 %v2454_v28  ;;  %v2967_v28 = vpop.f32.mrf.mxu2 }
 0x3e5   :  { %v6265_v40 = vpop.eup %6264 }
 0x3e6   :  { %v2279_v25 = vpop.xlane.xlu2 %2278  ;;  %v2215_v9 = vpop.xlane.xlu0 %2214  ;;  %v2407_v58 = vmul.f32 %v6265_v40, %v8208_v34  ;;  %v2488_v34 = vpack.c.bf16 %v2424_v16, %v2424_v16  ;;  %v3634_v40 = vsel %vm3284_vm2, %v3219_v18, 0 }
 0x3e7   :  { %v6267_v11 = vpop.eup %6266  ;;  %6270 = vrcp.f32 %v2279_v25  ;;  %v2305_v51 = vpop.xlane.xlu1 %2304  ;;  %3131 = vmatmul.bf16.gmra.mxu3 %v3043_v35  ;;  %v3217_v25 = vld [vmem:[%s9774_s6 + $0x4] sm:$0xf] }
 0x3e8   :  { %6272 = vrcp.f32 %v2215_v9  ;;  %v2391_v63 = vmul.f32 %v6267_v11, %v8210_v29  ;;  %v6269_v17 = vpop.eup %6268  ;;  %v2471_v15 = vpack.c.bf16 %v2407_v58, %v2407_v58  ;;  %3643 = vmatpush.bf16.msrb.mxu3 %v3634_v40  ;;  %v3402_v11 = vsel %vm3284_vm2, %v3217_v25, 0 }
 0x3e9   :  { %6274 = vrcp.f32 %v2305_v51  ;;  %v2439_v2 = vmul.f32 %v6269_v17, %v8206_v33  ;;  %v2890_v33 = vunpack.c.l.b16 %v2488_v34  ;;  %3411 = vmatpush.bf16.msrb.mxu1 %v3402_v11 }
 0x3ea   :  { %v2455_v22 = vpack.c.bf16 %v2391_v63, %v2391_v63  ;;  %v2744_v26 = vunpack.c.l.b16 %v2471_v15 }
 0x3eb   :  { %v2503_v62 = vpack.c.bf16 %v2439_v2, %v2439_v2 }
 0x3ec   :  { %v2599_v60 = vunpack.c.l.b16 %v2455_v22  ;;  %v2754_v50 = vpack.c.b16 %v2744_v26, %v2743_v10 }
 0x3ed   :  { %v6271_v42 = vpop.eup %6270  ;;  %v3034_v14 = vunpack.c.l.b16 %v2503_v62 }
 0x3ee   :  { %v6273_v30 = vpop.eup %6272  ;;  %v2213_v3 = vpop.xlane.xlu2 %2212  ;;  %v2609_v29 = vpack.c.b16 %v2599_v60, %v2598_v23  ;;  %v2425_v46 = vmul.f32 %v6271_v42, %v8222_v39  ;;  %2846 = vmatmul.bf16.gmra.mxu1 %v2754_v50 }
 0x3ef   :  { %v2309_v1 = vpop.xlane.xlu0 %2308  ;;  %v6275_v47 = vpop.eup %6274  ;;  %6276 = vrcp.f32 %v2213_v3  ;;  %v2393_v56 = vmul.f32 %v6273_v30, %v8224_v61 }
 0x3f0   :  { %v2245_v4 = vpop.xlane.xlu1 %2244  ;;  %2701 = vmatmul.bf16.gmra.mxu0 %v2609_v29  ;;  %v2489_v7 = vpack.c.bf16 %v2425_v46, %v2425_v46  ;;  %v2438_v41 = vmul.f32 %v6275_v47, %v8226_v43 }
 0x3f1   :  { %6278 = vrcp.f32 %v2245_v4  ;;  %v2457_v32 = vpack.c.bf16 %v2393_v56, %v2393_v56 }
 0x3f2   :  { %6280 = vrcp.f32 %v2309_v1  ;;  %v2891_v27 = vunpack.c.l.b16 %v2489_v7  ;;  %v2502_v44 = vpack.c.bf16 %v2438_v41, %v2438_v41  ;;  %v2969_v7 = vpop.f32.mrf.mxu2 }
 0x3f3   :  { %v2601_v58 = vunpack.c.l.b16 %v2457_v32 }
 0x3f4   :  { %v2900_v57 = vpack.c.b16 %v2891_v27, %v2890_v33  ;;  %v3033_v12 = vunpack.c.l.b16 %v2502_v44 }
 0x3f5   :  { %v6277_v39 = vpop.eup %6276 }
 0x3f6   :  { %2996 = vmatmul.bf16.gmra.mxu2 %v2900_v57  ;;  %v2247_v5 = vpop.xlane.xlu2 %2246  ;;  %v3044_v0 = vpack.c.b16 %v3034_v14, %v3033_v12  ;;  %v2392_v52 = vmul.f32 %v6277_v39, %v8241_v6  ;;  %v3216_v6 = vld [vmem:[%s9774_s6] sm:$0xf] }
 0x3f7   :  { %v2281_v43 = vpop.xlane.xlu0 %2280  ;;  %v6279_v49 = vpop.eup %6278  ;;  %6282 = vrcp.f32 %v2247_v5  ;;  %v3286_v9 = vsel %vm3284_vm2, %v3216_v6, 0 }
 0x3f8   :  { %v2311_v61 = vpop.xlane.xlu1 %2310  ;;  %v6281_v21 = vpop.eup %6280  ;;  %3136 = vmatmul.bf16.gmra.mxu3 %v3044_v0  ;;  %v2456_v35 = vpack.c.bf16 %v2392_v52, %v2392_v52  ;;  %v2408_v37 = vmul.f32 %v6279_v49, %v8244_v54  ;;  %3295 = vmatpush.bf16.msra.mxu0 %v3286_v9  ;;  %v3184_v52 = vpack.c.bf16 %v2967_v28, %v2967_v28 }
 0x3f9   :  { %6284 = vrcp.f32 %v2311_v61  ;;  %v2440_v63 = vmul.f32 %v6281_v21, %v8239_v36 }
 0x3fa   :  { %6286 = vrcp.f32 %v2281_v43  ;;  %v2600_v51 = vunpack.c.l.b16 %v2456_v35  ;;  %v2472_v23 = vpack.c.bf16 %v2408_v37, %v2408_v37  ;;  %v2972_v39 = vpop.f32.mrf.mxu2  ;;  %v3185_v43 = vpack.c.bf16 %v2969_v7, %v2969_v7 }
 0x3fb   :  { %v2504_v42 = vpack.c.bf16 %v2440_v63, %v2440_v63  ;;  %v3186_v6 = vpack.c.bf16 %v2972_v39, %v2972_v39 }
 0x3fc   :  { %v2610_v17 = vpack.c.b16 %v2601_v58, %v2600_v51  ;;  %v2745_v34 = vunpack.c.l.b16 %v2472_v23 }
 0x3fd   :  { %v6283_v15 = vpop.eup %6282  ;;  %v3035_v3 = vunpack.c.l.b16 %v2504_v42  ;;  %v3471_v51 = vunpack.c.l.b16 %v3186_v6 }
 0x3fe   :  { %v2313_v22 = vpop.xlane.xlu2 %2312  ;;  %v2409_v26 = vmul.f32 %v6283_v15, %v8254_v48  ;;  %v8356_v15 = vpop.f32.mrf.mxu1 }
 0x3ff   :  { %v6285_v16 = vpop.eup %6284  ;;  %v2315_v10 = vpop.xlane.xlu0 %2314  ;;  %6288 = vrcp.f32 %v2313_v22 }
 0x400   :  { %v2283_v60 = vpop.xlane.xlu1 %2282  ;;  %v2441_v2 = vmul.f32 %v6285_v16, %v8258_v19  ;;  %v6287_v50 = vpop.eup %6286  ;;  %2706 = vmatmul.bf16.gmra.mxu0 %v2610_v17  ;;  %v2473_v54 = vpack.c.bf16 %v2409_v26, %v2409_v26 }
 0x401   :  { %6290 = vrcp.f32 %v2283_v60  ;;  %v2426_v29 = vmul.f32 %v6287_v50, %v8256_v24 }
 0x402   :  { %6292 = vrcp.f32 %v2315_v10  ;;  %v2505_v36 = vpack.c.bf16 %v2441_v2, %v2441_v2  ;;  %v2746_v30 = vunpack.c.l.b16 %v2473_v54  ;;  %v2974_v55 = vpop.f32.mrf.mxu2 }
 0x403   :  { %v2490_v62 = vpack.c.bf16 %v2426_v29, %v2426_v29  ;;  %v3187_v21 = vpack.c.bf16 %v2974_v55, %v2974_v55 }
 0x404   :  { %v3036_v1 = vunpack.c.l.b16 %v2505_v36  ;;  %v2755_v46 = vpack.c.b16 %v2746_v30, %v2745_v34 }
 0x405   :  { %v6289_v48 = vpop.eup %6288  ;;  %v2892_v56 = vunpack.c.l.b16 %v2490_v62  ;;  %v3472_v25 = vunpack.c.l.b16 %v3187_v21 }
 0x406   :  { %v3045_v47 = vpack.c.b16 %v3036_v1, %v3035_v3  ;;  %2851 = vmatmul.bf16.gmra.mxu1 %v2755_v46  ;;  %v2442_v27 = vmul.f32 %v6289_v48, %v8265_v8  ;;  %v3469_v8 = vunpack.c.l.b16 %v3184_v52  ;;  %v2824_v46 = vpop.f32.mrf.mxu1 }
 0x407   :  { %v6291_v4 = vpop.eup %6290  ;;  %v3486_v63 = vpack.c.b16 %v3472_v25, %v3471_v51 }
 0x408   :  { %v6293_v19 = vpop.eup %6292  ;;  %v2427_v41 = vmul.f32 %v6291_v4, %v8269_v31  ;;  %3141 = vmatmul.bf16.gmra.mxu3 %v3045_v47  ;;  %v2506_v24 = vpack.c.bf16 %v2442_v27, %v2442_v27  ;;  %v3470_v31 = vunpack.c.l.b16 %v3185_v43 }
 0x409   :  { %v2443_v44 = vmul.f32 %v6293_v19, %v8267_v38 }
 0x40a   :  { %v2491_v33 = vpack.c.bf16 %v2427_v41, %v2427_v41  ;;  %v3037_v13 = vunpack.c.l.b16 %v2506_v24  ;;  %v3485_v49 = vpack.c.b16 %v3470_v31, %v3469_v8  ;;  %v2977_v61 = vpop.f32.mrf.mxu2 }
 0x40b   :  { %v2507_v14 = vpack.c.bf16 %v2443_v44, %v2443_v44 }
 0x40c   :  { %v2893_v57 = vunpack.c.l.b16 %v2491_v33 }
 0x40d   :  { %v3038_v5 = vunpack.c.l.b16 %v2507_v14 }
 0x40e   :  { %v2901_v12 = vpack.c.b16 %v2893_v57, %v2892_v56  ;;  %v8366_v57 = vpop.f32.mrf.mxu1 }
 0x40f   :  { %v3046_v0 = vpack.c.b16 %v3038_v5, %v3037_v13 }
 0x410   :  { %3001 = vmatmul.bf16.gmra.mxu2 %v2901_v12 }
 0x412   :  { %v2979_v58 = vpop.f32.mrf.mxu2 }
 0x413   :  { %v3189_v50 = vpack.c.bf16 %v2979_v58, %v2979_v58 }
 0x414   :  { %v8350_v32 = vpop.f32.mrf.mxu0  ;;  %v2217_v38 = vpop.xlane.xlu1 %2216 }
 0x415   :  { %6294 = vrcp.f32 %v2217_v38  ;;  %v3474_v48 = vunpack.c.l.b16 %v3189_v50  ;;  %v3152_v44 = vpack.c.bf16 %v8350_v32, %v8350_v32 }
 0x417   :  { %v3236_v5 = vunpack.c.l.b16 %v3152_v44 }
 0x418   :  { %3146 = vmatmul.bf16.gmra.mxu3 %v3046_v0 }
 0x41a   :  { %v2982_v3 = vpop.f32.mrf.mxu2 }
 0x41b   :  { %v6295_v40 = vpop.eup %6294  ;;  %v3190_v8 = vpack.c.bf16 %v2982_v3, %v2982_v3 }
 0x41c   :  { %v2679_v18 = vpop.f32.mrf.mxu0  ;;  %v2394_v11 = vmul.f32 %v6295_v40, %v8281_v59 }
 0x41d   :  { %v3153_v41 = vpack.c.bf16 %v2679_v18, %v2679_v18  ;;  %v2829_v18 = vpop.f32.mrf.mxu1  ;;  %v3475_v40 = vunpack.c.l.b16 %v3190_v8 }
 0x41e   :  { %v2458_v22 = vpack.c.bf16 %v2394_v11, %v2394_v11 }
 0x41f   :  { %v3237_v24 = vunpack.c.l.b16 %v3153_v41 }
 0x420   :  { %5899 = vmatmul.msk.bf16.vlgmr.msrb.gmra.mxu2 %vm1239_vm1, %v3485_v49  ;;  %v2602_v60 = vunpack.c.l.b16 %v2458_v22 }
 0x421   :  { %v3252_v52 = vpack.c.b16 %v3237_v24, %v3236_v5 }
 0x422   :  { %v2984_v12 = vpop.f32.mrf.mxu2 }
 0x423   :  { %v3191_v31 = vpack.c.bf16 %v2984_v12, %v2984_v12 }
 0x424   :  { %v8354_v28 = vpop.f32.mrf.mxu0 }
 0x425   :  { %v3154_v51 = vpack.c.bf16 %v8354_v28, %v8354_v28 }
 0x426   :  { %v2219_v35 = vpop.xlane.xlu2 %2218 }
 0x427   :  { %6296 = vrcp.f32 %v2219_v35  ;;  %v3169_v35 = vpack.c.bf16 %v2824_v46, %v2824_v46 }
 0x429   :  { %v3354_v58 = vunpack.c.l.b16 %v3169_v35 }
 0x42a   :  { %v3112_v9 = vpop.f32.mrf.mxu3 }
 0x42b   :  { %v3200_v26 = vpack.c.bf16 %v3112_v9, %v3112_v9  ;;  %v3168_v9 = vpack.c.bf16 %v8356_v15, %v8356_v15 }
 0x42c   :  { %v2684_v1 = vpop.f32.mrf.mxu0 }
 0x42d   :  { %v6297_v37 = vpop.eup %6296  ;;  %v2249_v17 = vpop.xlane.xlu0 %2248  ;;  %v3585_v54 = vunpack.c.l.b16 %v3200_v26  ;;  %v3155_v25 = vpack.c.bf16 %v2684_v1, %v2684_v1  ;;  %v3170_v1 = vpack.c.bf16 %v8366_v57, %v8366_v57 }
 0x42e   :  { %v2395_v16 = vmul.f32 %v6297_v37, %v8292_v53  ;;  %6298 = vrcp.f32 %v2249_v17  ;;  %v3188_v53 = vpack.c.bf16 %v2977_v61, %v2977_v61  ;;  %v3476_v61 = vunpack.c.l.b16 %v3191_v31 }
 0x42f   :  { %v3239_v37 = vunpack.c.l.b16 %v3155_v25 }
 0x430   :  { %5900 = vmatmul.msk.bf16.gmra.mxu2 %vm1239_vm1, %v3486_v63  ;;  %v2459_v10 = vpack.c.bf16 %v2395_v16, %v2395_v16  ;;  %v3473_v7 = vunpack.c.l.b16 %v3188_v53  ;;  %v3488_v11 = vpack.c.b16 %v3476_v61, %v3475_v40  ;;  %v3353_v63 = vunpack.c.l.b16 %v3168_v9 }
 0x431   :  { %v3238_v16 = vunpack.c.l.b16 %v3154_v51 }
 0x432   :  { %v3114_v23 = vpop.f32.mrf.mxu3  ;;  %v2603_v59 = vunpack.c.l.b16 %v2459_v10  ;;  %v3487_v62 = vpack.c.b16 %v3474_v48, %v3473_v7  ;;  %v3369_v26 = vpack.c.b16 %v3354_v58, %v3353_v63 }
 0x433   :  { %v3201_v2 = vpack.c.bf16 %v3114_v23, %v3114_v23  ;;  %v2987_v38 = vpop.f32.mrf.mxu2 }
 0x434   :  { %v2611_v42 = vpack.c.b16 %v2603_v59, %v2602_v60  ;;  %v2251_v34 = vpop.xlane.xlu1 %2250  ;;  %v6299_v30 = vpop.eup %6298  ;;  %v3253_v59 = vpack.c.b16 %v3239_v37, %v3238_v16  ;;  %v3192_v28 = vpack.c.bf16 %v2987_v38, %v2987_v38 }
 0x435   :  { %v3586_v36 = vunpack.c.l.b16 %v3201_v2  ;;  %6300 = vrcp.f32 %v2251_v34  ;;  %v2410_v47 = vmul.f32 %v6299_v30, %v8296_v20  ;;  %v8368_v14 = vpop.f32.mrf.mxu0  ;;  %v2832_v60 = vpop.f32.mrf.mxu1  ;;  %v3171_v30 = vpack.c.bf16 %v2829_v18, %v2829_v18 }
 0x436   :  { %2711 = vmatmul.bf16.gmra.mxu0 %v2611_v42  ;;  %v3477_v3 = vunpack.c.l.b16 %v3192_v28  ;;  %v3156_v48 = vpack.c.bf16 %v8368_v14, %v8368_v14  ;;  %v3172_v31 = vpack.c.bf16 %v2832_v60, %v2832_v60 }
 0x437   :  { %v3601_v29 = vpack.c.b16 %v3586_v36, %v3585_v54  ;;  %v2474_v27 = vpack.c.bf16 %v2410_v47, %v2410_v47  ;;  %v3356_v47 = vunpack.c.l.b16 %v3171_v30 }
 0x438   :  { %v3357_v18 = vunpack.c.l.b16 %v3172_v31 }
 0x439   :  { %5907 = vmatmul.msk.bf16.vlgmr.msrb.gmra.mxu3 %vm1239_vm1, %v3601_v29  ;;  %v2747_v39 = vunpack.c.l.b16 %v2474_v27 }
 0x43a   :  { %v3117_v4 = vpop.f32.mrf.mxu3 }
 0x43b   :  { %v6301_v19 = vpop.eup %6300  ;;  %v3202_v20 = vpack.c.bf16 %v3117_v4, %v3117_v4  ;;  %v2989_v22 = vpop.f32.mrf.mxu2 }
 0x43c   :  { %v2411_v33 = vmul.f32 %v6301_v19, %v8303_v45  ;;  %v3193_v2 = vpack.c.bf16 %v2989_v22, %v2989_v22  ;;  %v3355_v19 = vunpack.c.l.b16 %v3170_v1 }
 0x43d   :  { %v3587_v55 = vunpack.c.l.b16 %v3202_v20  ;;  %v2689_v6 = vpop.f32.mrf.mxu0  ;;  %v2834_v46 = vpop.f32.mrf.mxu1 }
 0x43e   :  { %v2475_v56 = vpack.c.bf16 %v2411_v33, %v2411_v33  ;;  %v3478_v36 = vunpack.c.l.b16 %v3193_v2  ;;  %v3157_v53 = vpack.c.bf16 %v2689_v6, %v2689_v6  ;;  %v3370_v27 = vpack.c.b16 %v3356_v47, %v3355_v19 }
 0x440   :  { %5901 = vmatmul.msk.bf16.gmra.mxu2 %vm1239_vm1, %v3487_v62  ;;  %v2748_v13 = vunpack.c.l.b16 %v2475_v56  ;;  %v3489_v29 = vpack.c.b16 %v3478_v36, %v3477_v3  ;;  %v3241_v7 = vunpack.c.l.b16 %v3157_v53  ;;  %v3240_v62 = vunpack.c.l.b16 %v3156_v48 }
 0x442   :  { %v3119_v43 = vpop.f32.mrf.mxu3  ;;  %v2756_v45 = vpack.c.b16 %v2748_v13, %v2747_v39  ;;  %v3254_v12 = vpack.c.b16 %v3241_v7, %v3240_v62 }
 0x443   :  { %v3203_v0 = vpack.c.bf16 %v3119_v43, %v3119_v43  ;;  %v3173_v43 = vpack.c.bf16 %v2834_v46, %v2834_v46 }
 0x444   :  { %2856 = vmatmul.bf16.gmra.mxu1 %v2756_v45 }
 0x445   :  { %v3588_v32 = vunpack.c.l.b16 %v3203_v0  ;;  %v2692_v42 = vpop.f32.mrf.mxu0  ;;  %v2837_v20 = vpop.f32.mrf.mxu1 }
 0x446   :  { %5883 = vmatmul.msk.bf16.vlgmr.msra.gmra.mxu0 %vm1239_vm1, %v3252_v52  ;;  %v3174_v60 = vpack.c.bf16 %v2837_v20, %v2837_v20 }
 0x447   :  { %v3602_v49 = vpack.c.b16 %v3588_v32, %v3587_v55  ;;  %v3158_v55 = vpack.c.bf16 %v2692_v42, %v2692_v42 }
 0x449   :  { %5908 = vmatmul.msk.bf16.gmra.mxu3 %vm1239_vm1, %v3602_v49  ;;  %v3358_v49 = vunpack.c.l.b16 %v3173_v43  ;;  %v3242_v40 = vunpack.c.l.b16 %v3158_v55 }
 0x44a   :  { %v3122_v21 = vpop.f32.mrf.mxu3 }
 0x44b   :  { %v3204_v17 = vpack.c.bf16 %v3122_v21, %v3122_v21  ;;  %v3371_v25 = vpack.c.b16 %v3358_v49, %v3357_v18 }
 0x44d   :  { %v3589_v15 = vunpack.c.l.b16 %v3204_v17  ;;  %v2694_v4 = vpop.f32.mrf.mxu0  ;;  %v2839_v35 = vpop.f32.mrf.mxu1 }
 0x44e   :  { %v3159_v45 = vpack.c.bf16 %v2694_v4, %v2694_v4  ;;  %v3175_v22 = vpack.c.bf16 %v2839_v35, %v2839_v35 }
 0x450   :  { %5902 = vmatmul.msk.bf16.gmra.mxu2 %vm1239_vm1, %v3488_v11  ;;  %v3243_v38 = vunpack.c.l.b16 %v3159_v45  ;;  %v3360_v2 = vunpack.c.l.b16 %v3175_v22 }
 0x452   :  { %v3124_v10 = vpop.f32.mrf.mxu3  ;;  %v3255_v51 = vpack.c.b16 %v3243_v38, %v3242_v40 }
 0x453   :  { %v3205_v23 = vpack.c.bf16 %v3124_v10, %v3124_v10 }
 0x454   :  { %5891 = vmatmul.msk.bf16.vlgmr.msrb.gmra.mxu1 %vm1239_vm1, %v3369_v26 }
 0x455   :  { %v3590_v50 = vunpack.c.l.b16 %v3205_v23  ;;  %v2697_v39 = vpop.f32.mrf.mxu0  ;;  %v2842_v16 = vpop.f32.mrf.mxu1 }
 0x456   :  { %5884 = vmatmul.msk.bf16.gmra.mxu0 %vm1239_vm1, %v3253_v59  ;;  %v3160_v59 = vpack.c.bf16 %v2697_v39, %v2697_v39 }
 0x457   :  { %v3603_v54 = vpack.c.b16 %v3590_v50, %v3589_v15  ;;  %v3359_v50 = vunpack.c.l.b16 %v3174_v60 }
 0x459   :  { %5909 = vmatmul.msk.bf16.gmra.mxu3 %vm1239_vm1, %v3603_v54  ;;  %v3244_v54 = vunpack.c.l.b16 %v3160_v59  ;;  %v3372_v30 = vpack.c.b16 %v3360_v2, %v3359_v50 }
 0x45a   :  { %v3127_v34 = vpop.f32.mrf.mxu3 }
 0x45b   :  { %v3206_v41 = vpack.c.bf16 %v3127_v34, %v3127_v34 }
 0x45d   :  { %v3591_v24 = vunpack.c.l.b16 %v3206_v41  ;;  %v2699_v9 = vpop.f32.mrf.mxu0  ;;  %v2844_v1 = vpop.f32.mrf.mxu1 }
 0x45e   :  { %v3161_v23 = vpack.c.bf16 %v2699_v9, %v2699_v9  ;;  %v3177_v62 = vpack.c.bf16 %v2844_v1, %v2844_v1 }
 0x460   :  { %5903 = vmatmul.msk.bf16.gmra.mxu2 %vm1239_vm1, %v3489_v29  ;;  %v3245_v42 = vunpack.c.l.b16 %v3161_v23 }
 0x462   :  { %v3129_v33 = vpop.f32.mrf.mxu3  ;;  %v3256_v53 = vpack.c.b16 %v3245_v42, %v3244_v54 }
 0x463   :  { %v2992_v44 = vpop.f32.mrf.mxu2  ;;  %v3207_v56 = vpack.c.bf16 %v3129_v33, %v3129_v33 }
 0x464   :  { %5892 = vmatmul.msk.bf16.gmra.mxu1 %vm1239_vm1, %v3370_v27  ;;  %v3194_v13 = vpack.c.bf16 %v2992_v44, %v2992_v44 }
 0x465   :  { %v3592_v57 = vunpack.c.l.b16 %v3207_v56  ;;  %v3176_v56 = vpack.c.bf16 %v2842_v16, %v2842_v16 }
 0x466   :  { %5885 = vmatmul.msk.bf16.gmra.mxu0 %vm1239_vm1, %v3254_v12  ;;  %v3479_v32 = vunpack.c.l.b16 %v3194_v13 }
 0x467   :  { %v3604_v14 = vpack.c.b16 %v3592_v57, %v3591_v24  ;;  %v3362_v24 = vunpack.c.l.b16 %v3177_v62  ;;  %v3361_v20 = vunpack.c.l.b16 %v3176_v56 }
 0x469   :  { %5910 = vmatmul.msk.bf16.gmra.mxu3 %vm1239_vm1, %v3604_v14  ;;  %v3373_v43 = vpack.c.b16 %v3362_v24, %v3361_v20 }
 0x46a   :  { %v3132_v5 = vpop.f32.mrf.mxu3 }
 0x46b   :  { %v2994_v0 = vpop.f32.mrf.mxu2  ;;  %v3208_v21 = vpack.c.bf16 %v3132_v5, %v3132_v5  ;;  %v2847_v27 = vpop.f32.mrf.mxu1 }
 0x46c   :  { %v3195_v52 = vpack.c.bf16 %v2994_v0, %v2994_v0 }
 0x46d   :  { %v3593_v58 = vunpack.c.l.b16 %v3208_v21  ;;  %v2702_v10 = vpop.f32.mrf.mxu0 }
 0x46e   :  { %v3480_v8 = vunpack.c.l.b16 %v3195_v52  ;;  %v3162_v12 = vpack.c.bf16 %v2702_v10, %v2702_v10 }
 0x470   :  { %v3490_v61 = vpack.c.b16 %v3480_v8, %v3479_v32  ;;  %v3246_v39 = vunpack.c.l.b16 %v3162_v12 }
 0x472   :  { %5904 = vmatmul.msk.bf16.gmra.mxu2 %vm1239_vm1, %v3490_v61  ;;  %v3134_v6 = vpop.f32.mrf.mxu3 }
 0x473   :  { %v3209_v11 = vpack.c.bf16 %v3134_v6, %v3134_v6  ;;  %v2849_v31 = vpop.f32.mrf.mxu1  ;;  %v3178_v6 = vpack.c.bf16 %v2847_v27, %v2847_v27 }
 0x474   :  { %5893 = vmatmul.msk.bf16.gmra.mxu1 %vm1239_vm1, %v3371_v25  ;;  %v3179_v18 = vpack.c.bf16 %v2849_v31, %v2849_v31 }
 0x475   :  { %v3594_v37 = vunpack.c.l.b16 %v3209_v11  ;;  %v2704_v47 = vpop.f32.mrf.mxu0 }
 0x476   :  { %5886 = vmatmul.msk.bf16.gmra.mxu0 %vm1239_vm1, %v3255_v51  ;;  %v3163_v44 = vpack.c.bf16 %v2704_v47, %v2704_v47 }
 0x477   :  { %v3605_v63 = vpack.c.b16 %v3594_v37, %v3593_v58  ;;  %v3364_v58 = vunpack.c.l.b16 %v3179_v18 }
 0x478   :  { %v3247_v14 = vunpack.c.l.b16 %v3163_v44 }
 0x479   :  { %v2997_v17 = vpop.f32.mrf.mxu2  ;;  %5911 = vmatmul.msk.bf16.gmra.mxu3 %vm1239_vm1, %v3605_v63 }
 0x47a   :  { %v3196_v15 = vpack.c.bf16 %v2997_v17, %v2997_v17  ;;  %v3257_v45 = vpack.c.b16 %v3247_v14, %v3246_v39  ;;  %v3363_v17 = vunpack.c.l.b16 %v3178_v6 }
 0x47b   :  { %v3137_v26 = vpop.f32.mrf.mxu3 }
 0x47c   :  { %v3210_v36 = vpack.c.bf16 %v3137_v26, %v3137_v26  ;;  %v3481_v29 = vunpack.c.l.b16 %v3196_v15  ;;  %v3374_v10 = vpack.c.b16 %v3364_v58, %v3363_v17 }
 0x47d   :  { %v2707_v57 = vpop.f32.mrf.mxu0 }
 0x47e   :  { %v3595_v4 = vunpack.c.l.b16 %v3210_v36  ;;  %v3164_v11 = vpack.c.bf16 %v2707_v57, %v2707_v57 }
 0x480   :  { %v3248_v16 = vunpack.c.l.b16 %v3164_v11 }
 0x481   :  { %v2999_v28 = vpop.f32.mrf.mxu2 }
 0x482   :  { %v3197_v34 = vpack.c.bf16 %v2999_v28, %v2999_v28 }
 0x483   :  { %v3139_v3 = vpop.f32.mrf.mxu3  ;;  %v2852_v51 = vpop.f32.mrf.mxu1 }
 0x484   :  { %v3482_v46 = vunpack.c.l.b16 %v3197_v34  ;;  %v3211_v48 = vpack.c.bf16 %v3139_v3, %v3139_v3  ;;  %5894 = vmatmul.msk.bf16.gmra.mxu1 %vm1239_vm1, %v3372_v30  ;;  %v3180_v28 = vpack.c.bf16 %v2852_v51, %v2852_v51 }
 0x485   :  { %v2709_v49 = vpop.f32.mrf.mxu0 }
 0x486   :  { %v3491_v7 = vpack.c.b16 %v3482_v46, %v3481_v29  ;;  %v3596_v19 = vunpack.c.l.b16 %v3211_v48  ;;  %5887 = vmatmul.msk.bf16.gmra.mxu0 %vm1239_vm1, %v3256_v53  ;;  %v3165_v40 = vpack.c.bf16 %v2709_v49, %v2709_v49  ;;  %v3365_v36 = vunpack.c.l.b16 %v3180_v28 }
 0x488   :  { %v3606_v41 = vpack.c.b16 %v3596_v19, %v3595_v4  ;;  %5905 = vmatmul.msk.bf16.gmra.mxu2 %vm1239_vm1, %v3491_v7  ;;  %v3249_v63 = vunpack.c.l.b16 %v3165_v40 }
 0x48a   :  { %5912 = vmatmul.msk.bf16.gmra.mxu3 %vm1239_vm1, %v3606_v41  ;;  %v3258_v23 = vpack.c.b16 %v3249_v63, %v3248_v16 }
 0x48b   :  { %v3142_v33 = vpop.f32.mrf.mxu3  ;;  %v2854_v42 = vpop.f32.mrf.mxu1 }
 0x48c   :  { %v3212_v13 = vpack.c.bf16 %v3142_v33, %v3142_v33  ;;  %v3181_v50 = vpack.c.bf16 %v2854_v42, %v2854_v42 }
 0x48e   :  { %v3597_v55 = vunpack.c.l.b16 %v3212_v13  ;;  %v3366_v54 = vunpack.c.l.b16 %v3181_v50 }
 0x490   :  { %v3375_v34 = vpack.c.b16 %v3366_v54, %v3365_v36 }
 0x493   :  { %v3002_v5 = vpop.f32.mrf.mxu2  ;;  %v3144_v0 = vpop.f32.mrf.mxu3 }
 0x494   :  { %v3213_v52 = vpack.c.bf16 %v3144_v0, %v3144_v0  ;;  %5895 = vmatmul.msk.bf16.gmra.mxu1 %vm1239_vm1, %v3373_v43  ;;  %v3198_v38 = vpack.c.bf16 %v3002_v5, %v3002_v5  ;;  %v8412_v0 = vld [vmem:[%s9775_s10] ss:$0 sm:$0xff] }
 0x496   :  { %v3598_v32 = vunpack.c.l.b16 %v3213_v52  ;;  %5888 = vmatmul.msk.bf16.gmra.mxu0 %vm1239_vm1, %v3257_v45  ;;  %v3483_v25 = vunpack.c.l.b16 %v3198_v38 }
 0x498   :  { %v3607_v8 = vpack.c.b16 %v3598_v32, %v3597_v55 }
 0x49a   :  { %5913 = vmatmul.msk.bf16.gmra.mxu3 %vm1239_vm1, %v3607_v8 }
 0x49b   :  { %v3004_v61 = vpop.f32.mrf.mxu2  ;;  %v3147_v35 = vpop.f32.mrf.mxu3 }
 0x49c   :  { %v3199_v21 = vpack.c.bf16 %v3004_v61, %v3004_v61  ;;  %v3214_v22 = vpack.c.bf16 %v3147_v35, %v3147_v35 }
 0x49e   :  { %v3484_v9 = vunpack.c.l.b16 %v3199_v21  ;;  %v3599_v59 = vunpack.c.l.b16 %v3214_v22 }
 0x4a0   :  { %v3492_v37 = vpack.c.b16 %v3484_v9, %v3483_v25 }
 0x4a2   :  { %5906 = vmatmul.msk.bf16.gmra.mxu2 %vm1239_vm1, %v3492_v37 }
 0x4a3   :  { %v3149_v26 = vpop.f32.mrf.mxu3  ;;  %v3529_v7 = vpop.f32.mrf.mxu2 }
 0x4a4   :  { %v3215_v60 = vpack.c.bf16 %v3149_v26, %v3149_v26  ;;  %5896 = vmatmul.msk.bf16.gmra.mxu1 %vm1239_vm1, %v3374_v10  ;;  %v3688_v5 = vsel %vm174_vm0, %v3529_v7, 0.0 }
 0x4a6   :  { %v3600_v2 = vunpack.c.l.b16 %v3215_v60  ;;  %5889 = vmatmul.msk.bf16.gmra.mxu0 %vm1239_vm1, %v3258_v23 }
 0x4a8   :  { %v3608_v15 = vpack.c.b16 %v3600_v2, %v3599_v59 }
 0x4aa   :  { %5914 = vmatmul.msk.bf16.gmra.mxu3 %vm1239_vm1, %v3608_v15 }
 0x4ab   :  { %v3531_v24 = vpop.f32.mrf.mxu2 }
 0x4ac   :  { %v3695_v35 = vsel %vm174_vm0, %v3531_v24, 0.0 }
 0x4b3   :  { %v2712_v30 = vpop.f32.mrf.mxu0  ;;  %v3534_v55 = vpop.f32.mrf.mxu2 }
 0x4b4   :  { %5897 = vmatmul.msk.bf16.gmra.mxu1 %vm1239_vm1, %v3375_v34  ;;  %v3166_v3 = vpack.c.bf16 %v2712_v30, %v2712_v30  ;;  %v3702_v22 = vsel %vm174_vm0, %v3534_v55, 0.0 }
 0x4b6   :  { %v3250_v29 = vunpack.c.l.b16 %v3166_v3 }
 0x4bb   :  { %v2714_v53 = vpop.f32.mrf.mxu0  ;;  %v3536_v63 = vpop.f32.mrf.mxu2 }
 0x4bc   :  { %v3167_v1 = vpack.c.bf16 %v2714_v53, %v2714_v53  ;;  %v3645_v19 = vpop.f32.mrf.mxu3  ;;  %v3709_v36 = vsel %vm174_vm0, %v3536_v63, 0.0 }
 0x4bd   :  { %v3690_v45 = vsel %vm174_vm0, %v3645_v19, 0.0 }
 0x4be   :  { %v3251_v46 = vunpack.c.l.b16 %v3167_v1 }
 0x4c0   :  { %v3259_v48 = vpack.c.b16 %v3251_v46, %v3250_v29 }
 0x4c1   :  { %v2857_v47 = vpop.f32.mrf.mxu1 }
 0x4c2   :  { %5890 = vmatmul.msk.bf16.gmra.mxu0 %vm1239_vm1, %v3259_v48  ;;  %v3182_v41 = vpack.c.bf16 %v2857_v47, %v2857_v47 }
 0x4c3   :  { %v3297_v4 = vpop.f32.mrf.mxu0  ;;  %v3539_v34 = vpop.f32.mrf.mxu2 }
 0x4c4   :  { %v3367_v27 = vunpack.c.l.b16 %v3182_v41  ;;  %v3647_v57 = vpop.f32.mrf.mxu3  ;;  %v3685_v20 = vsel %vm174_vm0, %v3297_v4, 0.0  ;;  %v3716_v19 = vsel %vm174_vm0, %v3539_v34, 0.0 }
 0x4c5   :  { %v3697_v6 = vsel %vm174_vm0, %v3647_v57, 0.0 }
 0x4c9   :  { %v2859_v62 = vpop.f32.mrf.mxu1 }
 0x4ca   :  { %v3183_v33 = vpack.c.bf16 %v2859_v62, %v2859_v62 }
 0x4cb   :  { %v3299_v56 = vpop.f32.mrf.mxu0 }
 0x4cc   :  { %v3368_v44 = vunpack.c.l.b16 %v3183_v33  ;;  %v3692_v49 = vsel %vm174_vm0, %v3299_v56, 0.0  ;;  %v3650_v61 = vpop.f32.mrf.mxu3 }
 0x4cd   :  { %v3704_v23 = vsel %vm174_vm0, %v3650_v61, 0.0 }
 0x4ce   :  { %v3376_v12 = vpack.c.b16 %v3368_v44, %v3367_v27  ;;  %v3541_v27 = vpop.f32.mrf.mxu2 }
 0x4d0   :  { %5898 = vmatmul.msk.bf16.gmra.mxu1 %vm1239_vm1, %v3376_v12 }
 0x4d1   :  { %v3413_v14 = vpop.f32.mrf.mxu1 }
 0x4d2   :  { %v3686_v39 = vsel %vm174_vm0, %v3413_v14, 0.0 }
 0x4d3   :  { %v3687_v13 = vadd.f32 %v3686_v39, %v3685_v20  ;;  %v3302_v52 = vpop.f32.mrf.mxu0 }
 0x4d4   :  { %v3699_v58 = vsel %vm174_vm0, %v3302_v52, 0.0  ;;  %v3652_v10 = vpop.f32.mrf.mxu3 }
 0x4d5   :  { %v3689_v43 = vadd.f32 %v3688_v5, %v3687_v13  ;;  %v3711_v3 = vsel %vm174_vm0, %v3652_v10, 0.0  ;;  %v3723_v13 = vsel %vm174_vm0, %v3541_v27, 0.0 }
 0x4d7   :  { %v3691_v31 = vadd.f32 %v3690_v45, %v3689_v43 }
 0x4d9   :  { %v3415_v32 = vpop.f32.mrf.mxu1  ;;  %v8416_v8 = vadd.f32 %v8412_v0, %v3691_v31  ;;  %v3544_v31 = vpop.f32.mrf.mxu2 }
 0x4da   :  { %v3693_v38 = vsel %vm174_vm0, %v3415_v32, 0.0 }
 0x4db   :  { %v3694_v18 = vadd.f32 %v3693_v38, %v3692_v49  ;;  %v3817_v21 = vsel %vm174_vm0, %v8416_v8, 0.0  ;;  %v3304_v9 = vpop.f32.mrf.mxu0 }
 0x4dc   :  { %3818 = vadd.xlane.f32.xlu2 %v3817_v21  ;;  %v3706_v42 = vsel %vm174_vm0, %v3304_v9, 0.0  ;;  %v3655_v53 = vpop.f32.mrf.mxu3 }
 0x4dd   :  { %v3696_v40 = vadd.f32 %v3695_v35, %v3694_v18  ;;  %v3718_v33 = vsel %vm174_vm0, %v3655_v53, 0.0  ;;  %v3730_v35 = vsel %vm174_vm0, %v3544_v31, 0.0 }
 0x4df   :  { %v3698_v25 = vadd.f32 %v3697_v6, %v3696_v40 }
 0x4e1   :  { %v3418_v11 = vpop.f32.mrf.mxu1  ;;  %v8425_v51 = vadd.f32 %v8412_v0, %v3698_v25 }
 0x4e2   :  { %v3700_v37 = vsel %vm174_vm0, %v3418_v11, 0.0 }
 0x4e3   :  { %v3701_v17 = vadd.f32 %v3700_v37, %v3699_v58  ;;  %v3820_v16 = vsel %vm174_vm0, %v8425_v51, 0.0  ;;  %v3307_v50 = vpop.f32.mrf.mxu0  ;;  %v6420_v58 = vmov 32.0  }
 0x4e4   :  { %3821 = vadd.xlane.f32.xlu0 %v3820_v16  ;;  %v3713_v48 = vsel %vm174_vm0, %v3307_v50, 0.0  ;;  %v3657_v56 = vpop.f32.mrf.mxu3  ;;  %6302 = vrcp.f32 %v6420_v58 }
 0x4e5   :  { %v3703_v26 = vadd.f32 %v3702_v22, %v3701_v17  ;;  %v3725_v43 = vsel %vm174_vm0, %v3657_v56, 0.0 }
 0x4e7   :  { %v3705_v60 = vadd.f32 %v3704_v23, %v3703_v26  ;;  %v3546_v23 = vpop.f32.mrf.mxu2 }
 0x4e9   :  { %v3420_v59 = vpop.f32.mrf.mxu1  ;;  %v8434_v2 = vadd.f32 %v8412_v0, %v3705_v60 }
 0x4ea   :  { %v3707_v15 = vsel %vm174_vm0, %v3420_v59, 0.0  ;;  %v6303_v37 = vpop.eup %6302 }
 0x4eb   :  { %v3708_v28 = vadd.f32 %v3707_v15, %v3706_v42  ;;  %v3823_v54 = vsel %vm174_vm0, %v8434_v2, 0.0  ;;  %v3309_v41 = vpop.f32.mrf.mxu0  ;;  %v3866_v17 = vmul.f32 32.0, %v6303_v37  ;;  %vm3870_vm3 = vweird.f32 %v6303_v37 }
 0x4ec   :  { %3824 = vadd.xlane.f32.xlu1 %v3823_v54  ;;  %v3720_v57 = vsel %vm174_vm0, %v3309_v41, 0.0  ;;  %v3660_v61 = vpop.f32.mrf.mxu3 }
 0x4ed   :  { %v3710_v30 = vadd.f32 %v3709_v36, %v3708_v28  ;;  %v3732_v6 = vsel %vm174_vm0, %v3660_v61, 0.0  ;;  %v3867_v22 = vsub.f32 1.0, %v3866_v17 }
 0x4ef   :  { %v3712_v1 = vadd.f32 %v3711_v3, %v3710_v30  ;;  %v3868_v26 = vmul.f32 %v6303_v37, %v3867_v22  ;;  %v3549_v30 = vpop.f32.mrf.mxu2 }
 0x4f1   :  { %v3423_v29 = vpop.f32.mrf.mxu1  ;;  %v8443_v46 = vadd.f32 %v8412_v0, %v3712_v1  ;;  %v3869_v42 = vadd.f32 %v6303_v37, %v3868_v26  ;;  %v3737_v1 = vsel %vm174_vm0, %v3546_v23, 0.0 }
 0x4f2   :  { %v3714_v47 = vsel %vm174_vm0, %v3423_v29, 0.0 }
 0x4f3   :  { %v3715_v4 = vadd.f32 %v3714_v47, %v3713_v48  ;;  %v3826_v7 = vsel %vm174_vm0, %v8443_v46, 0.0  ;;  %v3312_v45 = vpop.f32.mrf.mxu0  ;;  %v8476_v28 = vsel %vm3870_vm3, %v6303_v37, %v3869_v42 }
 0x4f4   :  { %3827 = vadd.xlane.f32.xlu2 %v3826_v7  ;;  %v3727_v49 = vsel %vm174_vm0, %v3312_v45, 0.0  ;;  %v3662_v10 = vpop.f32.mrf.mxu3 }
 0x4f5   :  { %v3717_v62 = vadd.f32 %v3716_v19, %v3715_v4  ;;  %v3739_v19 = vsel %vm174_vm0, %v3662_v10, 0.0 }
 0x4f7   :  { %v3719_v44 = vadd.f32 %v3718_v33, %v3717_v62 }
 0x4f9   :  { %v3425_v12 = vpop.f32.mrf.mxu1  ;;  %v8452_v24 = vadd.f32 %v8412_v0, %v3719_v44 }
 0x4fa   :  { %v3721_v14 = vsel %vm174_vm0, %v3425_v12, 0.0 }
 0x4fb   :  { %v3722_v20 = vadd.f32 %v3721_v14, %v3720_v57  ;;  %v3829_v39 = vsel %vm174_vm0, %v8452_v24, 0.0  ;;  %v3314_v16 = vpop.f32.mrf.mxu0  ;;  %v3551_v57 = vpop.f32.mrf.mxu2 }
 0x4fc   :  { %3830 = vadd.xlane.f32.xlu0 %v3829_v39  ;;  %v3734_v50 = vsel %vm174_vm0, %v3314_v16, 0.0  ;;  %v3665_v54 = vpop.f32.mrf.mxu3 }
 0x4fd   :  { %v3724_v5 = vadd.f32 %v3723_v13, %v3722_v20 }
 0x4ff   :  { %v3726_v52 = vadd.f32 %v3725_v43, %v3724_v5 }
 0x501   :  { %v3428_v55 = vpop.f32.mrf.mxu1  ;;  %v8461_v32 = vadd.f32 %v8412_v0, %v3726_v52  ;;  %v3746_v52 = vsel %vm174_vm0, %v3665_v54, 0.0 }
 0x502   :  { %v3728_v38 = vsel %vm174_vm0, %v3428_v55, 0.0 }
 0x503   :  { %v3729_v18 = vadd.f32 %v3728_v38, %v3727_v49  ;;  %v3832_v21 = vsel %vm174_vm0, %v8461_v32, 0.0  ;;  %v3317_v59 = vpop.f32.mrf.mxu0 }
 0x504   :  { %3833 = vadd.xlane.f32.xlu1 %v3832_v21  ;;  %v3741_v41 = vsel %vm174_vm0, %v3317_v59, 0.0  ;;  %v3667_v56 = vpop.f32.mrf.mxu3  ;;  %v3751_v21 = vsel %vm174_vm0, %v3551_v57, 0.0 }
 0x505   :  { %v3731_v40 = vadd.f32 %v3730_v35, %v3729_v18  ;;  %v3554_v35 = vpop.f32.mrf.mxu2  ;;  %v3753_v17 = vsel %vm174_vm0, %v3667_v56, 0.0 }
 0x506   :  { %v3758_v42 = vsel %vm174_vm0, %v3554_v35, 0.0 }
 0x507   :  { %v3733_v25 = vadd.f32 %v3732_v6, %v3731_v40 }
 0x509   :  { %v8470_v9 = vadd.f32 %v8412_v0, %v3733_v25  ;;  %v3430_v63 = vpop.f32.mrf.mxu1 }
 0x50a   :  { %v3735_v15 = vsel %vm174_vm0, %v3430_v63, 0.0 }
 0x50b   :  { %v3835_v11 = vsel %vm174_vm0, %v8470_v9, 0.0  ;;  %v3736_v36 = vadd.f32 %v3735_v15, %v3734_v50  ;;  %v3319_v29 = vpop.f32.mrf.mxu0 }
 0x50c   :  { %3836 = vadd.xlane.f32.xlu1 %v3835_v11  ;;  %v3748_v31 = vsel %vm174_vm0, %v3319_v29, 0.0 }
 0x50d   :  { %v3738_v48 = vadd.f32 %v3737_v1, %v3736_v36  ;;  %v3670_v40 = vpop.f32.mrf.mxu3 }
 0x50f   :  { %v3740_v27 = vadd.f32 %v3739_v19, %v3738_v48 }
 0x511   :  { %v3433_v60 = vpop.f32.mrf.mxu1  ;;  %v8495_v13 = vadd.f32 %v8412_v0, %v3740_v27 }
 0x512   :  { %v3742_v4 = vsel %vm174_vm0, %v3433_v60, 0.0 }
 0x513   :  { %v3743_v62 = vadd.f32 %v3742_v4, %v3741_v41  ;;  %v3322_v43 = vpop.f32.mrf.mxu0 }
 0x514   :  { %v3755_v16 = vsel %vm174_vm0, %v3322_v43, 0.0 }
 0x519   :  { %v3435_v3 = vpop.f32.mrf.mxu1 }
 0x51a   :  { %v3749_v5 = vsel %vm174_vm0, %v3435_v3, 0.0 }
 0x51b   :  { %v3750_v55 = vadd.f32 %v3749_v5, %v3748_v31  ;;  %v3324_v22 = vpop.f32.mrf.mxu0 }
 0x51c   :  { %v3762_v1 = vsel %vm174_vm0, %v3324_v22, 0.0 }
 0x51d   :  { %v3752_v6 = vadd.f32 %v3751_v21, %v3750_v55 }
 0x51f   :  { %v3754_v23 = vadd.f32 %v3753_v17, %v3752_v6 }
 0x521   :  { %v3438_v20 = vpop.f32.mrf.mxu1  ;;  %v8527_v54 = vadd.f32 %v8412_v0, %v3754_v23 }
 0x522   :  { %v3756_v58 = vsel %vm174_vm0, %v3438_v20, 0.0 }
 0x523   :  { %v3757_v10 = vadd.f32 %v3756_v58, %v3755_v16  ;;  %v3327_v41 = vpop.f32.mrf.mxu0 }
 0x524   :  { %v3769_v20 = vsel %vm174_vm0, %v3327_v41, 0.0 }
 0x525   :  { %v3759_v15 = vadd.f32 %v3758_v42, %v3757_v10 }
 0x529   :  { %v3440_v37 = vpop.f32.mrf.mxu1 }
 0x52a   :  { %v3763_v36 = vsel %vm174_vm0, %v3440_v37, 0.0 }
 0x52b   :  { %v3764_v29 = vadd.f32 %v3763_v36, %v3762_v1 }
 0x531   :  { %v3443_v48 = vpop.f32.mrf.mxu1 }
 0x539   :  { %v3445_v55 = vpop.f32.mrf.mxu1 }
 0x53a   :  { %v3777_v35 = vsel %vm174_vm0, %v3445_v55, 0.0 }
 0x54f   :  { %v3819_v34 = vpop.xlane.xlu2 %3818 }
 0x550   :  { %v3872_v53 = vmul.f32 %v8476_v28, %v3819_v34  ;;  %v3556_v34 = vpop.f32.mrf.mxu2 }
 0x552   :  { %v8481_v47 = vsub.f32 %v8416_v8, %v3872_v53  ;;  %v3744_v8 = vsel %vm174_vm0, %v3549_v30, 0.0  ;;  %v3672_v30 = vpop.f32.mrf.mxu3  ;;  %v3760_v53 = vsel %vm174_vm0, %v3670_v40, 0.0 }
 0x553   :  { %v3745_v14 = vadd.f32 %v3744_v8, %v3743_v62 }
 0x554   :  { %v3904_v7 = vmul.f32 %v8481_v47, %v8481_v47 }
 0x555   :  { %v3747_v38 = vadd.f32 %v3746_v52, %v3745_v14  ;;  %v3767_v14 = vsel %vm174_vm0, %v3672_v30, 0.0 }
 0x556   :  { %v3920_v33 = vsel %vm174_vm0, %v3904_v7, 0.0  ;;  %v3761_v7 = vadd.f32 %v3760_v53, %v3759_v15 }
 0x557   :  { %v3822_v44 = vpop.xlane.xlu0 %3821  ;;  %3921 = vadd.xlane.f32.xlu2 %v3920_v33  ;;  %v8511_v11 = vadd.f32 %v8412_v0, %v3747_v38  ;;  %v3765_v33 = vsel %vm174_vm0, %v3556_v34, 0.0  ;;  %v3329_v38 = vpop.f32.mrf.mxu0 }
 0x558   :  { %v3873_v12 = vmul.f32 %v8476_v28, %v3822_v44  ;;  %v3766_v27 = vadd.f32 %v3765_v33, %v3764_v29  ;;  %v8543_v56 = vadd.f32 %v8412_v0, %v3761_v7  ;;  %v3559_v8 = vpop.f32.mrf.mxu2  ;;  %v3776_v58 = vsel %vm174_vm0, %v3329_v38, 0.0 }
 0x559   :  { %v3778_v17 = vadd.f32 %v3777_v35, %v3776_v58 }
 0x55a   :  { %v8492_v39 = vsub.f32 %v8425_v51, %v3873_v12  ;;  %v3838_v51 = vsel %vm174_vm0, %v8495_v13, 0.0  ;;  %v3770_v12 = vsel %vm174_vm0, %v3443_v48, 0.0  ;;  %v3675_v5 = vpop.f32.mrf.mxu3  ;;  %v3768_v52 = vadd.f32 %v3767_v14, %v3766_v27 }
 0x55b   :  { %v3771_v43 = vadd.f32 %v3770_v12, %v3769_v20  ;;  %v3774_v6 = vsel %vm174_vm0, %v3675_v5, 0.0  ;;  %v6020_v20 = vld [vmem:[%s9776_s7 + $0x8] sm:$0xff] }
 0x55c   :  { %v3905_v45 = vmul.f32 %v8492_v39, %v8492_v39  ;;  %v8559_v21 = vadd.f32 %v8412_v0, %v3768_v52  ;;  %v6022_v5 = vld [vmem:[%s9777_s8 + $0x8] sm:$0xff]  ;;  %4282 = vmatpush.bf16.msrb.mxu0 %v6020_v20 }
 0x55d   :  { %4349 = vmatpush.bf16.msra.mxu1 %v6022_v5 }
 0x55e   :  { %v3923_v49 = vsel %vm174_vm0, %v3905_v45, 0.0 }
 0x55f   :  { %v3825_v61 = vpop.xlane.xlu1 %3824  ;;  %3924 = vadd.xlane.f32.xlu0 %v3923_v49  ;;  %3839 = vadd.xlane.f32.xlu2 %v3838_v51  ;;  %v3772_v51 = vsel %vm174_vm0, %v3559_v8, 0.0 }
 0x560   :  { %v3874_v18 = vmul.f32 %v8476_v28, %v3825_v61  ;;  %v3773_v61 = vadd.f32 %v3772_v51, %v3771_v43  ;;  %v3561_v37 = vpop.f32.mrf.mxu2  ;;  %v6019_v43 = vld [vmem:[%s9776_s7] sm:$0xff] }
 0x561   :  { %v3779_v23 = vsel %vm174_vm0, %v3561_v37, 0.0  ;;  %4283 = vmatpush.bf16.msrb.mxu0 %v6019_v43 }
 0x562   :  { %v8508_v25 = vsub.f32 %v8434_v2, %v3874_v18  ;;  %v3841_v2 = vsel %vm174_vm0, %v8511_v11, 0.0  ;;  %v3677_v10 = vpop.f32.mrf.mxu3 }
 0x563   :  { %v3781_v30 = vsel %vm174_vm0, %v3677_v10, 0.0 }
 0x564   :  { %v3906_v63 = vmul.f32 %v8508_v25, %v8508_v25 }
 0x566   :  { %v3926_v26 = vsel %vm174_vm0, %v3906_v63, 0.0  ;;  %v3775_v63 = vadd.f32 %v3774_v6, %v3773_v61 }
 0x567   :  { %v3828_v60 = vpop.xlane.xlu2 %3827  ;;  %3927 = vadd.xlane.f32.xlu0 %v3926_v26  ;;  %3842 = vadd.xlane.f32.xlu2 %v3841_v2  ;;  %v3448_v26 = vpop.f32.mrf.mxu1 }
 0x568   :  { %v3875_v59 = vmul.f32 %v8476_v28, %v3828_v60  ;;  %v3780_v60 = vadd.f32 %v3779_v23, %v3778_v17  ;;  %v8575_v15 = vadd.f32 %v8412_v0, %v3775_v63  ;;  %v3784_v36 = vsel %vm174_vm0, %v3448_v26, 0.0  ;;  %v3564_v53 = vpop.f32.mrf.mxu2 }
 0x56a   :  { %v8524_v50 = vsub.f32 %v8443_v46, %v3875_v59  ;;  %v3844_v46 = vsel %vm174_vm0, %v8527_v54, 0.0  ;;  %v3332_v59 = vpop.f32.mrf.mxu0  ;;  %v3782_v1 = vadd.f32 %v3781_v30, %v3780_v60 }
 0x56c   :  { %v3907_v3 = vmul.f32 %v8524_v50, %v8524_v50 }
 0x56e   :  { %v3929_v4 = vsel %vm174_vm0, %v3907_v3, 0.0  ;;  %v3783_v3 = vsel %vm174_vm0, %v3332_v59, 0.0 }
 0x56f   :  { %v3831_v19 = vpop.xlane.xlu0 %3830  ;;  %3930 = vadd.xlane.f32.xlu1 %v3929_v4  ;;  %3845 = vadd.xlane.f32.xlu0 %v3844_v46  ;;  %v3785_v29 = vadd.f32 %v3784_v36, %v3783_v3  ;;  %v3786_v4 = vsel %vm174_vm0, %v3564_v53, 0.0  ;;  %v3680_v46 = vpop.f32.mrf.mxu3 }
 0x570   :  { %v3876_v62 = vmul.f32 %v8476_v28, %v3831_v19  ;;  %v8587_v19 = vadd.f32 %v8412_v0, %v3782_v1  ;;  %v3788_v41 = vsel %vm174_vm0, %v3680_v46, 0.0  ;;  %v3566_v17 = vpop.f32.mrf.mxu2 }
 0x571   :  { %v3787_v7 = vadd.f32 %v3786_v4, %v3785_v29  ;;  %v3793_v23 = vsel %vm174_vm0, %v3566_v17, 0.0 }
 0x572   :  { %v8540_v44 = vsub.f32 %v8452_v24, %v3876_v62  ;;  %v3847_v24 = vsel %vm174_vm0, %v8543_v56, 0.0  ;;  %v3856_v33 = vsel %vm174_vm0, %v8587_v19, 0.0  ;;  %v3334_v38 = vpop.f32.mrf.mxu0 }
 0x573   :  { %v3789_v62 = vadd.f32 %v3788_v41, %v3787_v7  ;;  %v3790_v37 = vsel %vm174_vm0, %v3334_v38, 0.0 }
 0x574   :  { %v3908_v57 = vmul.f32 %v8540_v44, %v8540_v44 }
 0x575   :  { %v8593_v27 = vadd.f32 %v8412_v0, %v3789_v62 }
 0x576   :  { %v3932_v45 = vsel %vm174_vm0, %v3908_v57, 0.0 }
 0x577   :  { %v3834_v31 = vpop.xlane.xlu1 %3833  ;;  %3933 = vadd.xlane.f32.xlu1 %v3932_v45  ;;  %3848 = vadd.xlane.f32.xlu0 %v3847_v24  ;;  %v3859_v12 = vsel %vm174_vm0, %v8593_v27, 0.0  ;;  %v6021_v45 = vld [vmem:[%s9777_s8] sm:$0xff]  ;;  %v3682_v36 = vpop.f32.mrf.mxu3 }
 0x578   :  { %v3877_v49 = vmul.f32 %v8476_v28, %v3834_v31  ;;  %v3450_v31 = vpop.f32.mrf.mxu1  ;;  %4350 = vmatpush.bf16.msra.mxu1 %v6021_v45 }
 0x57a   :  { %v8556_v18 = vsub.f32 %v8461_v32, %v3877_v49  ;;  %v3850_v32 = vsel %vm174_vm0, %v8559_v21, 0.0 }
 0x57c   :  { %v3909_v40 = vmul.f32 %v8556_v18, %v8556_v18 }
 0x57e   :  { %v3935_v16 = vsel %vm174_vm0, %v3909_v40, 0.0  ;;  %v3791_v40 = vsel %vm174_vm0, %v3450_v31, 0.0 }
 0x57f   :  { %v3837_v22 = vpop.xlane.xlu1 %3836  ;;  %3936 = vadd.xlane.f32.xlu2 %v3935_v16  ;;  %3851 = vadd.xlane.f32.xlu1 %v3850_v32  ;;  %v3792_v16 = vadd.f32 %v3791_v40, %v3790_v37 }
 0x580   :  { %v3878_v2 = vmul.f32 %v8476_v28, %v3837_v22 }
 0x582   :  { %v8572_v42 = vsub.f32 %v8470_v9, %v3878_v2  ;;  %v3853_v9 = vsel %vm174_vm0, %v8575_v15, 0.0 }
 0x584   :  { %v3910_v34 = vmul.f32 %v8572_v42, %v8572_v42 }
 0x586   :  { %v3938_v48 = vsel %vm174_vm0, %v3910_v34, 0.0  ;;  %v3794_v34 = vadd.f32 %v3793_v23, %v3792_v16 }
 0x587   :  { %3939 = vadd.xlane.f32.xlu2 %v3938_v48  ;;  %3854 = vadd.xlane.f32.xlu1 %v3853_v9  ;;  %v3795_v48 = vsel %vm174_vm0, %v3682_v36, 0.0 }
 0x588   :  { %v3796_v46 = vadd.f32 %v3795_v48, %v3794_v34 }
 0x58a   :  { %v8644_v45 = vadd.f32 %v8412_v0, %v3796_v46 }
 0x58c   :  { %v3862_v38 = vsel %vm174_vm0, %v8644_v45, 0.0 }
 0x58f   :  { %3857 = vadd.xlane.f32.xlu2 %v3856_v33 }
 0x597   :  { %3860 = vadd.xlane.f32.xlu2 %v3859_v12 }
 0x5ca   :  { %v3922_v8 = vpop.xlane.xlu2 %3921 }
 0x5cb   :  { %v3968_v57 = vmul.f32 %v3922_v8, %v8476_v28 }
 0x5cd   :  { %v3984_v14 = vadd.f32 1e-05, %v3968_v57 }
 0x5cf   :  { %6304 = vrsqrt.f32 %v3984_v14  ;;  %vm4006_vm5 = vweird.f32 %v3984_v14 }
 0x5d2   :  { %v3925_v24 = vpop.xlane.xlu0 %3924  ;;  %v3840_v52 = vpop.xlane.xlu2 %3839 }
 0x5d3   :  { %v3969_v55 = vmul.f32 %v3925_v24, %v8476_v28  ;;  %v3879_v49 = vmul.f32 %v8476_v28, %v3840_v52 }
 0x5d5   :  { %v6305_v51 = vpop.eup %6304  ;;  %v3985_v61 = vadd.f32 1e-05, %v3969_v55  ;;  %v8613_v35 = vsub.f32 %v8495_v13, %v3879_v49 }
 0x5d6   :  { %v4001_v6 = vmul.f32 %v6305_v51, %v3984_v14  ;;  %vm4007_vm4 = vweird.f32 %v6305_v51 }
 0x5d7   :  { %6306 = vrsqrt.f32 %v3985_v61  ;;  %v3911_v58 = vmul.f32 %v8613_v35, %v8613_v35  ;;  %vm4008_vm6 = vmor %vm4006_vm5, %vm4007_vm4  ;;  %vm4016_vm8 = vweird.f32 %v3985_v61 }
 0x5d8   :  { %v4002_v63 = vmul.f32 %v6305_v51, %v4001_v6 }
 0x5d9   :  { %v3941_v32 = vsel %vm174_vm0, %v3911_v58, 0.0 }
 0x5da   :  { %v4003_v22 = vmul.f32 0.5, %v4002_v63  ;;  %v3928_v10 = vpop.xlane.xlu0 %3927  ;;  %v3843_v26 = vpop.xlane.xlu2 %3842  ;;  %3942 = vadd.xlane.f32.xlu0 %v3941_v32 }
 0x5db   :  { %v3970_v13 = vmul.f32 %v3928_v10, %v8476_v28  ;;  %v3880_v2 = vmul.f32 %v8476_v28, %v3843_v26 }
 0x5dc   :  { %v4004_v60 = vsub.f32 1.5, %v4003_v22 }
 0x5dd   :  { %v6307_v59 = vpop.eup %6306  ;;  %v3986_v30 = vadd.f32 1e-05, %v3970_v13  ;;  %v8624_v3 = vsub.f32 %v8511_v11, %v3880_v2  ;;  %v8633_v11 = vld [vmem:[%s9775_s10 + $0x1] ss:$0 sm:$0xff] }
 0x5de   :  { %v4005_v53 = vmul.f32 %v6305_v51, %v4004_v60  ;;  %v4011_v1 = vmul.f32 %v6307_v59, %v3985_v61  ;;  %vm4017_vm7 = vweird.f32 %v6307_v59  ;;  %v6400_v2 = vld [vmem:[%s9769_s0] sm:$0xff]  ;;  %v6401_v60 = vld [vmem:[%s9769_s0 + $0x8] sm:$0xff] }
 0x5df   :  { %6308 = vrsqrt.f32 %v3986_v30  ;;  %v3912_v29 = vmul.f32 %v8624_v3, %v8624_v3  ;;  %vm4018_vm9 = vmor %vm4016_vm8, %vm4017_vm7  ;;  %vm4026_vm11 = vweird.f32 %v3986_v30 }
 0x5e0   :  { %v4009_v9 = vsel %vm4008_vm6, %v6305_v51, %v4005_v53  ;;  %v4012_v4 = vmul.f32 %v6307_v59, %v4011_v1 }
 0x5e1   :  { %v3944_v7 = vsel %vm174_vm0, %v3912_v29, 0.0  ;;  %v4160_v12 = vmul.f32 %v4009_v9, %v8481_v47  ;;  %v8649_v47 = vld [vmem:[%s9775_s10 + $0x2] ss:$0 sm:$0xff] }
 0x5e2   :  { %v4013_v41 = vmul.f32 0.5, %v4012_v4  ;;  %v3931_v62 = vpop.xlane.xlu1 %3930  ;;  %v3846_v33 = vpop.xlane.xlu0 %3845  ;;  %3945 = vadd.xlane.f32.xlu0 %v3944_v7 }
 0x5e3   :  { %v3971_v8 = vmul.f32 %v3931_v62, %v8476_v28  ;;  %v3881_v57 = vmul.f32 %v8476_v28, %v3846_v33  ;;  %v4177_v31 = vmul.f32 %v8633_v11, %v4160_v12 }
 0x5e4   :  { %v4014_v14 = vsub.f32 1.5, %v4013_v41 }
 0x5e5   :  { %v6309_v20 = vpop.eup %6308  ;;  %v8638_v5 = vadd.f32 1e-05, %v3971_v8  ;;  %v8641_v43 = vsub.f32 %v8527_v54, %v3881_v57  ;;  %v4194_v58 = vadd.f32 %v8649_v47, %v4177_v31 }
 0x5e6   :  { %v4015_v24 = vmul.f32 %v6307_v59, %v4014_v14  ;;  %v4021_v52 = vmul.f32 %v6309_v20, %v3986_v30  ;;  %vm4027_vm10 = vweird.f32 %v6309_v20 }
 0x5e7   :  { %6310 = vrsqrt.f32 %v8638_v5  ;;  %v3913_v54 = vmul.f32 %v8641_v43, %v8641_v43  ;;  %v8671_v23 = vadd.f32 %v6400_v2, %v4194_v58  ;;  %vm4028_vm12 = vmor %vm4026_vm11, %vm4027_vm10  ;;  %vm4036_vm14 = vweird.f32 %v8638_v5  ;;  %v6402_v58 = vld [vmem:[%s9769_s0 + $0x10] sm:$0xff] }
 0x5e8   :  { %v4019_v55 = vsel %vm4018_vm9, %v6307_v59, %v4015_v24  ;;  %v4022_v49 = vmul.f32 %v6309_v20, %v4021_v52 }
 0x5e9   :  { %v4161_v0 = vmul.f32 %v4019_v55, %v8492_v39  ;;  %v3947_v51 = vsel %vm174_vm0, %v3913_v54, 0.0 }
 0x5ea   :  { %v4023_v61 = vmul.f32 0.5, %v4022_v49  ;;  %v3934_v40 = vpop.xlane.xlu1 %3933  ;;  %v3849_v6 = vpop.xlane.xlu0 %3848  ;;  %3948 = vadd.xlane.f32.xlu1 %v3947_v51  ;;  %3863 = vadd.xlane.f32.xlu0 %v3862_v38 }
 0x5eb   :  { %v4178_v37 = vmul.f32 %v8633_v11, %v4161_v0  ;;  %v3972_v63 = vmul.f32 %v3934_v40, %v8476_v28  ;;  %v3882_v17 = vmul.f32 %v8476_v28, %v3849_v6 }
 0x5ec   :  { %v4024_v16 = vsub.f32 1.5, %v4023_v61 }
 0x5ed   :  { %v6311_v39 = vpop.eup %6310  ;;  %v4195_v32 = vadd.f32 %v8649_v47, %v4178_v37  ;;  %v3988_v22 = vadd.f32 1e-05, %v3972_v63  ;;  %v8665_v10 = vsub.f32 %v8543_v56, %v3882_v17 }
 0x5ee   :  { %v4025_v26 = vmul.f32 %v6309_v20, %v4024_v16  ;;  %v4031_v13 = vmul.f32 %v6311_v39, %v8638_v5  ;;  %vm4037_vm13 = vweird.f32 %v6311_v39 }
 0x5ef   :  { %v8676_v59 = vadd.f32 %v6401_v60, %v4195_v32  ;;  %6312 = vrsqrt.f32 %v3988_v22  ;;  %v3914_v56 = vmul.f32 %v8665_v10, %v8665_v10  ;;  %vm4038_vm15 = vmor %vm4036_vm14, %vm4037_vm13  ;;  %vm4046_vm2 = vweird.f32 %v3988_v22 }
 0x5f0   :  { %v4029_v36 = vsel %vm4028_vm12, %v6309_v20, %v4025_v26  ;;  %v4032_v34 = vmul.f32 %v6311_v39, %v4031_v13 }
 0x5f1   :  { %v3950_v30 = vsel %vm174_vm0, %v3914_v56, 0.0  ;;  %v4226_v53 = vpack.c.bf16 %v8676_v59, %v8671_v23  ;;  %v4162_v9 = vmul.f32 %v4029_v36, %v8508_v25 }
 0x5f2   :  { %v4033_v1 = vmul.f32 0.5, %v4032_v34  ;;  %v3937_v29 = vpop.xlane.xlu2 %3936  ;;  %v3852_v48 = vpop.xlane.xlu1 %3851  ;;  %3951 = vadd.xlane.f32.xlu1 %v3950_v30 }
 0x5f3   :  { %v3973_v4 = vmul.f32 %v3937_v29, %v8476_v28  ;;  %v3883_v46 = vmul.f32 %v8476_v28, %v3852_v48  ;;  %5923 = vmatmul.msk.bf16.vlgmr.msrb.gmra.mxu0 %vm174_vm0, %v4226_v53  ;;  %5939 = vmatmul.msk.bf16.vlgmr.msra.gmra.mxu1 %vm174_vm0, %v4226_v53  ;;  %v4179_v25 = vmul.f32 %v8633_v11, %v4162_v9 }
 0x5f4   :  { %v4034_v7 = vsub.f32 1.5, %v4033_v1 }
 0x5f5   :  { %v6313_v41 = vpop.eup %6312  ;;  %v3989_v62 = vadd.f32 1e-05, %v3973_v4  ;;  %v8689_v33 = vsub.f32 %v8559_v21, %v3883_v46  ;;  %v4196_v49 = vadd.f32 %v8649_v47, %v4179_v25 }
 0x5f6   :  { %v4035_v12 = vmul.f32 %v6311_v39, %v4034_v7  ;;  %v4041_v8 = vmul.f32 %v6313_v41, %v3988_v22  ;;  %vm4047_vm1 = vweird.f32 %v6313_v41 }
 0x5f7   :  { %6314 = vrsqrt.f32 %v3989_v62  ;;  %v3915_v57 = vmul.f32 %v8689_v33, %v8689_v33  ;;  %vm4048_vm3 = vmor %vm4046_vm2, %vm4047_vm1  ;;  %v8709_v37 = vadd.f32 %v6402_v58, %v4196_v49  ;;  %vm4056_vm5 = vweird.f32 %v3989_v62 }
 0x5f8   :  { %v4039_v14 = vsel %vm4038_vm15, %v6311_v39, %v4035_v12  ;;  %v4042_v20 = vmul.f32 %v6313_v41, %v4041_v8 }
 0x5f9   :  { %v4163_v24 = vmul.f32 %v4039_v14, %v8524_v50  ;;  %v3953_v52 = vsel %vm174_vm0, %v3915_v57, 0.0 }
 0x5fa   :  { %v4043_v31 = vmul.f32 0.5, %v4042_v20  ;;  %v3940_v21 = vpop.xlane.xlu2 %3939  ;;  %v3855_v54 = vpop.xlane.xlu1 %3854  ;;  %3954 = vadd.xlane.f32.xlu2 %v3953_v52 }
 0x5fb   :  { %v4180_v5 = vmul.f32 %v8633_v11, %v4163_v24  ;;  %v3884_v55 = vmul.f32 %v8476_v28, %v3855_v54  ;;  %v3974_v25 = vmul.f32 %v3940_v21, %v8476_v28 }
 0x5fc   :  { %v4044_v0 = vsub.f32 1.5, %v4043_v31 }
 0x5fd   :  { %v6315_v51 = vpop.eup %6314  ;;  %v8701_v38 = vsub.f32 %v8575_v15, %v3884_v55  ;;  %v4197_v50 = vadd.f32 %v8649_v47, %v4180_v5  ;;  %v6403_v15 = vld [vmem:[%s9769_s0 + $0x18] sm:$0xff]  ;;  %v3990_v57 = vadd.f32 1e-05, %v3974_v25 }
 0x5fe   :  { %v4045_v61 = vmul.f32 %v6313_v41, %v4044_v0  ;;  %v4051_v40 = vmul.f32 %v6315_v51, %v3989_v62  ;;  %vm4057_vm4 = vweird.f32 %v6315_v51  ;;  %v6405_v62 = vld [vmem:[%s9769_s0 + $0x28] sm:$0xff] }
 0x5ff   :  { %v3916_v6 = vmul.f32 %v8701_v38, %v8701_v38  ;;  %v8714_v63 = vadd.f32 %v6403_v15, %v4197_v50  ;;  %vm4058_vm6 = vmor %vm4056_vm5, %vm4057_vm4  ;;  %6316 = vrsqrt.f32 %v3990_v57  ;;  %vm4066_vm8 = vweird.f32 %v3990_v57 }
 0x600   :  { %v4049_v17 = vsel %vm4048_vm3, %v6313_v41, %v4045_v61  ;;  %v4052_v16 = vmul.f32 %v6315_v51, %v4051_v40 }
 0x601   :  { %v3956_v39 = vsel %vm174_vm0, %v3916_v6, 0.0  ;;  %v4227_v32 = vpack.c.bf16 %v8714_v63, %v8709_v37  ;;  %v4164_v13 = vmul.f32 %v4049_v17, %v8540_v44 }
 0x602   :  { %v4053_v22 = vmul.f32 0.5, %v4052_v16  ;;  %v3858_v26 = vpop.xlane.xlu2 %3857  ;;  %3957 = vadd.xlane.f32.xlu0 %v3956_v39 }
 0x603   :  { %v3885_v2 = vmul.f32 %v8476_v28, %v3858_v26  ;;  %5924 = vmatmul.msk.bf16.gmra.mxu0 %vm174_vm0, %v4227_v32  ;;  %5940 = vmatmul.msk.bf16.gmra.mxu1 %vm174_vm0, %v4227_v32  ;;  %v4181_v34 = vmul.f32 %v8633_v11, %v4164_v13 }
 0x604   :  { %v4054_v60 = vsub.f32 1.5, %v4053_v22 }
 0x605   :  { %v8724_v56 = vsub.f32 %v8587_v19, %v3885_v2  ;;  %v4198_v9 = vadd.f32 %v8649_v47, %v4181_v34  ;;  %v6317_v14 = vpop.eup %6316 }
 0x606   :  { %v4055_v36 = vmul.f32 %v6315_v51, %v4054_v60  ;;  %v4061_v20 = vmul.f32 %v6317_v14, %v3990_v57  ;;  %vm4067_vm7 = vweird.f32 %v6317_v14  ;;  %v6407_v57 = vld [vmem:[%s9769_s0 + $0x38] sm:$0xff] }
 0x607   :  { %v3917_v30 = vmul.f32 %v8724_v56, %v8724_v56  ;;  %vm4068_vm9 = vmor %vm4066_vm8, %vm4067_vm7 }
 0x608   :  { %v4059_v44 = vsel %vm4058_vm6, %v6315_v51, %v4055_v36  ;;  %v4062_v24 = vmul.f32 %v6317_v14, %v4061_v20 }
 0x609   :  { %v4165_v53 = vmul.f32 %v4059_v44, %v8556_v18  ;;  %v3959_v1 = vsel %vm174_vm0, %v3917_v30, 0.0  ;;  %v6404_v18 = vld [vmem:[%s9769_s0 + $0x20] sm:$0xff] }
 0x60a   :  { %3960 = vadd.xlane.f32.xlu1 %v3959_v1  ;;  %v3861_v29 = vpop.xlane.xlu2 %3860  ;;  %v8743_v41 = vadd.f32 %v6404_v18, %v4198_v9  ;;  %v4063_v54 = vmul.f32 0.5, %v4062_v24 }
 0x60b   :  { %v4182_v48 = vmul.f32 %v8633_v11, %v4165_v53  ;;  %v3886_v19 = vmul.f32 %v8476_v28, %v3861_v29 }
 0x60c   :  { %v4064_v55 = vsub.f32 1.5, %v4063_v54 }
 0x60d   :  { %v8735_v4 = vsub.f32 %v8593_v27, %v3886_v19  ;;  %v4199_v46 = vadd.f32 %v8649_v47, %v4182_v48 }
 0x60e   :  { %v4065_v51 = vmul.f32 %v6317_v14, %v4064_v55  ;;  %v8794_v55 = vld [vmem:[%s9778_s11 + $0x1] ss:$0 sm:$0xff] }
 0x60f   :  { %v3918_v7 = vmul.f32 %v8735_v4, %v8735_v4  ;;  %v8748_v12 = vadd.f32 %v6405_v62, %v4199_v46 }
 0x610   :  { %v4069_v40 = vsel %vm4068_vm9, %v6317_v14, %v4065_v51 }
 0x611   :  { %v3962_v27 = vsel %vm174_vm0, %v3918_v7, 0.0  ;;  %v4228_v8 = vpack.c.bf16 %v8748_v12, %v8743_v41  ;;  %v4166_v16 = vmul.f32 %v4069_v40, %v8572_v42 }
 0x612   :  { %3963 = vadd.xlane.f32.xlu2 %v3962_v27 }
 0x613   :  { %5925 = vmatmul.msk.bf16.gmra.mxu0 %vm174_vm0, %v4228_v8  ;;  %5941 = vmatmul.msk.bf16.gmra.mxu1 %vm174_vm0, %v4228_v8  ;;  %v4183_v34 = vmul.f32 %v8633_v11, %v4166_v16  ;;  %v6406_v8 = vld [vmem:[%s9769_s0 + $0x30] sm:$0xff] }
 0x615   :  { %v4200_v9 = vadd.f32 %v8649_v47, %v4183_v34 }
 0x617   :  { %v8778_v25 = vadd.f32 %v6406_v8, %v4200_v9 }
 0x64d   :  { %v3943_v52 = vpop.xlane.xlu0 %3942 }
 0x64e   :  { %v3975_v31 = vmul.f32 %v3943_v52, %v8476_v28 }
 0x650   :  { %v3991_v5 = vadd.f32 1e-05, %v3975_v31 }
 0x652   :  { %6318 = vrsqrt.f32 %v3991_v5  ;;  %vm4076_vm11 = vweird.f32 %v3991_v5 }
 0x655   :  { %v3946_v49 = vpop.xlane.xlu0 %3945 }
 0x656   :  { %v3976_v0 = vmul.f32 %v3946_v49, %v8476_v28 }
 0x658   :  { %v6319_v50 = vpop.eup %6318  ;;  %v3992_v61 = vadd.f32 1e-05, %v3976_v0 }
 0x659   :  { %v4071_v21 = vmul.f32 %v6319_v50, %v3991_v5  ;;  %vm4077_vm10 = vweird.f32 %v6319_v50 }
 0x65a   :  { %6320 = vrsqrt.f32 %v3992_v61  ;;  %vm4078_vm12 = vmor %vm4076_vm11, %vm4077_vm10  ;;  %vm4086_vm14 = vweird.f32 %v3992_v61 }
 0x65b   :  { %v4072_v6 = vmul.f32 %v6319_v50, %v4071_v21 }
 0x65d   :  { %v4073_v58 = vmul.f32 0.5, %v4072_v6  ;;  %v3949_v15 = vpop.xlane.xlu1 %3948  ;;  %v3864_v17 = vpop.xlane.xlu0 %3863 }
 0x65e   :  { %v3977_v39 = vmul.f32 %v3949_v15, %v8476_v28  ;;  %v3887_v32 = vmul.f32 %v8476_v28, %v3864_v17 }
 0x65f   :  { %v4074_v22 = vsub.f32 1.5, %v4073_v58 }
 0x660   :  { %v6321_v26 = vpop.eup %6320  ;;  %v3993_v13 = vadd.f32 1e-05, %v3977_v39  ;;  %v8762_v2 = vsub.f32 %v8644_v45, %v3887_v32 }
 0x661   :  { %v4075_v60 = vmul.f32 %v6319_v50, %v4074_v22  ;;  %v4081_v36 = vmul.f32 %v6321_v26, %v3992_v61  ;;  %vm4087_vm13 = vweird.f32 %v6321_v26 }
 0x662   :  { %6322 = vrsqrt.f32 %v3993_v13  ;;  %v3919_v42 = vmul.f32 %v8762_v2, %v8762_v2  ;;  %vm4088_vm15 = vmor %vm4086_vm14, %vm4087_vm13  ;;  %vm4096_vm2 = vweird.f32 %v3993_v13 }
 0x663   :  { %v4079_v30 = vsel %vm4078_vm12, %v6319_v50, %v4075_v60  ;;  %v4082_v44 = vmul.f32 %v6321_v26, %v4081_v36 }
 0x664   :  { %v4167_v53 = vmul.f32 %v4079_v30, %v8613_v35  ;;  %v3965_v1 = vsel %vm174_vm0, %v3919_v42, 0.0 }
 0x665   :  { %v4083_v29 = vmul.f32 0.5, %v4082_v44  ;;  %v3952_v48 = vpop.xlane.xlu1 %3951  ;;  %3966 = vadd.xlane.f32.xlu0 %v3965_v1 }
 0x666   :  { %v4184_v45 = vmul.f32 %v8633_v11, %v4167_v53  ;;  %v3978_v19 = vmul.f32 %v3952_v48, %v8476_v28  ;;  %v6408_v48 = vld [vmem:[%s9769_s0 + $0x40] sm:$0xff] }
 0x667   :  { %v4084_v46 = vsub.f32 1.5, %v4083_v29 }
 0x668   :  { %v6323_v7 = vpop.eup %6322  ;;  %v8772_v18 = vadd.f32 1e-05, %v3978_v19  ;;  %v4201_v62 = vadd.f32 %v8649_v47, %v4184_v45  ;;  %v6409_v19 = vld [vmem:[%s9769_s0 + $0x48] sm:$0xff] }
 0x669   :  { %v4085_v27 = vmul.f32 %v6321_v26, %v4084_v46  ;;  %v4091_v35 = vmul.f32 %v6323_v7, %v3993_v13  ;;  %vm4097_vm1 = vweird.f32 %v6323_v7 }
 0x66a   :  { %v8783_v14 = vadd.f32 %v6407_v57, %v4201_v62  ;;  %6324 = vrsqrt.f32 %v8772_v18  ;;  %vm4098_vm3 = vmor %vm4096_vm2, %vm4097_vm1  ;;  %vm4106_vm5 = vweird.f32 %v8772_v18 }
 0x66b   :  { %v4092_v20 = vmul.f32 %v6323_v7, %v4091_v35  ;;  %v4089_v24 = vsel %vm4088_vm15, %v6321_v26, %v4085_v27 }
 0x66c   :  { %v4229_v52 = vpack.c.bf16 %v8783_v14, %v8778_v25  ;;  %v4168_v49 = vmul.f32 %v4089_v24, %v8624_v3 }
 0x66d   :  { %v4093_v31 = vmul.f32 0.5, %v4092_v20  ;;  %v3955_v54 = vpop.xlane.xlu2 %3954 }
 0x66e   :  { %v3979_v5 = vmul.f32 %v3955_v54, %v8476_v28  ;;  %5926 = vmatmul.msk.bf16.gmra.mxu0 %vm174_vm0, %v4229_v52  ;;  %5942 = vmatmul.msk.bf16.gmra.mxu1 %vm174_vm0, %v4229_v52  ;;  %v4185_v6 = vmul.f32 %v8633_v11, %v4168_v49 }
 0x66f   :  { %v4094_v0 = vsub.f32 1.5, %v4093_v31 }
 0x670   :  { %v8797_v51 = vadd.f32 1e-05, %v3979_v5  ;;  %v4352_v50 = vpop.f32.mrf.mxu1  ;;  %v8799_v21 = vpop.eup %6324  ;;  %v4202_v26 = vadd.f32 %v8649_v47, %v4185_v6 }
 0x671   :  { %v4095_v61 = vmul.f32 %v6323_v7, %v4094_v0  ;;  %v8803_v40 = vadd.f32 %v8794_v55, %v4352_v50  ;;  %v4101_v17 = vmul.f32 %v8799_v21, %v8772_v18  ;;  %vm4107_vm4 = vweird.f32 %v8799_v21 }
 0x672   :  { %6326 = vrsqrt.f32 %v8797_v51  ;;  %v8836_v45 = vadd.f32 %v6408_v48, %v4202_v26  ;;  %vm8884_vm7 = vmor %vm4106_vm5, %vm4107_vm4  ;;  %vm4116_vm8 = vweird.f32 %v8797_v51 }
 0x673   :  { %v4099_v58 = vsel %vm4098_vm3, %v6323_v7, %v4095_v61  ;;  %v8808_v15 = vmul.f32 0.70710677, %v8803_v40  ;;  %v4102_v34 = vmul.f32 %v8799_v21, %v4101_v17 }
 0x674   :  { %v4169_v3 = vmul.f32 %v4099_v58, %v8641_v43 }
 0x675   :  { %v3958_v16 = vpop.xlane.xlu0 %3957  ;;  %v4424_v32 = vmul.f32 %v8808_v15, %v8808_v15  ;;  %v4103_v62 = vmul.f32 0.5, %v4102_v34 }
 0x676   :  { %v4186_v39 = vmul.f32 %v8633_v11, %v4169_v3  ;;  %v3980_v22 = vmul.f32 %v3958_v16, %v8476_v28 }
 0x677   :  { %v8819_v60 = vmin.f32 %v4424_v32, 16.0  ;;  %v4104_v0 = vsub.f32 1.5, %v4103_v62 }
 0x678   :  { %v8817_v13 = vpop.eup %6326  ;;  %v4354_v43 = vpop.f32.mrf.mxu1  ;;  %v4203_v36 = vadd.f32 %v8649_v47, %v4186_v39  ;;  %v8825_v30 = vadd.f32 1e-05, %v3980_v22 }
 0x679   :  { %v4111_v42 = vmul.f32 %v8817_v13, %v8797_v51  ;;  %v4426_v44 = vmul.f32 2.1237322e-06, %v8819_v60  ;;  %v4437_v53 = vmul.f32 3.8918573e-05, %v8819_v60  ;;  %v8831_v29 = vadd.f32 %v8794_v55, %v4354_v43 }
 0x67a   :  { %v8841_v9 = vadd.f32 %v6409_v19, %v4203_v36  ;;  %6328 = vrsqrt.f32 %v8825_v30  ;;  %v4105_v22 = vmul.f32 %v8799_v21, %v4104_v0  ;;  %vm4117_vm6 = vweird.f32 %v8817_v13 }
 0x67b   :  { %v4112_v1 = vmul.f32 %v8817_v13, %v4111_v42  ;;  %v4427_v46 = vadd.f32 0.00028619796, %v4426_v44  ;;  %v4438_v7 = vadd.f32 0.001143296, %v4437_v53  ;;  %v8845_v27 = vmul.f32 0.70710677, %v8831_v29  ;;  %vm4118_vm9 = vmor %vm4116_vm8, %vm4117_vm6 }
 0x67c   :  { %v4230_v8 = vpack.c.bf16 %v8841_v9, %v8836_v45  ;;  %v4109_v62 = vsel %vm8884_vm7, %v8799_v21, %v4105_v22  ;;  %vm4126_vm10 = vweird.f32 %v8825_v30 }
 0x67d   :  { %v3961_v35 = vpop.xlane.xlu1 %3960  ;;  %v4428_v57 = vmul.f32 %v4427_v46, %v8819_v60  ;;  %v4439_v20 = vmul.f32 %v4438_v7, %v8819_v60  ;;  %v4113_v52 = vmul.f32 0.5, %v4112_v1  ;;  %v4464_v31 = vmul.f32 %v8845_v27, %v8845_v27 }
 0x67e   :  { %v3981_v24 = vmul.f32 %v3961_v35, %v8476_v28  ;;  %5927 = vmatmul.msk.bf16.gmra.mxu0 %vm174_vm0, %v4230_v8  ;;  %5943 = vmatmul.msk.bf16.gmra.mxu1 %vm174_vm0, %v4230_v8  ;;  %v4170_v0 = vmul.f32 %v4109_v62, %v8665_v10 }
 0x67f   :  { %v4429_v54 = vadd.f32 0.0036580483, %v4428_v57  ;;  %v4440_v5 = vadd.f32 0.014752088, %v4439_v20  ;;  %v8858_v50 = vmin.f32 %v4464_v31, 16.0  ;;  %v4114_v17 = vsub.f32 1.5, %v4113_v52 }
 0x680   :  { %v8856_v49 = vadd.f32 1e-05, %v3981_v24  ;;  %v4357_v58 = vpop.f32.mrf.mxu1  ;;  %v8863_v3 = vpop.eup %6328  ;;  %v6030_v57 = vld [vmem:[%s9779_s9 + $0x38] sm:$0xff] }
 0x681   :  { %v4430_v61 = vmul.f32 %v4429_v54, %v8819_v60  ;;  %v4441_v6 = vmul.f32 %v4440_v5, %v8819_v60  ;;  %v4466_v16 = vmul.f32 2.1237322e-06, %v8858_v50  ;;  %v4477_v39 = vmul.f32 3.8918573e-05, %v8858_v50  ;;  %5186 = vmatpush.bf16.msra.mxu2 %v6030_v57 }
 0x682   :  { %6330 = vrsqrt.f32 %v8856_v49  ;;  %v8870_v36 = vadd.f32 %v8794_v55, %v4357_v58  ;;  %v4121_v44 = vmul.f32 %v8863_v3, %v8825_v30  ;;  %v4115_v53 = vmul.f32 %v8817_v13, %v4114_v17  ;;  %v6029_v58 = vld [vmem:[%s9779_s9 + $0x30] sm:$0xff] }
 0x683   :  { %v4442_v32 = vadd.f32 0.112945676, %v4441_v6  ;;  %v4467_v26 = vadd.f32 0.00028619796, %v4466_v16  ;;  %v4478_v43 = vadd.f32 0.001143296, %v4477_v39  ;;  %vm4127_vm11 = vweird.f32 %v8863_v3 }
 0x684   :  { %v4431_v34 = vadd.f32 0.05243302, %v4430_v61  ;;  %v8889_v7 = vmul.f32 0.70710677, %v8870_v36  ;;  %v4122_v52 = vmul.f32 %v8863_v3, %v4121_v44  ;;  %v4119_v21 = vsel %vm4118_vm9, %v8817_v13, %v4115_v53  ;;  %vm8959_vm15 = vmor %vm4126_vm10, %vm4127_vm11  ;;  %v6410_v30 = vld [vmem:[%s9769_s0 + $0x50] sm:$0xff] }
 0x685   :  { %v4443_v42 = vmul.f32 %v4442_v32, %v8819_v60  ;;  %v4468_v1 = vmul.f32 %v4467_v26, %v8858_v50  ;;  %v4479_v48 = vmul.f32 %v4478_v43, %v8858_v50  ;;  %v4171_v13 = vmul.f32 %v4119_v21, %v8689_v33  ;;  %5187 = vmatpush.bf16.msra.mxu2 %v6029_v58  ;;  %v6028_v33 = vld [vmem:[%s9779_s9 + $0x28] sm:$0xff] }
 0x686   :  { %v4432_v20 = vmul.f32 %v4431_v34, %v8819_v60  ;;  %v4504_v31 = vmul.f32 %v8889_v7, %v8889_v7  ;;  %v4123_v39 = vmul.f32 0.5, %v4122_v52  ;;  %v4187_v43 = vmul.f32 %v8633_v11, %v4170_v0 }
 0x687   :  { %v4444_v46 = vadd.f32 0.4994258, %v4443_v42  ;;  %v4469_v35 = vadd.f32 0.0036580483, %v4468_v1  ;;  %v4480_v8 = vadd.f32 0.014752088, %v4479_v48  ;;  %v4188_v53 = vmul.f32 %v8633_v11, %v4171_v13 }
 0x688   :  { %v8880_v19 = vpop.eup %6330  ;;  %v8911_v6 = vmin.f32 %v4504_v31, 16.0  ;;  %v4433_v16 = vadd.f32 0.18741608, %v4432_v20  ;;  %v4359_v32 = vpop.f32.mrf.mxu1  ;;  %v4124_v48 = vsub.f32 1.5, %v4123_v39  ;;  %vm4136_vm12 = vweird.f32 %v8856_v49 }
 0x689   :  { %v4445_v24 = vmul.f32 %v4444_v46, %v8819_v60  ;;  %v4470_v51 = vmul.f32 %v4469_v35, %v8858_v50  ;;  %v4481_v54 = vmul.f32 %v4480_v8, %v8858_v50  ;;  %v4131_v5 = vmul.f32 %v8880_v19, %v8856_v49  ;;  %5188 = vmatpush.bf16.msra.mxu2 %v6028_v33  ;;  %v6411_v33 = vld [vmem:[%s9769_s0 + $0x58] sm:$0xff]  ;;  %v4285_v49 = vpop.f32.mrf.mxu0 }
 0x68a   :  { %v4517_v34 = vmul.f32 3.8918573e-05, %v8911_v6  ;;  %v8923_v44 = vadd.f32 %v8794_v55, %v4359_v32  ;;  %v4434_v1 = vmul.f32 %v4433_v16, %v8819_v60  ;;  %v4506_v57 = vmul.f32 2.1237322e-06, %v8911_v6  ;;  %v6027_v32 = vld [vmem:[%s9779_s9 + $0x20] sm:$0xff] }
 0x68b   :  { %v8909_v61 = vadd.f32 1.0, %v4445_v24  ;;  %v4482_v17 = vadd.f32 0.112945676, %v4481_v54  ;;  %v4471_v22 = vadd.f32 0.05243302, %v4470_v51  ;;  %v4132_v10 = vmul.f32 %v8880_v19, %v4131_v5 }
 0x68c   :  { %v4518_v18 = vadd.f32 0.001143296, %v4517_v34  ;;  %v4204_v24 = vadd.f32 %v8649_v47, %v4187_v43  ;;  %v8942_v31 = vmul.f32 0.70710677, %v8923_v44  ;;  %v4435_v21 = vadd.f32 1.1283791, %v4434_v1 }
 0x68d   :  { %6332 = vrcp.f32 %v8909_v61  ;;  %v4483_v26 = vmul.f32 %v4482_v17, %v8858_v50  ;;  %v4472_v46 = vmul.f32 %v4471_v22, %v8858_v50  ;;  %v4133_v35 = vmul.f32 0.5, %v4132_v10  ;;  %5189 = vmatpush.bf16.msra.mxu2 %v6027_v32 }
 0x68e   :  { %v4519_v20 = vmul.f32 %v4518_v18, %v8911_v6  ;;  %v8945_v51 = vmul.f32 %v8863_v3, %v4124_v48  ;;  %v4205_v5 = vadd.f32 %v8649_v47, %v4188_v53  ;;  %v4456_v13 = vand.u32 2147483647, %v8909_v61 }
 0x68f   :  { %v4484_v42 = vadd.f32 0.4994258, %v4483_v26  ;;  %v4473_v58 = vadd.f32 0.18741608, %v4472_v46  ;;  %v4134_v17 = vsub.f32 1.5, %v4133_v35  ;;  %v4458_v16 = vand.u32 2147483648, %v8909_v61 }
 0x690   :  { %v4520_v54 = vadd.f32 0.014752088, %v4519_v20  ;;  %vm4137_vm13 = vweird.f32 %v8880_v19  ;;  %v4507_v39 = vadd.f32 0.00028619796, %v4506_v57  ;;  %v4544_v43 = vmul.f32 %v8942_v31, %v8942_v31  ;;  %v6026_v20 = vld [vmem:[%s9779_s9 + $0x18] sm:$0xff] }
 0x691   :  { %v4485_v62 = vmul.f32 %v4484_v42, %v8858_v50  ;;  %vm4452_vm1 = vweird.f32 %v8909_v61  ;;  %v4129_v34 = vsel %vm8959_vm15, %v8863_v3, %v8945_v51  ;;  %v8974_v42 = vadd.f32 %v6410_v30, %v4204_v24  ;;  %v4362_v3 = vpop.f32.mrf.mxu1  ;;  %vm8999_vm4 = vmor %vm4136_vm12, %vm4137_vm13  ;;  %5190 = vmatpush.bf16.msra.mxu2 %v6026_v20  ;;  %v6024_v20 = vld [vmem:[%s9779_s9 + $0x8] sm:$0xff] }
 0x692   :  { %v4521_v10 = vmul.f32 %v4520_v54, %v8911_v6  ;;  %v8979_v53 = vadd.f32 %v6411_v33, %v4205_v5  ;;  %v4135_v48 = vmul.f32 %v8880_v19, %v4134_v17  ;;  %v4459_v46 = vor.u32 1.1754944e-38, %v4458_v16 }
 0x693   :  { %v6333_v8 = vpop.eup %6332  ;;  %v8938_v52 = vadd.f32 1.0, %v4485_v62  ;;  %v4508_v62 = vmul.f32 %v4507_v39, %v8911_v6  ;;  %v8985_v35 = vmin.f32 %v4544_v43, 16.0  ;;  %vm4457_vm3 = vcmp.eq.f32.partialorder %v4456_v13, 8.507059e+37 }
 0x694   :  { %v4448_v60 = vmul.f32 %v6333_v8, %v8909_v61  ;;  %vm4453_vm14 = vweird.f32 %v6333_v8  ;;  %v4474_v61 = vmul.f32 %v4473_v58, %v8858_v50  ;;  %v4522_v18 = vadd.f32 0.112945676, %v4521_v10 }
 0x695   :  { %6334 = vrcp.f32 %v8938_v52  ;;  %vm4454_vm2 = vmor %vm4452_vm1, %vm4453_vm14  ;;  %v4231_v57 = vpack.c.bf16 %v8979_v53, %v8974_v42  ;;  %v4436_v50 = vmul.f32 %v4435_v21, %v8808_v15  ;;  %v9006_v15 = vadd.f32 %v8794_v55, %v4362_v3 }
 0x696   :  { %v4449_v0 = vsub.f32 1.0, %v4448_v60  ;;  %v4523_v51 = vmul.f32 %v4522_v18, %v8911_v6  ;;  %v4139_v21 = vsel %vm8999_vm4, %v8880_v19, %v4135_v48  ;;  %v4546_v17 = vmul.f32 2.1237322e-06, %v8985_v35 }
 0x697   :  { %5928 = vmatmul.msk.bf16.gmra.mxu0 %vm174_vm0, %v4231_v57  ;;  %5944 = vmatmul.msk.bf16.gmra.mxu1 %vm174_vm0, %v4231_v57  ;;  %v4509_v39 = vadd.f32 0.0036580483, %v4508_v62  ;;  %v4557_v32 = vmul.f32 3.8918573e-05, %v8985_v35  ;;  %v4496_v26 = vand.u32 2147483647, %v8938_v52  ;;  %vm4492_vm6 = vweird.f32 %v8938_v52 }
 0x698   :  { %v4450_v22 = vmul.f32 %v6333_v8, %v4449_v0  ;;  %v4524_v58 = vadd.f32 0.4994258, %v4523_v51  ;;  %v4498_v10 = vand.u32 2147483648, %v8938_v52  ;;  %v4547_v30 = vadd.f32 0.00028619796, %v4546_v17 }
 0x699   :  { %v4558_v33 = vadd.f32 0.001143296, %v4557_v32  ;;  %v4173_v48 = vmul.f32 %v4139_v21, %v8724_v56  ;;  %v4510_v62 = vmul.f32 %v4509_v39, %v8911_v6  ;;  %vm4497_vm8 = vcmp.eq.f32.partialorder %v4496_v26, 8.507059e+37  ;;  %v4364_v0 = vpop.f32.mrf.mxu1  ;;  %v4287_v32 = vpop.f32.mrf.mxu0 }
 0x69a   :  { %v4451_v1 = vadd.f32 %v6333_v8, %v4450_v22  ;;  %v6025_v22 = vld [vmem:[%s9779_s9 + $0x10] sm:$0xff]  ;;  %v4525_v19 = vmul.f32 %v4524_v58, %v8911_v6  ;;  %v4499_v56 = vor.u32 1.1754944e-38, %v4498_v10  ;;  %v9055_v10 = vadd.f32 %v8794_v55, %v4364_v0 }
 0x69b   :  { %v6335_v24 = vpop.eup %6334  ;;  %5191 = vmatpush.bf16.msra.mxu2 %v6025_v22  ;;  %v4559_v57 = vmul.f32 %v4558_v33, %v8985_v35  ;;  %v4511_v17 = vadd.f32 0.05243302, %v4510_v62 }
 0x69c   :  { %v4455_v60 = vsel %vm4454_vm2, %v6333_v8, %v4451_v1  ;;  %v4488_v5 = vmul.f32 %v6335_v24, %v8938_v52  ;;  %v4475_v8 = vadd.f32 1.1283791, %v4474_v61  ;;  %vm4493_vm5 = vweird.f32 %v6335_v24 }
 0x69d   :  { %v4460_v54 = vsel %vm4457_vm3, %v4459_v46, %v4455_v60  ;;  %v9020_v1 = vmul.f32 0.70710677, %v9006_v15  ;;  %v4172_v61 = vmul.f32 %v4129_v34, %v8701_v38  ;;  %v9025_v18 = vadd.f32 1.0, %v4525_v19  ;;  %v9035_v38 = vld [vmem:[%s9778_s11] ss:$0 sm:$0xff]  ;;  %vm4494_vm7 = vmor %vm4492_vm6, %vm4493_vm5 }
 0x69e   :  { %v4461_v13 = vmul.f32 %v4460_v54, %v4436_v50  ;;  %v4489_v16 = vsub.f32 1.0, %v4488_v5  ;;  %v4476_v34 = vmul.f32 %v4475_v8, %v8845_v27  ;;  %v4548_v60 = vmul.f32 %v4547_v30, %v8985_v35 }
 0x69f   :  { %6336 = vrcp.f32 %v9025_v18  ;;  %v4584_v52 = vmul.f32 %v9020_v1, %v9020_v1  ;;  %v4189_v51 = vmul.f32 %v8633_v11, %v4172_v61  ;;  %v4190_v5 = vmul.f32 %v8633_v11, %v4173_v48  ;;  %5192 = vmatpush.bf16.msra.mxu2 %v6024_v20 }
 0x6a0   :  { %v4490_v43 = vmul.f32 %v6335_v24, %v4489_v16  ;;  %v5947_v3 = vclamps-f32 %v4461_v13, 1.0  ;;  %v4560_v13 = vadd.f32 0.014752088, %v4559_v57  ;;  %v6023_v16 = vld [vmem:[%s9779_s9] sm:$0xff]  ;;  %v4286_v27 = vadd.f32 %v9035_v38, %v4285_v49 }
 0x6a1   :  { %v4393_v8 = vmul.f32 0.5, %v8831_v29  ;;  %v9051_v39 = vmin.f32 %v4584_v52, 16.0  ;;  %v4549_v22 = vadd.f32 0.0036580483, %v4548_v60  ;;  %v4207_v29 = vadd.f32 %v8649_v47, %v4190_v5  ;;  %v6412_v60 = vld [vmem:[%s9769_s0 + $0x60] sm:$0xff] }
 0x6a2   :  { %v4491_v46 = vadd.f32 %v6335_v24, %v4490_v43  ;;  %v5064_v21 = vadd.f32 1.0, %v5947_v3  ;;  %v4561_v26 = vmul.f32 %v4560_v13, %v8985_v35  ;;  %v4512_v61 = vmul.f32 %v4511_v17, %v8911_v6 }
 0x6a3   :  { %v4586_v43 = vmul.f32 2.1237322e-06, %v9051_v39  ;;  %v4597_v49 = vmul.f32 3.8918573e-05, %v9051_v39  ;;  %5193 = vmatpush.bf16.msra.mxu2 %v6023_v16  ;;  %v4288_v3 = vadd.f32 %v9035_v38, %v4287_v32  ;;  %v4550_v52 = vmul.f32 %v4549_v22, %v8985_v35 }
 0x6a4   :  { %v4495_v50 = vsel %vm4494_vm7, %v6335_v24, %v4491_v46  ;;  %v4392_v24 = vmul.f32 0.5, %v8803_v40  ;;  %v4206_v40 = vadd.f32 %v8649_v47, %v4189_v51  ;;  %v4562_v46 = vadd.f32 0.112945676, %v4561_v26 }
 0x6a5   :  { %v4500_v54 = vsel %vm4497_vm8, %v4499_v56, %v4495_v50  ;;  %v9057_v19 = vpop.eup %6336  ;;  %v4587_v62 = vadd.f32 0.00028619796, %v4586_v43  ;;  %v4598_v57 = vadd.f32 0.001143296, %v4597_v49  ;;  %v4551_v22 = vadd.f32 0.05243302, %v4550_v52 }
 0x6a6   :  { %v4501_v58 = vmul.f32 %v4500_v54, %v4476_v34  ;;  %v5080_v30 = vmul.f32 %v5064_v21, %v4392_v24  ;;  %v4528_v48 = vmul.f32 %v9057_v19, %v9025_v18  ;;  %v9069_v34 = vmul.f32 0.70710677, %v9055_v10  ;;  %v6413_v54 = vld [vmem:[%s9769_s0 + $0x68] sm:$0xff] }
 0x6a7   :  { %v4563_v47 = vmul.f32 %v4562_v46, %v8985_v35  ;;  %v4599_v50 = vmul.f32 %v4598_v57, %v9051_v39  ;;  %v9076_v51 = vadd.f32 %v6412_v60, %v4206_v40  ;;  %v9081_v5 = vadd.f32 %v6413_v54, %v4207_v29 }
 0x6a8   :  { %v5948_v11 = vclamps-f32 %v4501_v58, 1.0  ;;  %v4529_v56 = vsub.f32 1.0, %v4528_v48  ;;  %v5096_v0 = vmul.f32 %v5080_v30, %v4286_v27  ;;  %v4513_v58 = vadd.f32 0.18741608, %v4512_v61 }
 0x6a9   :  { %v4624_v17 = vmul.f32 %v9069_v34, %v9069_v34  ;;  %v4564_v13 = vadd.f32 0.4994258, %v4563_v47  ;;  %v4588_v16 = vmul.f32 %v4587_v62, %v9051_v39  ;;  %v4600_v24 = vadd.f32 0.014752088, %v4599_v50 }
 0x6aa   :  { %v5065_v33 = vadd.f32 1.0, %v5948_v11  ;;  %v4530_v11 = vmul.f32 %v9057_v19, %v4529_v56  ;;  %v4514_v49 = vmul.f32 %v4513_v58, %v8911_v6  ;;  %vm4533_vm9 = vweird.f32 %v9057_v19 }
 0x6ab   :  { %v9089_v26 = vmin.f32 %v4624_v17, 16.0  ;;  %v4565_v27 = vmul.f32 %v4564_v13, %v8985_v35  ;;  %v4601_v43 = vmul.f32 %v4600_v24, %v9051_v39  ;;  %v4538_v57 = vand.u32 2147483648, %v9025_v18 }
 0x6ac   :  { %v5081_v20 = vmul.f32 %v5065_v33, %v4393_v8  ;;  %v4232_v8 = vpack.c.bf16 %v9081_v5, %v9076_v51  ;;  %v4589_v33 = vadd.f32 0.0036580483, %v4588_v16  ;;  %v4531_v48 = vadd.f32 %v9057_v19, %v4530_v11  ;;  %v3964_v16 = vpop.xlane.xlu2 %3963 }
 0x6ad   :  { %v4626_v40 = vmul.f32 2.1237322e-06, %v9089_v26  ;;  %v4637_v29 = vmul.f32 3.8918573e-05, %v9089_v26  ;;  %v4566_v30 = vadd.f32 1.0, %v4565_v27  ;;  %vm4532_vm10 = vweird.f32 %v9025_v18 }
 0x6ae   :  { %v5097_v21 = vmul.f32 %v5081_v20, %v4288_v3  ;;  %5929 = vmatmul.msk.bf16.gmra.mxu0 %vm174_vm0, %v4232_v8  ;;  %5945 = vmatmul.msk.bf16.gmra.mxu1 %vm174_vm0, %v4232_v8  ;;  %v4602_v61 = vadd.f32 0.112945676, %v4601_v43  ;;  %v4552_v3 = vmul.f32 %v4551_v22, %v8985_v35  ;;  %v4536_v6 = vand.u32 2147483647, %v9025_v18  ;;  %vm4534_vm11 = vmor %vm4532_vm10, %vm4533_vm9 }
 0x6af   :  { %v4627_v46 = vadd.f32 0.00028619796, %v4626_v40  ;;  %v4638_v62 = vadd.f32 0.001143296, %v4637_v29  ;;  %6338 = vrcp.f32 %v4566_v30  ;;  %v4590_v56 = vmul.f32 %v4589_v33, %v9051_v39 }
 0x6b0   :  { %v5112_v32 = vpack.c.bf16 %v5097_v21, %v5096_v0  ;;  %v4603_v20 = vmul.f32 %v4602_v61, %v9051_v39  ;;  %v4515_v50 = vadd.f32 1.1283791, %v4514_v49  ;;  %v4535_v60 = vsel %vm4534_vm11, %v9057_v19, %v4531_v48  ;;  %v4290_v49 = vpop.f32.mrf.mxu0 }
 0x6b1   :  { %v4628_v52 = vmul.f32 %v4627_v46, %v9089_v26  ;;  %v4639_v47 = vmul.f32 %v4638_v62, %v9089_v26  ;;  %v4553_v54 = vadd.f32 0.18741608, %v4552_v3  ;;  %v4539_v21 = vor.u32 1.1754944e-38, %v4538_v57 }
 0x6b2   :  { %5194 = vmatmul.bf16.vlgmr.msra.gmra.mxu2 %v5112_v32  ;;  %v4604_v0 = vadd.f32 0.4994258, %v4603_v20  ;;  %vm4537_vm12 = vcmp.eq.f32.partialorder %v4536_v6, 8.507059e+37  ;;  %v4591_v24 = vadd.f32 0.05243302, %v4590_v56  ;;  %v4516_v11 = vmul.f32 %v4515_v50, %v8889_v7 }
 0x6b3   :  { %v4640_v58 = vadd.f32 0.014752088, %v4639_v47  ;;  %v4540_v13 = vsel %vm4537_vm12, %v4539_v21, %v4535_v60  ;;  %v4629_v8 = vadd.f32 0.0036580483, %v4628_v52  ;;  %v4554_v22 = vmul.f32 %v4553_v54, %v8985_v35 }
 0x6b4   :  { %v4605_v17 = vmul.f32 %v4604_v0, %v9051_v39  ;;  %v4541_v40 = vmul.f32 %v4540_v13, %v4516_v11  ;;  %v3982_v29 = vmul.f32 %v3964_v16, %v8476_v28  ;;  %v4578_v61 = vand.u32 2147483648, %v4566_v30 }
 0x6b5   :  { %v6339_v18 = vpop.eup %6338  ;;  %v4641_v32 = vmul.f32 %v4640_v58, %v9089_v26  ;;  %v4592_v48 = vmul.f32 %v4591_v24, %v9051_v39  ;;  %v4630_v3 = vmul.f32 %v4629_v8, %v9089_v26  ;;  %v4555_v62 = vadd.f32 1.1283791, %v4554_v22 }
 0x6b6   :  { %v4568_v27 = vmul.f32 %v6339_v18, %v4566_v30  ;;  %v4606_v19 = vadd.f32 1.0, %v4605_v17  ;;  %vm4573_vm13 = vweird.f32 %v6339_v18  ;;  %v4576_v35 = vand.u32 2147483647, %v4566_v30 }
 0x6b7   :  { %v4642_v43 = vadd.f32 0.112945676, %v4641_v32  ;;  %v5949_v6 = vclamps-f32 %v4541_v40, 1.0  ;;  %v9117_v20 = vadd.f32 1e-05, %v3982_v29  ;;  %vm4572_vm14 = vweird.f32 %v4566_v30 }
 0x6b8   :  { %v4569_v33 = vsub.f32 1.0, %v4568_v27  ;;  %6340 = vrcp.f32 %v4606_v19  ;;  %vm4574_vm15 = vmor %vm4572_vm14, %vm4573_vm13  ;;  %v4579_v52 = vor.u32 1.1754944e-38, %v4578_v61  ;;  %v4593_v47 = vadd.f32 0.18741608, %v4592_v48  ;;  %v4292_v22 = vpop.f32.mrf.mxu0 }
 0x6b9   :  { %v4643_v46 = vmul.f32 %v4642_v43, %v9089_v26  ;;  %v4631_v50 = vadd.f32 0.05243302, %v4630_v3  ;;  %v4556_v0 = vmul.f32 %v4555_v62, %v8942_v31  ;;  %vm4577_vm1 = vcmp.eq.f32.partialorder %v4576_v35, 8.507059e+37 }
 0x6ba   :  { %v4570_v7 = vmul.f32 %v6339_v18, %v4569_v33  ;;  %v5066_v13 = vadd.f32 1.0, %v5949_v6  ;;  %6342 = vrsqrt.f32 %v9117_v20  ;;  %v4594_v30 = vmul.f32 %v4593_v47, %v9051_v39 }
 0x6bb   :  { %v4644_v57 = vadd.f32 0.4994258, %v4643_v46  ;;  %v4632_v32 = vmul.f32 %v4631_v50, %v9089_v26  ;;  %v4394_v11 = vmul.f32 0.5, %v8870_v36  ;;  %v4618_v43 = vand.u32 2147483648, %v4606_v19 }
 0x6bc   :  { %v4571_v56 = vadd.f32 %v6339_v18, %v4570_v7  ;;  %v4395_v29 = vmul.f32 0.5, %v8923_v44  ;;  %v4595_v61 = vadd.f32 1.1283791, %v4594_v30  ;;  %vm4612_vm3 = vweird.f32 %v4606_v19 }
 0x6bd   :  { %v4645_v60 = vmul.f32 %v4644_v57, %v9089_v26  ;;  %v5082_v40 = vmul.f32 %v5066_v13, %v4394_v11  ;;  %v4633_v39 = vadd.f32 0.18741608, %v4632_v32  ;;  %v4291_v3 = vadd.f32 %v9035_v38, %v4290_v49 }
 0x6be   :  { %v6341_v54 = vpop.eup %6340  ;;  %v4575_v21 = vsel %vm4574_vm15, %v6339_v18, %v4571_v56  ;;  %v4616_v18 = vand.u32 2147483647, %v4606_v19  ;;  %v4293_v46 = vadd.f32 %v9035_v38, %v4292_v22  ;;  %v4619_v62 = vor.u32 1.1754944e-38, %v4618_v43 }
 0x6bf   :  { %v4580_v58 = vsel %vm4577_vm1, %v4579_v52, %v4575_v21  ;;  %v4608_v17 = vmul.f32 %v6341_v54, %v4606_v19  ;;  %v4646_v24 = vadd.f32 1.0, %v4645_v60  ;;  %vm4613_vm2 = vweird.f32 %v6341_v54 }
 0x6c0   :  { %v4581_v16 = vmul.f32 %v4580_v58, %v4556_v0  ;;  %vm4614_vm4 = vmor %vm4612_vm3, %vm4613_vm2  ;;  %v6343_v7 = vpop.eup %6342  ;;  %vm4617_vm5 = vcmp.eq.f32.partialorder %v4616_v18, 8.507059e+37  ;;  %v5098_v56 = vmul.f32 %v5082_v40, %v4291_v3  ;;  %v4596_v44 = vmul.f32 %v4595_v61, %v9020_v1  ;;  %v4295_v21 = vpop.f32.mrf.mxu0 }
 0x6c1   :  { %v4609_v8 = vsub.f32 1.0, %v4608_v17  ;;  %6344 = vrcp.f32 %v4646_v24  ;;  %v4634_v47 = vmul.f32 %v4633_v39, %v9089_v26  ;;  %v4141_v50 = vmul.f32 %v6343_v7, %v9117_v20 }
 0x6c2   :  { %v5950_v27 = vclamps-f32 %v4581_v16, 1.0  ;;  %v4658_v58 = vand.u32 2147483648, %v4646_v24  ;;  %v4656_v13 = vand.u32 2147483647, %v4646_v24  ;;  %vm4652_vm7 = vweird.f32 %v4646_v24 }
 0x6c3   :  { %v4610_v31 = vmul.f32 %v6341_v54, %v4609_v8  ;;  %v4635_v17 = vadd.f32 1.1283791, %v4634_v47  ;;  %v4142_v16 = vmul.f32 %v6343_v7, %v4141_v50  ;;  %v4397_v39 = vmul.f32 0.5, %v9055_v10 }
 0x6c4   :  { %v5067_v33 = vadd.f32 1.0, %v5950_v27  ;;  %v4659_v1 = vor.u32 1.1754944e-38, %v4658_v58  ;;  %vm4657_vm9 = vcmp.eq.f32.partialorder %v4656_v13, 8.507059e+37  ;;  %vm4147_vm10 = vweird.f32 %v6343_v7 }
 0x6c5   :  { %v4611_v48 = vadd.f32 %v6341_v54, %v4610_v31  ;;  %v4636_v32 = vmul.f32 %v4635_v17, %v9069_v34  ;;  %v4143_v27 = vmul.f32 0.5, %v4142_v16  ;;  %v4296_v34 = vadd.f32 %v9035_v38, %v4295_v21 }
 0x6c6   :  { %v5083_v36 = vmul.f32 %v5067_v33, %v4395_v29  ;;  %v4396_v29 = vmul.f32 0.5, %v9006_v15  ;;  %vm4146_vm11 = vweird.f32 %v9117_v20  ;;  %v6414_v20 = vld [vmem:[%s9775_s10 + $0x1] ss:$0 sm:$0xff] }
 0x6c7   :  { %v4615_v35 = vsel %vm4614_vm4, %v6341_v54, %v4611_v48  ;;  %v6345_v57 = vpop.eup %6344  ;;  %v4144_v61 = vsub.f32 1.5, %v4143_v27  ;;  %vm4148_vm12 = vmor %vm4146_vm11, %vm4147_vm10 }
 0x6c8   :  { %v4620_v6 = vsel %vm4617_vm5, %v4619_v62, %v4615_v35  ;;  %v5099_v52 = vmul.f32 %v5083_v36, %v4293_v46  ;;  %v4648_v19 = vmul.f32 %v6345_v57, %v4646_v24  ;;  %vm4653_vm6 = vweird.f32 %v6345_v57  ;;  %v4297_v24 = vpop.f32.mrf.mxu0 }
 0x6c9   :  { %v4621_v60 = vmul.f32 %v4620_v6, %v4596_v44  ;;  %vm4654_vm8 = vmor %vm4652_vm7, %vm4653_vm6  ;;  %v4298_v46 = vadd.f32 %v9035_v38, %v4297_v24  ;;  %v4145_v62 = vmul.f32 %v6343_v7, %v4144_v61 }
 0x6ca   :  { %v5113_v49 = vpack.c.bf16 %v5099_v52, %v5098_v56  ;;  %v4649_v0 = vsub.f32 1.0, %v4648_v19 }
 0x6cb   :  { %v5951_v30 = vclamps-f32 %v4621_v60, 1.0  ;;  %v4149_v52 = vsel %vm4148_vm12, %v6343_v7, %v4145_v62 }
 0x6cc   :  { %5199 = vmatmul.bf16.gmra.mxu2 %v5113_v49  ;;  %v4650_v54 = vmul.f32 %v6345_v57, %v4649_v0  ;;  %v4174_v47 = vmul.f32 %v4149_v52, %v8735_v4 }
 0x6cd   :  { %v5068_v31 = vadd.f32 1.0, %v5951_v30 }
 0x6ce   :  { %v4651_v8 = vadd.f32 %v6345_v57, %v4650_v54  ;;  %v4191_v0 = vmul.f32 %v6414_v20, %v4174_v47  ;;  %v6415_v54 = vld [vmem:[%s9775_s10 + $0x2] ss:$0 sm:$0xff] }
 0x6cf   :  { %v5084_v48 = vmul.f32 %v5068_v31, %v4396_v29 }
 0x6d0   :  { %v4655_v11 = vsel %vm4654_vm8, %v6345_v57, %v4651_v8  ;;  %v4208_v13 = vadd.f32 %v6415_v54, %v4191_v0 }
 0x6d1   :  { %v4660_v43 = vsel %vm4657_vm9, %v4659_v1, %v4655_v11  ;;  %v5100_v57 = vmul.f32 %v5084_v48, %v4296_v34 }
 0x6d2   :  { %v4661_v18 = vmul.f32 %v4660_v43, %v4636_v32 }
 0x6d4   :  { %v5952_v33 = vclamps-f32 %v4661_v18, 1.0 }
 0x6d6   :  { %v5069_v3 = vadd.f32 1.0, %v5952_v33 }
 0x6d8   :  { %v3967_v26 = vpop.xlane.xlu0 %3966  ;;  %v5085_v36 = vmul.f32 %v5069_v3, %v4397_v39 }
 0x6d9   :  { %v3983_v22 = vmul.f32 %v3967_v26, %v8476_v28 }
 0x6da   :  { %v5101_v6 = vmul.f32 %v5085_v36, %v4298_v46 }
 0x6db   :  { %v3999_v40 = vadd.f32 1e-05, %v3983_v22  ;;  %v6417_v22 = vld [vmem:[%s9769_s0 + $0x78] sm:$0xff] }
 0x6dc   :  { %v5114_v56 = vpack.c.bf16 %v5101_v6, %v5100_v57 }
 0x6dd   :  { %6346 = vrsqrt.f32 %v3999_v40  ;;  %vm4156_vm14 = vweird.f32 %v3999_v40 }
 0x6de   :  { %5204 = vmatmul.bf16.gmra.mxu2 %v5114_v56 }
 0x6e3   :  { %v6347_v35 = vpop.eup %6346 }
 0x6e4   :  { %v4151_v15 = vmul.f32 %v6347_v35, %v3999_v40  ;;  %vm4157_vm13 = vweird.f32 %v6347_v35 }
 0x6e5   :  { %vm4158_vm15 = vmor %vm4156_vm14, %vm4157_vm13 }
 0x6e6   :  { %v4152_v44 = vmul.f32 %v6347_v35, %v4151_v15 }
 0x6e8   :  { %v4153_v10 = vmul.f32 0.5, %v4152_v44 }
 0x6ea   :  { %v4154_v19 = vsub.f32 1.5, %v4153_v10 }
 0x6eb   :  { %v4367_v50 = vpop.f32.mrf.mxu1 }
 0x6ec   :  { %v4155_v49 = vmul.f32 %v6347_v35, %v4154_v19  ;;  %v9140_v60 = vadd.f32 %v8794_v55, %v4367_v50 }
 0x6ee   :  { %v4159_v7 = vsel %vm4158_vm15, %v6347_v35, %v4155_v49  ;;  %v9146_v21 = vmul.f32 0.70710677, %v9140_v60 }
 0x6ef   :  { %v4175_v4 = vmul.f32 %v4159_v7, %v8762_v2  ;;  %v6416_v2 = vld [vmem:[%s9769_s0 + $0x70] sm:$0xff] }
 0x6f0   :  { %v4664_v58 = vmul.f32 %v9146_v21, %v9146_v21  ;;  %v9160_v11 = vadd.f32 %v6416_v2, %v4208_v13 }
 0x6f1   :  { %v4192_v17 = vmul.f32 %v6414_v20, %v4175_v4 }
 0x6f2   :  { %v4665_v16 = vmin.f32 %v4664_v58, 16.0 }
 0x6f3   :  { %v4369_v30 = vpop.f32.mrf.mxu1  ;;  %v4209_v8 = vadd.f32 %v6415_v54, %v4192_v17 }
 0x6f4   :  { %v4666_v1 = vmul.f32 2.1237322e-06, %v4665_v16  ;;  %v4677_v26 = vmul.f32 3.8918573e-05, %v4665_v16  ;;  %v9155_v32 = vadd.f32 %v8794_v55, %v4369_v30 }
 0x6f5   :  { %v9165_v27 = vadd.f32 %v6417_v22, %v4209_v8 }
 0x6f6   :  { %v4667_v43 = vadd.f32 0.00028619796, %v4666_v1  ;;  %v4678_v31 = vadd.f32 0.001143296, %v4677_v26  ;;  %v9168_v18 = vmul.f32 0.70710677, %v9155_v32 }
 0x6f7   :  { %v4233_v40 = vpack.c.bf16 %v9165_v27, %v9160_v11 }
 0x6f8   :  { %v4668_v29 = vmul.f32 %v4667_v43, %v4665_v16  ;;  %v4679_v33 = vmul.f32 %v4678_v31, %v4665_v16  ;;  %v4704_v61 = vmul.f32 %v9168_v18, %v9168_v18 }
 0x6f9   :  { %5930 = vmatmul.msk.bf16.gmra.mxu0 %vm174_vm0, %v4233_v40  ;;  %5946 = vmatmul.msk.bf16.gmra.mxu1 %vm174_vm0, %v4233_v40 }
 0x6fa   :  { %v4669_v24 = vadd.f32 0.0036580483, %v4668_v29  ;;  %v4680_v48 = vadd.f32 0.014752088, %v4679_v33  ;;  %v9176_v39 = vmin.f32 %v4704_v61, 16.0 }
 0x6fb   :  { %v4372_v34 = vpop.f32.mrf.mxu1 }
 0x6fc   :  { %v4681_v3 = vmul.f32 %v4680_v48, %v4665_v16  ;;  %v4670_v46 = vmul.f32 %v4669_v24, %v4665_v16  ;;  %v4706_v36 = vmul.f32 2.1237322e-06, %v9176_v39  ;;  %v4717_v62 = vmul.f32 3.8918573e-05, %v9176_v39 }
 0x6fd   :  { %v9181_v35 = vadd.f32 %v8794_v55, %v4372_v34 }
 0x6fe   :  { %v4682_v57 = vadd.f32 0.112945676, %v4681_v3  ;;  %v4707_v6 = vadd.f32 0.00028619796, %v4706_v36  ;;  %v4718_v15 = vadd.f32 0.001143296, %v4717_v62 }
 0x6ff   :  { %v9184_v52 = vmul.f32 0.70710677, %v9181_v35  ;;  %v4671_v44 = vadd.f32 0.05243302, %v4670_v46 }
 0x700   :  { %v4683_v56 = vmul.f32 %v4682_v57, %v4665_v16  ;;  %v4708_v10 = vmul.f32 %v4707_v6, %v9176_v39  ;;  %v4719_v47 = vmul.f32 %v4718_v15, %v9176_v39 }
 0x701   :  { %v4744_v50 = vmul.f32 %v9184_v52, %v9184_v52  ;;  %v4672_v58 = vmul.f32 %v4671_v44, %v4665_v16 }
 0x702   :  { %v4684_v19 = vadd.f32 0.4994258, %v4683_v56  ;;  %v4709_v49 = vadd.f32 0.0036580483, %v4708_v10  ;;  %v4720_v20 = vadd.f32 0.014752088, %v4719_v47 }
 0x703   :  { %v9190_v7 = vmin.f32 %v4744_v50, 16.0  ;;  %v4374_v4 = vpop.f32.mrf.mxu1  ;;  %v4673_v2 = vadd.f32 0.18741608, %v4672_v58 }
 0x704   :  { %v4685_v0 = vmul.f32 %v4684_v19, %v4665_v16  ;;  %v4721_v17 = vmul.f32 %v4720_v20, %v9176_v39  ;;  %v4710_v13 = vmul.f32 %v4709_v49, %v9176_v39  ;;  %v9196_v8 = vadd.f32 %v8794_v55, %v4374_v4 }
 0x705   :  { %v4746_v30 = vmul.f32 2.1237322e-06, %v9190_v7  ;;  %v4757_v26 = vmul.f32 3.8918573e-05, %v9190_v7  ;;  %v4674_v48 = vmul.f32 %v4673_v2, %v4665_v16  ;;  %v4300_v2 = vpop.f32.mrf.mxu0 }
 0x706   :  { %v4686_v54 = vadd.f32 1.0, %v4685_v0  ;;  %v4722_v1 = vadd.f32 0.112945676, %v4721_v17  ;;  %v4711_v31 = vadd.f32 0.05243302, %v4710_v13 }
 0x707   :  { %v4747_v43 = vadd.f32 0.00028619796, %v4746_v30  ;;  %v4758_v40 = vadd.f32 0.001143296, %v4757_v26  ;;  %v9201_v29 = vmul.f32 0.70710677, %v9196_v8 }
 0x708   :  { %6348 = vrcp.f32 %v4686_v54  ;;  %v4723_v22 = vmul.f32 %v4722_v1, %v9176_v39  ;;  %v4712_v46 = vmul.f32 %v4711_v31, %v9176_v39  ;;  %v4675_v47 = vadd.f32 1.1283791, %v4674_v48 }
 0x709   :  { %v4748_v61 = vmul.f32 %v4747_v43, %v9190_v7  ;;  %v4759_v24 = vmul.f32 %v4758_v40, %v9190_v7  ;;  %v4784_v55 = vmul.f32 %v9201_v29, %v9201_v29  ;;  %v4696_v19 = vand.u32 2147483647, %v4686_v54 }
 0x70a   :  { %v4724_v33 = vadd.f32 0.4994258, %v4723_v22  ;;  %v4698_v50 = vand.u32 2147483648, %v4686_v54  ;;  %v4713_v49 = vadd.f32 0.18741608, %v4712_v46  ;;  %vm4692_vm2 = vweird.f32 %v4686_v54 }
 0x70b   :  { %v4760_v36 = vadd.f32 0.014752088, %v4759_v24  ;;  %v9209_v62 = vmin.f32 %v4784_v55, 16.0  ;;  %v4749_v15 = vadd.f32 0.0036580483, %v4748_v61  ;;  %v4676_v22 = vmul.f32 %v4675_v47, %v9146_v21 }
 0x70c   :  { %v4725_v3 = vmul.f32 %v4724_v33, %v9176_v39  ;;  %vm4697_vm4 = vcmp.eq.f32.partialorder %v4696_v19, 8.507059e+37  ;;  %v4699_v43 = vor.u32 1.1754944e-38, %v4698_v50  ;;  %v4714_v31 = vmul.f32 %v4713_v49, %v9176_v39  ;;  %v9236_v50 = vld [vmem:[%s9778_s11 + $0x1] ss:$0 sm:$0xff] }
 0x70d   :  { %v4761_v56 = vmul.f32 %v4760_v36, %v9190_v7  ;;  %v4786_v44 = vmul.f32 2.1237322e-06, %v9209_v62  ;;  %v4797_v10 = vmul.f32 3.8918573e-05, %v9209_v62  ;;  %v4750_v17 = vmul.f32 %v4749_v15, %v9190_v7 }
 0x70e   :  { %v6349_v34 = vpop.eup %6348  ;;  %v9211_v6 = vadd.f32 1.0, %v4725_v3 }
 0x70f   :  { %v4688_v57 = vmul.f32 %v6349_v34, %v4686_v54  ;;  %vm4693_vm1 = vweird.f32 %v6349_v34  ;;  %v4762_v0 = vadd.f32 0.112945676, %v4761_v56  ;;  %v4787_v4 = vadd.f32 0.00028619796, %v4786_v44 }
 0x710   :  { %6350 = vrcp.f32 %v9211_v6  ;;  %v4798_v58 = vadd.f32 0.001143296, %v4797_v10  ;;  %vm4694_vm3 = vmor %vm4692_vm2, %vm4693_vm1  ;;  %v4751_v3 = vadd.f32 0.05243302, %v4750_v17  ;;  %v4736_v56 = vand.u32 2147483647, %v9211_v6 }
 0x711   :  { %v4689_v16 = vsub.f32 1.0, %v4688_v57  ;;  %v4763_v30 = vmul.f32 %v4762_v0, %v9190_v7  ;;  %v4788_v1 = vmul.f32 %v4787_v4, %v9209_v62  ;;  %v4715_v57 = vadd.f32 1.1283791, %v4714_v31 }
 0x712   :  { %v4799_v26 = vmul.f32 %v4798_v58, %v9209_v62  ;;  %v4738_v39 = vand.u32 2147483648, %v9211_v6  ;;  %v4752_v19 = vmul.f32 %v4751_v3, %v9190_v7  ;;  %vm4732_vm6 = vweird.f32 %v9211_v6 }
 0x713   :  { %v4690_v20 = vmul.f32 %v6349_v34, %v4689_v16  ;;  %v4764_v33 = vadd.f32 0.4994258, %v4763_v30  ;;  %v4789_v61 = vadd.f32 0.0036580483, %v4788_v1  ;;  %v4716_v58 = vmul.f32 %v4715_v57, %v9168_v18  ;;  %v4302_v1 = vpop.f32.mrf.mxu0 }
 0x714   :  { %v4800_v24 = vadd.f32 0.014752088, %v4799_v26  ;;  %v4377_v47 = vpop.f32.mrf.mxu1  ;;  %v4739_v17 = vor.u32 1.1754944e-38, %v4738_v39  ;;  %vm4737_vm8 = vcmp.eq.f32.partialorder %v4736_v56, 8.507059e+37 }
 0x715   :  { %v4691_v13 = vadd.f32 %v6349_v34, %v4690_v20  ;;  %v4765_v36 = vmul.f32 %v4764_v33, %v9190_v7  ;;  %v9239_v49 = vadd.f32 %v9236_v50, %v4377_v47  ;;  %v4301_v33 = vadd.f32 %v9035_v38, %v4300_v2 }
 0x716   :  { %v6351_v40 = vpop.eup %6350  ;;  %v4801_v21 = vmul.f32 %v4800_v24, %v9209_v62 }
 0x717   :  { %v4695_v54 = vsel %vm4694_vm3, %v6349_v34, %v4691_v13  ;;  %v4728_v48 = vmul.f32 %v6351_v40, %v9211_v6  ;;  %v9229_v44 = vadd.f32 1.0, %v4765_v36  ;;  %v4790_v34 = vmul.f32 %v4789_v61, %v9209_v62 }
 0x718   :  { %v4700_v55 = vsel %vm4697_vm4, %v4699_v43, %v4695_v54  ;;  %v4802_v10 = vadd.f32 0.112945676, %v4801_v21  ;;  %vm4733_vm5 = vweird.f32 %v6351_v40  ;;  %v9246_v30 = vmul.f32 0.70710677, %v9239_v49 }
 0x719   :  { %v4701_v46 = vmul.f32 %v4700_v55, %v4676_v22  ;;  %v4729_v15 = vsub.f32 1.0, %v4728_v48  ;;  %6352 = vrcp.f32 %v9229_v44  ;;  %vm4734_vm7 = vmor %vm4732_vm6, %vm4733_vm5  ;;  %v4791_v13 = vadd.f32 0.05243302, %v4790_v34 }
 0x71a   :  { %v4803_v4 = vmul.f32 %v4802_v10, %v9209_v62  ;;  %v4753_v22 = vadd.f32 0.18741608, %v4752_v19  ;;  %v4824_v6 = vmul.f32 %v9246_v30, %v9246_v30  ;;  %v4398_v55 = vmul.f32 0.5, %v9140_v60 }
 0x71b   :  { %v4730_v16 = vmul.f32 %v6351_v40, %v4729_v15  ;;  %v5953_v20 = vclamps-f32 %v4701_v46, 1.0  ;;  %v4303_v48 = vadd.f32 %v9035_v38, %v4302_v1  ;;  %v4399_v36 = vmul.f32 0.5, %v9155_v32 }
 0x71c   :  { %v4804_v43 = vadd.f32 0.4994258, %v4803_v4  ;;  %v9255_v3 = vmin.f32 %v4824_v6, 16.0  ;;  %v4379_v46 = vpop.f32.mrf.mxu1  ;;  %v4754_v57 = vmul.f32 %v4753_v22, %v9190_v7  ;;  %v4776_v47 = vand.u32 2147483647, %v9229_v44 }
 0x71d   :  { %v4731_v0 = vadd.f32 %v6351_v40, %v4730_v16  ;;  %v5070_v31 = vadd.f32 1.0, %v5953_v20  ;;  %v9266_v16 = vadd.f32 %v9236_v50, %v4379_v46  ;;  %v4778_v32 = vand.u32 2147483648, %v9229_v44 }
 0x71e   :  { %v4805_v18 = vmul.f32 %v4804_v43, %v9209_v62  ;;  %v4826_v39 = vmul.f32 2.1237322e-06, %v9255_v3  ;;  %v4837_v60 = vmul.f32 3.8918573e-05, %v9255_v3  ;;  %vm4772_vm10 = vweird.f32 %v9229_v44 }
 0x71f   :  { %v4735_v26 = vsel %vm4734_vm7, %v6351_v40, %v4731_v0  ;;  %v6353_v24 = vpop.eup %6352  ;;  %v4792_v40 = vmul.f32 %v4791_v13, %v9209_v62  ;;  %v5086_v15 = vmul.f32 %v5070_v31, %v4398_v55  ;;  %vm4777_vm12 = vcmp.eq.f32.partialorder %v4776_v47, 8.507059e+37 }
 0x720   :  { %v4740_v54 = vsel %vm4737_vm8, %v4739_v17, %v4735_v26  ;;  %v4768_v2 = vmul.f32 %v6353_v24, %v9229_v44  ;;  %v9260_v56 = vadd.f32 1.0, %v4805_v18  ;;  %vm4773_vm9 = vweird.f32 %v6353_v24 }
 0x721   :  { %v4741_v61 = vmul.f32 %v4740_v54, %v4716_v58  ;;  %v4793_v7 = vadd.f32 0.18741608, %v4792_v40  ;;  %v4827_v0 = vadd.f32 0.00028619796, %v4826_v39  ;;  %v4838_v4 = vadd.f32 0.001143296, %v4837_v60  ;;  %vm4774_vm11 = vmor %vm4772_vm10, %vm4773_vm9 }
 0x722   :  { %v4769_v10 = vsub.f32 1.0, %v4768_v2  ;;  %6354 = vrcp.f32 %v9260_v56  ;;  %v4755_v58 = vadd.f32 1.1283791, %v4754_v57  ;;  %v9272_v17 = vmul.f32 0.70710677, %v9266_v16 }
 0x723   :  { %v5954_v21 = vclamps-f32 %v4741_v61, 1.0  ;;  %v5102_v13 = vmul.f32 %v5086_v15, %v4301_v33  ;;  %v4828_v26 = vmul.f32 %v4827_v0, %v9255_v3  ;;  %v4839_v22 = vmul.f32 %v4838_v4, %v9255_v3 }
 0x724   :  { %v4770_v20 = vmul.f32 %v6353_v24, %v4769_v10  ;;  %v4779_v31 = vor.u32 1.1754944e-38, %v4778_v32  ;;  %v4864_v54 = vmul.f32 %v9272_v17, %v9272_v17  ;;  %v4794_v44 = vmul.f32 %v4793_v7, %v9209_v62  ;;  %v4305_v32 = vpop.f32.mrf.mxu0 }
 0x725   :  { %v5071_v34 = vadd.f32 1.0, %v5954_v21  ;;  %v4840_v61 = vadd.f32 0.014752088, %v4839_v22  ;;  %v4756_v33 = vmul.f32 %v4755_v58, %v9184_v52  ;;  %v4816_v39 = vand.u32 2147483647, %v9260_v56 }
 0x726   :  { %v4771_v1 = vadd.f32 %v6353_v24, %v4770_v20  ;;  %v9281_v46 = vmin.f32 %v4864_v54, 16.0  ;;  %v4795_v62 = vadd.f32 1.1283791, %v4794_v44  ;;  %v4818_v52 = vand.u32 2147483648, %v9260_v56 }
 0x727   :  { %v5087_v19 = vmul.f32 %v5071_v34, %v4399_v36  ;;  %v4829_v36 = vadd.f32 0.0036580483, %v4828_v26  ;;  %v4841_v57 = vmul.f32 %v4840_v61, %v9255_v3  ;;  %vm4812_vm14 = vweird.f32 %v9260_v56 }
 0x728   :  { %v4775_v6 = vsel %vm4774_vm11, %v6353_v24, %v4771_v1  ;;  %v6355_v55 = vpop.eup %6354  ;;  %v4866_v2 = vmul.f32 2.1237322e-06, %v9281_v46  ;;  %v4877_v24 = vmul.f32 3.8918573e-05, %v9281_v46  ;;  %v4819_v26 = vor.u32 1.1754944e-38, %v4818_v52 }
 0x729   :  { %v5103_v43 = vmul.f32 %v5087_v19, %v4303_v48  ;;  %v4780_v40 = vsel %vm4777_vm12, %v4779_v31, %v4775_v6  ;;  %v4808_v48 = vmul.f32 %v6355_v55, %v9260_v56  ;;  %v4842_v34 = vadd.f32 0.112945676, %v4841_v57 }
 0x72a   :  { %v4781_v21 = vmul.f32 %v4780_v40, %v4756_v33  ;;  %v4867_v10 = vadd.f32 0.00028619796, %v4866_v2  ;;  %v4878_v47 = vadd.f32 0.001143296, %v4877_v24  ;;  %vm4813_vm13 = vweird.f32 %v6355_v55 }
 0x72b   :  { %v5115_v18 = vpack.c.bf16 %v5103_v43, %v5102_v13  ;;  %v4809_v15 = vsub.f32 1.0, %v4808_v48  ;;  %v4382_v60 = vpop.f32.mrf.mxu1  ;;  %v4830_v19 = vmul.f32 %v4829_v36, %v9255_v3  ;;  %v4843_v4 = vmul.f32 %v4842_v34, %v9255_v3  ;;  %vm4814_vm15 = vmor %vm4812_vm14, %vm4813_vm13 }
 0x72c   :  { %v9291_v20 = vadd.f32 %v9236_v50, %v4382_v60  ;;  %v5955_v0 = vclamps-f32 %v4781_v21, 1.0  ;;  %v4868_v58 = vmul.f32 %v4867_v10, %v9281_v46  ;;  %v4879_v13 = vmul.f32 %v4878_v47, %v9281_v46 }
 0x72d   :  { %5209 = vmatmul.bf16.gmra.mxu2 %v5115_v18  ;;  %v4810_v7 = vmul.f32 %v6355_v55, %v4809_v15  ;;  %v4796_v22 = vmul.f32 %v4795_v62, %v9201_v29  ;;  %v4844_v43 = vadd.f32 0.4994258, %v4843_v4  ;;  %vm4817_vm1 = vcmp.eq.f32.partialorder %v4816_v39, 8.507059e+37  ;;  %v9306_v29 = vld [vmem:[%s9775_s10 + $0x3] ss:$0 sm:$0xff] }
 0x72e   :  { %v4869_v31 = vadd.f32 0.0036580483, %v4868_v58  ;;  %v4880_v54 = vadd.f32 0.014752088, %v4879_v13  ;;  %v4831_v44 = vadd.f32 0.05243302, %v4830_v19  ;;  %v4306_v4 = vadd.f32 %v9035_v38, %v4305_v32 }
 0x72f   :  { %v4811_v1 = vadd.f32 %v6355_v55, %v4810_v7  ;;  %v9299_v61 = vmul.f32 0.70710677, %v9291_v20  ;;  %v5072_v18 = vadd.f32 1.0, %v5955_v0  ;;  %v4845_v40 = vmul.f32 %v4844_v43, %v9255_v3 }
 0x730   :  { %v4881_v48 = vmul.f32 %v4880_v54, %v9281_v46  ;;  %v4400_v2 = vmul.f32 0.5, %v9181_v35  ;;  %v4401_v15 = vmul.f32 0.5, %v9196_v8  ;;  %v4832_v52 = vmul.f32 %v4831_v44, %v9255_v3  ;;  %v4307_v35 = vpop.f32.mrf.mxu0 }
 0x731   :  { %v4815_v6 = vsel %vm4814_vm15, %v6355_v55, %v4811_v1  ;;  %v4870_v55 = vmul.f32 %v4869_v31, %v9281_v46  ;;  %v4904_v21 = vmul.f32 %v9299_v61, %v9299_v61  ;;  %v9312_v24 = vadd.f32 1.0, %v4845_v40 }
 0x732   :  { %v4820_v33 = vsel %vm4817_vm1, %v4819_v26, %v4815_v6  ;;  %v4882_v62 = vadd.f32 0.112945676, %v4881_v48  ;;  %v5088_v34 = vmul.f32 %v5072_v18, %v4400_v2  ;;  %v4833_v1 = vadd.f32 0.18741608, %v4832_v52 }
 0x733   :  { %v4821_v36 = vmul.f32 %v4820_v33, %v4796_v22  ;;  %v4384_v57 = vpop.f32.mrf.mxu1  ;;  %v9316_v60 = vmin.f32 %v4904_v21, 16.0  ;;  %6356 = vrcp.f32 %v9312_v24  ;;  %v4871_v19 = vadd.f32 0.05243302, %v4870_v55 }
 0x734   :  { %v9320_v10 = vadd.f32 %v9236_v50, %v4384_v57  ;;  %v4883_v0 = vmul.f32 %v4882_v62, %v9281_v46  ;;  %v4308_v43 = vadd.f32 %v9035_v38, %v4307_v35  ;;  %v5104_v33 = vmul.f32 %v5088_v34, %v4306_v4 }
 0x735   :  { %v5195_v56 = vpop.f32.mrf.mxu2  ;;  %v5956_v39 = vclamps-f32 %v4821_v36, 1.0  ;;  %v4906_v8 = vmul.f32 2.1237322e-06, %v9316_v60  ;;  %v4917_v58 = vmul.f32 3.8918573e-05, %v9316_v60  ;;  %v4872_v18 = vmul.f32 %v4871_v19, %v9281_v46 }
 0x736   :  { %v9323_v47 = vadd.f32 %v9306_v29, %v5195_v56  ;;  %v4884_v26 = vadd.f32 0.4994258, %v4883_v0  ;;  %v9331_v54 = vmul.f32 0.70710677, %v9320_v10  ;;  %v4834_v2 = vmul.f32 %v4833_v1, %v9255_v3 }
 0x737   :  { %v5073_v7 = vadd.f32 1.0, %v5956_v39  ;;  %v4907_v22 = vadd.f32 0.00028619796, %v4906_v8  ;;  %v4918_v31 = vadd.f32 0.001143296, %v4917_v58  ;;  %v4858_v35 = vand.u32 2147483648, %v9312_v24 }
 0x738   :  { %v5237_v6 = vsel %vm174_vm0, %v9323_v47, 0.0  ;;  %v4885_v32 = vmul.f32 %v4884_v26, %v9281_v46  ;;  %v4944_v38 = vmul.f32 %v9331_v54, %v9331_v54  ;;  %v4856_v34 = vand.u32 2147483647, %v9312_v24 }
 0x739   :  { %v5089_v13 = vmul.f32 %v5073_v7, %v4401_v15  ;;  %5238 = vadd.xlane.f32.xlu1 %v5237_v6  ;;  %v6357_v40 = vpop.eup %6356  ;;  %v4908_v48 = vmul.f32 %v4907_v22, %v9316_v60  ;;  %v4919_v56 = vmul.f32 %v4918_v31, %v9316_v60  ;;  %v4873_v7 = vadd.f32 0.18741608, %v4872_v18 }
 0x73a   :  { %v4848_v55 = vmul.f32 %v6357_v40, %v9312_v24  ;;  %v9342_v21 = vadd.f32 1.0, %v4885_v32  ;;  %v9348_v15 = vmin.f32 %v4944_v38, 16.0  ;;  %vm4853_vm2 = vweird.f32 %v6357_v40 }
 0x73b   :  { %v5105_v36 = vmul.f32 %v5089_v13, %v4308_v43  ;;  %v4920_v62 = vadd.f32 0.014752088, %v4919_v56  ;;  %v4909_v19 = vadd.f32 0.0036580483, %v4908_v48  ;;  %v4835_v13 = vadd.f32 1.1283791, %v4834_v2 }
 0x73c   :  { %v4849_v52 = vsub.f32 1.0, %v4848_v55  ;;  %6358 = vrcp.f32 %v9342_v21  ;;  %v4946_v3 = vmul.f32 2.1237322e-06, %v9348_v15  ;;  %v4957_v4 = vmul.f32 3.8918573e-05, %v9348_v15 }
 0x73d   :  { %v5197_v44 = vpop.f32.mrf.mxu2  ;;  %v5116_v39 = vpack.c.bf16 %v5105_v36, %v5104_v33  ;;  %v4921_v0 = vmul.f32 %v4920_v62, %v9316_v60  ;;  %vm4852_vm3 = vweird.f32 %v9312_v24  ;;  %v4859_v31 = vor.u32 1.1754944e-38, %v4858_v35 }
 0x73e   :  { %v9345_v57 = vadd.f32 %v9306_v29, %v5197_v44  ;;  %v4850_v8 = vmul.f32 %v6357_v40, %v4849_v52  ;;  %v4947_v22 = vadd.f32 0.00028619796, %v4946_v3  ;;  %v4958_v43 = vadd.f32 0.001143296, %v4957_v4  ;;  %vm4854_vm4 = vmor %vm4852_vm3, %vm4853_vm2  ;;  %v4310_v52 = vpop.f32.mrf.mxu0 }
 0x73f   :  { %5214 = vmatmul.bf16.gmra.mxu2 %v5116_v39  ;;  %v4922_v1 = vadd.f32 0.112945676, %v4921_v0  ;;  %v4874_v6 = vmul.f32 %v4873_v7, %v9281_v46  ;;  %vm4857_vm5 = vcmp.eq.f32.partialorder %v4856_v34, 8.507059e+37  ;;  %v4910_v33 = vmul.f32 %v4909_v19, %v9316_v60 }
 0x740   :  { %v5240_v58 = vsel %vm174_vm0, %v9345_v57, 0.0  ;;  %v4851_v26 = vadd.f32 %v6357_v40, %v4850_v8  ;;  %v4959_v48 = vmul.f32 %v4958_v43, %v9348_v15  ;;  %v4836_v56 = vmul.f32 %v4835_v13, %v9246_v30 }
 0x741   :  { %5241 = vadd.xlane.f32.xlu2 %v5240_v58  ;;  %v4923_v44 = vmul.f32 %v4922_v1, %v9316_v60  ;;  %v4948_v36 = vmul.f32 %v4947_v22, %v9348_v15  ;;  %v4875_v46 = vadd.f32 1.1283791, %v4874_v6  ;;  %v4911_v34 = vadd.f32 0.05243302, %v4910_v33 }
 0x742   :  { %v6359_v18 = vpop.eup %6358  ;;  %v4855_v32 = vsel %vm4854_vm4, %v6357_v40, %v4851_v26  ;;  %v4960_v2 = vadd.f32 0.014752088, %v4959_v48  ;;  %v4898_v40 = vand.u32 2147483648, %v9342_v21  ;;  %v4896_v30 = vand.u32 2147483647, %v9342_v21 }
 0x743   :  { %v4860_v38 = vsel %vm4857_vm5, %v4859_v31, %v4855_v32  ;;  %v4888_v24 = vmul.f32 %v6359_v18, %v9342_v21  ;;  %v4924_v55 = vadd.f32 0.4994258, %v4923_v44  ;;  %vm4893_vm6 = vweird.f32 %v6359_v18 }
 0x744   :  { %v4861_v62 = vmul.f32 %v4860_v38, %v4836_v56  ;;  %v4961_v7 = vmul.f32 %v4960_v2, %v9348_v15  ;;  %v4949_v0 = vadd.f32 0.0036580483, %v4948_v36  ;;  %vm4892_vm7 = vweird.f32 %v9342_v21 }
 0x745   :  { %v4889_v39 = vsub.f32 1.0, %v4888_v24  ;;  %v4925_v35 = vmul.f32 %v4924_v55, %v9316_v60  ;;  %v4876_v13 = vmul.f32 %v4875_v46, %v9272_v17  ;;  %vm4894_vm8 = vmor %vm4892_vm7, %vm4893_vm6  ;;  %v4899_v1 = vor.u32 1.1754944e-38, %v4898_v40  ;;  %v9385_v40 = vld [vmem:[%s9778_s11] ss:$0 sm:$0xff] }
 0x746   :  { %v4962_v3 = vadd.f32 0.112945676, %v4961_v7  ;;  %v5957_v4 = vclamps-f32 %v4861_v62, 1.0  ;;  %v4912_v26 = vmul.f32 %v4911_v34, %v9316_v60  ;;  %vm4897_vm9 = vcmp.eq.f32.partialorder %v4896_v30, 8.507059e+37  ;;  %v4312_v55 = vpop.f32.mrf.mxu0 }
 0x747   :  { %v4890_v19 = vmul.f32 %v6359_v18, %v4889_v39  ;;  %v4926_v8 = vadd.f32 1.0, %v4925_v35  ;;  %v4950_v43 = vmul.f32 %v4949_v0, %v9348_v15  ;;  %v4402_v21 = vmul.f32 0.5, %v9239_v49 }
 0x748   :  { %v4963_v31 = vmul.f32 %v4962_v3, %v9348_v15  ;;  %v5074_v44 = vadd.f32 1.0, %v5957_v4  ;;  %v4913_v48 = vadd.f32 0.18741608, %v4912_v26  ;;  %v4403_v62 = vmul.f32 0.5, %v9266_v16 }
 0x749   :  { %v4891_v58 = vadd.f32 %v6359_v18, %v4890_v19  ;;  %6360 = vrcp.f32 %v4926_v8  ;;  %v4951_v17 = vadd.f32 0.05243302, %v4950_v43  ;;  %v4311_v49 = vadd.f32 %v9385_v40, %v4310_v52 }
 0x74a   :  { %v4964_v33 = vadd.f32 0.4994258, %v4963_v31  ;;  %v5090_v2 = vmul.f32 %v5074_v44, %v4402_v21  ;;  %v4914_v34 = vmul.f32 %v4913_v48, %v9316_v60  ;;  %v4313_v19 = vadd.f32 %v9385_v40, %v4312_v55 }
 0x74b   :  { %v4895_v22 = vsel %vm4894_vm8, %v6359_v18, %v4891_v58  ;;  %v4952_v16 = vmul.f32 %v4951_v17, %v9348_v15  ;;  %v4936_v3 = vand.u32 2147483647, %v4926_v8  ;;  %v4938_v4 = vand.u32 2147483648, %v4926_v8 }
 0x74c   :  { %v4900_v6 = vsel %vm4897_vm9, %v4899_v1, %v4895_v22  ;;  %v4965_v38 = vmul.f32 %v4964_v33, %v9348_v15  ;;  %v4915_v1 = vadd.f32 1.1283791, %v4914_v34  ;;  %vm4932_vm11 = vweird.f32 %v4926_v8 }
 0x74d   :  { %v4901_v32 = vmul.f32 %v4900_v6, %v4876_v13  ;;  %v5106_v13 = vmul.f32 %v5090_v2, %v4311_v49  ;;  %v4953_v26 = vadd.f32 0.18741608, %v4952_v16  ;;  %v4939_v31 = vor.u32 1.1754944e-38, %v4938_v4 }
 0x74e   :  { %v4966_v35 = vadd.f32 1.0, %v4965_v38  ;;  %vm4937_vm13 = vcmp.eq.f32.partialorder %v4936_v3, 8.507059e+37  ;;  %v4916_v21 = vmul.f32 %v4915_v1, %v9299_v61  ;;  %v4404_v3 = vmul.f32 0.5, %v9291_v20 }
 0x74f   :  { %v5958_v56 = vclamps-f32 %v4901_v32, 1.0  ;;  %v5200_v24 = vpop.f32.mrf.mxu2  ;;  %v6361_v36 = vpop.eup %6360 }
 0x750   :  { %v9379_v18 = vadd.f32 %v9306_v29, %v5200_v24  ;;  %v4928_v39 = vmul.f32 %v6361_v36, %v4926_v8  ;;  %6362 = vrcp.f32 %v4966_v35  ;;  %vm4933_vm10 = vweird.f32 %v6361_v36  ;;  %v4315_v24 = vpop.f32.mrf.mxu0 }
 0x751   :  { %v5075_v46 = vadd.f32 1.0, %v5958_v56  ;;  %vm4934_vm12 = vmor %vm4932_vm11, %vm4933_vm10  ;;  %v4954_v8 = vmul.f32 %v4953_v26, %v9348_v15  ;;  %v4978_v55 = vand.u32 2147483648, %v4966_v35  ;;  %vm4972_vm15 = vweird.f32 %v4966_v35 }
 0x752   :  { %v5243_v7 = vsel %vm174_vm0, %v9379_v18, 0.0  ;;  %v4929_v0 = vsub.f32 1.0, %v4928_v39  ;;  %v4316_v1 = vadd.f32 %v9385_v40, %v4315_v24 }
 0x753   :  { %v5091_v30 = vmul.f32 %v5075_v46, %v4403_v62  ;;  %5244 = vadd.xlane.f32.xlu0 %v5243_v7  ;;  %v4955_v2 = vadd.f32 1.1283791, %v4954_v8  ;;  %v4979_v49 = vor.u32 1.1754944e-38, %v4978_v55 }
 0x754   :  { %v4930_v58 = vmul.f32 %v6361_v36, %v4929_v0 }
 0x755   :  { %v5107_v52 = vmul.f32 %v5091_v30, %v4313_v19  ;;  %v4956_v61 = vmul.f32 %v4955_v2, %v9331_v54 }
 0x756   :  { %v4931_v60 = vadd.f32 %v6361_v36, %v4930_v58  ;;  %v6363_v32 = vpop.eup %6362 }
 0x757   :  { %v5202_v22 = vpop.f32.mrf.mxu2  ;;  %v5117_v43 = vpack.c.bf16 %v5107_v52, %v5106_v13  ;;  %v4968_v56 = vmul.f32 %v6363_v32, %v4966_v35  ;;  %vm4973_vm14 = vweird.f32 %v6363_v32  ;;  %v4405_v13 = vmul.f32 0.5, %v9320_v10 }
 0x758   :  { %v9394_v6 = vadd.f32 %v9306_v29, %v5202_v22  ;;  %v4935_v44 = vsel %vm4934_vm12, %v6361_v36, %v4931_v60  ;;  %v4976_v36 = vand.u32 2147483647, %v4966_v35  ;;  %vm4974_vm1 = vmor %vm4972_vm15, %vm4973_vm14  ;;  %v4317_v4 = vpop.f32.mrf.mxu0 }
 0x759   :  { %5219 = vmatmul.bf16.gmra.mxu2 %v5117_v43  ;;  %v4940_v33 = vsel %vm4937_vm13, %v4939_v31, %v4935_v44  ;;  %v4969_v38 = vsub.f32 1.0, %v4968_v56  ;;  %v4318_v60 = vadd.f32 %v9385_v40, %v4317_v4 }
 0x75a   :  { %v5246_v48 = vsel %vm174_vm0, %v9394_v6, 0.0  ;;  %v4941_v17 = vmul.f32 %v4940_v33, %v4916_v21  ;;  %vm4977_vm2 = vcmp.eq.f32.partialorder %v4976_v36, 8.507059e+37 }
 0x75b   :  { %5247 = vadd.xlane.f32.xlu1 %v5246_v48  ;;  %v4970_v62 = vmul.f32 %v6363_v32, %v4969_v38 }
 0x75c   :  { %v5959_v46 = vclamps-f32 %v4941_v17, 1.0 }
 0x75d   :  { %v4971_v39 = vadd.f32 %v6363_v32, %v4970_v62 }
 0x75e   :  { %v5076_v30 = vadd.f32 1.0, %v5959_v46 }
 0x75f   :  { %v4975_v7 = vsel %vm4974_vm1, %v6363_v32, %v4971_v39 }
 0x760   :  { %v4980_v19 = vsel %vm4977_vm2, %v4979_v49, %v4975_v7  ;;  %v5092_v58 = vmul.f32 %v5076_v30, %v4404_v3 }
 0x761   :  { %v5205_v34 = vpop.f32.mrf.mxu2  ;;  %v4981_v0 = vmul.f32 %v4980_v19, %v4956_v61 }
 0x762   :  { %v9402_v15 = vadd.f32 %v9306_v29, %v5205_v34  ;;  %v5108_v43 = vmul.f32 %v5092_v58, %v4316_v1 }
 0x763   :  { %v5960_v35 = vclamps-f32 %v4981_v0, 1.0 }
 0x764   :  { %v5249_v16 = vsel %vm174_vm0, %v9402_v15, 0.0 }
 0x765   :  { %5250 = vadd.xlane.f32.xlu2 %v5249_v16  ;;  %v5077_v54 = vadd.f32 1.0, %v5960_v35 }
 0x767   :  { %v5093_v26 = vmul.f32 %v5077_v54, %v4405_v13 }
 0x769   :  { %v5207_v52 = vpop.f32.mrf.mxu2  ;;  %v5109_v31 = vmul.f32 %v5093_v26, %v4318_v60 }
 0x76a   :  { %v9411_v22 = vadd.f32 %v9306_v29, %v5207_v52 }
 0x76b   :  { %v5118_v32 = vpack.c.bf16 %v5109_v31, %v5108_v43 }
 0x76c   :  { %v5252_v20 = vsel %vm174_vm0, %v9411_v22, 0.0 }
 0x76d   :  { %5253 = vadd.xlane.f32.xlu0 %v5252_v20  ;;  %5224 = vmatmul.bf16.gmra.mxu2 %v5118_v32 }
 0x776   :  { %v4387_v44 = vpop.f32.mrf.mxu1 }
 0x777   :  { %v9416_v10 = vadd.f32 %v9236_v50, %v4387_v44 }
 0x779   :  { %v4422_v33 = vmul.f32 0.70710677, %v9416_v10 }
 0x77b   :  { %v4984_v48 = vmul.f32 %v4422_v33, %v4422_v33 }
 0x77d   :  { %v4985_v21 = vmin.f32 %v4984_v48, 16.0 }
 0x77e   :  { %v4389_v8 = vpop.f32.mrf.mxu1 }
 0x77f   :  { %v4986_v56 = vmul.f32 2.1237322e-06, %v4985_v21  ;;  %v4997_v17 = vmul.f32 3.8918573e-05, %v4985_v21  ;;  %v9420_v38 = vadd.f32 %v9236_v50, %v4389_v8 }
 0x781   :  { %v4987_v24 = vadd.f32 0.00028619796, %v4986_v56  ;;  %v4998_v55 = vadd.f32 0.001143296, %v4997_v17  ;;  %v9423_v2 = vmul.f32 0.70710677, %v9420_v38 }
 0x783   :  { %v4988_v62 = vmul.f32 %v4987_v24, %v4985_v21  ;;  %v4999_v36 = vmul.f32 %v4998_v55, %v4985_v21  ;;  %v5024_v46 = vmul.f32 %v9423_v2, %v9423_v2 }
 0x785   :  { %v5000_v39 = vadd.f32 0.014752088, %v4999_v36  ;;  %v5025_v49 = vmin.f32 %v5024_v46, 16.0  ;;  %v4989_v34 = vadd.f32 0.0036580483, %v4988_v62 }
 0x787   :  { %v5001_v61 = vmul.f32 %v5000_v39, %v4985_v21  ;;  %v5026_v7 = vmul.f32 2.1237322e-06, %v5025_v49  ;;  %v5037_v19 = vmul.f32 3.8918573e-05, %v5025_v49  ;;  %v4990_v16 = vmul.f32 %v4989_v34, %v4985_v21 }
 0x789   :  { %v5002_v30 = vadd.f32 0.112945676, %v5001_v61  ;;  %v5027_v0 = vadd.f32 0.00028619796, %v5026_v7  ;;  %v5038_v50 = vadd.f32 0.001143296, %v5037_v19 }
 0x78a   :  { %v4991_v54 = vadd.f32 0.05243302, %v4990_v16 }
 0x78b   :  { %v5003_v3 = vmul.f32 %v5002_v30, %v4985_v21  ;;  %v5028_v35 = vmul.f32 %v5027_v0, %v5025_v49  ;;  %v5039_v4 = vmul.f32 %v5038_v50, %v5025_v49 }
 0x78c   :  { %v4992_v31 = vmul.f32 %v4991_v54, %v4985_v21  ;;  %v4320_v54 = vpop.f32.mrf.mxu0 }
 0x78d   :  { %v5004_v58 = vadd.f32 0.4994258, %v5003_v3  ;;  %v5040_v13 = vadd.f32 0.014752088, %v5039_v4  ;;  %v5029_v1 = vadd.f32 0.0036580483, %v5028_v35 }
 0x78e   :  { %v4993_v48 = vadd.f32 0.18741608, %v4992_v31 }
 0x78f   :  { %v5005_v52 = vmul.f32 %v5004_v58, %v4985_v21  ;;  %v5041_v60 = vmul.f32 %v5040_v13, %v5025_v49  ;;  %v5030_v20 = vmul.f32 %v5029_v1, %v5025_v49 }
 0x790   :  { %v4994_v62 = vmul.f32 %v4993_v48, %v4985_v21 }
 0x791   :  { %v5006_v26 = vadd.f32 1.0, %v5005_v52  ;;  %v5042_v43 = vadd.f32 0.112945676, %v5041_v60  ;;  %v5031_v8 = vadd.f32 0.05243302, %v5030_v20 }
 0x792   :  { %v4995_v7 = vadd.f32 1.1283791, %v4994_v62  ;;  %v4407_v62 = vmul.f32 0.5, %v9420_v38 }
 0x793   :  { %6364 = vrcp.f32 %v5006_v26  ;;  %v5043_v44 = vmul.f32 %v5042_v43, %v5025_v49  ;;  %v5032_v36 = vmul.f32 %v5031_v8, %v5025_v49  ;;  %v5018_v39 = vand.u32 2147483648, %v5006_v26 }
 0x794   :  { %v5016_v61 = vand.u32 2147483647, %v5006_v26  ;;  %vm5012_vm4 = vweird.f32 %v5006_v26  ;;  %v4996_v3 = vmul.f32 %v4995_v7, %v4422_v33  ;;  %v4406_v8 = vmul.f32 0.5, %v9416_v10 }
 0x795   :  { %v5044_v32 = vadd.f32 0.4994258, %v5043_v44  ;;  %v5033_v19 = vadd.f32 0.18741608, %v5032_v36  ;;  %v5019_v0 = vor.u32 1.1754944e-38, %v5018_v39  ;;  %v4321_v39 = vadd.f32 %v9385_v40, %v4320_v54 }
 0x796   :  { %vm5017_vm6 = vcmp.eq.f32.partialorder %v5016_v61, 8.507059e+37 }
 0x797   :  { %v5045_v56 = vmul.f32 %v5044_v32, %v5025_v49  ;;  %v5034_v4 = vmul.f32 %v5033_v19, %v5025_v49 }
 0x799   :  { %v6365_v17 = vpop.eup %6364  ;;  %v5046_v55 = vadd.f32 1.0, %v5045_v56  ;;  %v5035_v1 = vadd.f32 1.1283791, %v5034_v4 }
 0x79a   :  { %v5008_v24 = vmul.f32 %v6365_v17, %v5006_v26  ;;  %vm5013_vm3 = vweird.f32 %v6365_v17 }
 0x79b   :  { %6366 = vrcp.f32 %v5046_v55  ;;  %vm5014_vm5 = vmor %vm5012_vm4, %vm5013_vm3  ;;  %v5058_v52 = vand.u32 2147483648, %v5046_v55  ;;  %v5056_v43 = vand.u32 2147483647, %v5046_v55  ;;  %vm5052_vm8 = vweird.f32 %v5046_v55 }
 0x79c   :  { %v5009_v46 = vsub.f32 1.0, %v5008_v24  ;;  %v5036_v44 = vmul.f32 %v5035_v1, %v9423_v2 }
 0x79d   :  { %v5059_v26 = vor.u32 1.1754944e-38, %v5058_v52  ;;  %vm5057_vm10 = vcmp.eq.f32.partialorder %v5056_v43, 8.507059e+37 }
 0x79e   :  { %v5010_v34 = vmul.f32 %v6365_v17, %v5009_v46 }
 0x7a0   :  { %v5011_v30 = vadd.f32 %v6365_v17, %v5010_v34 }
 0x7a1   :  { %v6367_v50 = vpop.eup %6366 }
 0x7a2   :  { %v5015_v16 = vsel %vm5014_vm5, %v6365_v17, %v5011_v30  ;;  %v5048_v21 = vmul.f32 %v6367_v50, %v5046_v55  ;;  %vm5053_vm7 = vweird.f32 %v6367_v50  ;;  %v4322_v17 = vpop.f32.mrf.mxu0 }
 0x7a3   :  { %v5020_v35 = vsel %vm5017_vm6, %v5019_v0, %v5015_v16  ;;  %vm5054_vm9 = vmor %vm5052_vm8, %vm5053_vm7  ;;  %v4323_v2 = vadd.f32 %v9385_v40, %v4322_v17 }
 0x7a4   :  { %v5021_v58 = vmul.f32 %v5020_v35, %v4996_v3  ;;  %v5049_v13 = vsub.f32 1.0, %v5048_v21 }
 0x7a6   :  { %v5050_v60 = vmul.f32 %v6367_v50, %v5049_v13  ;;  %v5961_v31 = vclamps-f32 %v5021_v58, 1.0 }
 0x7a8   :  { %v5051_v20 = vadd.f32 %v6367_v50, %v5050_v60  ;;  %v5078_v49 = vadd.f32 1.0, %v5961_v31 }
 0x7aa   :  { %v5055_v32 = vsel %vm5054_vm9, %v6367_v50, %v5051_v20  ;;  %v5094_v24 = vmul.f32 %v5078_v49, %v4406_v8 }
 0x7ab   :  { %v5060_v33 = vsel %vm5057_vm10, %v5059_v26, %v5055_v32 }
 0x7ac   :  { %v5061_v48 = vmul.f32 %v5060_v33, %v5036_v44  ;;  %v5110_v7 = vmul.f32 %v5094_v24, %v4321_v39  ;;  %v5239_v20 = vpop.xlane.xlu1 %5238 }
 0x7ad   :  { %v5285_v26 = vmul.f32 %v5239_v20, %v8476_v28 }
 0x7ae   :  { %v5962_v56 = vclamps-f32 %v5061_v48, 1.0 }
 0x7af   :  { %v9466_v33 = vsub.f32 %v9323_v47, %v5285_v26 }
 0x7b0   :  { %v5079_v36 = vadd.f32 1.0, %v5962_v56  ;;  %v5210_v46 = vpop.f32.mrf.mxu2 }
 0x7b1   :  { %v5211_v55 = vadd.f32 %v9306_v29, %v5210_v46  ;;  %v5317_v56 = vmul.f32 %v9466_v33, %v9466_v33 }
 0x7b2   :  { %v5095_v34 = vmul.f32 %v5079_v36, %v4407_v62 }
 0x7b3   :  { %v5255_v61 = vsel %vm174_vm0, %v5211_v55, 0.0  ;;  %v5333_v24 = vsel %vm174_vm0, %v5317_v56, 0.0 }
 0x7b4   :  { %5256 = vadd.xlane.f32.xlu1 %v5255_v61  ;;  %v5111_v19 = vmul.f32 %v5095_v34, %v4323_v2  ;;  %v5242_v34 = vpop.xlane.xlu2 %5241 }
 0x7b5   :  { %v5286_v61 = vmul.f32 %v5242_v34, %v8476_v28 }
 0x7b6   :  { %v5119_v10 = vpack.c.bf16 %v5111_v19, %v5110_v7 }
 0x7b8   :  { %v5212_v30 = vpop.f32.mrf.mxu2  ;;  %5229 = vmatmul.bf16.gmra.mxu2 %v5119_v10  ;;  %v9491_v10 = vsub.f32 %v9345_v57, %v5286_v61 }
 0x7b9   :  { %v9435_v0 = vadd.f32 %v9306_v29, %v5212_v30 }
 0x7bb   :  { %v5258_v38 = vsel %vm174_vm0, %v9435_v0, 0.0 }
 0x7bc   :  { %5259 = vadd.xlane.f32.xlu2 %v5258_v38 }
 0x7c2   :  { %v5215_v50 = vpop.f32.mrf.mxu2 }
 0x7c3   :  { %v9440_v16 = vadd.f32 %v9306_v29, %v5215_v50 }
 0x7c5   :  { %v5261_v40 = vsel %vm174_vm0, %v9440_v16, 0.0 }
 0x7c6   :  { %5262 = vadd.xlane.f32.xlu0 %v5261_v40  ;;  %v5245_v30 = vpop.xlane.xlu0 %5244 }
 0x7c7   :  { %v5287_v50 = vmul.f32 %v5245_v30, %v8476_v28 }
 0x7c9   :  { %v9503_v57 = vsub.f32 %v9379_v18, %v5287_v50 }
 0x7ca   :  { %v5217_v3 = vpop.f32.mrf.mxu2 }
 0x7cb   :  { %v5218_v35 = vadd.f32 %v9306_v29, %v5217_v3  ;;  %v5318_v3 = vmul.f32 %v9491_v10, %v9491_v10 }
 0x7cd   :  { %v5264_v4 = vsel %vm174_vm0, %v5218_v35, 0.0 }
 0x7ce   :  { %5265 = vadd.xlane.f32.xlu1 %v5264_v4  ;;  %v5248_v48 = vpop.xlane.xlu1 %5247 }
 0x7cf   :  { %v5288_v8 = vmul.f32 %v5248_v48, %v8476_v28 }
 0x7d1   :  { %v9474_v17 = vsub.f32 %v9394_v6, %v5288_v8 }
 0x7d3   :  { %v5320_v47 = vmul.f32 %v9474_v17, %v9474_v17 }
 0x7d5   :  { %v5342_v62 = vsel %vm174_vm0, %v5320_v47, 0.0 }
 0x7d8   :  { %v5251_v38 = vpop.xlane.xlu2 %5250 }
 0x7d9   :  { %v5289_v40 = vmul.f32 %v5251_v38, %v8476_v28 }
 0x7dc   :  { %v5220_v21 = vpop.f32.mrf.mxu2 }
 0x7dd   :  { %v9447_v58 = vadd.f32 %v9306_v29, %v5220_v21 }
 0x7df   :  { %v5267_v13 = vsel %vm174_vm0, %v9447_v58, 0.0 }
 0x7e0   :  { %5268 = vadd.xlane.f32.xlu2 %v5267_v13  ;;  %v9506_v13 = vsub.f32 %v9402_v15, %v5289_v40 }
 0x7e2   :  { %v5321_v15 = vmul.f32 %v9506_v13, %v9506_v13 }
 0x7e4   :  { %v5222_v54 = vpop.f32.mrf.mxu2 }
 0x7e5   :  { %v9452_v52 = vadd.f32 %v9306_v29, %v5222_v54 }
 0x7e7   :  { %v5270_v1 = vsel %vm174_vm0, %v9452_v52, 0.0 }
 0x7e8   :  { %5271 = vadd.xlane.f32.xlu0 %v5270_v1 }
 0x7f0   :  { %v5225_v60 = vpop.f32.mrf.mxu2 }
 0x7f1   :  { %v9457_v43 = vadd.f32 %v9306_v29, %v5225_v60  ;;  %v5336_v60 = vsel %vm174_vm0, %v5318_v3, 0.0 }
 0x7f3   :  { %v5273_v31 = vsel %vm174_vm0, %v9457_v43, 0.0 }
 0x7f4   :  { %5274 = vadd.xlane.f32.xlu1 %v5273_v31  ;;  %v5254_v31 = vpop.xlane.xlu0 %5253 }
 0x7f5   :  { %v5290_v18 = vmul.f32 %v5254_v31, %v8476_v28 }
 0x7f7   :  { %v9524_v56 = vsub.f32 %v9411_v22, %v5290_v18 }
 0x7f8   :  { %v5227_v44 = vpop.f32.mrf.mxu2 }
 0x7f9   :  { %v9463_v32 = vadd.f32 %v9306_v29, %v5227_v44  ;;  %v5322_v22 = vmul.f32 %v9524_v56, %v9524_v56 }
 0x7fb   :  { %v5276_v49 = vsel %vm174_vm0, %v9463_v32, 0.0 }
 0x7fc   :  { %5277 = vadd.xlane.f32.xlu2 %v5276_v49  ;;  %v5319_v49 = vmul.f32 %v9503_v57, %v9503_v57 }
 0x7fe   :  { %v5339_v47 = vsel %vm174_vm0, %v5319_v49, 0.0 }
 0x804   :  { %5334 = vadd.xlane.f32.xlu2 %v5333_v24  ;;  %v5345_v24 = vsel %vm174_vm0, %v5321_v15, 0.0 }
 0x80c   :  { %5343 = vadd.xlane.f32.xlu2 %v5342_v62 }
 0x827   :  { %v5257_v36 = vpop.xlane.xlu1 %5256 }
 0x828   :  { %v5291_v46 = vmul.f32 %v5257_v36, %v8476_v28 }
 0x82a   :  { %v9481_v39 = vsub.f32 %v5211_v55, %v5291_v46 }
 0x82c   :  { %v5323_v2 = vmul.f32 %v9481_v39, %v9481_v39 }
 0x82e   :  { %v5351_v6 = vsel %vm174_vm0, %v5323_v2, 0.0 }
 0x82f   :  { %5352 = vadd.xlane.f32.xlu2 %v5351_v6  ;;  %v5260_v20 = vpop.xlane.xlu2 %5259  ;;  %v5348_v6 = vsel %vm174_vm0, %v5322_v22, 0.0 }
 0x830   :  { %v5292_v44 = vmul.f32 %v5260_v20, %v8476_v28 }
 0x839   :  { %v5263_v62 = vpop.xlane.xlu0 %5262 }
 0x83a   :  { %v5293_v36 = vmul.f32 %v5263_v62, %v8476_v28 }
 0x83b   :  { %v5230_v7 = vpop.f32.mrf.mxu2 }
 0x83c   :  { %v9488_v19 = vadd.f32 %v9306_v29, %v5230_v7  ;;  %v9537_v2 = vsub.f32 %v9440_v16, %v5293_v36 }
 0x83e   :  { %v5279_v55 = vsel %vm174_vm0, %v9488_v19, 0.0  ;;  %v5325_v61 = vmul.f32 %v9537_v2, %v9537_v2 }
 0x83f   :  { %5280 = vadd.xlane.f32.xlu0 %v5279_v55 }
 0x840   :  { %v5357_v30 = vsel %vm174_vm0, %v5325_v61, 0.0  ;;  %v9577_v61 = vld [vmem:[%s9775_s10 + $0x4] ss:$0 sm:$0xff] }
 0x841   :  { %v5266_v54 = vpop.xlane.xlu1 %5265 }
 0x842   :  { %v5294_v26 = vmul.f32 %v5266_v54, %v8476_v28 }
 0x843   :  { %v5232_v4 = vpop.f32.mrf.mxu2 }
 0x844   :  { %v9500_v21 = vadd.f32 %v9306_v29, %v5232_v4  ;;  %v9512_v29 = vsub.f32 %v5218_v35, %v5294_v26  ;;  %v9527_v35 = vsub.f32 %v9435_v0, %v5292_v44 }
 0x846   :  { %v5282_v1 = vsel %vm174_vm0, %v9500_v21, 0.0  ;;  %v5326_v48 = vmul.f32 %v9512_v29, %v9512_v29  ;;  %v5324_v46 = vmul.f32 %v9527_v35, %v9527_v35 }
 0x847   :  { %5283 = vadd.xlane.f32.xlu1 %v5282_v1  ;;  %5337 = vadd.xlane.f32.xlu0 %v5336_v60 }
 0x848   :  { %v5360_v8 = vsel %vm174_vm0, %v5326_v48, 0.0  ;;  %v5354_v0 = vsel %vm174_vm0, %v5324_v46, 0.0 }
 0x849   :  { %5361 = vadd.xlane.f32.xlu2 %v5360_v8 }
 0x84f   :  { %5346 = vadd.xlane.f32.xlu0 %v5345_v24  ;;  %5340 = vadd.xlane.f32.xlu1 %v5339_v47 }
 0x853   :  { %v5269_v34 = vpop.xlane.xlu2 %5268 }
 0x854   :  { %v5295_v7 = vmul.f32 %v5269_v34, %v8476_v28 }
 0x856   :  { %v9545_v55 = vsub.f32 %v9447_v58, %v5295_v7 }
 0x857   :  { %5355 = vadd.xlane.f32.xlu0 %v5354_v0  ;;  %5349 = vadd.xlane.f32.xlu1 %v5348_v6 }
 0x858   :  { %v5327_v16 = vmul.f32 %v9545_v55, %v9545_v55 }
 0x85a   :  { %v5363_v38 = vsel %vm174_vm0, %v5327_v16, 0.0  ;;  %v9582_v16 = vld [vmem:[%s9775_s10 + $0x5] ss:$0 sm:$0xff] }
 0x85b   :  { %v5272_v50 = vpop.xlane.xlu0 %5271 }
 0x85c   :  { %v5296_v40 = vmul.f32 %v5272_v50, %v8476_v28 }
 0x85e   :  { %v9553_v3 = vsub.f32 %v9452_v52, %v5296_v40 }
 0x85f   :  { %5358 = vadd.xlane.f32.xlu1 %v5357_v30  ;;  %5364 = vadd.xlane.f32.xlu0 %v5363_v38 }
 0x860   :  { %v5328_v4 = vmul.f32 %v9553_v3, %v9553_v3 }
 0x862   :  { %v5366_v58 = vsel %vm174_vm0, %v5328_v4, 0.0 }
 0x867   :  { %5367 = vadd.xlane.f32.xlu1 %v5366_v58  ;;  %v5275_v54 = vpop.xlane.xlu1 %5274 }
 0x868   :  { %v5297_v1 = vmul.f32 %v5275_v54, %v8476_v28 }
 0x86a   :  { %v9560_v60 = vsub.f32 %v9457_v43, %v5297_v1 }
 0x86c   :  { %v5329_v31 = vmul.f32 %v9560_v60, %v9560_v60 }
 0x86e   :  { %v5369_v20 = vsel %vm174_vm0, %v5329_v31, 0.0 }
 0x86f   :  { %v5278_v26 = vpop.xlane.xlu2 %5277  ;;  %5370 = vadd.xlane.f32.xlu2 %v5369_v20 }
 0x870   :  { %v5298_v52 = vmul.f32 %v5278_v26, %v8476_v28 }
 0x872   :  { %v9567_v18 = vsub.f32 %v9463_v32, %v5298_v52 }
 0x874   :  { %v5330_v44 = vmul.f32 %v9567_v18, %v9567_v18 }
 0x876   :  { %v5372_v15 = vsel %vm174_vm0, %v5330_v44, 0.0 }
 0x877   :  { %v5335_v49 = vpop.xlane.xlu2 %5334  ;;  %5373 = vadd.xlane.f32.xlu0 %v5372_v15 }
 0x878   :  { %v5381_v43 = vmul.f32 %v5335_v49, %v8476_v28 }
 0x87a   :  { %v5397_v48 = vadd.f32 1e-05, %v5381_v43 }
 0x87c   :  { %6368 = vrsqrt.f32 %v5397_v48  ;;  %vm5419_vm12 = vweird.f32 %v5397_v48 }
 0x87f   :  { %v5344_v8 = vpop.xlane.xlu2 %5343 }
 0x880   :  { %v5384_v24 = vmul.f32 %v5344_v8, %v8476_v28 }
 0x882   :  { %v6369_v47 = vpop.eup %6368  ;;  %v5400_v62 = vadd.f32 1e-05, %v5384_v24 }
 0x883   :  { %v5414_v36 = vmul.f32 %v6369_v47, %v5397_v48  ;;  %vm5420_vm11 = vweird.f32 %v6369_v47 }
 0x884   :  { %6370 = vrsqrt.f32 %v5400_v62  ;;  %vm5421_vm13 = vmor %vm5419_vm12, %vm5420_vm11  ;;  %vm5449_vm15 = vweird.f32 %v5400_v62 }
 0x885   :  { %v5415_v32 = vmul.f32 %v6369_v47, %v5414_v36 }
 0x887   :  { %v5416_v46 = vmul.f32 0.5, %v5415_v32 }
 0x889   :  { %v5417_v22 = vsub.f32 1.5, %v5416_v46 }
 0x88a   :  { %v6371_v0 = vpop.eup %6370 }
 0x88b   :  { %v5418_v6 = vmul.f32 %v6369_v47, %v5417_v22  ;;  %v5444_v34 = vmul.f32 %v6371_v0, %v5400_v62  ;;  %vm5450_vm14 = vweird.f32 %v6371_v0 }
 0x88c   :  { %vm5451_vm1 = vmor %vm5449_vm15, %vm5450_vm14 }
 0x88d   :  { %v5422_v7 = vsel %vm5421_vm13, %v6369_v47, %v5418_v6  ;;  %v5445_v30 = vmul.f32 %v6371_v0, %v5444_v34 }
 0x88e   :  { %v5573_v38 = vmul.f32 %v5422_v7, %v9466_v33 }
 0x88f   :  { %v5446_v50 = vmul.f32 0.5, %v5445_v30 }
 0x890   :  { %v5590_v40 = vmul.f32 %v9577_v61, %v5573_v38 }
 0x891   :  { %v5447_v4 = vsub.f32 1.5, %v5446_v50 }
 0x892   :  { %v5607_v58 = vadd.f32 %v9582_v16, %v5590_v40 }
 0x893   :  { %v5448_v54 = vmul.f32 %v6371_v0, %v5447_v4 }
 0x894   :  { %v5623_v1 = vadd.f32 %v5607_v58, %v8671_v23 }
 0x895   :  { %v5452_v31 = vsel %vm5451_vm1, %v6371_v0, %v5448_v54 }
 0x896   :  { %5639 = vst.msk [vmem:[%s9780_s12] sm:$0xff] %vm174_vm0, %v5623_v1  ;;  %v5576_v33 = vmul.f32 %v5452_v31, %v9474_v17 }
 0x898   :  { %v5593_v26 = vmul.f32 %v9577_v61, %v5576_v33 }
 0x89a   :  { %v5610_v44 = vadd.f32 %v9582_v16, %v5593_v26 }
 0x89c   :  { %v5626_v49 = vadd.f32 %v5610_v44, %v8714_v63 }
 0x89e   :  { %5642 = vst.msk [vmem:[%s9780_s12 + $0x18] sm:$0xff] %vm174_vm0, %v5626_v49 }
 0x8a2   :  { %v5353_v20 = vpop.xlane.xlu2 %5352 }
 0x8a3   :  { %v5387_v52 = vmul.f32 %v5353_v20, %v8476_v28 }
 0x8a5   :  { %v5403_v15 = vadd.f32 1e-05, %v5387_v52 }
 0x8a7   :  { %6372 = vrsqrt.f32 %v5403_v15  ;;  %vm5479_vm3 = vweird.f32 %v5403_v15 }
 0x8ad   :  { %v6373_v23 = vpop.eup %6372 }
 0x8ae   :  { %v5474_v43 = vmul.f32 %v6373_v23, %v5403_v15  ;;  %vm5480_vm2 = vweird.f32 %v6373_v23 }
 0x8af   :  { %vm5481_vm4 = vmor %vm5479_vm3, %vm5480_vm2 }
 0x8b0   :  { %v5475_v48 = vmul.f32 %v6373_v23, %v5474_v43 }
 0x8b2   :  { %v5476_v17 = vmul.f32 0.5, %v5475_v48  ;;  %v5281_v8 = vpop.xlane.xlu0 %5280 }
 0x8b3   :  { %v5299_v24 = vmul.f32 %v5281_v8, %v8476_v28 }
 0x8b4   :  { %v5477_v47 = vsub.f32 1.5, %v5476_v17 }
 0x8b5   :  { %v9603_v62 = vsub.f32 %v9488_v19, %v5299_v24 }
 0x8b6   :  { %v5478_v36 = vmul.f32 %v6373_v23, %v5477_v47 }
 0x8b7   :  { %v5331_v63 = vmul.f32 %v9603_v62, %v9603_v62 }
 0x8b8   :  { %v5482_v32 = vsel %vm5481_vm4, %v6373_v23, %v5478_v36 }
 0x8b9   :  { %v5579_v46 = vmul.f32 %v5482_v32, %v9481_v39  ;;  %v5375_v22 = vsel %vm174_vm0, %v5331_v63, 0.0 }
 0x8ba   :  { %v5284_v0 = vpop.xlane.xlu1 %5283  ;;  %5376 = vadd.xlane.f32.xlu1 %v5375_v22  ;;  %v5338_v6 = vpop.xlane.xlu0 %5337 }
 0x8bb   :  { %v5596_v34 = vmul.f32 %v9577_v61, %v5579_v46  ;;  %v5300_v7 = vmul.f32 %v5284_v0, %v8476_v28  ;;  %v5382_v19 = vmul.f32 %v5338_v6, %v8476_v28 }
 0x8bc   :  { %v5362_v4 = vpop.xlane.xlu2 %5361 }
 0x8bd   :  { %v5613_v30 = vadd.f32 %v9582_v16, %v5596_v34  ;;  %v9614_v38 = vsub.f32 %v9500_v21, %v5300_v7  ;;  %v5398_v50 = vadd.f32 1e-05, %v5382_v19  ;;  %v5390_v54 = vmul.f32 %v5362_v4, %v8476_v28 }
 0x8bf   :  { %v5629_v40 = vadd.f32 %v5613_v30, %v8778_v25  ;;  %6374 = vrsqrt.f32 %v5398_v50  ;;  %v5332_v39 = vmul.f32 %v9614_v38, %v9614_v38  ;;  %v5406_v33 = vadd.f32 1e-05, %v5390_v54 }
 0x8c0   :  { %vm5429_vm6 = vweird.f32 %v5398_v50 }
 0x8c1   :  { %5645 = vst.msk [vmem:[%s9780_s12 + $0x30] sm:$0xff] %vm174_vm0, %v5629_v40  ;;  %v5378_v58 = vsel %vm174_vm0, %v5332_v39, 0.0  ;;  %6376 = vrsqrt.f32 %v5406_v33  ;;  %vm5509_vm8 = vweird.f32 %v5406_v33 }
 0x8c2   :  { %5379 = vadd.xlane.f32.xlu2 %v5378_v58  ;;  %v5341_v21 = vpop.xlane.xlu1 %5340  ;;  %v5347_v1 = vpop.xlane.xlu0 %5346 }
 0x8c3   :  { %v5383_v31 = vmul.f32 %v5341_v21, %v8476_v28  ;;  %v5385_v25 = vmul.f32 %v5347_v1, %v8476_v28 }
 0x8c5   :  { %v6375_v20 = vpop.eup %6374  ;;  %v5399_v26 = vadd.f32 1e-05, %v5383_v31  ;;  %v9627_v52 = vadd.f32 1e-05, %v5385_v25 }
 0x8c6   :  { %v5424_v44 = vmul.f32 %v6375_v20, %v5398_v50  ;;  %vm5430_vm5 = vweird.f32 %v6375_v20 }
 0x8c7   :  { %6378 = vrsqrt.f32 %v5399_v26  ;;  %v6377_v8 = vpop.eup %6376  ;;  %vm5431_vm7 = vmor %vm5429_vm6, %vm5430_vm5  ;;  %vm5439_vm10 = vweird.f32 %v5399_v26  ;;  %vm5459_vm14 = vweird.f32 %v9627_v52 }
 0x8c8   :  { %v5425_v15 = vmul.f32 %v6375_v20, %v5424_v44  ;;  %6380 = vrsqrt.f32 %v9627_v52  ;;  %v5504_v36 = vmul.f32 %v6377_v8, %v5406_v33  ;;  %vm5510_vm9 = vweird.f32 %v6377_v8 }
 0x8c9   :  { %vm5511_vm13 = vmor %vm5509_vm8, %vm5510_vm9 }
 0x8ca   :  { %v5426_v49 = vmul.f32 0.5, %v5425_v15  ;;  %v5350_v23 = vpop.xlane.xlu1 %5349  ;;  %v5356_v43 = vpop.xlane.xlu0 %5355  ;;  %v5505_v6 = vmul.f32 %v6377_v8, %v5504_v36 }
 0x8cb   :  { %v5386_v48 = vmul.f32 %v5350_v23, %v8476_v28  ;;  %v5388_v17 = vmul.f32 %v5356_v43, %v8476_v28 }
 0x8cc   :  { %v5427_v24 = vsub.f32 1.5, %v5426_v49  ;;  %v5506_v30 = vmul.f32 0.5, %v5505_v6 }
 0x8cd   :  { %v6379_v47 = vpop.eup %6378  ;;  %v9632_v63 = vadd.f32 1e-05, %v5386_v48  ;;  %v9634_v32 = vadd.f32 1e-05, %v5388_v17 }
 0x8ce   :  { %v6381_v46 = vpop.eup %6380  ;;  %v5428_v22 = vmul.f32 %v6375_v20, %v5427_v24  ;;  %v5434_v0 = vmul.f32 %v6379_v47, %v5399_v26  ;;  %v5507_v50 = vsub.f32 1.5, %v5506_v30  ;;  %vm5440_vm11 = vweird.f32 %v6379_v47 }
 0x8cf   :  { %v5454_v34 = vmul.f32 %v6381_v46, %v9627_v52  ;;  %6382 = vrsqrt.f32 %v9632_v63  ;;  %vm5460_vm12 = vweird.f32 %v6381_v46  ;;  %vm5441_vm15 = vmor %vm5439_vm10, %vm5440_vm11  ;;  %vm5469_vm2 = vweird.f32 %v9632_v63 }
 0x8d0   :  { %v5432_v7 = vsel %vm5431_vm7, %v6375_v20, %v5428_v22  ;;  %v5435_v19 = vmul.f32 %v6379_v47, %v5434_v0  ;;  %6384 = vrsqrt.f32 %v9634_v32  ;;  %v5508_v20 = vmul.f32 %v6377_v8, %v5507_v50  ;;  %vm5461_vm1 = vmor %vm5459_vm14, %vm5460_vm12 }
 0x8d1   :  { %v5574_v40 = vmul.f32 %v5432_v7, %v9491_v10  ;;  %v5455_v39 = vmul.f32 %v6381_v46, %v5454_v34  ;;  %vm5489_vm6 = vweird.f32 %v9634_v32 }
 0x8d2   :  { %v5436_v4 = vmul.f32 0.5, %v5435_v19  ;;  %v5359_v58 = vpop.xlane.xlu1 %5358  ;;  %v5365_v49 = vpop.xlane.xlu0 %5364  ;;  %v5512_v24 = vsel %vm5511_vm13, %v6377_v8, %v5508_v20 }
 0x8d3   :  { %v5591_v54 = vmul.f32 %v9577_v61, %v5574_v40  ;;  %v5456_v21 = vmul.f32 0.5, %v5455_v39  ;;  %v5389_v1 = vmul.f32 %v5359_v58, %v8476_v28  ;;  %v5391_v17 = vmul.f32 %v5365_v49, %v8476_v28 }
 0x8d4   :  { %v5437_v31 = vsub.f32 1.5, %v5436_v4  ;;  %v5582_v6 = vmul.f32 %v5512_v24, %v9512_v29 }
 0x8d5   :  { %v6383_v25 = vpop.eup %6382  ;;  %v5608_v44 = vadd.f32 %v9582_v16, %v5591_v54  ;;  %v5457_v10 = vsub.f32 1.5, %v5456_v21  ;;  %v9643_v15 = vadd.f32 1e-05, %v5389_v1  ;;  %v5407_v30 = vadd.f32 1e-05, %v5391_v17 }
 0x8d6   :  { %v6385_v23 = vpop.eup %6384  ;;  %v5438_v43 = vmul.f32 %v6379_v47, %v5437_v31  ;;  %v5464_v48 = vmul.f32 %v6383_v25, %v9632_v63  ;;  %v5599_v26 = vmul.f32 %v9577_v61, %v5582_v6  ;;  %vm5470_vm3 = vweird.f32 %v6383_v25 }
 0x8d7   :  { %v5624_v36 = vadd.f32 %v5608_v44, %v8676_v59  ;;  %v5458_v22 = vmul.f32 %v6381_v46, %v5457_v10  ;;  %v5484_v0 = vmul.f32 %v6385_v23, %v9634_v32  ;;  %6386 = vrsqrt.f32 %v9643_v15  ;;  %vm5471_vm5 = vmor %vm5469_vm2, %vm5470_vm3 }
 0x8d8   :  { %v5442_v33 = vsel %vm5441_vm15, %v6379_v47, %v5438_v43  ;;  %v5465_v34 = vmul.f32 %v6383_v25, %v5464_v48  ;;  %v5616_v40 = vadd.f32 %v9582_v16, %v5599_v26  ;;  %vm5490_vm4 = vweird.f32 %v6385_v23 }
 0x8d9   :  { %5640 = vst.msk [vmem:[%s9780_s12 + $0x8] sm:$0xff] %vm174_vm0, %v5624_v36  ;;  %v5575_v52 = vmul.f32 %v5442_v33, %v9503_v57  ;;  %v5462_v59 = vsel %vm5461_vm1, %v6381_v46, %v5458_v22  ;;  %v5485_v8 = vmul.f32 %v6385_v23, %v5484_v0  ;;  %6388 = vrsqrt.f32 %v5407_v30  ;;  %vm5491_vm7 = vmor %vm5489_vm6, %vm5490_vm4 }
 0x8da   :  { %v5577_v7 = vmul.f32 %v5462_v59, %v9506_v13  ;;  %v5466_v29 = vmul.f32 0.5, %v5465_v34  ;;  %v5368_v58 = vpop.xlane.xlu1 %5367  ;;  %v5632_v13 = vadd.f32 %v5616_v40, %v8841_v9  ;;  %vm5499_vm9 = vweird.f32 %v9643_v15 }
 0x8db   :  { %v5592_v47 = vmul.f32 %v9577_v61, %v5575_v52  ;;  %v5486_v19 = vmul.f32 0.5, %v5485_v8  ;;  %v5392_v21 = vmul.f32 %v5368_v58, %v8476_v28  ;;  %vm5519_vm12 = vweird.f32 %v5407_v30 }
 0x8dc   :  { %v5594_v39 = vmul.f32 %v9577_v61, %v5577_v7  ;;  %v5467_v57 = vsub.f32 1.5, %v5466_v29  ;;  %5648 = vst.msk [vmem:[%s9780_s12 + $0x48] sm:$0xff] %vm174_vm0, %v5632_v13 }
 0x8dd   :  { %v5609_v46 = vadd.f32 %v9582_v16, %v5592_v47  ;;  %v5487_v4 = vsub.f32 1.5, %v5486_v19  ;;  %v6387_v1 = vpop.eup %6386  ;;  %v5408_v32 = vadd.f32 1e-05, %v5392_v21 }
 0x8de   :  { %v5611_v50 = vadd.f32 %v9582_v16, %v5594_v39  ;;  %v5468_v54 = vmul.f32 %v6383_v25, %v5467_v57  ;;  %v5494_v10 = vmul.f32 %v6387_v1, %v9643_v15  ;;  %vm5500_vm8 = vweird.f32 %v6387_v1 }
 0x8df   :  { %v5625_v31 = vadd.f32 %v5609_v46, %v8709_v37  ;;  %v5488_v20 = vmul.f32 %v6385_v23, %v5487_v4  ;;  %v6389_v49 = vpop.eup %6388  ;;  %6390 = vrsqrt.f32 %v5408_v32  ;;  %vm5501_vm10 = vmor %vm5499_vm9, %vm5500_vm8  ;;  %vm5529_vm15 = vweird.f32 %v5408_v32 }
 0x8e0   :  { %v5627_v9 = vadd.f32 %v5611_v50, %v8743_v41  ;;  %v5472_v44 = vsel %vm5471_vm5, %v6383_v25, %v5468_v54  ;;  %v5495_v25 = vmul.f32 %v6387_v1, %v5494_v10  ;;  %v5514_v24 = vmul.f32 %v6389_v49, %v5407_v30 }
 0x8e1   :  { %5641 = vst.msk [vmem:[%s9780_s12 + $0x10] sm:$0xff] %vm174_vm0, %v5625_v31  ;;  %v5578_v37 = vmul.f32 %v5472_v44, %v9524_v56  ;;  %v5492_v63 = vsel %vm5491_vm7, %v6385_v23, %v5488_v20  ;;  %vm5520_vm11 = vweird.f32 %v6389_v49 }
 0x8e2   :  { %5643 = vst.msk [vmem:[%s9780_s12 + $0x20] sm:$0xff] %vm174_vm0, %v5627_v9  ;;  %v5580_v41 = vmul.f32 %v5492_v63, %v9527_v35  ;;  %v5496_v17 = vmul.f32 0.5, %v5495_v25  ;;  %v5515_v22 = vmul.f32 %v6389_v49, %v5514_v24  ;;  %v5371_v26 = vpop.xlane.xlu2 %5370  ;;  %vm5521_vm13 = vmor %vm5519_vm12, %vm5520_vm11 }
 0x8e3   :  { %v5595_v43 = vmul.f32 %v9577_v61, %v5578_v37  ;;  %v5393_v29 = vmul.f32 %v5371_v26, %v8476_v28 }
 0x8e4   :  { %v5597_v48 = vmul.f32 %v9577_v61, %v5580_v41  ;;  %v5497_v36 = vsub.f32 1.5, %v5496_v17  ;;  %v5516_v33 = vmul.f32 0.5, %v5515_v22 }
 0x8e5   :  { %v5612_v56 = vadd.f32 %v9582_v16, %v5595_v43  ;;  %v6391_v34 = vpop.eup %6390  ;;  %v5409_v57 = vadd.f32 1e-05, %v5393_v29 }
 0x8e6   :  { %v5614_v23 = vadd.f32 %v9582_v16, %v5597_v48  ;;  %v5498_v6 = vmul.f32 %v6387_v1, %v5497_v36  ;;  %vm5530_vm14 = vweird.f32 %v6391_v34 }
 0x8e7   :  { %v5628_v0 = vadd.f32 %v5612_v56, %v8748_v12  ;;  %v5517_v12 = vsub.f32 1.5, %v5516_v33  ;;  %6392 = vrsqrt.f32 %v5409_v57  ;;  %vm5531_vm1 = vmor %vm5529_vm15, %vm5530_vm14  ;;  %vm5539_vm3 = vweird.f32 %v5409_v57 }
 0x8e8   :  { %v5630_v35 = vadd.f32 %v5614_v23, %v8783_v14  ;;  %v5502_v52 = vsel %vm5501_vm10, %v6387_v1, %v5498_v6  ;;  %v5524_v14 = vmul.f32 %v6391_v34, %v5408_v32 }
 0x8e9   :  { %5644 = vst.msk [vmem:[%s9780_s12 + $0x28] sm:$0xff] %vm174_vm0, %v5628_v0  ;;  %v5581_v59 = vmul.f32 %v5502_v52, %v9537_v2  ;;  %v5518_v15 = vmul.f32 %v6389_v49, %v5517_v12 }
 0x8ea   :  { %5646 = vst.msk [vmem:[%s9780_s12 + $0x38] sm:$0xff] %vm174_vm0, %v5630_v35  ;;  %v5525_v8 = vmul.f32 %v6391_v34, %v5524_v14  ;;  %v5374_v54 = vpop.xlane.xlu0 %5373 }
 0x8eb   :  { %v5598_v7 = vmul.f32 %v9577_v61, %v5581_v59  ;;  %v5522_v47 = vsel %vm5521_vm13, %v6389_v49, %v5518_v15 }
 0x8ec   :  { %v5526_v19 = vmul.f32 0.5, %v5525_v8  ;;  %v5583_v39 = vmul.f32 %v5522_v47, %v9545_v55 }
 0x8ed   :  { %v5615_v40 = vadd.f32 %v9582_v16, %v5598_v7  ;;  %v6393_v1 = vpop.eup %6392 }
 0x8ee   :  { %v5527_v46 = vsub.f32 1.5, %v5526_v19  ;;  %v5600_v30 = vmul.f32 %v9577_v61, %v5583_v39  ;;  %v5534_v20 = vmul.f32 %v6393_v1, %v5409_v57  ;;  %vm5540_vm2 = vweird.f32 %v6393_v1 }
 0x8ef   :  { %v5631_v2 = vadd.f32 %v5615_v40, %v8836_v45  ;;  %v5394_v45 = vmul.f32 %v5374_v54, %v8476_v28  ;;  %vm5541_vm4 = vmor %vm5539_vm3, %vm5540_vm2 }
 0x8f0   :  { %v5528_v4 = vmul.f32 %v6391_v34, %v5527_v46  ;;  %v5617_v58 = vadd.f32 %v9582_v16, %v5600_v30  ;;  %v5535_v44 = vmul.f32 %v6393_v1, %v5534_v20 }
 0x8f1   :  { %5647 = vst.msk [vmem:[%s9780_s12 + $0x40] sm:$0xff] %vm174_vm0, %v5631_v2  ;;  %v5410_v31 = vadd.f32 1e-05, %v5394_v45 }
 0x8f2   :  { %v5532_v13 = vsel %vm5531_vm1, %v6391_v34, %v5528_v4  ;;  %v5633_v55 = vadd.f32 %v5617_v58, %v8974_v42 }
 0x8f3   :  { %v5584_v50 = vmul.f32 %v5532_v13, %v9553_v3  ;;  %6394 = vrsqrt.f32 %v5410_v31  ;;  %v5536_v3 = vmul.f32 0.5, %v5535_v44  ;;  %vm5549_vm6 = vweird.f32 %v5410_v31 }
 0x8f4   :  { %5649 = vst.msk [vmem:[%s9780_s12 + $0x50] sm:$0xff] %vm174_vm0, %v5633_v55 }
 0x8f5   :  { %v5601_v21 = vmul.f32 %v9577_v61, %v5584_v50  ;;  %v5537_v10 = vsub.f32 1.5, %v5536_v3 }
 0x8f7   :  { %v5618_v9 = vadd.f32 %v9582_v16, %v5601_v21  ;;  %v5538_v63 = vmul.f32 %v6393_v1, %v5537_v10 }
 0x8f9   :  { %v5634_v42 = vadd.f32 %v5618_v9, %v8979_v53  ;;  %v6395_v37 = vpop.eup %6394  ;;  %v5542_v41 = vsel %vm5541_vm4, %v6393_v1, %v5538_v63 }
 0x8fa   :  { %v5544_v32 = vmul.f32 %v6395_v37, %v5410_v31  ;;  %v5585_v49 = vmul.f32 %v5542_v41, %v9560_v60  ;;  %vm5550_vm5 = vweird.f32 %v6395_v37 }
 0x8fb   :  { %5650 = vst.msk [vmem:[%s9780_s12 + $0x58] sm:$0xff] %vm174_vm0, %v5634_v42  ;;  %vm5551_vm7 = vmor %vm5549_vm6, %vm5550_vm5 }
 0x8fc   :  { %v5545_v25 = vmul.f32 %v6395_v37, %v5544_v32  ;;  %v5602_v53 = vmul.f32 %v9577_v61, %v5585_v49 }
 0x8fe   :  { %v5546_v43 = vmul.f32 0.5, %v5545_v25  ;;  %v5619_v17 = vadd.f32 %v9582_v16, %v5602_v53 }
 0x900   :  { %v5547_v48 = vsub.f32 1.5, %v5546_v43  ;;  %v5635_v56 = vadd.f32 %v5619_v17, %v9076_v51 }
 0x902   :  { %v5548_v24 = vmul.f32 %v6395_v37, %v5547_v48  ;;  %5651 = vst.msk [vmem:[%s9780_s12 + $0x60] sm:$0xff] %vm174_vm0, %v5635_v56 }
 0x904   :  { %v5552_v23 = vsel %vm5551_vm7, %v6395_v37, %v5548_v24 }
 0x905   :  { %v5586_v60 = vmul.f32 %v5552_v23, %v9567_v18 }
 0x907   :  { %v5603_v36 = vmul.f32 %v9577_v61, %v5586_v60 }
 0x909   :  { %v5620_v22 = vadd.f32 %v9582_v16, %v5603_v36 }
 0x90b   :  { %v5636_v0 = vadd.f32 %v5620_v22, %v9081_v5 }
 0x90d   :  { %5652 = vst.msk [vmem:[%s9780_s12 + $0x68] sm:$0xff] %vm174_vm0, %v5636_v0 }
 0x92d   :  { %v5377_v51 = vpop.xlane.xlu1 %5376 }
 0x92e   :  { %v5395_v35 = vmul.f32 %v5377_v51, %v8476_v28 }
 0x930   :  { %v5411_v6 = vadd.f32 1e-05, %v5395_v35 }
 0x932   :  { %6396 = vrsqrt.f32 %v5411_v6  ;;  %vm5559_vm9 = vweird.f32 %v5411_v6 }
 0x935   :  { %v5380_v33 = vpop.xlane.xlu2 %5379 }
 0x936   :  { %v5396_v34 = vmul.f32 %v5380_v33, %v8476_v28 }
 0x938   :  { %v6397_v18 = vpop.eup %6396  ;;  %v5412_v52 = vadd.f32 1e-05, %v5396_v34 }
 0x939   :  { %v5554_v12 = vmul.f32 %v6397_v18, %v5411_v6  ;;  %vm5560_vm8 = vweird.f32 %v6397_v18 }
 0x93a   :  { %6398 = vrsqrt.f32 %v5412_v52  ;;  %vm5561_vm10 = vmor %vm5559_vm9, %vm5560_vm8  ;;  %vm5569_vm12 = vweird.f32 %v5412_v52 }
 0x93b   :  { %v5555_v14 = vmul.f32 %v6397_v18, %v5554_v12 }
 0x93d   :  { %v5556_v59 = vmul.f32 0.5, %v5555_v14 }
 0x93f   :  { %v5557_v5 = vsub.f32 1.5, %v5556_v59 }
 0x940   :  { %v6399_v15 = vpop.eup %6398 }
 0x941   :  { %v5558_v8 = vmul.f32 %v6397_v18, %v5557_v5  ;;  %v5564_v26 = vmul.f32 %v6399_v15, %v5412_v52  ;;  %vm5570_vm11 = vweird.f32 %v6399_v15 }
 0x942   :  { %vm5571_vm13 = vmor %vm5569_vm12, %vm5570_vm11 }
 0x943   :  { %v5562_v7 = vsel %vm5561_vm10, %v6397_v18, %v5558_v8  ;;  %v5565_v29 = vmul.f32 %v6399_v15, %v5564_v26 }
 0x944   :  { %v5587_v47 = vmul.f32 %v5562_v7, %v9603_v62 }
 0x945   :  { %v5566_v19 = vmul.f32 0.5, %v5565_v29 }
 0x946   :  { %v5604_v28 = vmul.f32 %v9577_v61, %v5587_v47 }
 0x947   :  { %v5567_v40 = vsub.f32 1.5, %v5566_v19 }
 0x948   :  { %v5621_v39 = vadd.f32 %v9582_v16, %v5604_v28 }
 0x949   :  { %v5568_v57 = vmul.f32 %v6399_v15, %v5567_v40 }
 0x94a   :  { %v5637_v46 = vadd.f32 %v5621_v39, %v9160_v11 }
 0x94b   :  { %v5572_v2 = vsel %vm5571_vm13, %v6399_v15, %v5568_v57 }
 0x94c   :  { %5653 = vst.msk [vmem:[%s9780_s12 + $0x70] sm:$0xff] %vm174_vm0, %v5637_v46  ;;  %v5588_v62 = vmul.f32 %v5572_v2, %v9614_v38 }
 0x94e   :  { %v5605_v30 = vmul.f32 %v9577_v61, %v5588_v62 }
 0x950   :  { %v5622_v4 = vadd.f32 %v9582_v16, %v5605_v30 }
 0x952   :  { %v5638_v58 = vadd.f32 %v5622_v4, %v9165_v27 }
 0x954   :  { %5654 = vst.msk [vmem:[%s9780_s12 + $0x78] sm:$0xff] %vm174_vm0, %v5638_v58 }

</bundles_post_ra>
